<compile_context>
chip_gen: v7x
topology: tpu7x:2x2x1
jax: 0.10.0
libtpu: 0.0.40
codegen_flags: <defaults>
</compile_context>

<pallas_src>
import functools

import jax
import jax.numpy as jnp
from jax.experimental import pallas as pl
from jax.experimental.pallas import tpu as pltpu

HID = 32        # GRU hidden size
OUT_PAD = 128   # lane-dense output width (horizon columns + zero padding)


# ----------------------------------------------------------------------------
# GRU cell (PyTorch GRUCell semantics), per-gate weights, bf16 MXU / f32 state
# ----------------------------------------------------------------------------
def _gru_step(gi, h, wh_ref, bh_ref):
    """gi = per-gate (r,z,n) input projections [m, HID]; h = f32 state [m, HID].

    wh_ref: [3, HID, HID] bf16 recurrent weights; bh_ref: [3, 1, HID] f32 biases.
    r = sigmoid(gi_r + h@Wr + br), z = sigmoid(gi_z + h@Wz + bz),
    n = tanh(gi_n + r*(h@Wn + bn)), h' = (1-z)*n + z*h.
    """
    hb = h.astype(wh_ref.dtype)   # bf16 for a single-pass MXU matmul, f32 accumulate
    gh_r = jnp.dot(hb, wh_ref[0], preferred_element_type=jnp.float32) + bh_ref[0]
    gh_z = jnp.dot(hb, wh_ref[1], preferred_element_type=jnp.float32) + bh_ref[1]
    gh_n = jnp.dot(hb, wh_ref[2], preferred_element_type=jnp.float32) + bh_ref[2]
    r = jax.nn.sigmoid(gi[0] + gh_r)
    z = jax.nn.sigmoid(gi[1] + gh_z)
    n = jnp.tanh(gi[2] + r * gh_n)
    return (1.0 - z) * n + z * h


# ----------------------------------------------------------------------------
# Fused TwoResNet kernel (single pallas_call, no grid — everything fits in VMEM)
# ----------------------------------------------------------------------------
def _two_resnet_kernel(
    # activations / structure
    gi_lo_ref, prev_lo_ref, gi_hi_ref, prev_hi_ref, up_ref,
    # LowResNet (cluster level) weights
    lo_whe_ref, lo_bhe_ref, lo_wxd_ref, lo_bid_ref, lo_whd_ref, lo_bhd_ref, lo_wo_ref, lo_bo_ref,
    # HighResNet (node level) weights
    hi_whe_ref, hi_bhe_ref, hi_wxd_ref, hi_bid_ref, hi_whd_ref, hi_bhd_ref, hi_wo_ref, hi_bo_ref,
    # outputs
    y_ref, ybar_ref,
    *, horizon, out_pad,
):
    t_in = gi_lo_ref.shape[1]
    m_lo = gi_lo_ref.shape[2]
    m_hi = gi_hi_ref.shape[2]

    # ---- Encoders: the two recurrences are independent -> advanced together so the
    #      scheduler can overlap one chain's MXU push with the other's EUP/VALU work.
    h_lo = jnp.zeros((m_lo, HID), jnp.float32)
    h_hi = jnp.zeros((m_hi, HID), jnp.float32)
    for t in range(t_in):   # small static trip count -> fully unrolled, one basic block
        h_lo = _gru_step([gi_lo_ref[g, t] for g in range(3)], h_lo, lo_whe_ref, lo_bhe_ref)
        h_hi = _gru_step([gi_hi_ref[g, t] for g in range(3)], h_hi, hi_whe_ref, hi_bhe_ref)

    # ---- Decoders (no teacher forcing): high step s depends only on low step s through
    #      the upsampled coarse increment, so the two chains run in lock-step and the
    #      scheduler software-pipelines them (low step s+1 overlaps high step s).
    up = up_ref[...]            # [m_hi, m_lo] block-diagonal one-hot membership
    bo_lo = lo_bo_ref[0]        # SMEM scalars, hoisted
    bo_hi = hi_bo_ref[0]
    prev_lo = prev_lo_ref[...]  # [m_lo, 1] coarse value at the last input step
    prev_hi = prev_hi_ref[...]  # [m_hi, 1] fine value at the last input step
    ybar_cols, y_cols = [], []
    for s in range(horizon):
        # LowResNet decoder step; K=1 input projection is a VPU broadcast-multiply.
        gi = [prev_lo * lo_wxd_ref[g] + lo_bid_ref[g] for g in range(3)]
        h_lo = _gru_step(gi, h_lo, lo_whd_ref, lo_bhd_ref)
        pred_lo = jnp.sum(h_lo * lo_wo_ref[...], axis=-1, keepdims=True) + bo_lo   # [m_lo, 1]
        # ybar_diff column s (pred - previous coarse value), upsampled to nodes.
        offset_s = jnp.dot(up, pred_lo - prev_lo,
                           preferred_element_type=jnp.float32)                     # [m_hi, 1]
        ybar_cols.append(pred_lo)
        prev_lo = pred_lo

        # HighResNet decoder step with additive coarse-increment offset.
        gi = [prev_hi * hi_wxd_ref[g] + hi_bid_ref[g] for g in range(3)]
        h_hi = _gru_step(gi, h_hi, hi_whd_ref, hi_bhd_ref)
        pred_hi = jnp.sum(h_hi * hi_wo_ref[...], axis=-1, keepdims=True) + bo_hi + offset_s
        y_cols.append(pred_hi)
        # TODO(synk): HighResNet internals are unspecified — feedback uses the
        # offset-corrected prediction (same choice as the previous versions).
        prev_hi = pred_hi

    # Single lane-dense writeback per output (horizon columns + zero lane padding).
    pad = out_pad - horizon
    if pad:
        ybar_cols.append(jnp.zeros((m_lo, pad), jnp.float32))
        y_cols.append(jnp.zeros((m_hi, pad), jnp.float32))
    ybar_ref[...] = jnp.concatenate(ybar_cols, axis=1)
    y_ref[...] = jnp.concatenate(y_cols, axis=1)


# ----------------------------------------------------------------------------
# Parameters (deterministic synthetic init) + conversion to the kernel layout
# ----------------------------------------------------------------------------
def make_gru_params(key, in_dim, hid):
    k = jax.random.split(key, 4)
    return {
        "wx": 0.1 * jax.random.normal(k[0], (in_dim, 3 * hid), jnp.float32),
        "wh": 0.1 * jax.random.normal(k[1], (hid, 3 * hid), jnp.float32),
        "b_ih": 0.05 * jax.random.normal(k[2], (1, 3 * hid), jnp.float32),
        "b_hh": 0.05 * jax.random.normal(k[3], (1, 3 * hid), jnp.float32),
    }


def make_seq2seq_params(key, in_feat, hid):
    k = jax.random.split(key, 4)
    return {
        "enc": make_gru_params(k[0], in_feat, hid),
        "dec": make_gru_params(k[1], 1, hid),
        "w_out": 0.1 * jax.random.normal(k[2], (hid, 1), jnp.float32),
        "b_out": 0.05 * jax.random.normal(k[3], (1, 1), jnp.float32),
    }


def _split_gates(w, hid):
    """[rows, 3*hid] -> [3, rows, hid] (gate order r, z, n)."""
    return jnp.stack([w[:, g * hid:(g + 1) * hid] for g in range(3)], axis=0)


def prepare_seq2seq(raw, hid):
    """Convert a seq2seq GRU parameter set to the per-gate stacked kernel layout."""
    enc, dec = raw["enc"], raw["dec"]
    return {
        "enc_wx": _split_gates(enc["wx"], hid),                          # [3, F, hid] f32
        "enc_bih": _split_gates(enc["b_ih"], hid),                       # [3, 1, hid] f32
        "enc_wh": _split_gates(enc["wh"], hid).astype(jnp.bfloat16),     # [3, hid, hid] bf16
        "enc_bhh": _split_gates(enc["b_hh"], hid),                       # [3, 1, hid] f32
        "dec_wx": _split_gates(dec["wx"], hid),                          # [3, 1, hid] f32
        "dec_bih": _split_gates(dec["b_ih"], hid),                       # [3, 1, hid] f32
        "dec_wh": _split_gates(dec["wh"], hid).astype(jnp.bfloat16),     # [3, hid, hid] bf16
        "dec_bhh": _split_gates(dec["b_hh"], hid),                       # [3, 1, hid] f32
        "w_out": raw["w_out"].T,                                         # [1, hid] f32
        "b_out": raw["b_out"].reshape(1),                                # (1,) f32 -> SMEM
    }


# ----------------------------------------------------------------------------
# TwoResNet forward (jit-wrapped; one fused Pallas kernel inside)
# ----------------------------------------------------------------------------
@functools.partial(jax.jit, static_argnames=("horizon", "training"))
def two_resnet_forward(x, params, horizon, training=True):
    if not (1 <= horizon <= OUT_PAD):
        raise ValueError(f"horizon must be in [1, {OUT_PAD}], got {horizon}")
    b, _, n, t = x.shape
    c = params["m_norm"].shape[1]
    m_lo, m_hi = b * c, b * n
    lo, hi = params["low"], params["high"]

    # Encoder input projections (x @ W_ih + b_ih) for all T steps, one einsum per net;
    # coarse() (cluster mean over nodes) is folded into the low-net projection.
    # TODO(synk): could be folded into the kernel to save the HBM round trip; the
    # [3, T, m, HID] intermediates are tiny so it is kept as a fused XLA einsum.
    gi_lo = (jnp.einsum("bfnt,nc,gfh->gtbch", x, params["m_norm"], lo["enc_wx"])
             .reshape(3, t, m_lo, HID) + lo["enc_bih"][:, None])
    gi_hi = (jnp.einsum("bfnt,gfh->gtbnh", x, hi["enc_wx"])
             .reshape(3, t, m_hi, HID) + hi["enc_bih"][:, None])

    # Decoder seeds: feature 0 at the last input time step (coarse / fine level).
    x_last = x[:, 0, :, -1]                                                  # [B, N]
    prev_lo = jnp.einsum("bn,nc->bc", x_last, params["m_norm"]).reshape(m_lo, 1)
    prev_hi = x_last.reshape(m_hi, 1)

    vmem = pl.BlockSpec(memory_space=pltpu.MemorySpace.VMEM)
    smem = pl.BlockSpec(memory_space=pltpu.MemorySpace.SMEM)
    net_specs = [vmem] * 7 + [smem]

    y_rows, ybar_rows = pl.pallas_call(
        functools.partial(_two_resnet_kernel, horizon=horizon, out_pad=OUT_PAD),
        out_shape=(jax.ShapeDtypeStruct((m_hi, OUT_PAD), jnp.float32),
                   jax.ShapeDtypeStruct((m_lo, OUT_PAD), jnp.float32)),
        in_specs=[vmem] * 5 + net_specs + net_specs,
        out_specs=(vmem, vmem),
    )(gi_lo, prev_lo, gi_hi, prev_hi, params["up_mat"],
      lo["enc_wh"], lo["enc_bhh"], lo["dec_wx"], lo["dec_bih"],
      lo["dec_wh"], lo["dec_bhh"], lo["w_out"], lo["b_out"],
      hi["enc_wh"], hi["enc_bhh"], hi["dec_wx"], hi["dec_bih"],
      hi["dec_wh"], hi["dec_bhh"], hi["w_out"], hi["b_out"])

    y = y_rows[:, :horizon].reshape(b, 1, n, horizon)
    ybar = ybar_rows[:, :horizon].reshape(b, 1, c, horizon)
    return (y, ybar) if training else y


# ----------------------------------------------------------------------------
# Main
# ----------------------------------------------------------------------------
if __name__ == "__main__":
    B, IN_FEAT, N, T = 2, 2, 16, 8
    C, HORIZON = 4, 3

    key = jax.random.PRNGKey(0)
    k_x, k_low, k_high = jax.random.split(key, 3)
    x = jax.random.normal(k_x, (B, IN_FEAT, N, T), jnp.float32)

    # Cluster structure: node n belongs to cluster n % C.
    assign = jnp.eye(C, dtype=jnp.float32)[jnp.arange(N) % C]                # [N, C] one-hot
    m_norm = assign / jnp.sum(assign, axis=0, keepdims=True)                 # cluster-mean op
    # Block-diagonal (per-batch) upsample operator: rows (b, n), cols (b, c).
    up_mat = (jnp.eye(B, dtype=jnp.float32)[:, None, :, None]
              * assign[None, :, None, :]).reshape(B * N, B * C)

    params = {
        "m_norm": m_norm,
        "up_mat": up_mat,
        "low": prepare_seq2seq(make_seq2seq_params(k_low, IN_FEAT, HID), HID),
        "high": prepare_seq2seq(make_seq2seq_params(k_high, IN_FEAT, HID), HID),
    }

    # PyTorch nn.Module defaults to training mode -> forward returns (y, ybar).
    y, ybar = two_resnet_forward(x, params, horizon=HORIZON, training=True)
    jax.block_until_ready(y)
    jax.block_until_ready(ybar)

    assert y.shape == (B, 1, N, HORIZON)
    assert ybar.shape == (B, 1, C, HORIZON)
    assert bool(jnp.all(jnp.isfinite(y))) and bool(jnp.all(jnp.isfinite(ybar)))
    # TODO(synk): teacher forcing / scheduled sampling (teachers dict) is not implemented;
    # the reference default is teachers=None, so this matches the inference path only.
    print("KERNEL_OK")
</pallas_src>

<mosaic_0001>
module attributes {stable_mosaic.version = 11 : i64} {
  func.func @_two_resnet_kernel(%arg0: memref<3x8x8x32xf32, #tpu.memory_space<vmem>>, %arg1: memref<8x1xf32, #tpu.memory_space<vmem>>, %arg2: memref<3x8x32x32xf32, #tpu.memory_space<vmem>>, %arg3: memref<32x1xf32, #tpu.memory_space<vmem>>, %arg4: memref<32x8xf32, #tpu.memory_space<vmem>>, %arg5: memref<3x32x32xbf16, #tpu.memory_space<vmem>>, %arg6: memref<3x1x32xf32, #tpu.memory_space<vmem>>, %arg7: memref<3x1x32xf32, #tpu.memory_space<vmem>>, %arg8: memref<3x1x32xf32, #tpu.memory_space<vmem>>, %arg9: memref<3x32x32xbf16, #tpu.memory_space<vmem>>, %arg10: memref<3x1x32xf32, #tpu.memory_space<vmem>>, %arg11: memref<1x32xf32, #tpu.memory_space<vmem>>, %arg12: memref<1xf32, #tpu.memory_space<smem>>, %arg13: memref<3x32x32xbf16, #tpu.memory_space<vmem>>, %arg14: memref<3x1x32xf32, #tpu.memory_space<vmem>>, %arg15: memref<3x1x32xf32, #tpu.memory_space<vmem>>, %arg16: memref<3x1x32xf32, #tpu.memory_space<vmem>>, %arg17: memref<3x32x32xbf16, #tpu.memory_space<vmem>>, %arg18: memref<3x1x32xf32, #tpu.memory_space<vmem>>, %arg19: memref<1x32xf32, #tpu.memory_space<vmem>>, %arg20: memref<1xf32, #tpu.memory_space<smem>>, %arg21: memref<32x128xf32, #tpu.memory_space<vmem>>, %arg22: memref<8x128xf32, #tpu.memory_space<vmem>>) attributes {dimension_semantics = [], scalar_prefetch = 0 : i64, scratch_operands = 0 : i64, tpu.core_type = #tpu.core_type<tc>} {
    %cst = arith.constant 0.000000e+00 : f32
    %0 = vector.broadcast %cst : f32 to vector<8x32xf32>
    %cst_0 = arith.constant 0.000000e+00 : f32
    %1 = vector.broadcast %cst_0 : f32 to vector<32x32xf32>
    %c0 = arith.constant 0 : index
    %c0_1 = arith.constant 0 : index
    %c0_2 = arith.constant 0 : index
    %c0_3 = arith.constant 0 : index
    %2 = vector.load %arg0[%c0, %c0_1, %c0_2, %c0_3] : memref<3x8x8x32xf32, #tpu.memory_space<vmem>>, vector<1x1x8x32xf32>
    %3 = vector.shape_cast %2 : vector<1x1x8x32xf32> to vector<8x32xf32>
    %c1 = arith.constant 1 : index
    %c0_4 = arith.constant 0 : index
    %c0_5 = arith.constant 0 : index
    %c0_6 = arith.constant 0 : index
    %4 = vector.load %arg0[%c1, %c0_4, %c0_5, %c0_6] : memref<3x8x8x32xf32, #tpu.memory_space<vmem>>, vector<1x1x8x32xf32>
    %5 = vector.shape_cast %4 : vector<1x1x8x32xf32> to vector<8x32xf32>
    %c2 = arith.constant 2 : index
    %c0_7 = arith.constant 0 : index
    %c0_8 = arith.constant 0 : index
    %c0_9 = arith.constant 0 : index
    %6 = vector.load %arg0[%c2, %c0_7, %c0_8, %c0_9] : memref<3x8x8x32xf32, #tpu.memory_space<vmem>>, vector<1x1x8x32xf32>
    %7 = vector.shape_cast %6 : vector<1x1x8x32xf32> to vector<8x32xf32>
    %8 = arith.truncf %0 : vector<8x32xf32> to vector<8x32xbf16>
    %c0_10 = arith.constant 0 : index
    %c0_11 = arith.constant 0 : index
    %c0_12 = arith.constant 0 : index
    %9 = vector.load %arg5[%c0_10, %c0_11, %c0_12] : memref<3x32x32xbf16, #tpu.memory_space<vmem>>, vector<1x32x32xbf16>
    %10 = vector.shape_cast %9 : vector<1x32x32xbf16> to vector<32x32xbf16>
    %cst_13 = arith.constant dense<0.000000e+00> : vector<8x32xf32>
    %11 = tpu.matmul %8, %10, %cst_13 {dimension_numbers = #tpu.dot_dimension_numbers<[1], [0], [0], [1], [0, 0, 1, 1], [], []>} : vector<8x32xbf16>, vector<32x32xbf16>, vector<8x32xf32> -> vector<8x32xf32>
    %c0_14 = arith.constant 0 : index
    %c0_15 = arith.constant 0 : index
    %c0_16 = arith.constant 0 : index
    %12 = vector.load %arg6[%c0_14, %c0_15, %c0_16] : memref<3x1x32xf32, #tpu.memory_space<vmem>>, vector<1x1x32xf32>
    %13 = vector.shape_cast %12 : vector<1x1x32xf32> to vector<1x32xf32>
    %14 = vector.broadcast %13 : vector<1x32xf32> to vector<8x32xf32>
    %15 = arith.addf %11, %14 : vector<8x32xf32>
    %c1_17 = arith.constant 1 : index
    %c0_18 = arith.constant 0 : index
    %c0_19 = arith.constant 0 : index
    %16 = vector.load %arg5[%c1_17, %c0_18, %c0_19] : memref<3x32x32xbf16, #tpu.memory_space<vmem>>, vector<1x32x32xbf16>
    %17 = vector.shape_cast %16 : vector<1x32x32xbf16> to vector<32x32xbf16>
    %cst_20 = arith.constant dense<0.000000e+00> : vector<8x32xf32>
    %18 = tpu.matmul %8, %17, %cst_20 {dimension_numbers = #tpu.dot_dimension_numbers<[1], [0], [0], [1], [0, 0, 1, 1], [], []>} : vector<8x32xbf16>, vector<32x32xbf16>, vector<8x32xf32> -> vector<8x32xf32>
    %c1_21 = arith.constant 1 : index
    %c0_22 = arith.constant 0 : index
    %c0_23 = arith.constant 0 : index
    %19 = vector.load %arg6[%c1_21, %c0_22, %c0_23] : memref<3x1x32xf32, #tpu.memory_space<vmem>>, vector<1x1x32xf32>
    %20 = vector.shape_cast %19 : vector<1x1x32xf32> to vector<1x32xf32>
    %21 = vector.broadcast %20 : vector<1x32xf32> to vector<8x32xf32>
    %22 = arith.addf %18, %21 : vector<8x32xf32>
    %c2_24 = arith.constant 2 : index
    %c0_25 = arith.constant 0 : index
    %c0_26 = arith.constant 0 : index
    %23 = vector.load %arg5[%c2_24, %c0_25, %c0_26] : memref<3x32x32xbf16, #tpu.memory_space<vmem>>, vector<1x32x32xbf16>
    %24 = vector.shape_cast %23 : vector<1x32x32xbf16> to vector<32x32xbf16>
    %cst_27 = arith.constant dense<0.000000e+00> : vector<8x32xf32>
    %25 = tpu.matmul %8, %24, %cst_27 {dimension_numbers = #tpu.dot_dimension_numbers<[1], [0], [0], [1], [0, 0, 1, 1], [], []>} : vector<8x32xbf16>, vector<32x32xbf16>, vector<8x32xf32> -> vector<8x32xf32>
    %c2_28 = arith.constant 2 : index
    %c0_29 = arith.constant 0 : index
    %c0_30 = arith.constant 0 : index
    %26 = vector.load %arg6[%c2_28, %c0_29, %c0_30] : memref<3x1x32xf32, #tpu.memory_space<vmem>>, vector<1x1x32xf32>
    %27 = vector.shape_cast %26 : vector<1x1x32xf32> to vector<1x32xf32>
    %28 = vector.broadcast %27 : vector<1x32xf32> to vector<8x32xf32>
    %29 = arith.addf %25, %28 : vector<8x32xf32>
    %30 = arith.addf %3, %15 : vector<8x32xf32>
    %31 = arith.negf %30 : vector<8x32xf32>
    %32 = math.exp %31 : vector<8x32xf32>
    %cst_31 = arith.constant 1.000000e+00 : f32
    %33 = vector.broadcast %cst_31 : f32 to vector<8x32xf32>
    %34 = arith.addf %33, %32 : vector<8x32xf32>
    %35 = arith.divf %33, %34 : vector<8x32xf32>
    %36 = arith.addf %5, %22 : vector<8x32xf32>
    %37 = arith.negf %36 : vector<8x32xf32>
    %38 = math.exp %37 : vector<8x32xf32>
    %cst_32 = arith.constant 1.000000e+00 : f32
    %39 = vector.broadcast %cst_32 : f32 to vector<8x32xf32>
    %40 = arith.addf %39, %38 : vector<8x32xf32>
    %41 = arith.divf %39, %40 : vector<8x32xf32>
    %42 = arith.mulf %35, %29 : vector<8x32xf32>
    %43 = arith.addf %7, %42 : vector<8x32xf32>
    %44 = math.tanh %43 : vector<8x32xf32>
    %cst_33 = arith.constant 1.000000e+00 : f32
    %45 = vector.broadcast %cst_33 : f32 to vector<8x32xf32>
    %46 = arith.subf %45, %41 : vector<8x32xf32>
    %47 = arith.mulf %46, %44 : vector<8x32xf32>
    %48 = arith.mulf %41, %0 : vector<8x32xf32>
    %49 = arith.addf %47, %48 : vector<8x32xf32>
    %c0_34 = arith.constant 0 : index
    %c0_35 = arith.constant 0 : index
    %c0_36 = arith.constant 0 : index
    %c0_37 = arith.constant 0 : index
    %50 = vector.load %arg2[%c0_34, %c0_35, %c0_36, %c0_37] : memref<3x8x32x32xf32, #tpu.memory_space<vmem>>, vector<1x1x32x32xf32>
    %51 = vector.shape_cast %50 : vector<1x1x32x32xf32> to vector<32x32xf32>
    %c1_38 = arith.constant 1 : index
    %c0_39 = arith.constant 0 : index
    %c0_40 = arith.constant 0 : index
    %c0_41 = arith.constant 0 : index
    %52 = vector.load %arg2[%c1_38, %c0_39, %c0_40, %c0_41] : memref<3x8x32x32xf32, #tpu.memory_space<vmem>>, vector<1x1x32x32xf32>
    %53 = vector.shape_cast %52 : vector<1x1x32x32xf32> to vector<32x32xf32>
    %c2_42 = arith.constant 2 : index
    %c0_43 = arith.constant 0 : index
    %c0_44 = arith.constant 0 : index
    %c0_45 = arith.constant 0 : index
    %54 = vector.load %arg2[%c2_42, %c0_43, %c0_44, %c0_45] : memref<3x8x32x32xf32, #tpu.memory_space<vmem>>, vector<1x1x32x32xf32>
    %55 = vector.shape_cast %54 : vector<1x1x32x32xf32> to vector<32x32xf32>
    %56 = arith.truncf %1 : vector<32x32xf32> to vector<32x32xbf16>
    %c0_46 = arith.constant 0 : index
    %c0_47 = arith.constant 0 : index
    %c0_48 = arith.constant 0 : index
    %57 = vector.load %arg13[%c0_46, %c0_47, %c0_48] : memref<3x32x32xbf16, #tpu.memory_space<vmem>>, vector<1x32x32xbf16>
    %58 = vector.shape_cast %57 : vector<1x32x32xbf16> to vector<32x32xbf16>
    %cst_49 = arith.constant dense<0.000000e+00> : vector<32x32xf32>
    %59 = tpu.matmul %56, %58, %cst_49 {dimension_numbers = #tpu.dot_dimension_numbers<[1], [0], [0], [1], [0, 0, 1, 1], [], []>} : vector<32x32xbf16>, vector<32x32xbf16>, vector<32x32xf32> -> vector<32x32xf32>
    %c0_50 = arith.constant 0 : index
    %c0_51 = arith.constant 0 : index
    %c0_52 = arith.constant 0 : index
    %60 = vector.load %arg14[%c0_50, %c0_51, %c0_52] : memref<3x1x32xf32, #tpu.memory_space<vmem>>, vector<1x1x32xf32>
    %61 = vector.shape_cast %60 : vector<1x1x32xf32> to vector<1x32xf32>
    %62 = vector.broadcast %61 : vector<1x32xf32> to vector<32x32xf32>
    %63 = arith.addf %59, %62 : vector<32x32xf32>
    %c1_53 = arith.constant 1 : index
    %c0_54 = arith.constant 0 : index
    %c0_55 = arith.constant 0 : index
    %64 = vector.load %arg13[%c1_53, %c0_54, %c0_55] : memref<3x32x32xbf16, #tpu.memory_space<vmem>>, vector<1x32x32xbf16>
    %65 = vector.shape_cast %64 : vector<1x32x32xbf16> to vector<32x32xbf16>
    %cst_56 = arith.constant dense<0.000000e+00> : vector<32x32xf32>
    %66 = tpu.matmul %56, %65, %cst_56 {dimension_numbers = #tpu.dot_dimension_numbers<[1], [0], [0], [1], [0, 0, 1, 1], [], []>} : vector<32x32xbf16>, vector<32x32xbf16>, vector<32x32xf32> -> vector<32x32xf32>
    %c1_57 = arith.constant 1 : index
    %c0_58 = arith.constant 0 : index
    %c0_59 = arith.constant 0 : index
    %67 = vector.load %arg14[%c1_57, %c0_58, %c0_59] : memref<3x1x32xf32, #tpu.memory_space<vmem>>, vector<1x1x32xf32>
    %68 = vector.shape_cast %67 : vector<1x1x32xf32> to vector<1x32xf32>
    %69 = vector.broadcast %68 : vector<1x32xf32> to vector<32x32xf32>
    %70 = arith.addf %66, %69 : vector<32x32xf32>
    %c2_60 = arith.constant 2 : index
    %c0_61 = arith.constant 0 : index
    %c0_62 = arith.constant 0 : index
    %71 = vector.load %arg13[%c2_60, %c0_61, %c0_62] : memref<3x32x32xbf16, #tpu.memory_space<vmem>>, vector<1x32x32xbf16>
    %72 = vector.shape_cast %71 : vector<1x32x32xbf16> to vector<32x32xbf16>
    %cst_63 = arith.constant dense<0.000000e+00> : vector<32x32xf32>
    %73 = tpu.matmul %56, %72, %cst_63 {dimension_numbers = #tpu.dot_dimension_numbers<[1], [0], [0], [1], [0, 0, 1, 1], [], []>} : vector<32x32xbf16>, vector<32x32xbf16>, vector<32x32xf32> -> vector<32x32xf32>
    %c2_64 = arith.constant 2 : index
    %c0_65 = arith.constant 0 : index
    %c0_66 = arith.constant 0 : index
    %74 = vector.load %arg14[%c2_64, %c0_65, %c0_66] : memref<3x1x32xf32, #tpu.memory_space<vmem>>, vector<1x1x32xf32>
    %75 = vector.shape_cast %74 : vector<1x1x32xf32> to vector<1x32xf32>
    %76 = vector.broadcast %75 : vector<1x32xf32> to vector<32x32xf32>
    %77 = arith.addf %73, %76 : vector<32x32xf32>
    %78 = arith.addf %51, %63 : vector<32x32xf32>
    %79 = arith.negf %78 : vector<32x32xf32>
    %80 = math.exp %79 : vector<32x32xf32>
    %cst_67 = arith.constant 1.000000e+00 : f32
    %81 = vector.broadcast %cst_67 : f32 to vector<32x32xf32>
    %82 = arith.addf %81, %80 : vector<32x32xf32>
    %83 = arith.divf %81, %82 : vector<32x32xf32>
    %84 = arith.addf %53, %70 : vector<32x32xf32>
    %85 = arith.negf %84 : vector<32x32xf32>
    %86 = math.exp %85 : vector<32x32xf32>
    %cst_68 = arith.constant 1.000000e+00 : f32
    %87 = vector.broadcast %cst_68 : f32 to vector<32x32xf32>
    %88 = arith.addf %87, %86 : vector<32x32xf32>
    %89 = arith.divf %87, %88 : vector<32x32xf32>
    %90 = arith.mulf %83, %77 : vector<32x32xf32>
    %91 = arith.addf %55, %90 : vector<32x32xf32>
    %92 = math.tanh %91 : vector<32x32xf32>
    %cst_69 = arith.constant 1.000000e+00 : f32
    %93 = vector.broadcast %cst_69 : f32 to vector<32x32xf32>
    %94 = arith.subf %93, %89 : vector<32x32xf32>
    %95 = arith.mulf %94, %92 : vector<32x32xf32>
    %96 = arith.mulf %89, %1 : vector<32x32xf32>
    %97 = arith.addf %95, %96 : vector<32x32xf32>
    %c0_70 = arith.constant 0 : index
    %c1_71 = arith.constant 1 : index
    %c0_72 = arith.constant 0 : index
    %c0_73 = arith.constant 0 : index
    %98 = vector.load %arg0[%c0_70, %c1_71, %c0_72, %c0_73] : memref<3x8x8x32xf32, #tpu.memory_space<vmem>>, vector<1x1x8x32xf32>
    %99 = vector.shape_cast %98 : vector<1x1x8x32xf32> to vector<8x32xf32>
    %c1_74 = arith.constant 1 : index
    %c1_75 = arith.constant 1 : index
    %c0_76 = arith.constant 0 : index
    %c0_77 = arith.constant 0 : index
    %100 = vector.load %arg0[%c1_74, %c1_75, %c0_76, %c0_77] : memref<3x8x8x32xf32, #tpu.memory_space<vmem>>, vector<1x1x8x32xf32>
    %101 = vector.shape_cast %100 : vector<1x1x8x32xf32> to vector<8x32xf32>
    %c2_78 = arith.constant 2 : index
    %c1_79 = arith.constant 1 : index
    %c0_80 = arith.constant 0 : index
    %c0_81 = arith.constant 0 : index
    %102 = vector.load %arg0[%c2_78, %c1_79, %c0_80, %c0_81] : memref<3x8x8x32xf32, #tpu.memory_space<vmem>>, vector<1x1x8x32xf32>
    %103 = vector.shape_cast %102 : vector<1x1x8x32xf32> to vector<8x32xf32>
    %104 = arith.truncf %49 : vector<8x32xf32> to vector<8x32xbf16>
    %c0_82 = arith.constant 0 : index
    %c0_83 = arith.constant 0 : index
    %c0_84 = arith.constant 0 : index
    %105 = vector.load %arg5[%c0_82, %c0_83, %c0_84] : memref<3x32x32xbf16, #tpu.memory_space<vmem>>, vector<1x32x32xbf16>
    %106 = vector.shape_cast %105 : vector<1x32x32xbf16> to vector<32x32xbf16>
    %cst_85 = arith.constant dense<0.000000e+00> : vector<8x32xf32>
    %107 = tpu.matmul %104, %106, %cst_85 {dimension_numbers = #tpu.dot_dimension_numbers<[1], [0], [0], [1], [0, 0, 1, 1], [], []>} : vector<8x32xbf16>, vector<32x32xbf16>, vector<8x32xf32> -> vector<8x32xf32>
    %c0_86 = arith.constant 0 : index
    %c0_87 = arith.constant 0 : index
    %c0_88 = arith.constant 0 : index
    %108 = vector.load %arg6[%c0_86, %c0_87, %c0_88] : memref<3x1x32xf32, #tpu.memory_space<vmem>>, vector<1x1x32xf32>
    %109 = vector.shape_cast %108 : vector<1x1x32xf32> to vector<1x32xf32>
    %110 = vector.broadcast %109 : vector<1x32xf32> to vector<8x32xf32>
    %111 = arith.addf %107, %110 : vector<8x32xf32>
    %c1_89 = arith.constant 1 : index
    %c0_90 = arith.constant 0 : index
    %c0_91 = arith.constant 0 : index
    %112 = vector.load %arg5[%c1_89, %c0_90, %c0_91] : memref<3x32x32xbf16, #tpu.memory_space<vmem>>, vector<1x32x32xbf16>
    %113 = vector.shape_cast %112 : vector<1x32x32xbf16> to vector<32x32xbf16>
    %cst_92 = arith.constant dense<0.000000e+00> : vector<8x32xf32>
    %114 = tpu.matmul %104, %113, %cst_92 {dimension_numbers = #tpu.dot_dimension_numbers<[1], [0], [0], [1], [0, 0, 1, 1], [], []>} : vector<8x32xbf16>, vector<32x32xbf16>, vector<8x32xf32> -> vector<8x32xf32>
    %c1_93 = arith.constant 1 : index
    %c0_94 = arith.constant 0 : index
    %c0_95 = arith.constant 0 : index
    %115 = vector.load %arg6[%c1_93, %c0_94, %c0_95] : memref<3x1x32xf32, #tpu.memory_space<vmem>>, vector<1x1x32xf32>
    %116 = vector.shape_cast %115 : vector<1x1x32xf32> to vector<1x32xf32>
    %117 = vector.broadcast %116 : vector<1x32xf32> to vector<8x32xf32>
    %118 = arith.addf %114, %117 : vector<8x32xf32>
    %c2_96 = arith.constant 2 : index
    %c0_97 = arith.constant 0 : index
    %c0_98 = arith.constant 0 : index
    %119 = vector.load %arg5[%c2_96, %c0_97, %c0_98] : memref<3x32x32xbf16, #tpu.memory_space<vmem>>, vector<1x32x32xbf16>
    %120 = vector.shape_cast %119 : vector<1x32x32xbf16> to vector<32x32xbf16>
    %cst_99 = arith.constant dense<0.000000e+00> : vector<8x32xf32>
    %121 = tpu.matmul %104, %120, %cst_99 {dimension_numbers = #tpu.dot_dimension_numbers<[1], [0], [0], [1], [0, 0, 1, 1], [], []>} : vector<8x32xbf16>, vector<32x32xbf16>, vector<8x32xf32> -> vector<8x32xf32>
    %c2_100 = arith.constant 2 : index
    %c0_101 = arith.constant 0 : index
    %c0_102 = arith.constant 0 : index
    %122 = vector.load %arg6[%c2_100, %c0_101, %c0_102] : memref<3x1x32xf32, #tpu.memory_space<vmem>>, vector<1x1x32xf32>
    %123 = vector.shape_cast %122 : vector<1x1x32xf32> to vector<1x32xf32>
    %124 = vector.broadcast %123 : vector<1x32xf32> to vector<8x32xf32>
    %125 = arith.addf %121, %124 : vector<8x32xf32>
    %126 = arith.addf %99, %111 : vector<8x32xf32>
    %127 = arith.negf %126 : vector<8x32xf32>
    %128 = math.exp %127 : vector<8x32xf32>
    %cst_103 = arith.constant 1.000000e+00 : f32
    %129 = vector.broadcast %cst_103 : f32 to vector<8x32xf32>
    %130 = arith.addf %129, %128 : vector<8x32xf32>
    %131 = arith.divf %129, %130 : vector<8x32xf32>
    %132 = arith.addf %101, %118 : vector<8x32xf32>
    %133 = arith.negf %132 : vector<8x32xf32>
    %134 = math.exp %133 : vector<8x32xf32>
    %cst_104 = arith.constant 1.000000e+00 : f32
    %135 = vector.broadcast %cst_104 : f32 to vector<8x32xf32>
    %136 = arith.addf %135, %134 : vector<8x32xf32>
    %137 = arith.divf %135, %136 : vector<8x32xf32>
    %138 = arith.mulf %131, %125 : vector<8x32xf32>
    %139 = arith.addf %103, %138 : vector<8x32xf32>
    %140 = math.tanh %139 : vector<8x32xf32>
    %cst_105 = arith.constant 1.000000e+00 : f32
    %141 = vector.broadcast %cst_105 : f32 to vector<8x32xf32>
    %142 = arith.subf %141, %137 : vector<8x32xf32>
    %143 = arith.mulf %142, %140 : vector<8x32xf32>
    %144 = arith.mulf %137, %49 : vector<8x32xf32>
    %145 = arith.addf %143, %144 : vector<8x32xf32>
    %c0_106 = arith.constant 0 : index
    %c1_107 = arith.constant 1 : index
    %c0_108 = arith.constant 0 : index
    %c0_109 = arith.constant 0 : index
    %146 = vector.load %arg2[%c0_106, %c1_107, %c0_108, %c0_109] : memref<3x8x32x32xf32, #tpu.memory_space<vmem>>, vector<1x1x32x32xf32>
    %147 = vector.shape_cast %146 : vector<1x1x32x32xf32> to vector<32x32xf32>
    %c1_110 = arith.constant 1 : index
    %c1_111 = arith.constant 1 : index
    %c0_112 = arith.constant 0 : index
    %c0_113 = arith.constant 0 : index
    %148 = vector.load %arg2[%c1_110, %c1_111, %c0_112, %c0_113] : memref<3x8x32x32xf32, #tpu.memory_space<vmem>>, vector<1x1x32x32xf32>
    %149 = vector.shape_cast %148 : vector<1x1x32x32xf32> to vector<32x32xf32>
    %c2_114 = arith.constant 2 : index
    %c1_115 = arith.constant 1 : index
    %c0_116 = arith.constant 0 : index
    %c0_117 = arith.constant 0 : index
    %150 = vector.load %arg2[%c2_114, %c1_115, %c0_116, %c0_117] : memref<3x8x32x32xf32, #tpu.memory_space<vmem>>, vector<1x1x32x32xf32>
    %151 = vector.shape_cast %150 : vector<1x1x32x32xf32> to vector<32x32xf32>
    %152 = arith.truncf %97 : vector<32x32xf32> to vector<32x32xbf16>
    %c0_118 = arith.constant 0 : index
    %c0_119 = arith.constant 0 : index
    %c0_120 = arith.constant 0 : index
    %153 = vector.load %arg13[%c0_118, %c0_119, %c0_120] : memref<3x32x32xbf16, #tpu.memory_space<vmem>>, vector<1x32x32xbf16>
    %154 = vector.shape_cast %153 : vector<1x32x32xbf16> to vector<32x32xbf16>
    %cst_121 = arith.constant dense<0.000000e+00> : vector<32x32xf32>
    %155 = tpu.matmul %152, %154, %cst_121 {dimension_numbers = #tpu.dot_dimension_numbers<[1], [0], [0], [1], [0, 0, 1, 1], [], []>} : vector<32x32xbf16>, vector<32x32xbf16>, vector<32x32xf32> -> vector<32x32xf32>
    %c0_122 = arith.constant 0 : index
    %c0_123 = arith.constant 0 : index
    %c0_124 = arith.constant 0 : index
    %156 = vector.load %arg14[%c0_122, %c0_123, %c0_124] : memref<3x1x32xf32, #tpu.memory_space<vmem>>, vector<1x1x32xf32>
    %157 = vector.shape_cast %156 : vector<1x1x32xf32> to vector<1x32xf32>
    %158 = vector.broadcast %157 : vector<1x32xf32> to vector<32x32xf32>
    %159 = arith.addf %155, %158 : vector<32x32xf32>
    %c1_125 = arith.constant 1 : index
    %c0_126 = arith.constant 0 : index
    %c0_127 = arith.constant 0 : index
    %160 = vector.load %arg13[%c1_125, %c0_126, %c0_127] : memref<3x32x32xbf16, #tpu.memory_space<vmem>>, vector<1x32x32xbf16>
    %161 = vector.shape_cast %160 : vector<1x32x32xbf16> to vector<32x32xbf16>
    %cst_128 = arith.constant dense<0.000000e+00> : vector<32x32xf32>
    %162 = tpu.matmul %152, %161, %cst_128 {dimension_numbers = #tpu.dot_dimension_numbers<[1], [0], [0], [1], [0, 0, 1, 1], [], []>} : vector<32x32xbf16>, vector<32x32xbf16>, vector<32x32xf32> -> vector<32x32xf32>
    %c1_129 = arith.constant 1 : index
    %c0_130 = arith.constant 0 : index
    %c0_131 = arith.constant 0 : index
    %163 = vector.load %arg14[%c1_129, %c0_130, %c0_131] : memref<3x1x32xf32, #tpu.memory_space<vmem>>, vector<1x1x32xf32>
    %164 = vector.shape_cast %163 : vector<1x1x32xf32> to vector<1x32xf32>
    %165 = vector.broadcast %164 : vector<1x32xf32> to vector<32x32xf32>
    %166 = arith.addf %162, %165 : vector<32x32xf32>
    %c2_132 = arith.constant 2 : index
    %c0_133 = arith.constant 0 : index
    %c0_134 = arith.constant 0 : index
    %167 = vector.load %arg13[%c2_132, %c0_133, %c0_134] : memref<3x32x32xbf16, #tpu.memory_space<vmem>>, vector<1x32x32xbf16>
    %168 = vector.shape_cast %167 : vector<1x32x32xbf16> to vector<32x32xbf16>
    %cst_135 = arith.constant dense<0.000000e+00> : vector<32x32xf32>
    %169 = tpu.matmul %152, %168, %cst_135 {dimension_numbers = #tpu.dot_dimension_numbers<[1], [0], [0], [1], [0, 0, 1, 1], [], []>} : vector<32x32xbf16>, vector<32x32xbf16>, vector<32x32xf32> -> vector<32x32xf32>
    %c2_136 = arith.constant 2 : index
    %c0_137 = arith.constant 0 : index
    %c0_138 = arith.constant 0 : index
    %170 = vector.load %arg14[%c2_136, %c0_137, %c0_138] : memref<3x1x32xf32, #tpu.memory_space<vmem>>, vector<1x1x32xf32>
    %171 = vector.shape_cast %170 : vector<1x1x32xf32> to vector<1x32xf32>
    %172 = vector.broadcast %171 : vector<1x32xf32> to vector<32x32xf32>
    %173 = arith.addf %169, %172 : vector<32x32xf32>
    %174 = arith.addf %147, %159 : vector<32x32xf32>
    %175 = arith.negf %174 : vector<32x32xf32>
    %176 = math.exp %175 : vector<32x32xf32>
    %cst_139 = arith.constant 1.000000e+00 : f32
    %177 = vector.broadcast %cst_139 : f32 to vector<32x32xf32>
    %178 = arith.addf %177, %176 : vector<32x32xf32>
    %179 = arith.divf %177, %178 : vector<32x32xf32>
    %180 = arith.addf %149, %166 : vector<32x32xf32>
    %181 = arith.negf %180 : vector<32x32xf32>
    %182 = math.exp %181 : vector<32x32xf32>
    %cst_140 = arith.constant 1.000000e+00 : f32
    %183 = vector.broadcast %cst_140 : f32 to vector<32x32xf32>
    %184 = arith.addf %183, %182 : vector<32x32xf32>
    %185 = arith.divf %183, %184 : vector<32x32xf32>
    %186 = arith.mulf %179, %173 : vector<32x32xf32>
    %187 = arith.addf %151, %186 : vector<32x32xf32>
    %188 = math.tanh %187 : vector<32x32xf32>
    %cst_141 = arith.constant 1.000000e+00 : f32
    %189 = vector.broadcast %cst_141 : f32 to vector<32x32xf32>
    %190 = arith.subf %189, %185 : vector<32x32xf32>
    %191 = arith.mulf %190, %188 : vector<32x32xf32>
    %192 = arith.mulf %185, %97 : vector<32x32xf32>
    %193 = arith.addf %191, %192 : vector<32x32xf32>
    %c0_142 = arith.constant 0 : index
    %c2_143 = arith.constant 2 : index
    %c0_144 = arith.constant 0 : index
    %c0_145 = arith.constant 0 : index
    %194 = vector.load %arg0[%c0_142, %c2_143, %c0_144, %c0_145] : memref<3x8x8x32xf32, #tpu.memory_space<vmem>>, vector<1x1x8x32xf32>
    %195 = vector.shape_cast %194 : vector<1x1x8x32xf32> to vector<8x32xf32>
    %c1_146 = arith.constant 1 : index
    %c2_147 = arith.constant 2 : index
    %c0_148 = arith.constant 0 : index
    %c0_149 = arith.constant 0 : index
    %196 = vector.load %arg0[%c1_146, %c2_147, %c0_148, %c0_149] : memref<3x8x8x32xf32, #tpu.memory_space<vmem>>, vector<1x1x8x32xf32>
    %197 = vector.shape_cast %196 : vector<1x1x8x32xf32> to vector<8x32xf32>
    %c2_150 = arith.constant 2 : index
    %c2_151 = arith.constant 2 : index
    %c0_152 = arith.constant 0 : index
    %c0_153 = arith.constant 0 : index
    %198 = vector.load %arg0[%c2_150, %c2_151, %c0_152, %c0_153] : memref<3x8x8x32xf32, #tpu.memory_space<vmem>>, vector<1x1x8x32xf32>
    %199 = vector.shape_cast %198 : vector<1x1x8x32xf32> to vector<8x32xf32>
    %200 = arith.truncf %145 : vector<8x32xf32> to vector<8x32xbf16>
    %c0_154 = arith.constant 0 : index
    %c0_155 = arith.constant 0 : index
    %c0_156 = arith.constant 0 : index
    %201 = vector.load %arg5[%c0_154, %c0_155, %c0_156] : memref<3x32x32xbf16, #tpu.memory_space<vmem>>, vector<1x32x32xbf16>
    %202 = vector.shape_cast %201 : vector<1x32x32xbf16> to vector<32x32xbf16>
    %cst_157 = arith.constant dense<0.000000e+00> : vector<8x32xf32>
    %203 = tpu.matmul %200, %202, %cst_157 {dimension_numbers = #tpu.dot_dimension_numbers<[1], [0], [0], [1], [0, 0, 1, 1], [], []>} : vector<8x32xbf16>, vector<32x32xbf16>, vector<8x32xf32> -> vector<8x32xf32>
    %c0_158 = arith.constant 0 : index
    %c0_159 = arith.constant 0 : index
    %c0_160 = arith.constant 0 : index
    %204 = vector.load %arg6[%c0_158, %c0_159, %c0_160] : memref<3x1x32xf32, #tpu.memory_space<vmem>>, vector<1x1x32xf32>
    %205 = vector.shape_cast %204 : vector<1x1x32xf32> to vector<1x32xf32>
    %206 = vector.broadcast %205 : vector<1x32xf32> to vector<8x32xf32>
    %207 = arith.addf %203, %206 : vector<8x32xf32>
    %c1_161 = arith.constant 1 : index
    %c0_162 = arith.constant 0 : index
    %c0_163 = arith.constant 0 : index
    %208 = vector.load %arg5[%c1_161, %c0_162, %c0_163] : memref<3x32x32xbf16, #tpu.memory_space<vmem>>, vector<1x32x32xbf16>
    %209 = vector.shape_cast %208 : vector<1x32x32xbf16> to vector<32x32xbf16>
    %cst_164 = arith.constant dense<0.000000e+00> : vector<8x32xf32>
    %210 = tpu.matmul %200, %209, %cst_164 {dimension_numbers = #tpu.dot_dimension_numbers<[1], [0], [0], [1], [0, 0, 1, 1], [], []>} : vector<8x32xbf16>, vector<32x32xbf16>, vector<8x32xf32> -> vector<8x32xf32>
    %c1_165 = arith.constant 1 : index
    %c0_166 = arith.constant 0 : index
    %c0_167 = arith.constant 0 : index
    %211 = vector.load %arg6[%c1_165, %c0_166, %c0_167] : memref<3x1x32xf32, #tpu.memory_space<vmem>>, vector<1x1x32xf32>
    %212 = vector.shape_cast %211 : vector<1x1x32xf32> to vector<1x32xf32>
    %213 = vector.broadcast %212 : vector<1x32xf32> to vector<8x32xf32>
    %214 = arith.addf %210, %213 : vector<8x32xf32>
    %c2_168 = arith.constant 2 : index
    %c0_169 = arith.constant 0 : index
    %c0_170 = arith.constant 0 : index
    %215 = vector.load %arg5[%c2_168, %c0_169, %c0_170] : memref<3x32x32xbf16, #tpu.memory_space<vmem>>, vector<1x32x32xbf16>
    %216 = vector.shape_cast %215 : vector<1x32x32xbf16> to vector<32x32xbf16>
    %cst_171 = arith.constant dense<0.000000e+00> : vector<8x32xf32>
    %217 = tpu.matmul %200, %216, %cst_171 {dimension_numbers = #tpu.dot_dimension_numbers<[1], [0], [0], [1], [0, 0, 1, 1], [], []>} : vector<8x32xbf16>, vector<32x32xbf16>, vector<8x32xf32> -> vector<8x32xf32>
    %c2_172 = arith.constant 2 : index
    %c0_173 = arith.constant 0 : index
    %c0_174 = arith.constant 0 : index
    %218 = vector.load %arg6[%c2_172, %c0_173, %c0_174] : memref<3x1x32xf32, #tpu.memory_space<vmem>>, vector<1x1x32xf32>
    %219 = vector.shape_cast %218 : vector<1x1x32xf32> to vector<1x32xf32>
    %220 = vector.broadcast %219 : vector<1x32xf32> to vector<8x32xf32>
    %221 = arith.addf %217, %220 : vector<8x32xf32>
    %222 = arith.addf %195, %207 : vector<8x32xf32>
    %223 = arith.negf %222 : vector<8x32xf32>
    %224 = math.exp %223 : vector<8x32xf32>
    %cst_175 = arith.constant 1.000000e+00 : f32
    %225 = vector.broadcast %cst_175 : f32 to vector<8x32xf32>
    %226 = arith.addf %225, %224 : vector<8x32xf32>
    %227 = arith.divf %225, %226 : vector<8x32xf32>
    %228 = arith.addf %197, %214 : vector<8x32xf32>
    %229 = arith.negf %228 : vector<8x32xf32>
    %230 = math.exp %229 : vector<8x32xf32>
    %cst_176 = arith.constant 1.000000e+00 : f32
    %231 = vector.broadcast %cst_176 : f32 to vector<8x32xf32>
    %232 = arith.addf %231, %230 : vector<8x32xf32>
    %233 = arith.divf %231, %232 : vector<8x32xf32>
    %234 = arith.mulf %227, %221 : vector<8x32xf32>
    %235 = arith.addf %199, %234 : vector<8x32xf32>
    %236 = math.tanh %235 : vector<8x32xf32>
    %cst_177 = arith.constant 1.000000e+00 : f32
    %237 = vector.broadcast %cst_177 : f32 to vector<8x32xf32>
    %238 = arith.subf %237, %233 : vector<8x32xf32>
    %239 = arith.mulf %238, %236 : vector<8x32xf32>
    %240 = arith.mulf %233, %145 : vector<8x32xf32>
    %241 = arith.addf %239, %240 : vector<8x32xf32>
    %c0_178 = arith.constant 0 : index
    %c2_179 = arith.constant 2 : index
    %c0_180 = arith.constant 0 : index
    %c0_181 = arith.constant 0 : index
    %242 = vector.load %arg2[%c0_178, %c2_179, %c0_180, %c0_181] : memref<3x8x32x32xf32, #tpu.memory_space<vmem>>, vector<1x1x32x32xf32>
    %243 = vector.shape_cast %242 : vector<1x1x32x32xf32> to vector<32x32xf32>
    %c1_182 = arith.constant 1 : index
    %c2_183 = arith.constant 2 : index
    %c0_184 = arith.constant 0 : index
    %c0_185 = arith.constant 0 : index
    %244 = vector.load %arg2[%c1_182, %c2_183, %c0_184, %c0_185] : memref<3x8x32x32xf32, #tpu.memory_space<vmem>>, vector<1x1x32x32xf32>
    %245 = vector.shape_cast %244 : vector<1x1x32x32xf32> to vector<32x32xf32>
    %c2_186 = arith.constant 2 : index
    %c2_187 = arith.constant 2 : index
    %c0_188 = arith.constant 0 : index
    %c0_189 = arith.constant 0 : index
    %246 = vector.load %arg2[%c2_186, %c2_187, %c0_188, %c0_189] : memref<3x8x32x32xf32, #tpu.memory_space<vmem>>, vector<1x1x32x32xf32>
    %247 = vector.shape_cast %246 : vector<1x1x32x32xf32> to vector<32x32xf32>
    %248 = arith.truncf %193 : vector<32x32xf32> to vector<32x32xbf16>
    %c0_190 = arith.constant 0 : index
    %c0_191 = arith.constant 0 : index
    %c0_192 = arith.constant 0 : index
    %249 = vector.load %arg13[%c0_190, %c0_191, %c0_192] : memref<3x32x32xbf16, #tpu.memory_space<vmem>>, vector<1x32x32xbf16>
    %250 = vector.shape_cast %249 : vector<1x32x32xbf16> to vector<32x32xbf16>
    %cst_193 = arith.constant dense<0.000000e+00> : vector<32x32xf32>
    %251 = tpu.matmul %248, %250, %cst_193 {dimension_numbers = #tpu.dot_dimension_numbers<[1], [0], [0], [1], [0, 0, 1, 1], [], []>} : vector<32x32xbf16>, vector<32x32xbf16>, vector<32x32xf32> -> vector<32x32xf32>
    %c0_194 = arith.constant 0 : index
    %c0_195 = arith.constant 0 : index
    %c0_196 = arith.constant 0 : index
    %252 = vector.load %arg14[%c0_194, %c0_195, %c0_196] : memref<3x1x32xf32, #tpu.memory_space<vmem>>, vector<1x1x32xf32>
    %253 = vector.shape_cast %252 : vector<1x1x32xf32> to vector<1x32xf32>
    %254 = vector.broadcast %253 : vector<1x32xf32> to vector<32x32xf32>
    %255 = arith.addf %251, %254 : vector<32x32xf32>
    %c1_197 = arith.constant 1 : index
    %c0_198 = arith.constant 0 : index
    %c0_199 = arith.constant 0 : index
    %256 = vector.load %arg13[%c1_197, %c0_198, %c0_199] : memref<3x32x32xbf16, #tpu.memory_space<vmem>>, vector<1x32x32xbf16>
    %257 = vector.shape_cast %256 : vector<1x32x32xbf16> to vector<32x32xbf16>
    %cst_200 = arith.constant dense<0.000000e+00> : vector<32x32xf32>
    %258 = tpu.matmul %248, %257, %cst_200 {dimension_numbers = #tpu.dot_dimension_numbers<[1], [0], [0], [1], [0, 0, 1, 1], [], []>} : vector<32x32xbf16>, vector<32x32xbf16>, vector<32x32xf32> -> vector<32x32xf32>
    %c1_201 = arith.constant 1 : index
    %c0_202 = arith.constant 0 : index
    %c0_203 = arith.constant 0 : index
    %259 = vector.load %arg14[%c1_201, %c0_202, %c0_203] : memref<3x1x32xf32, #tpu.memory_space<vmem>>, vector<1x1x32xf32>
    %260 = vector.shape_cast %259 : vector<1x1x32xf32> to vector<1x32xf32>
    %261 = vector.broadcast %260 : vector<1x32xf32> to vector<32x32xf32>
    %262 = arith.addf %258, %261 : vector<32x32xf32>
    %c2_204 = arith.constant 2 : index
    %c0_205 = arith.constant 0 : index
    %c0_206 = arith.constant 0 : index
    %263 = vector.load %arg13[%c2_204, %c0_205, %c0_206] : memref<3x32x32xbf16, #tpu.memory_space<vmem>>, vector<1x32x32xbf16>
    %264 = vector.shape_cast %263 : vector<1x32x32xbf16> to vector<32x32xbf16>
    %cst_207 = arith.constant dense<0.000000e+00> : vector<32x32xf32>
    %265 = tpu.matmul %248, %264, %cst_207 {dimension_numbers = #tpu.dot_dimension_numbers<[1], [0], [0], [1], [0, 0, 1, 1], [], []>} : vector<32x32xbf16>, vector<32x32xbf16>, vector<32x32xf32> -> vector<32x32xf32>
    %c2_208 = arith.constant 2 : index
    %c0_209 = arith.constant 0 : index
    %c0_210 = arith.constant 0 : index
    %266 = vector.load %arg14[%c2_208, %c0_209, %c0_210] : memref<3x1x32xf32, #tpu.memory_space<vmem>>, vector<1x1x32xf32>
    %267 = vector.shape_cast %266 : vector<1x1x32xf32> to vector<1x32xf32>
    %268 = vector.broadcast %267 : vector<1x32xf32> to vector<32x32xf32>
    %269 = arith.addf %265, %268 : vector<32x32xf32>
    %270 = arith.addf %243, %255 : vector<32x32xf32>
    %271 = arith.negf %270 : vector<32x32xf32>
    %272 = math.exp %271 : vector<32x32xf32>
    %cst_211 = arith.constant 1.000000e+00 : f32
    %273 = vector.broadcast %cst_211 : f32 to vector<32x32xf32>
    %274 = arith.addf %273, %272 : vector<32x32xf32>
    %275 = arith.divf %273, %274 : vector<32x32xf32>
    %276 = arith.addf %245, %262 : vector<32x32xf32>
    %277 = arith.negf %276 : vector<32x32xf32>
    %278 = math.exp %277 : vector<32x32xf32>
    %cst_212 = arith.constant 1.000000e+00 : f32
    %279 = vector.broadcast %cst_212 : f32 to vector<32x32xf32>
    %280 = arith.addf %279, %278 : vector<32x32xf32>
    %281 = arith.divf %279, %280 : vector<32x32xf32>
    %282 = arith.mulf %275, %269 : vector<32x32xf32>
    %283 = arith.addf %247, %282 : vector<32x32xf32>
    %284 = math.tanh %283 : vector<32x32xf32>
    %cst_213 = arith.constant 1.000000e+00 : f32
    %285 = vector.broadcast %cst_213 : f32 to vector<32x32xf32>
    %286 = arith.subf %285, %281 : vector<32x32xf32>
    %287 = arith.mulf %286, %284 : vector<32x32xf32>
    %288 = arith.mulf %281, %193 : vector<32x32xf32>
    %289 = arith.addf %287, %288 : vector<32x32xf32>
    %c0_214 = arith.constant 0 : index
    %c3 = arith.constant 3 : index
    %c0_215 = arith.constant 0 : index
    %c0_216 = arith.constant 0 : index
    %290 = vector.load %arg0[%c0_214, %c3, %c0_215, %c0_216] : memref<3x8x8x32xf32, #tpu.memory_space<vmem>>, vector<1x1x8x32xf32>
    %291 = vector.shape_cast %290 : vector<1x1x8x32xf32> to vector<8x32xf32>
    %c1_217 = arith.constant 1 : index
    %c3_218 = arith.constant 3 : index
    %c0_219 = arith.constant 0 : index
    %c0_220 = arith.constant 0 : index
    %292 = vector.load %arg0[%c1_217, %c3_218, %c0_219, %c0_220] : memref<3x8x8x32xf32, #tpu.memory_space<vmem>>, vector<1x1x8x32xf32>
    %293 = vector.shape_cast %292 : vector<1x1x8x32xf32> to vector<8x32xf32>
    %c2_221 = arith.constant 2 : index
    %c3_222 = arith.constant 3 : index
    %c0_223 = arith.constant 0 : index
    %c0_224 = arith.constant 0 : index
    %294 = vector.load %arg0[%c2_221, %c3_222, %c0_223, %c0_224] : memref<3x8x8x32xf32, #tpu.memory_space<vmem>>, vector<1x1x8x32xf32>
    %295 = vector.shape_cast %294 : vector<1x1x8x32xf32> to vector<8x32xf32>
    %296 = arith.truncf %241 : vector<8x32xf32> to vector<8x32xbf16>
    %c0_225 = arith.constant 0 : index
    %c0_226 = arith.constant 0 : index
    %c0_227 = arith.constant 0 : index
    %297 = vector.load %arg5[%c0_225, %c0_226, %c0_227] : memref<3x32x32xbf16, #tpu.memory_space<vmem>>, vector<1x32x32xbf16>
    %298 = vector.shape_cast %297 : vector<1x32x32xbf16> to vector<32x32xbf16>
    %cst_228 = arith.constant dense<0.000000e+00> : vector<8x32xf32>
    %299 = tpu.matmul %296, %298, %cst_228 {dimension_numbers = #tpu.dot_dimension_numbers<[1], [0], [0], [1], [0, 0, 1, 1], [], []>} : vector<8x32xbf16>, vector<32x32xbf16>, vector<8x32xf32> -> vector<8x32xf32>
    %c0_229 = arith.constant 0 : index
    %c0_230 = arith.constant 0 : index
    %c0_231 = arith.constant 0 : index
    %300 = vector.load %arg6[%c0_229, %c0_230, %c0_231] : memref<3x1x32xf32, #tpu.memory_space<vmem>>, vector<1x1x32xf32>
    %301 = vector.shape_cast %300 : vector<1x1x32xf32> to vector<1x32xf32>
    %302 = vector.broadcast %301 : vector<1x32xf32> to vector<8x32xf32>
    %303 = arith.addf %299, %302 : vector<8x32xf32>
    %c1_232 = arith.constant 1 : index
    %c0_233 = arith.constant 0 : index
    %c0_234 = arith.constant 0 : index
    %304 = vector.load %arg5[%c1_232, %c0_233, %c0_234] : memref<3x32x32xbf16, #tpu.memory_space<vmem>>, vector<1x32x32xbf16>
    %305 = vector.shape_cast %304 : vector<1x32x32xbf16> to vector<32x32xbf16>
    %cst_235 = arith.constant dense<0.000000e+00> : vector<8x32xf32>
    %306 = tpu.matmul %296, %305, %cst_235 {dimension_numbers = #tpu.dot_dimension_numbers<[1], [0], [0], [1], [0, 0, 1, 1], [], []>} : vector<8x32xbf16>, vector<32x32xbf16>, vector<8x32xf32> -> vector<8x32xf32>
    %c1_236 = arith.constant 1 : index
    %c0_237 = arith.constant 0 : index
    %c0_238 = arith.constant 0 : index
    %307 = vector.load %arg6[%c1_236, %c0_237, %c0_238] : memref<3x1x32xf32, #tpu.memory_space<vmem>>, vector<1x1x32xf32>
    %308 = vector.shape_cast %307 : vector<1x1x32xf32> to vector<1x32xf32>
    %309 = vector.broadcast %308 : vector<1x32xf32> to vector<8x32xf32>
    %310 = arith.addf %306, %309 : vector<8x32xf32>
    %c2_239 = arith.constant 2 : index
    %c0_240 = arith.constant 0 : index
    %c0_241 = arith.constant 0 : index
    %311 = vector.load %arg5[%c2_239, %c0_240, %c0_241] : memref<3x32x32xbf16, #tpu.memory_space<vmem>>, vector<1x32x32xbf16>
    %312 = vector.shape_cast %311 : vector<1x32x32xbf16> to vector<32x32xbf16>
    %cst_242 = arith.constant dense<0.000000e+00> : vector<8x32xf32>
    %313 = tpu.matmul %296, %312, %cst_242 {dimension_numbers = #tpu.dot_dimension_numbers<[1], [0], [0], [1], [0, 0, 1, 1], [], []>} : vector<8x32xbf16>, vector<32x32xbf16>, vector<8x32xf32> -> vector<8x32xf32>
    %c2_243 = arith.constant 2 : index
    %c0_244 = arith.constant 0 : index
    %c0_245 = arith.constant 0 : index
    %314 = vector.load %arg6[%c2_243, %c0_244, %c0_245] : memref<3x1x32xf32, #tpu.memory_space<vmem>>, vector<1x1x32xf32>
    %315 = vector.shape_cast %314 : vector<1x1x32xf32> to vector<1x32xf32>
    %316 = vector.broadcast %315 : vector<1x32xf32> to vector<8x32xf32>
    %317 = arith.addf %313, %316 : vector<8x32xf32>
    %318 = arith.addf %291, %303 : vector<8x32xf32>
    %319 = arith.negf %318 : vector<8x32xf32>
    %320 = math.exp %319 : vector<8x32xf32>
    %cst_246 = arith.constant 1.000000e+00 : f32
    %321 = vector.broadcast %cst_246 : f32 to vector<8x32xf32>
    %322 = arith.addf %321, %320 : vector<8x32xf32>
    %323 = arith.divf %321, %322 : vector<8x32xf32>
    %324 = arith.addf %293, %310 : vector<8x32xf32>
    %325 = arith.negf %324 : vector<8x32xf32>
    %326 = math.exp %325 : vector<8x32xf32>
    %cst_247 = arith.constant 1.000000e+00 : f32
    %327 = vector.broadcast %cst_247 : f32 to vector<8x32xf32>
    %328 = arith.addf %327, %326 : vector<8x32xf32>
    %329 = arith.divf %327, %328 : vector<8x32xf32>
    %330 = arith.mulf %323, %317 : vector<8x32xf32>
    %331 = arith.addf %295, %330 : vector<8x32xf32>
    %332 = math.tanh %331 : vector<8x32xf32>
    %cst_248 = arith.constant 1.000000e+00 : f32
    %333 = vector.broadcast %cst_248 : f32 to vector<8x32xf32>
    %334 = arith.subf %333, %329 : vector<8x32xf32>
    %335 = arith.mulf %334, %332 : vector<8x32xf32>
    %336 = arith.mulf %329, %241 : vector<8x32xf32>
    %337 = arith.addf %335, %336 : vector<8x32xf32>
    %c0_249 = arith.constant 0 : index
    %c3_250 = arith.constant 3 : index
    %c0_251 = arith.constant 0 : index
    %c0_252 = arith.constant 0 : index
    %338 = vector.load %arg2[%c0_249, %c3_250, %c0_251, %c0_252] : memref<3x8x32x32xf32, #tpu.memory_space<vmem>>, vector<1x1x32x32xf32>
    %339 = vector.shape_cast %338 : vector<1x1x32x32xf32> to vector<32x32xf32>
    %c1_253 = arith.constant 1 : index
    %c3_254 = arith.constant 3 : index
    %c0_255 = arith.constant 0 : index
    %c0_256 = arith.constant 0 : index
    %340 = vector.load %arg2[%c1_253, %c3_254, %c0_255, %c0_256] : memref<3x8x32x32xf32, #tpu.memory_space<vmem>>, vector<1x1x32x32xf32>
    %341 = vector.shape_cast %340 : vector<1x1x32x32xf32> to vector<32x32xf32>
    %c2_257 = arith.constant 2 : index
    %c3_258 = arith.constant 3 : index
    %c0_259 = arith.constant 0 : index
    %c0_260 = arith.constant 0 : index
    %342 = vector.load %arg2[%c2_257, %c3_258, %c0_259, %c0_260] : memref<3x8x32x32xf32, #tpu.memory_space<vmem>>, vector<1x1x32x32xf32>
    %343 = vector.shape_cast %342 : vector<1x1x32x32xf32> to vector<32x32xf32>
    %344 = arith.truncf %289 : vector<32x32xf32> to vector<32x32xbf16>
    %c0_261 = arith.constant 0 : index
    %c0_262 = arith.constant 0 : index
    %c0_263 = arith.constant 0 : index
    %345 = vector.load %arg13[%c0_261, %c0_262, %c0_263] : memref<3x32x32xbf16, #tpu.memory_space<vmem>>, vector<1x32x32xbf16>
    %346 = vector.shape_cast %345 : vector<1x32x32xbf16> to vector<32x32xbf16>
    %cst_264 = arith.constant dense<0.000000e+00> : vector<32x32xf32>
    %347 = tpu.matmul %344, %346, %cst_264 {dimension_numbers = #tpu.dot_dimension_numbers<[1], [0], [0], [1], [0, 0, 1, 1], [], []>} : vector<32x32xbf16>, vector<32x32xbf16>, vector<32x32xf32> -> vector<32x32xf32>
    %c0_265 = arith.constant 0 : index
    %c0_266 = arith.constant 0 : index
    %c0_267 = arith.constant 0 : index
    %348 = vector.load %arg14[%c0_265, %c0_266, %c0_267] : memref<3x1x32xf32, #tpu.memory_space<vmem>>, vector<1x1x32xf32>
    %349 = vector.shape_cast %348 : vector<1x1x32xf32> to vector<1x32xf32>
    %350 = vector.broadcast %349 : vector<1x32xf32> to vector<32x32xf32>
    %351 = arith.addf %347, %350 : vector<32x32xf32>
    %c1_268 = arith.constant 1 : index
    %c0_269 = arith.constant 0 : index
    %c0_270 = arith.constant 0 : index
    %352 = vector.load %arg13[%c1_268, %c0_269, %c0_270] : memref<3x32x32xbf16, #tpu.memory_space<vmem>>, vector<1x32x32xbf16>
    %353 = vector.shape_cast %352 : vector<1x32x32xbf16> to vector<32x32xbf16>
    %cst_271 = arith.constant dense<0.000000e+00> : vector<32x32xf32>
    %354 = tpu.matmul %344, %353, %cst_271 {dimension_numbers = #tpu.dot_dimension_numbers<[1], [0], [0], [1], [0, 0, 1, 1], [], []>} : vector<32x32xbf16>, vector<32x32xbf16>, vector<32x32xf32> -> vector<32x32xf32>
    %c1_272 = arith.constant 1 : index
    %c0_273 = arith.constant 0 : index
    %c0_274 = arith.constant 0 : index
    %355 = vector.load %arg14[%c1_272, %c0_273, %c0_274] : memref<3x1x32xf32, #tpu.memory_space<vmem>>, vector<1x1x32xf32>
    %356 = vector.shape_cast %355 : vector<1x1x32xf32> to vector<1x32xf32>
    %357 = vector.broadcast %356 : vector<1x32xf32> to vector<32x32xf32>
    %358 = arith.addf %354, %357 : vector<32x32xf32>
    %c2_275 = arith.constant 2 : index
    %c0_276 = arith.constant 0 : index
    %c0_277 = arith.constant 0 : index
    %359 = vector.load %arg13[%c2_275, %c0_276, %c0_277] : memref<3x32x32xbf16, #tpu.memory_space<vmem>>, vector<1x32x32xbf16>
    %360 = vector.shape_cast %359 : vector<1x32x32xbf16> to vector<32x32xbf16>
    %cst_278 = arith.constant dense<0.000000e+00> : vector<32x32xf32>
    %361 = tpu.matmul %344, %360, %cst_278 {dimension_numbers = #tpu.dot_dimension_numbers<[1], [0], [0], [1], [0, 0, 1, 1], [], []>} : vector<32x32xbf16>, vector<32x32xbf16>, vector<32x32xf32> -> vector<32x32xf32>
    %c2_279 = arith.constant 2 : index
    %c0_280 = arith.constant 0 : index
    %c0_281 = arith.constant 0 : index
    %362 = vector.load %arg14[%c2_279, %c0_280, %c0_281] : memref<3x1x32xf32, #tpu.memory_space<vmem>>, vector<1x1x32xf32>
    %363 = vector.shape_cast %362 : vector<1x1x32xf32> to vector<1x32xf32>
    %364 = vector.broadcast %363 : vector<1x32xf32> to vector<32x32xf32>
    %365 = arith.addf %361, %364 : vector<32x32xf32>
    %366 = arith.addf %339, %351 : vector<32x32xf32>
    %367 = arith.negf %366 : vector<32x32xf32>
    %368 = math.exp %367 : vector<32x32xf32>
    %cst_282 = arith.constant 1.000000e+00 : f32
    %369 = vector.broadcast %cst_282 : f32 to vector<32x32xf32>
    %370 = arith.addf %369, %368 : vector<32x32xf32>
    %371 = arith.divf %369, %370 : vector<32x32xf32>
    %372 = arith.addf %341, %358 : vector<32x32xf32>
    %373 = arith.negf %372 : vector<32x32xf32>
    %374 = math.exp %373 : vector<32x32xf32>
    %cst_283 = arith.constant 1.000000e+00 : f32
    %375 = vector.broadcast %cst_283 : f32 to vector<32x32xf32>
    %376 = arith.addf %375, %374 : vector<32x32xf32>
    %377 = arith.divf %375, %376 : vector<32x32xf32>
    %378 = arith.mulf %371, %365 : vector<32x32xf32>
    %379 = arith.addf %343, %378 : vector<32x32xf32>
    %380 = math.tanh %379 : vector<32x32xf32>
    %cst_284 = arith.constant 1.000000e+00 : f32
    %381 = vector.broadcast %cst_284 : f32 to vector<32x32xf32>
    %382 = arith.subf %381, %377 : vector<32x32xf32>
    %383 = arith.mulf %382, %380 : vector<32x32xf32>
    %384 = arith.mulf %377, %289 : vector<32x32xf32>
    %385 = arith.addf %383, %384 : vector<32x32xf32>
    %c0_285 = arith.constant 0 : index
    %c4 = arith.constant 4 : index
    %c0_286 = arith.constant 0 : index
    %c0_287 = arith.constant 0 : index
    %386 = vector.load %arg0[%c0_285, %c4, %c0_286, %c0_287] : memref<3x8x8x32xf32, #tpu.memory_space<vmem>>, vector<1x1x8x32xf32>
    %387 = vector.shape_cast %386 : vector<1x1x8x32xf32> to vector<8x32xf32>
    %c1_288 = arith.constant 1 : index
    %c4_289 = arith.constant 4 : index
    %c0_290 = arith.constant 0 : index
    %c0_291 = arith.constant 0 : index
    %388 = vector.load %arg0[%c1_288, %c4_289, %c0_290, %c0_291] : memref<3x8x8x32xf32, #tpu.memory_space<vmem>>, vector<1x1x8x32xf32>
    %389 = vector.shape_cast %388 : vector<1x1x8x32xf32> to vector<8x32xf32>
    %c2_292 = arith.constant 2 : index
    %c4_293 = arith.constant 4 : index
    %c0_294 = arith.constant 0 : index
    %c0_295 = arith.constant 0 : index
    %390 = vector.load %arg0[%c2_292, %c4_293, %c0_294, %c0_295] : memref<3x8x8x32xf32, #tpu.memory_space<vmem>>, vector<1x1x8x32xf32>
    %391 = vector.shape_cast %390 : vector<1x1x8x32xf32> to vector<8x32xf32>
    %392 = arith.truncf %337 : vector<8x32xf32> to vector<8x32xbf16>
    %c0_296 = arith.constant 0 : index
    %c0_297 = arith.constant 0 : index
    %c0_298 = arith.constant 0 : index
    %393 = vector.load %arg5[%c0_296, %c0_297, %c0_298] : memref<3x32x32xbf16, #tpu.memory_space<vmem>>, vector<1x32x32xbf16>
    %394 = vector.shape_cast %393 : vector<1x32x32xbf16> to vector<32x32xbf16>
    %cst_299 = arith.constant dense<0.000000e+00> : vector<8x32xf32>
    %395 = tpu.matmul %392, %394, %cst_299 {dimension_numbers = #tpu.dot_dimension_numbers<[1], [0], [0], [1], [0, 0, 1, 1], [], []>} : vector<8x32xbf16>, vector<32x32xbf16>, vector<8x32xf32> -> vector<8x32xf32>
    %c0_300 = arith.constant 0 : index
    %c0_301 = arith.constant 0 : index
    %c0_302 = arith.constant 0 : index
    %396 = vector.load %arg6[%c0_300, %c0_301, %c0_302] : memref<3x1x32xf32, #tpu.memory_space<vmem>>, vector<1x1x32xf32>
    %397 = vector.shape_cast %396 : vector<1x1x32xf32> to vector<1x32xf32>
    %398 = vector.broadcast %397 : vector<1x32xf32> to vector<8x32xf32>
    %399 = arith.addf %395, %398 : vector<8x32xf32>
    %c1_303 = arith.constant 1 : index
    %c0_304 = arith.constant 0 : index
    %c0_305 = arith.constant 0 : index
    %400 = vector.load %arg5[%c1_303, %c0_304, %c0_305] : memref<3x32x32xbf16, #tpu.memory_space<vmem>>, vector<1x32x32xbf16>
    %401 = vector.shape_cast %400 : vector<1x32x32xbf16> to vector<32x32xbf16>
    %cst_306 = arith.constant dense<0.000000e+00> : vector<8x32xf32>
    %402 = tpu.matmul %392, %401, %cst_306 {dimension_numbers = #tpu.dot_dimension_numbers<[1], [0], [0], [1], [0, 0, 1, 1], [], []>} : vector<8x32xbf16>, vector<32x32xbf16>, vector<8x32xf32> -> vector<8x32xf32>
    %c1_307 = arith.constant 1 : index
    %c0_308 = arith.constant 0 : index
    %c0_309 = arith.constant 0 : index
    %403 = vector.load %arg6[%c1_307, %c0_308, %c0_309] : memref<3x1x32xf32, #tpu.memory_space<vmem>>, vector<1x1x32xf32>
    %404 = vector.shape_cast %403 : vector<1x1x32xf32> to vector<1x32xf32>
    %405 = vector.broadcast %404 : vector<1x32xf32> to vector<8x32xf32>
    %406 = arith.addf %402, %405 : vector<8x32xf32>
    %c2_310 = arith.constant 2 : index
    %c0_311 = arith.constant 0 : index
    %c0_312 = arith.constant 0 : index
    %407 = vector.load %arg5[%c2_310, %c0_311, %c0_312] : memref<3x32x32xbf16, #tpu.memory_space<vmem>>, vector<1x32x32xbf16>
    %408 = vector.shape_cast %407 : vector<1x32x32xbf16> to vector<32x32xbf16>
    %cst_313 = arith.constant dense<0.000000e+00> : vector<8x32xf32>
    %409 = tpu.matmul %392, %408, %cst_313 {dimension_numbers = #tpu.dot_dimension_numbers<[1], [0], [0], [1], [0, 0, 1, 1], [], []>} : vector<8x32xbf16>, vector<32x32xbf16>, vector<8x32xf32> -> vector<8x32xf32>
    %c2_314 = arith.constant 2 : index
    %c0_315 = arith.constant 0 : index
    %c0_316 = arith.constant 0 : index
    %410 = vector.load %arg6[%c2_314, %c0_315, %c0_316] : memref<3x1x32xf32, #tpu.memory_space<vmem>>, vector<1x1x32xf32>
    %411 = vector.shape_cast %410 : vector<1x1x32xf32> to vector<1x32xf32>
    %412 = vector.broadcast %411 : vector<1x32xf32> to vector<8x32xf32>
    %413 = arith.addf %409, %412 : vector<8x32xf32>
    %414 = arith.addf %387, %399 : vector<8x32xf32>
    %415 = arith.negf %414 : vector<8x32xf32>
    %416 = math.exp %415 : vector<8x32xf32>
    %cst_317 = arith.constant 1.000000e+00 : f32
    %417 = vector.broadcast %cst_317 : f32 to vector<8x32xf32>
    %418 = arith.addf %417, %416 : vector<8x32xf32>
    %419 = arith.divf %417, %418 : vector<8x32xf32>
    %420 = arith.addf %389, %406 : vector<8x32xf32>
    %421 = arith.negf %420 : vector<8x32xf32>
    %422 = math.exp %421 : vector<8x32xf32>
    %cst_318 = arith.constant 1.000000e+00 : f32
    %423 = vector.broadcast %cst_318 : f32 to vector<8x32xf32>
    %424 = arith.addf %423, %422 : vector<8x32xf32>
    %425 = arith.divf %423, %424 : vector<8x32xf32>
    %426 = arith.mulf %419, %413 : vector<8x32xf32>
    %427 = arith.addf %391, %426 : vector<8x32xf32>
    %428 = math.tanh %427 : vector<8x32xf32>
    %cst_319 = arith.constant 1.000000e+00 : f32
    %429 = vector.broadcast %cst_319 : f32 to vector<8x32xf32>
    %430 = arith.subf %429, %425 : vector<8x32xf32>
    %431 = arith.mulf %430, %428 : vector<8x32xf32>
    %432 = arith.mulf %425, %337 : vector<8x32xf32>
    %433 = arith.addf %431, %432 : vector<8x32xf32>
    %c0_320 = arith.constant 0 : index
    %c4_321 = arith.constant 4 : index
    %c0_322 = arith.constant 0 : index
    %c0_323 = arith.constant 0 : index
    %434 = vector.load %arg2[%c0_320, %c4_321, %c0_322, %c0_323] : memref<3x8x32x32xf32, #tpu.memory_space<vmem>>, vector<1x1x32x32xf32>
    %435 = vector.shape_cast %434 : vector<1x1x32x32xf32> to vector<32x32xf32>
    %c1_324 = arith.constant 1 : index
    %c4_325 = arith.constant 4 : index
    %c0_326 = arith.constant 0 : index
    %c0_327 = arith.constant 0 : index
    %436 = vector.load %arg2[%c1_324, %c4_325, %c0_326, %c0_327] : memref<3x8x32x32xf32, #tpu.memory_space<vmem>>, vector<1x1x32x32xf32>
    %437 = vector.shape_cast %436 : vector<1x1x32x32xf32> to vector<32x32xf32>
    %c2_328 = arith.constant 2 : index
    %c4_329 = arith.constant 4 : index
    %c0_330 = arith.constant 0 : index
    %c0_331 = arith.constant 0 : index
    %438 = vector.load %arg2[%c2_328, %c4_329, %c0_330, %c0_331] : memref<3x8x32x32xf32, #tpu.memory_space<vmem>>, vector<1x1x32x32xf32>
    %439 = vector.shape_cast %438 : vector<1x1x32x32xf32> to vector<32x32xf32>
    %440 = arith.truncf %385 : vector<32x32xf32> to vector<32x32xbf16>
    %c0_332 = arith.constant 0 : index
    %c0_333 = arith.constant 0 : index
    %c0_334 = arith.constant 0 : index
    %441 = vector.load %arg13[%c0_332, %c0_333, %c0_334] : memref<3x32x32xbf16, #tpu.memory_space<vmem>>, vector<1x32x32xbf16>
    %442 = vector.shape_cast %441 : vector<1x32x32xbf16> to vector<32x32xbf16>
    %cst_335 = arith.constant dense<0.000000e+00> : vector<32x32xf32>
    %443 = tpu.matmul %440, %442, %cst_335 {dimension_numbers = #tpu.dot_dimension_numbers<[1], [0], [0], [1], [0, 0, 1, 1], [], []>} : vector<32x32xbf16>, vector<32x32xbf16>, vector<32x32xf32> -> vector<32x32xf32>
    %c0_336 = arith.constant 0 : index
    %c0_337 = arith.constant 0 : index
    %c0_338 = arith.constant 0 : index
    %444 = vector.load %arg14[%c0_336, %c0_337, %c0_338] : memref<3x1x32xf32, #tpu.memory_space<vmem>>, vector<1x1x32xf32>
    %445 = vector.shape_cast %444 : vector<1x1x32xf32> to vector<1x32xf32>
    %446 = vector.broadcast %445 : vector<1x32xf32> to vector<32x32xf32>
    %447 = arith.addf %443, %446 : vector<32x32xf32>
    %c1_339 = arith.constant 1 : index
    %c0_340 = arith.constant 0 : index
    %c0_341 = arith.constant 0 : index
    %448 = vector.load %arg13[%c1_339, %c0_340, %c0_341] : memref<3x32x32xbf16, #tpu.memory_space<vmem>>, vector<1x32x32xbf16>
    %449 = vector.shape_cast %448 : vector<1x32x32xbf16> to vector<32x32xbf16>
    %cst_342 = arith.constant dense<0.000000e+00> : vector<32x32xf32>
    %450 = tpu.matmul %440, %449, %cst_342 {dimension_numbers = #tpu.dot_dimension_numbers<[1], [0], [0], [1], [0, 0, 1, 1], [], []>} : vector<32x32xbf16>, vector<32x32xbf16>, vector<32x32xf32> -> vector<32x32xf32>
    %c1_343 = arith.constant 1 : index
    %c0_344 = arith.constant 0 : index
    %c0_345 = arith.constant 0 : index
    %451 = vector.load %arg14[%c1_343, %c0_344, %c0_345] : memref<3x1x32xf32, #tpu.memory_space<vmem>>, vector<1x1x32xf32>
    %452 = vector.shape_cast %451 : vector<1x1x32xf32> to vector<1x32xf32>
    %453 = vector.broadcast %452 : vector<1x32xf32> to vector<32x32xf32>
    %454 = arith.addf %450, %453 : vector<32x32xf32>
    %c2_346 = arith.constant 2 : index
    %c0_347 = arith.constant 0 : index
    %c0_348 = arith.constant 0 : index
    %455 = vector.load %arg13[%c2_346, %c0_347, %c0_348] : memref<3x32x32xbf16, #tpu.memory_space<vmem>>, vector<1x32x32xbf16>
    %456 = vector.shape_cast %455 : vector<1x32x32xbf16> to vector<32x32xbf16>
    %cst_349 = arith.constant dense<0.000000e+00> : vector<32x32xf32>
    %457 = tpu.matmul %440, %456, %cst_349 {dimension_numbers = #tpu.dot_dimension_numbers<[1], [0], [0], [1], [0, 0, 1, 1], [], []>} : vector<32x32xbf16>, vector<32x32xbf16>, vector<32x32xf32> -> vector<32x32xf32>
    %c2_350 = arith.constant 2 : index
    %c0_351 = arith.constant 0 : index
    %c0_352 = arith.constant 0 : index
    %458 = vector.load %arg14[%c2_350, %c0_351, %c0_352] : memref<3x1x32xf32, #tpu.memory_space<vmem>>, vector<1x1x32xf32>
    %459 = vector.shape_cast %458 : vector<1x1x32xf32> to vector<1x32xf32>
    %460 = vector.broadcast %459 : vector<1x32xf32> to vector<32x32xf32>
    %461 = arith.addf %457, %460 : vector<32x32xf32>
    %462 = arith.addf %435, %447 : vector<32x32xf32>
    %463 = arith.negf %462 : vector<32x32xf32>
    %464 = math.exp %463 : vector<32x32xf32>
    %cst_353 = arith.constant 1.000000e+00 : f32
    %465 = vector.broadcast %cst_353 : f32 to vector<32x32xf32>
    %466 = arith.addf %465, %464 : vector<32x32xf32>
    %467 = arith.divf %465, %466 : vector<32x32xf32>
    %468 = arith.addf %437, %454 : vector<32x32xf32>
    %469 = arith.negf %468 : vector<32x32xf32>
    %470 = math.exp %469 : vector<32x32xf32>
    %cst_354 = arith.constant 1.000000e+00 : f32
    %471 = vector.broadcast %cst_354 : f32 to vector<32x32xf32>
    %472 = arith.addf %471, %470 : vector<32x32xf32>
    %473 = arith.divf %471, %472 : vector<32x32xf32>
    %474 = arith.mulf %467, %461 : vector<32x32xf32>
    %475 = arith.addf %439, %474 : vector<32x32xf32>
    %476 = math.tanh %475 : vector<32x32xf32>
    %cst_355 = arith.constant 1.000000e+00 : f32
    %477 = vector.broadcast %cst_355 : f32 to vector<32x32xf32>
    %478 = arith.subf %477, %473 : vector<32x32xf32>
    %479 = arith.mulf %478, %476 : vector<32x32xf32>
    %480 = arith.mulf %473, %385 : vector<32x32xf32>
    %481 = arith.addf %479, %480 : vector<32x32xf32>
    %c0_356 = arith.constant 0 : index
    %c5 = arith.constant 5 : index
    %c0_357 = arith.constant 0 : index
    %c0_358 = arith.constant 0 : index
    %482 = vector.load %arg0[%c0_356, %c5, %c0_357, %c0_358] : memref<3x8x8x32xf32, #tpu.memory_space<vmem>>, vector<1x1x8x32xf32>
    %483 = vector.shape_cast %482 : vector<1x1x8x32xf32> to vector<8x32xf32>
    %c1_359 = arith.constant 1 : index
    %c5_360 = arith.constant 5 : index
    %c0_361 = arith.constant 0 : index
    %c0_362 = arith.constant 0 : index
    %484 = vector.load %arg0[%c1_359, %c5_360, %c0_361, %c0_362] : memref<3x8x8x32xf32, #tpu.memory_space<vmem>>, vector<1x1x8x32xf32>
    %485 = vector.shape_cast %484 : vector<1x1x8x32xf32> to vector<8x32xf32>
    %c2_363 = arith.constant 2 : index
    %c5_364 = arith.constant 5 : index
    %c0_365 = arith.constant 0 : index
    %c0_366 = arith.constant 0 : index
    %486 = vector.load %arg0[%c2_363, %c5_364, %c0_365, %c0_366] : memref<3x8x8x32xf32, #tpu.memory_space<vmem>>, vector<1x1x8x32xf32>
    %487 = vector.shape_cast %486 : vector<1x1x8x32xf32> to vector<8x32xf32>
    %488 = arith.truncf %433 : vector<8x32xf32> to vector<8x32xbf16>
    %c0_367 = arith.constant 0 : index
    %c0_368 = arith.constant 0 : index
    %c0_369 = arith.constant 0 : index
    %489 = vector.load %arg5[%c0_367, %c0_368, %c0_369] : memref<3x32x32xbf16, #tpu.memory_space<vmem>>, vector<1x32x32xbf16>
    %490 = vector.shape_cast %489 : vector<1x32x32xbf16> to vector<32x32xbf16>
    %cst_370 = arith.constant dense<0.000000e+00> : vector<8x32xf32>
    %491 = tpu.matmul %488, %490, %cst_370 {dimension_numbers = #tpu.dot_dimension_numbers<[1], [0], [0], [1], [0, 0, 1, 1], [], []>} : vector<8x32xbf16>, vector<32x32xbf16>, vector<8x32xf32> -> vector<8x32xf32>
    %c0_371 = arith.constant 0 : index
    %c0_372 = arith.constant 0 : index
    %c0_373 = arith.constant 0 : index
    %492 = vector.load %arg6[%c0_371, %c0_372, %c0_373] : memref<3x1x32xf32, #tpu.memory_space<vmem>>, vector<1x1x32xf32>
    %493 = vector.shape_cast %492 : vector<1x1x32xf32> to vector<1x32xf32>
    %494 = vector.broadcast %493 : vector<1x32xf32> to vector<8x32xf32>
    %495 = arith.addf %491, %494 : vector<8x32xf32>
    %c1_374 = arith.constant 1 : index
    %c0_375 = arith.constant 0 : index
    %c0_376 = arith.constant 0 : index
    %496 = vector.load %arg5[%c1_374, %c0_375, %c0_376] : memref<3x32x32xbf16, #tpu.memory_space<vmem>>, vector<1x32x32xbf16>
    %497 = vector.shape_cast %496 : vector<1x32x32xbf16> to vector<32x32xbf16>
    %cst_377 = arith.constant dense<0.000000e+00> : vector<8x32xf32>
    %498 = tpu.matmul %488, %497, %cst_377 {dimension_numbers = #tpu.dot_dimension_numbers<[1], [0], [0], [1], [0, 0, 1, 1], [], []>} : vector<8x32xbf16>, vector<32x32xbf16>, vector<8x32xf32> -> vector<8x32xf32>
    %c1_378 = arith.constant 1 : index
    %c0_379 = arith.constant 0 : index
    %c0_380 = arith.constant 0 : index
    %499 = vector.load %arg6[%c1_378, %c0_379, %c0_380] : memref<3x1x32xf32, #tpu.memory_space<vmem>>, vector<1x1x32xf32>
    %500 = vector.shape_cast %499 : vector<1x1x32xf32> to vector<1x32xf32>
    %501 = vector.broadcast %500 : vector<1x32xf32> to vector<8x32xf32>
    %502 = arith.addf %498, %501 : vector<8x32xf32>
    %c2_381 = arith.constant 2 : index
    %c0_382 = arith.constant 0 : index
    %c0_383 = arith.constant 0 : index
    %503 = vector.load %arg5[%c2_381, %c0_382, %c0_383] : memref<3x32x32xbf16, #tpu.memory_space<vmem>>, vector<1x32x32xbf16>
    %504 = vector.shape_cast %503 : vector<1x32x32xbf16> to vector<32x32xbf16>
    %cst_384 = arith.constant dense<0.000000e+00> : vector<8x32xf32>
    %505 = tpu.matmul %488, %504, %cst_384 {dimension_numbers = #tpu.dot_dimension_numbers<[1], [0], [0], [1], [0, 0, 1, 1], [], []>} : vector<8x32xbf16>, vector<32x32xbf16>, vector<8x32xf32> -> vector<8x32xf32>
    %c2_385 = arith.constant 2 : index
    %c0_386 = arith.constant 0 : index
    %c0_387 = arith.constant 0 : index
    %506 = vector.load %arg6[%c2_385, %c0_386, %c0_387] : memref<3x1x32xf32, #tpu.memory_space<vmem>>, vector<1x1x32xf32>
    %507 = vector.shape_cast %506 : vector<1x1x32xf32> to vector<1x32xf32>
    %508 = vector.broadcast %507 : vector<1x32xf32> to vector<8x32xf32>
    %509 = arith.addf %505, %508 : vector<8x32xf32>
    %510 = arith.addf %483, %495 : vector<8x32xf32>
    %511 = arith.negf %510 : vector<8x32xf32>
    %512 = math.exp %511 : vector<8x32xf32>
    %cst_388 = arith.constant 1.000000e+00 : f32
    %513 = vector.broadcast %cst_388 : f32 to vector<8x32xf32>
    %514 = arith.addf %513, %512 : vector<8x32xf32>
    %515 = arith.divf %513, %514 : vector<8x32xf32>
    %516 = arith.addf %485, %502 : vector<8x32xf32>
    %517 = arith.negf %516 : vector<8x32xf32>
    %518 = math.exp %517 : vector<8x32xf32>
    %cst_389 = arith.constant 1.000000e+00 : f32
    %519 = vector.broadcast %cst_389 : f32 to vector<8x32xf32>
    %520 = arith.addf %519, %518 : vector<8x32xf32>
    %521 = arith.divf %519, %520 : vector<8x32xf32>
    %522 = arith.mulf %515, %509 : vector<8x32xf32>
    %523 = arith.addf %487, %522 : vector<8x32xf32>
    %524 = math.tanh %523 : vector<8x32xf32>
    %cst_390 = arith.constant 1.000000e+00 : f32
    %525 = vector.broadcast %cst_390 : f32 to vector<8x32xf32>
    %526 = arith.subf %525, %521 : vector<8x32xf32>
    %527 = arith.mulf %526, %524 : vector<8x32xf32>
    %528 = arith.mulf %521, %433 : vector<8x32xf32>
    %529 = arith.addf %527, %528 : vector<8x32xf32>
    %c0_391 = arith.constant 0 : index
    %c5_392 = arith.constant 5 : index
    %c0_393 = arith.constant 0 : index
    %c0_394 = arith.constant 0 : index
    %530 = vector.load %arg2[%c0_391, %c5_392, %c0_393, %c0_394] : memref<3x8x32x32xf32, #tpu.memory_space<vmem>>, vector<1x1x32x32xf32>
    %531 = vector.shape_cast %530 : vector<1x1x32x32xf32> to vector<32x32xf32>
    %c1_395 = arith.constant 1 : index
    %c5_396 = arith.constant 5 : index
    %c0_397 = arith.constant 0 : index
    %c0_398 = arith.constant 0 : index
    %532 = vector.load %arg2[%c1_395, %c5_396, %c0_397, %c0_398] : memref<3x8x32x32xf32, #tpu.memory_space<vmem>>, vector<1x1x32x32xf32>
    %533 = vector.shape_cast %532 : vector<1x1x32x32xf32> to vector<32x32xf32>
    %c2_399 = arith.constant 2 : index
    %c5_400 = arith.constant 5 : index
    %c0_401 = arith.constant 0 : index
    %c0_402 = arith.constant 0 : index
    %534 = vector.load %arg2[%c2_399, %c5_400, %c0_401, %c0_402] : memref<3x8x32x32xf32, #tpu.memory_space<vmem>>, vector<1x1x32x32xf32>
    %535 = vector.shape_cast %534 : vector<1x1x32x32xf32> to vector<32x32xf32>
    %536 = arith.truncf %481 : vector<32x32xf32> to vector<32x32xbf16>
    %c0_403 = arith.constant 0 : index
    %c0_404 = arith.constant 0 : index
    %c0_405 = arith.constant 0 : index
    %537 = vector.load %arg13[%c0_403, %c0_404, %c0_405] : memref<3x32x32xbf16, #tpu.memory_space<vmem>>, vector<1x32x32xbf16>
    %538 = vector.shape_cast %537 : vector<1x32x32xbf16> to vector<32x32xbf16>
    %cst_406 = arith.constant dense<0.000000e+00> : vector<32x32xf32>
    %539 = tpu.matmul %536, %538, %cst_406 {dimension_numbers = #tpu.dot_dimension_numbers<[1], [0], [0], [1], [0, 0, 1, 1], [], []>} : vector<32x32xbf16>, vector<32x32xbf16>, vector<32x32xf32> -> vector<32x32xf32>
    %c0_407 = arith.constant 0 : index
    %c0_408 = arith.constant 0 : index
    %c0_409 = arith.constant 0 : index
    %540 = vector.load %arg14[%c0_407, %c0_408, %c0_409] : memref<3x1x32xf32, #tpu.memory_space<vmem>>, vector<1x1x32xf32>
    %541 = vector.shape_cast %540 : vector<1x1x32xf32> to vector<1x32xf32>
    %542 = vector.broadcast %541 : vector<1x32xf32> to vector<32x32xf32>
    %543 = arith.addf %539, %542 : vector<32x32xf32>
    %c1_410 = arith.constant 1 : index
    %c0_411 = arith.constant 0 : index
    %c0_412 = arith.constant 0 : index
    %544 = vector.load %arg13[%c1_410, %c0_411, %c0_412] : memref<3x32x32xbf16, #tpu.memory_space<vmem>>, vector<1x32x32xbf16>
    %545 = vector.shape_cast %544 : vector<1x32x32xbf16> to vector<32x32xbf16>
    %cst_413 = arith.constant dense<0.000000e+00> : vector<32x32xf32>
    %546 = tpu.matmul %536, %545, %cst_413 {dimension_numbers = #tpu.dot_dimension_numbers<[1], [0], [0], [1], [0, 0, 1, 1], [], []>} : vector<32x32xbf16>, vector<32x32xbf16>, vector<32x32xf32> -> vector<32x32xf32>
    %c1_414 = arith.constant 1 : index
    %c0_415 = arith.constant 0 : index
    %c0_416 = arith.constant 0 : index
    %547 = vector.load %arg14[%c1_414, %c0_415, %c0_416] : memref<3x1x32xf32, #tpu.memory_space<vmem>>, vector<1x1x32xf32>
    %548 = vector.shape_cast %547 : vector<1x1x32xf32> to vector<1x32xf32>
    %549 = vector.broadcast %548 : vector<1x32xf32> to vector<32x32xf32>
    %550 = arith.addf %546, %549 : vector<32x32xf32>
    %c2_417 = arith.constant 2 : index
    %c0_418 = arith.constant 0 : index
    %c0_419 = arith.constant 0 : index
    %551 = vector.load %arg13[%c2_417, %c0_418, %c0_419] : memref<3x32x32xbf16, #tpu.memory_space<vmem>>, vector<1x32x32xbf16>
    %552 = vector.shape_cast %551 : vector<1x32x32xbf16> to vector<32x32xbf16>
    %cst_420 = arith.constant dense<0.000000e+00> : vector<32x32xf32>
    %553 = tpu.matmul %536, %552, %cst_420 {dimension_numbers = #tpu.dot_dimension_numbers<[1], [0], [0], [1], [0, 0, 1, 1], [], []>} : vector<32x32xbf16>, vector<32x32xbf16>, vector<32x32xf32> -> vector<32x32xf32>
    %c2_421 = arith.constant 2 : index
    %c0_422 = arith.constant 0 : index
    %c0_423 = arith.constant 0 : index
    %554 = vector.load %arg14[%c2_421, %c0_422, %c0_423] : memref<3x1x32xf32, #tpu.memory_space<vmem>>, vector<1x1x32xf32>
    %555 = vector.shape_cast %554 : vector<1x1x32xf32> to vector<1x32xf32>
    %556 = vector.broadcast %555 : vector<1x32xf32> to vector<32x32xf32>
    %557 = arith.addf %553, %556 : vector<32x32xf32>
    %558 = arith.addf %531, %543 : vector<32x32xf32>
    %559 = arith.negf %558 : vector<32x32xf32>
    %560 = math.exp %559 : vector<32x32xf32>
    %cst_424 = arith.constant 1.000000e+00 : f32
    %561 = vector.broadcast %cst_424 : f32 to vector<32x32xf32>
    %562 = arith.addf %561, %560 : vector<32x32xf32>
    %563 = arith.divf %561, %562 : vector<32x32xf32>
    %564 = arith.addf %533, %550 : vector<32x32xf32>
    %565 = arith.negf %564 : vector<32x32xf32>
    %566 = math.exp %565 : vector<32x32xf32>
    %cst_425 = arith.constant 1.000000e+00 : f32
    %567 = vector.broadcast %cst_425 : f32 to vector<32x32xf32>
    %568 = arith.addf %567, %566 : vector<32x32xf32>
    %569 = arith.divf %567, %568 : vector<32x32xf32>
    %570 = arith.mulf %563, %557 : vector<32x32xf32>
    %571 = arith.addf %535, %570 : vector<32x32xf32>
    %572 = math.tanh %571 : vector<32x32xf32>
    %cst_426 = arith.constant 1.000000e+00 : f32
    %573 = vector.broadcast %cst_426 : f32 to vector<32x32xf32>
    %574 = arith.subf %573, %569 : vector<32x32xf32>
    %575 = arith.mulf %574, %572 : vector<32x32xf32>
    %576 = arith.mulf %569, %481 : vector<32x32xf32>
    %577 = arith.addf %575, %576 : vector<32x32xf32>
    %c0_427 = arith.constant 0 : index
    %c6 = arith.constant 6 : index
    %c0_428 = arith.constant 0 : index
    %c0_429 = arith.constant 0 : index
    %578 = vector.load %arg0[%c0_427, %c6, %c0_428, %c0_429] : memref<3x8x8x32xf32, #tpu.memory_space<vmem>>, vector<1x1x8x32xf32>
    %579 = vector.shape_cast %578 : vector<1x1x8x32xf32> to vector<8x32xf32>
    %c1_430 = arith.constant 1 : index
    %c6_431 = arith.constant 6 : index
    %c0_432 = arith.constant 0 : index
    %c0_433 = arith.constant 0 : index
    %580 = vector.load %arg0[%c1_430, %c6_431, %c0_432, %c0_433] : memref<3x8x8x32xf32, #tpu.memory_space<vmem>>, vector<1x1x8x32xf32>
    %581 = vector.shape_cast %580 : vector<1x1x8x32xf32> to vector<8x32xf32>
    %c2_434 = arith.constant 2 : index
    %c6_435 = arith.constant 6 : index
    %c0_436 = arith.constant 0 : index
    %c0_437 = arith.constant 0 : index
    %582 = vector.load %arg0[%c2_434, %c6_435, %c0_436, %c0_437] : memref<3x8x8x32xf32, #tpu.memory_space<vmem>>, vector<1x1x8x32xf32>
    %583 = vector.shape_cast %582 : vector<1x1x8x32xf32> to vector<8x32xf32>
    %584 = arith.truncf %529 : vector<8x32xf32> to vector<8x32xbf16>
    %c0_438 = arith.constant 0 : index
    %c0_439 = arith.constant 0 : index
    %c0_440 = arith.constant 0 : index
    %585 = vector.load %arg5[%c0_438, %c0_439, %c0_440] : memref<3x32x32xbf16, #tpu.memory_space<vmem>>, vector<1x32x32xbf16>
    %586 = vector.shape_cast %585 : vector<1x32x32xbf16> to vector<32x32xbf16>
    %cst_441 = arith.constant dense<0.000000e+00> : vector<8x32xf32>
    %587 = tpu.matmul %584, %586, %cst_441 {dimension_numbers = #tpu.dot_dimension_numbers<[1], [0], [0], [1], [0, 0, 1, 1], [], []>} : vector<8x32xbf16>, vector<32x32xbf16>, vector<8x32xf32> -> vector<8x32xf32>
    %c0_442 = arith.constant 0 : index
    %c0_443 = arith.constant 0 : index
    %c0_444 = arith.constant 0 : index
    %588 = vector.load %arg6[%c0_442, %c0_443, %c0_444] : memref<3x1x32xf32, #tpu.memory_space<vmem>>, vector<1x1x32xf32>
    %589 = vector.shape_cast %588 : vector<1x1x32xf32> to vector<1x32xf32>
    %590 = vector.broadcast %589 : vector<1x32xf32> to vector<8x32xf32>
    %591 = arith.addf %587, %590 : vector<8x32xf32>
    %c1_445 = arith.constant 1 : index
    %c0_446 = arith.constant 0 : index
    %c0_447 = arith.constant 0 : index
    %592 = vector.load %arg5[%c1_445, %c0_446, %c0_447] : memref<3x32x32xbf16, #tpu.memory_space<vmem>>, vector<1x32x32xbf16>
    %593 = vector.shape_cast %592 : vector<1x32x32xbf16> to vector<32x32xbf16>
    %cst_448 = arith.constant dense<0.000000e+00> : vector<8x32xf32>
    %594 = tpu.matmul %584, %593, %cst_448 {dimension_numbers = #tpu.dot_dimension_numbers<[1], [0], [0], [1], [0, 0, 1, 1], [], []>} : vector<8x32xbf16>, vector<32x32xbf16>, vector<8x32xf32> -> vector<8x32xf32>
    %c1_449 = arith.constant 1 : index
    %c0_450 = arith.constant 0 : index
    %c0_451 = arith.constant 0 : index
    %595 = vector.load %arg6[%c1_449, %c0_450, %c0_451] : memref<3x1x32xf32, #tpu.memory_space<vmem>>, vector<1x1x32xf32>
    %596 = vector.shape_cast %595 : vector<1x1x32xf32> to vector<1x32xf32>
    %597 = vector.broadcast %596 : vector<1x32xf32> to vector<8x32xf32>
    %598 = arith.addf %594, %597 : vector<8x32xf32>
    %c2_452 = arith.constant 2 : index
    %c0_453 = arith.constant 0 : index
    %c0_454 = arith.constant 0 : index
    %599 = vector.load %arg5[%c2_452, %c0_453, %c0_454] : memref<3x32x32xbf16, #tpu.memory_space<vmem>>, vector<1x32x32xbf16>
    %600 = vector.shape_cast %599 : vector<1x32x32xbf16> to vector<32x32xbf16>
    %cst_455 = arith.constant dense<0.000000e+00> : vector<8x32xf32>
    %601 = tpu.matmul %584, %600, %cst_455 {dimension_numbers = #tpu.dot_dimension_numbers<[1], [0], [0], [1], [0, 0, 1, 1], [], []>} : vector<8x32xbf16>, vector<32x32xbf16>, vector<8x32xf32> -> vector<8x32xf32>
    %c2_456 = arith.constant 2 : index
    %c0_457 = arith.constant 0 : index
    %c0_458 = arith.constant 0 : index
    %602 = vector.load %arg6[%c2_456, %c0_457, %c0_458] : memref<3x1x32xf32, #tpu.memory_space<vmem>>, vector<1x1x32xf32>
    %603 = vector.shape_cast %602 : vector<1x1x32xf32> to vector<1x32xf32>
    %604 = vector.broadcast %603 : vector<1x32xf32> to vector<8x32xf32>
    %605 = arith.addf %601, %604 : vector<8x32xf32>
    %606 = arith.addf %579, %591 : vector<8x32xf32>
    %607 = arith.negf %606 : vector<8x32xf32>
    %608 = math.exp %607 : vector<8x32xf32>
    %cst_459 = arith.constant 1.000000e+00 : f32
    %609 = vector.broadcast %cst_459 : f32 to vector<8x32xf32>
    %610 = arith.addf %609, %608 : vector<8x32xf32>
    %611 = arith.divf %609, %610 : vector<8x32xf32>
    %612 = arith.addf %581, %598 : vector<8x32xf32>
    %613 = arith.negf %612 : vector<8x32xf32>
    %614 = math.exp %613 : vector<8x32xf32>
    %cst_460 = arith.constant 1.000000e+00 : f32
    %615 = vector.broadcast %cst_460 : f32 to vector<8x32xf32>
    %616 = arith.addf %615, %614 : vector<8x32xf32>
    %617 = arith.divf %615, %616 : vector<8x32xf32>
    %618 = arith.mulf %611, %605 : vector<8x32xf32>
    %619 = arith.addf %583, %618 : vector<8x32xf32>
    %620 = math.tanh %619 : vector<8x32xf32>
    %cst_461 = arith.constant 1.000000e+00 : f32
    %621 = vector.broadcast %cst_461 : f32 to vector<8x32xf32>
    %622 = arith.subf %621, %617 : vector<8x32xf32>
    %623 = arith.mulf %622, %620 : vector<8x32xf32>
    %624 = arith.mulf %617, %529 : vector<8x32xf32>
    %625 = arith.addf %623, %624 : vector<8x32xf32>
    %c0_462 = arith.constant 0 : index
    %c6_463 = arith.constant 6 : index
    %c0_464 = arith.constant 0 : index
    %c0_465 = arith.constant 0 : index
    %626 = vector.load %arg2[%c0_462, %c6_463, %c0_464, %c0_465] : memref<3x8x32x32xf32, #tpu.memory_space<vmem>>, vector<1x1x32x32xf32>
    %627 = vector.shape_cast %626 : vector<1x1x32x32xf32> to vector<32x32xf32>
    %c1_466 = arith.constant 1 : index
    %c6_467 = arith.constant 6 : index
    %c0_468 = arith.constant 0 : index
    %c0_469 = arith.constant 0 : index
    %628 = vector.load %arg2[%c1_466, %c6_467, %c0_468, %c0_469] : memref<3x8x32x32xf32, #tpu.memory_space<vmem>>, vector<1x1x32x32xf32>
    %629 = vector.shape_cast %628 : vector<1x1x32x32xf32> to vector<32x32xf32>
    %c2_470 = arith.constant 2 : index
    %c6_471 = arith.constant 6 : index
    %c0_472 = arith.constant 0 : index
    %c0_473 = arith.constant 0 : index
    %630 = vector.load %arg2[%c2_470, %c6_471, %c0_472, %c0_473] : memref<3x8x32x32xf32, #tpu.memory_space<vmem>>, vector<1x1x32x32xf32>
    %631 = vector.shape_cast %630 : vector<1x1x32x32xf32> to vector<32x32xf32>
    %632 = arith.truncf %577 : vector<32x32xf32> to vector<32x32xbf16>
    %c0_474 = arith.constant 0 : index
    %c0_475 = arith.constant 0 : index
    %c0_476 = arith.constant 0 : index
    %633 = vector.load %arg13[%c0_474, %c0_475, %c0_476] : memref<3x32x32xbf16, #tpu.memory_space<vmem>>, vector<1x32x32xbf16>
    %634 = vector.shape_cast %633 : vector<1x32x32xbf16> to vector<32x32xbf16>
    %cst_477 = arith.constant dense<0.000000e+00> : vector<32x32xf32>
    %635 = tpu.matmul %632, %634, %cst_477 {dimension_numbers = #tpu.dot_dimension_numbers<[1], [0], [0], [1], [0, 0, 1, 1], [], []>} : vector<32x32xbf16>, vector<32x32xbf16>, vector<32x32xf32> -> vector<32x32xf32>
    %c0_478 = arith.constant 0 : index
    %c0_479 = arith.constant 0 : index
    %c0_480 = arith.constant 0 : index
    %636 = vector.load %arg14[%c0_478, %c0_479, %c0_480] : memref<3x1x32xf32, #tpu.memory_space<vmem>>, vector<1x1x32xf32>
    %637 = vector.shape_cast %636 : vector<1x1x32xf32> to vector<1x32xf32>
    %638 = vector.broadcast %637 : vector<1x32xf32> to vector<32x32xf32>
    %639 = arith.addf %635, %638 : vector<32x32xf32>
    %c1_481 = arith.constant 1 : index
    %c0_482 = arith.constant 0 : index
    %c0_483 = arith.constant 0 : index
    %640 = vector.load %arg13[%c1_481, %c0_482, %c0_483] : memref<3x32x32xbf16, #tpu.memory_space<vmem>>, vector<1x32x32xbf16>
    %641 = vector.shape_cast %640 : vector<1x32x32xbf16> to vector<32x32xbf16>
    %cst_484 = arith.constant dense<0.000000e+00> : vector<32x32xf32>
    %642 = tpu.matmul %632, %641, %cst_484 {dimension_numbers = #tpu.dot_dimension_numbers<[1], [0], [0], [1], [0, 0, 1, 1], [], []>} : vector<32x32xbf16>, vector<32x32xbf16>, vector<32x32xf32> -> vector<32x32xf32>
    %c1_485 = arith.constant 1 : index
    %c0_486 = arith.constant 0 : index
    %c0_487 = arith.constant 0 : index
    %643 = vector.load %arg14[%c1_485, %c0_486, %c0_487] : memref<3x1x32xf32, #tpu.memory_space<vmem>>, vector<1x1x32xf32>
    %644 = vector.shape_cast %643 : vector<1x1x32xf32> to vector<1x32xf32>
    %645 = vector.broadcast %644 : vector<1x32xf32> to vector<32x32xf32>
    %646 = arith.addf %642, %645 : vector<32x32xf32>
    %c2_488 = arith.constant 2 : index
    %c0_489 = arith.constant 0 : index
    %c0_490 = arith.constant 0 : index
    %647 = vector.load %arg13[%c2_488, %c0_489, %c0_490] : memref<3x32x32xbf16, #tpu.memory_space<vmem>>, vector<1x32x32xbf16>
    %648 = vector.shape_cast %647 : vector<1x32x32xbf16> to vector<32x32xbf16>
    %cst_491 = arith.constant dense<0.000000e+00> : vector<32x32xf32>
    %649 = tpu.matmul %632, %648, %cst_491 {dimension_numbers = #tpu.dot_dimension_numbers<[1], [0], [0], [1], [0, 0, 1, 1], [], []>} : vector<32x32xbf16>, vector<32x32xbf16>, vector<32x32xf32> -> vector<32x32xf32>
    %c2_492 = arith.constant 2 : index
    %c0_493 = arith.constant 0 : index
    %c0_494 = arith.constant 0 : index
    %650 = vector.load %arg14[%c2_492, %c0_493, %c0_494] : memref<3x1x32xf32, #tpu.memory_space<vmem>>, vector<1x1x32xf32>
    %651 = vector.shape_cast %650 : vector<1x1x32xf32> to vector<1x32xf32>
    %652 = vector.broadcast %651 : vector<1x32xf32> to vector<32x32xf32>
    %653 = arith.addf %649, %652 : vector<32x32xf32>
    %654 = arith.addf %627, %639 : vector<32x32xf32>
    %655 = arith.negf %654 : vector<32x32xf32>
    %656 = math.exp %655 : vector<32x32xf32>
    %cst_495 = arith.constant 1.000000e+00 : f32
    %657 = vector.broadcast %cst_495 : f32 to vector<32x32xf32>
    %658 = arith.addf %657, %656 : vector<32x32xf32>
    %659 = arith.divf %657, %658 : vector<32x32xf32>
    %660 = arith.addf %629, %646 : vector<32x32xf32>
    %661 = arith.negf %660 : vector<32x32xf32>
    %662 = math.exp %661 : vector<32x32xf32>
    %cst_496 = arith.constant 1.000000e+00 : f32
    %663 = vector.broadcast %cst_496 : f32 to vector<32x32xf32>
    %664 = arith.addf %663, %662 : vector<32x32xf32>
    %665 = arith.divf %663, %664 : vector<32x32xf32>
    %666 = arith.mulf %659, %653 : vector<32x32xf32>
    %667 = arith.addf %631, %666 : vector<32x32xf32>
    %668 = math.tanh %667 : vector<32x32xf32>
    %cst_497 = arith.constant 1.000000e+00 : f32
    %669 = vector.broadcast %cst_497 : f32 to vector<32x32xf32>
    %670 = arith.subf %669, %665 : vector<32x32xf32>
    %671 = arith.mulf %670, %668 : vector<32x32xf32>
    %672 = arith.mulf %665, %577 : vector<32x32xf32>
    %673 = arith.addf %671, %672 : vector<32x32xf32>
    %c0_498 = arith.constant 0 : index
    %c7 = arith.constant 7 : index
    %c0_499 = arith.constant 0 : index
    %c0_500 = arith.constant 0 : index
    %674 = vector.load %arg0[%c0_498, %c7, %c0_499, %c0_500] : memref<3x8x8x32xf32, #tpu.memory_space<vmem>>, vector<1x1x8x32xf32>
    %675 = vector.shape_cast %674 : vector<1x1x8x32xf32> to vector<8x32xf32>
    %c1_501 = arith.constant 1 : index
    %c7_502 = arith.constant 7 : index
    %c0_503 = arith.constant 0 : index
    %c0_504 = arith.constant 0 : index
    %676 = vector.load %arg0[%c1_501, %c7_502, %c0_503, %c0_504] : memref<3x8x8x32xf32, #tpu.memory_space<vmem>>, vector<1x1x8x32xf32>
    %677 = vector.shape_cast %676 : vector<1x1x8x32xf32> to vector<8x32xf32>
    %c2_505 = arith.constant 2 : index
    %c7_506 = arith.constant 7 : index
    %c0_507 = arith.constant 0 : index
    %c0_508 = arith.constant 0 : index
    %678 = vector.load %arg0[%c2_505, %c7_506, %c0_507, %c0_508] : memref<3x8x8x32xf32, #tpu.memory_space<vmem>>, vector<1x1x8x32xf32>
    %679 = vector.shape_cast %678 : vector<1x1x8x32xf32> to vector<8x32xf32>
    %680 = arith.truncf %625 : vector<8x32xf32> to vector<8x32xbf16>
    %c0_509 = arith.constant 0 : index
    %c0_510 = arith.constant 0 : index
    %c0_511 = arith.constant 0 : index
    %681 = vector.load %arg5[%c0_509, %c0_510, %c0_511] : memref<3x32x32xbf16, #tpu.memory_space<vmem>>, vector<1x32x32xbf16>
    %682 = vector.shape_cast %681 : vector<1x32x32xbf16> to vector<32x32xbf16>
    %cst_512 = arith.constant dense<0.000000e+00> : vector<8x32xf32>
    %683 = tpu.matmul %680, %682, %cst_512 {dimension_numbers = #tpu.dot_dimension_numbers<[1], [0], [0], [1], [0, 0, 1, 1], [], []>} : vector<8x32xbf16>, vector<32x32xbf16>, vector<8x32xf32> -> vector<8x32xf32>
    %c0_513 = arith.constant 0 : index
    %c0_514 = arith.constant 0 : index
    %c0_515 = arith.constant 0 : index
    %684 = vector.load %arg6[%c0_513, %c0_514, %c0_515] : memref<3x1x32xf32, #tpu.memory_space<vmem>>, vector<1x1x32xf32>
    %685 = vector.shape_cast %684 : vector<1x1x32xf32> to vector<1x32xf32>
    %686 = vector.broadcast %685 : vector<1x32xf32> to vector<8x32xf32>
    %687 = arith.addf %683, %686 : vector<8x32xf32>
    %c1_516 = arith.constant 1 : index
    %c0_517 = arith.constant 0 : index
    %c0_518 = arith.constant 0 : index
    %688 = vector.load %arg5[%c1_516, %c0_517, %c0_518] : memref<3x32x32xbf16, #tpu.memory_space<vmem>>, vector<1x32x32xbf16>
    %689 = vector.shape_cast %688 : vector<1x32x32xbf16> to vector<32x32xbf16>
    %cst_519 = arith.constant dense<0.000000e+00> : vector<8x32xf32>
    %690 = tpu.matmul %680, %689, %cst_519 {dimension_numbers = #tpu.dot_dimension_numbers<[1], [0], [0], [1], [0, 0, 1, 1], [], []>} : vector<8x32xbf16>, vector<32x32xbf16>, vector<8x32xf32> -> vector<8x32xf32>
    %c1_520 = arith.constant 1 : index
    %c0_521 = arith.constant 0 : index
    %c0_522 = arith.constant 0 : index
    %691 = vector.load %arg6[%c1_520, %c0_521, %c0_522] : memref<3x1x32xf32, #tpu.memory_space<vmem>>, vector<1x1x32xf32>
    %692 = vector.shape_cast %691 : vector<1x1x32xf32> to vector<1x32xf32>
    %693 = vector.broadcast %692 : vector<1x32xf32> to vector<8x32xf32>
    %694 = arith.addf %690, %693 : vector<8x32xf32>
    %c2_523 = arith.constant 2 : index
    %c0_524 = arith.constant 0 : index
    %c0_525 = arith.constant 0 : index
    %695 = vector.load %arg5[%c2_523, %c0_524, %c0_525] : memref<3x32x32xbf16, #tpu.memory_space<vmem>>, vector<1x32x32xbf16>
    %696 = vector.shape_cast %695 : vector<1x32x32xbf16> to vector<32x32xbf16>
    %cst_526 = arith.constant dense<0.000000e+00> : vector<8x32xf32>
    %697 = tpu.matmul %680, %696, %cst_526 {dimension_numbers = #tpu.dot_dimension_numbers<[1], [0], [0], [1], [0, 0, 1, 1], [], []>} : vector<8x32xbf16>, vector<32x32xbf16>, vector<8x32xf32> -> vector<8x32xf32>
    %c2_527 = arith.constant 2 : index
    %c0_528 = arith.constant 0 : index
    %c0_529 = arith.constant 0 : index
    %698 = vector.load %arg6[%c2_527, %c0_528, %c0_529] : memref<3x1x32xf32, #tpu.memory_space<vmem>>, vector<1x1x32xf32>
    %699 = vector.shape_cast %698 : vector<1x1x32xf32> to vector<1x32xf32>
    %700 = vector.broadcast %699 : vector<1x32xf32> to vector<8x32xf32>
    %701 = arith.addf %697, %700 : vector<8x32xf32>
    %702 = arith.addf %675, %687 : vector<8x32xf32>
    %703 = arith.negf %702 : vector<8x32xf32>
    %704 = math.exp %703 : vector<8x32xf32>
    %cst_530 = arith.constant 1.000000e+00 : f32
    %705 = vector.broadcast %cst_530 : f32 to vector<8x32xf32>
    %706 = arith.addf %705, %704 : vector<8x32xf32>
    %707 = arith.divf %705, %706 : vector<8x32xf32>
    %708 = arith.addf %677, %694 : vector<8x32xf32>
    %709 = arith.negf %708 : vector<8x32xf32>
    %710 = math.exp %709 : vector<8x32xf32>
    %cst_531 = arith.constant 1.000000e+00 : f32
    %711 = vector.broadcast %cst_531 : f32 to vector<8x32xf32>
    %712 = arith.addf %711, %710 : vector<8x32xf32>
    %713 = arith.divf %711, %712 : vector<8x32xf32>
    %714 = arith.mulf %707, %701 : vector<8x32xf32>
    %715 = arith.addf %679, %714 : vector<8x32xf32>
    %716 = math.tanh %715 : vector<8x32xf32>
    %cst_532 = arith.constant 1.000000e+00 : f32
    %717 = vector.broadcast %cst_532 : f32 to vector<8x32xf32>
    %718 = arith.subf %717, %713 : vector<8x32xf32>
    %719 = arith.mulf %718, %716 : vector<8x32xf32>
    %720 = arith.mulf %713, %625 : vector<8x32xf32>
    %721 = arith.addf %719, %720 : vector<8x32xf32>
    %c0_533 = arith.constant 0 : index
    %c7_534 = arith.constant 7 : index
    %c0_535 = arith.constant 0 : index
    %c0_536 = arith.constant 0 : index
    %722 = vector.load %arg2[%c0_533, %c7_534, %c0_535, %c0_536] : memref<3x8x32x32xf32, #tpu.memory_space<vmem>>, vector<1x1x32x32xf32>
    %723 = vector.shape_cast %722 : vector<1x1x32x32xf32> to vector<32x32xf32>
    %c1_537 = arith.constant 1 : index
    %c7_538 = arith.constant 7 : index
    %c0_539 = arith.constant 0 : index
    %c0_540 = arith.constant 0 : index
    %724 = vector.load %arg2[%c1_537, %c7_538, %c0_539, %c0_540] : memref<3x8x32x32xf32, #tpu.memory_space<vmem>>, vector<1x1x32x32xf32>
    %725 = vector.shape_cast %724 : vector<1x1x32x32xf32> to vector<32x32xf32>
    %c2_541 = arith.constant 2 : index
    %c7_542 = arith.constant 7 : index
    %c0_543 = arith.constant 0 : index
    %c0_544 = arith.constant 0 : index
    %726 = vector.load %arg2[%c2_541, %c7_542, %c0_543, %c0_544] : memref<3x8x32x32xf32, #tpu.memory_space<vmem>>, vector<1x1x32x32xf32>
    %727 = vector.shape_cast %726 : vector<1x1x32x32xf32> to vector<32x32xf32>
    %728 = arith.truncf %673 : vector<32x32xf32> to vector<32x32xbf16>
    %c0_545 = arith.constant 0 : index
    %c0_546 = arith.constant 0 : index
    %c0_547 = arith.constant 0 : index
    %729 = vector.load %arg13[%c0_545, %c0_546, %c0_547] : memref<3x32x32xbf16, #tpu.memory_space<vmem>>, vector<1x32x32xbf16>
    %730 = vector.shape_cast %729 : vector<1x32x32xbf16> to vector<32x32xbf16>
    %cst_548 = arith.constant dense<0.000000e+00> : vector<32x32xf32>
    %731 = tpu.matmul %728, %730, %cst_548 {dimension_numbers = #tpu.dot_dimension_numbers<[1], [0], [0], [1], [0, 0, 1, 1], [], []>} : vector<32x32xbf16>, vector<32x32xbf16>, vector<32x32xf32> -> vector<32x32xf32>
    %c0_549 = arith.constant 0 : index
    %c0_550 = arith.constant 0 : index
    %c0_551 = arith.constant 0 : index
    %732 = vector.load %arg14[%c0_549, %c0_550, %c0_551] : memref<3x1x32xf32, #tpu.memory_space<vmem>>, vector<1x1x32xf32>
    %733 = vector.shape_cast %732 : vector<1x1x32xf32> to vector<1x32xf32>
    %734 = vector.broadcast %733 : vector<1x32xf32> to vector<32x32xf32>
    %735 = arith.addf %731, %734 : vector<32x32xf32>
    %c1_552 = arith.constant 1 : index
    %c0_553 = arith.constant 0 : index
    %c0_554 = arith.constant 0 : index
    %736 = vector.load %arg13[%c1_552, %c0_553, %c0_554] : memref<3x32x32xbf16, #tpu.memory_space<vmem>>, vector<1x32x32xbf16>
    %737 = vector.shape_cast %736 : vector<1x32x32xbf16> to vector<32x32xbf16>
    %cst_555 = arith.constant dense<0.000000e+00> : vector<32x32xf32>
    %738 = tpu.matmul %728, %737, %cst_555 {dimension_numbers = #tpu.dot_dimension_numbers<[1], [0], [0], [1], [0, 0, 1, 1], [], []>} : vector<32x32xbf16>, vector<32x32xbf16>, vector<32x32xf32> -> vector<32x32xf32>
    %c1_556 = arith.constant 1 : index
    %c0_557 = arith.constant 0 : index
    %c0_558 = arith.constant 0 : index
    %739 = vector.load %arg14[%c1_556, %c0_557, %c0_558] : memref<3x1x32xf32, #tpu.memory_space<vmem>>, vector<1x1x32xf32>
    %740 = vector.shape_cast %739 : vector<1x1x32xf32> to vector<1x32xf32>
    %741 = vector.broadcast %740 : vector<1x32xf32> to vector<32x32xf32>
    %742 = arith.addf %738, %741 : vector<32x32xf32>
    %c2_559 = arith.constant 2 : index
    %c0_560 = arith.constant 0 : index
    %c0_561 = arith.constant 0 : index
    %743 = vector.load %arg13[%c2_559, %c0_560, %c0_561] : memref<3x32x32xbf16, #tpu.memory_space<vmem>>, vector<1x32x32xbf16>
    %744 = vector.shape_cast %743 : vector<1x32x32xbf16> to vector<32x32xbf16>
    %cst_562 = arith.constant dense<0.000000e+00> : vector<32x32xf32>
    %745 = tpu.matmul %728, %744, %cst_562 {dimension_numbers = #tpu.dot_dimension_numbers<[1], [0], [0], [1], [0, 0, 1, 1], [], []>} : vector<32x32xbf16>, vector<32x32xbf16>, vector<32x32xf32> -> vector<32x32xf32>
    %c2_563 = arith.constant 2 : index
    %c0_564 = arith.constant 0 : index
    %c0_565 = arith.constant 0 : index
    %746 = vector.load %arg14[%c2_563, %c0_564, %c0_565] : memref<3x1x32xf32, #tpu.memory_space<vmem>>, vector<1x1x32xf32>
    %747 = vector.shape_cast %746 : vector<1x1x32xf32> to vector<1x32xf32>
    %748 = vector.broadcast %747 : vector<1x32xf32> to vector<32x32xf32>
    %749 = arith.addf %745, %748 : vector<32x32xf32>
    %750 = arith.addf %723, %735 : vector<32x32xf32>
    %751 = arith.negf %750 : vector<32x32xf32>
    %752 = math.exp %751 : vector<32x32xf32>
    %cst_566 = arith.constant 1.000000e+00 : f32
    %753 = vector.broadcast %cst_566 : f32 to vector<32x32xf32>
    %754 = arith.addf %753, %752 : vector<32x32xf32>
    %755 = arith.divf %753, %754 : vector<32x32xf32>
    %756 = arith.addf %725, %742 : vector<32x32xf32>
    %757 = arith.negf %756 : vector<32x32xf32>
    %758 = math.exp %757 : vector<32x32xf32>
    %cst_567 = arith.constant 1.000000e+00 : f32
    %759 = vector.broadcast %cst_567 : f32 to vector<32x32xf32>
    %760 = arith.addf %759, %758 : vector<32x32xf32>
    %761 = arith.divf %759, %760 : vector<32x32xf32>
    %762 = arith.mulf %755, %749 : vector<32x32xf32>
    %763 = arith.addf %727, %762 : vector<32x32xf32>
    %764 = math.tanh %763 : vector<32x32xf32>
    %cst_568 = arith.constant 1.000000e+00 : f32
    %765 = vector.broadcast %cst_568 : f32 to vector<32x32xf32>
    %766 = arith.subf %765, %761 : vector<32x32xf32>
    %767 = arith.mulf %766, %764 : vector<32x32xf32>
    %768 = arith.mulf %761, %673 : vector<32x32xf32>
    %769 = arith.addf %767, %768 : vector<32x32xf32>
    %c0_569 = arith.constant 0 : index
    %c0_570 = arith.constant 0 : index
    %770 = vector.load %arg4[%c0_569, %c0_570] : memref<32x8xf32, #tpu.memory_space<vmem>>, vector<32x8xf32>
    %c0_571 = arith.constant 0 : index
    %771 = memref.load %arg12[%c0_571] : memref<1xf32, #tpu.memory_space<smem>>
    %c0_572 = arith.constant 0 : index
    %772 = memref.load %arg20[%c0_572] : memref<1xf32, #tpu.memory_space<smem>>
    %c0_573 = arith.constant 0 : index
    %c0_574 = arith.constant 0 : index
    %773 = vector.load %arg1[%c0_573, %c0_574] : memref<8x1xf32, #tpu.memory_space<vmem>>, vector<8x1xf32>
    %c0_575 = arith.constant 0 : index
    %c0_576 = arith.constant 0 : index
    %774 = vector.load %arg3[%c0_575, %c0_576] : memref<32x1xf32, #tpu.memory_space<vmem>>, vector<32x1xf32>
    %c0_577 = arith.constant 0 : index
    %c0_578 = arith.constant 0 : index
    %c0_579 = arith.constant 0 : index
    %775 = vector.load %arg7[%c0_577, %c0_578, %c0_579] : memref<3x1x32xf32, #tpu.memory_space<vmem>>, vector<1x1x32xf32>
    %776 = vector.shape_cast %775 : vector<1x1x32xf32> to vector<1x32xf32>
    %777 = vector.broadcast %773 : vector<8x1xf32> to vector<8x32xf32>
    %778 = vector.broadcast %776 : vector<1x32xf32> to vector<8x32xf32>
    %779 = arith.mulf %777, %778 : vector<8x32xf32>
    %c0_580 = arith.constant 0 : index
    %c0_581 = arith.constant 0 : index
    %c0_582 = arith.constant 0 : index
    %780 = vector.load %arg8[%c0_580, %c0_581, %c0_582] : memref<3x1x32xf32, #tpu.memory_space<vmem>>, vector<1x1x32xf32>
    %781 = vector.shape_cast %780 : vector<1x1x32xf32> to vector<1x32xf32>
    %782 = vector.broadcast %781 : vector<1x32xf32> to vector<8x32xf32>
    %783 = arith.addf %779, %782 : vector<8x32xf32>
    %c1_583 = arith.constant 1 : index
    %c0_584 = arith.constant 0 : index
    %c0_585 = arith.constant 0 : index
    %784 = vector.load %arg7[%c1_583, %c0_584, %c0_585] : memref<3x1x32xf32, #tpu.memory_space<vmem>>, vector<1x1x32xf32>
    %785 = vector.shape_cast %784 : vector<1x1x32xf32> to vector<1x32xf32>
    %786 = vector.broadcast %773 : vector<8x1xf32> to vector<8x32xf32>
    %787 = vector.broadcast %785 : vector<1x32xf32> to vector<8x32xf32>
    %788 = arith.mulf %786, %787 : vector<8x32xf32>
    %c1_586 = arith.constant 1 : index
    %c0_587 = arith.constant 0 : index
    %c0_588 = arith.constant 0 : index
    %789 = vector.load %arg8[%c1_586, %c0_587, %c0_588] : memref<3x1x32xf32, #tpu.memory_space<vmem>>, vector<1x1x32xf32>
    %790 = vector.shape_cast %789 : vector<1x1x32xf32> to vector<1x32xf32>
    %791 = vector.broadcast %790 : vector<1x32xf32> to vector<8x32xf32>
    %792 = arith.addf %788, %791 : vector<8x32xf32>
    %c2_589 = arith.constant 2 : index
    %c0_590 = arith.constant 0 : index
    %c0_591 = arith.constant 0 : index
    %793 = vector.load %arg7[%c2_589, %c0_590, %c0_591] : memref<3x1x32xf32, #tpu.memory_space<vmem>>, vector<1x1x32xf32>
    %794 = vector.shape_cast %793 : vector<1x1x32xf32> to vector<1x32xf32>
    %795 = vector.broadcast %773 : vector<8x1xf32> to vector<8x32xf32>
    %796 = vector.broadcast %794 : vector<1x32xf32> to vector<8x32xf32>
    %797 = arith.mulf %795, %796 : vector<8x32xf32>
    %c2_592 = arith.constant 2 : index
    %c0_593 = arith.constant 0 : index
    %c0_594 = arith.constant 0 : index
    %798 = vector.load %arg8[%c2_592, %c0_593, %c0_594] : memref<3x1x32xf32, #tpu.memory_space<vmem>>, vector<1x1x32xf32>
    %799 = vector.shape_cast %798 : vector<1x1x32xf32> to vector<1x32xf32>
    %800 = vector.broadcast %799 : vector<1x32xf32> to vector<8x32xf32>
    %801 = arith.addf %797, %800 : vector<8x32xf32>
    %802 = arith.truncf %721 : vector<8x32xf32> to vector<8x32xbf16>
    %c0_595 = arith.constant 0 : index
    %c0_596 = arith.constant 0 : index
    %c0_597 = arith.constant 0 : index
    %803 = vector.load %arg9[%c0_595, %c0_596, %c0_597] : memref<3x32x32xbf16, #tpu.memory_space<vmem>>, vector<1x32x32xbf16>
    %804 = vector.shape_cast %803 : vector<1x32x32xbf16> to vector<32x32xbf16>
    %cst_598 = arith.constant dense<0.000000e+00> : vector<8x32xf32>
    %805 = tpu.matmul %802, %804, %cst_598 {dimension_numbers = #tpu.dot_dimension_numbers<[1], [0], [0], [1], [0, 0, 1, 1], [], []>} : vector<8x32xbf16>, vector<32x32xbf16>, vector<8x32xf32> -> vector<8x32xf32>
    %c0_599 = arith.constant 0 : index
    %c0_600 = arith.constant 0 : index
    %c0_601 = arith.constant 0 : index
    %806 = vector.load %arg10[%c0_599, %c0_600, %c0_601] : memref<3x1x32xf32, #tpu.memory_space<vmem>>, vector<1x1x32xf32>
    %807 = vector.shape_cast %806 : vector<1x1x32xf32> to vector<1x32xf32>
    %808 = vector.broadcast %807 : vector<1x32xf32> to vector<8x32xf32>
    %809 = arith.addf %805, %808 : vector<8x32xf32>
    %c1_602 = arith.constant 1 : index
    %c0_603 = arith.constant 0 : index
    %c0_604 = arith.constant 0 : index
    %810 = vector.load %arg9[%c1_602, %c0_603, %c0_604] : memref<3x32x32xbf16, #tpu.memory_space<vmem>>, vector<1x32x32xbf16>
    %811 = vector.shape_cast %810 : vector<1x32x32xbf16> to vector<32x32xbf16>
    %cst_605 = arith.constant dense<0.000000e+00> : vector<8x32xf32>
    %812 = tpu.matmul %802, %811, %cst_605 {dimension_numbers = #tpu.dot_dimension_numbers<[1], [0], [0], [1], [0, 0, 1, 1], [], []>} : vector<8x32xbf16>, vector<32x32xbf16>, vector<8x32xf32> -> vector<8x32xf32>
    %c1_606 = arith.constant 1 : index
    %c0_607 = arith.constant 0 : index
    %c0_608 = arith.constant 0 : index
    %813 = vector.load %arg10[%c1_606, %c0_607, %c0_608] : memref<3x1x32xf32, #tpu.memory_space<vmem>>, vector<1x1x32xf32>
    %814 = vector.shape_cast %813 : vector<1x1x32xf32> to vector<1x32xf32>
    %815 = vector.broadcast %814 : vector<1x32xf32> to vector<8x32xf32>
    %816 = arith.addf %812, %815 : vector<8x32xf32>
    %c2_609 = arith.constant 2 : index
    %c0_610 = arith.constant 0 : index
    %c0_611 = arith.constant 0 : index
    %817 = vector.load %arg9[%c2_609, %c0_610, %c0_611] : memref<3x32x32xbf16, #tpu.memory_space<vmem>>, vector<1x32x32xbf16>
    %818 = vector.shape_cast %817 : vector<1x32x32xbf16> to vector<32x32xbf16>
    %cst_612 = arith.constant dense<0.000000e+00> : vector<8x32xf32>
    %819 = tpu.matmul %802, %818, %cst_612 {dimension_numbers = #tpu.dot_dimension_numbers<[1], [0], [0], [1], [0, 0, 1, 1], [], []>} : vector<8x32xbf16>, vector<32x32xbf16>, vector<8x32xf32> -> vector<8x32xf32>
    %c2_613 = arith.constant 2 : index
    %c0_614 = arith.constant 0 : index
    %c0_615 = arith.constant 0 : index
    %820 = vector.load %arg10[%c2_613, %c0_614, %c0_615] : memref<3x1x32xf32, #tpu.memory_space<vmem>>, vector<1x1x32xf32>
    %821 = vector.shape_cast %820 : vector<1x1x32xf32> to vector<1x32xf32>
    %822 = vector.broadcast %821 : vector<1x32xf32> to vector<8x32xf32>
    %823 = arith.addf %819, %822 : vector<8x32xf32>
    %824 = arith.addf %783, %809 : vector<8x32xf32>
    %825 = arith.negf %824 : vector<8x32xf32>
    %826 = math.exp %825 : vector<8x32xf32>
    %cst_616 = arith.constant 1.000000e+00 : f32
    %827 = vector.broadcast %cst_616 : f32 to vector<8x32xf32>
    %828 = arith.addf %827, %826 : vector<8x32xf32>
    %829 = arith.divf %827, %828 : vector<8x32xf32>
    %830 = arith.addf %792, %816 : vector<8x32xf32>
    %831 = arith.negf %830 : vector<8x32xf32>
    %832 = math.exp %831 : vector<8x32xf32>
    %cst_617 = arith.constant 1.000000e+00 : f32
    %833 = vector.broadcast %cst_617 : f32 to vector<8x32xf32>
    %834 = arith.addf %833, %832 : vector<8x32xf32>
    %835 = arith.divf %833, %834 : vector<8x32xf32>
    %836 = arith.mulf %829, %823 : vector<8x32xf32>
    %837 = arith.addf %801, %836 : vector<8x32xf32>
    %838 = math.tanh %837 : vector<8x32xf32>
    %cst_618 = arith.constant 1.000000e+00 : f32
    %839 = vector.broadcast %cst_618 : f32 to vector<8x32xf32>
    %840 = arith.subf %839, %835 : vector<8x32xf32>
    %841 = arith.mulf %840, %838 : vector<8x32xf32>
    %842 = arith.mulf %835, %721 : vector<8x32xf32>
    %843 = arith.addf %841, %842 : vector<8x32xf32>
    %c0_619 = arith.constant 0 : index
    %c0_620 = arith.constant 0 : index
    %844 = vector.load %arg11[%c0_619, %c0_620] : memref<1x32xf32, #tpu.memory_space<vmem>>, vector<1x32xf32>
    %845 = vector.broadcast %844 : vector<1x32xf32> to vector<8x32xf32>
    %846 = arith.mulf %843, %845 : vector<8x32xf32>
    %cst_621 = arith.constant dense<0.000000e+00> : vector<8xf32>
    %847 = vector.multi_reduction <add>, %846, %cst_621 [1] : vector<8x32xf32> to vector<8xf32>
    %848 = vector.shape_cast %847 : vector<8xf32> to vector<8x1xf32>
    %849 = vector.broadcast %771 : f32 to vector<8x1xf32>
    %850 = arith.addf %848, %849 : vector<8x1xf32>
    %851 = arith.subf %850, %773 : vector<8x1xf32>
    %cst_622 = arith.constant dense<0.000000e+00> : vector<32x1xf32>
    %852 = tpu.matmul %770, %851, %cst_622 {dimension_numbers = #tpu.dot_dimension_numbers<[1], [0], [0], [1], [0, 0, 1, 1], [], []>} : vector<32x8xf32>, vector<8x1xf32>, vector<32x1xf32> -> vector<32x1xf32>
    %c0_623 = arith.constant 0 : index
    %c0_624 = arith.constant 0 : index
    %c0_625 = arith.constant 0 : index
    %853 = vector.load %arg15[%c0_623, %c0_624, %c0_625] : memref<3x1x32xf32, #tpu.memory_space<vmem>>, vector<1x1x32xf32>
    %854 = vector.shape_cast %853 : vector<1x1x32xf32> to vector<1x32xf32>
    %855 = vector.broadcast %774 : vector<32x1xf32> to vector<32x32xf32>
    %856 = vector.broadcast %854 : vector<1x32xf32> to vector<32x32xf32>
    %857 = arith.mulf %855, %856 : vector<32x32xf32>
    %c0_626 = arith.constant 0 : index
    %c0_627 = arith.constant 0 : index
    %c0_628 = arith.constant 0 : index
    %858 = vector.load %arg16[%c0_626, %c0_627, %c0_628] : memref<3x1x32xf32, #tpu.memory_space<vmem>>, vector<1x1x32xf32>
    %859 = vector.shape_cast %858 : vector<1x1x32xf32> to vector<1x32xf32>
    %860 = vector.broadcast %859 : vector<1x32xf32> to vector<32x32xf32>
    %861 = arith.addf %857, %860 : vector<32x32xf32>
    %c1_629 = arith.constant 1 : index
    %c0_630 = arith.constant 0 : index
    %c0_631 = arith.constant 0 : index
    %862 = vector.load %arg15[%c1_629, %c0_630, %c0_631] : memref<3x1x32xf32, #tpu.memory_space<vmem>>, vector<1x1x32xf32>
    %863 = vector.shape_cast %862 : vector<1x1x32xf32> to vector<1x32xf32>
    %864 = vector.broadcast %774 : vector<32x1xf32> to vector<32x32xf32>
    %865 = vector.broadcast %863 : vector<1x32xf32> to vector<32x32xf32>
    %866 = arith.mulf %864, %865 : vector<32x32xf32>
    %c1_632 = arith.constant 1 : index
    %c0_633 = arith.constant 0 : index
    %c0_634 = arith.constant 0 : index
    %867 = vector.load %arg16[%c1_632, %c0_633, %c0_634] : memref<3x1x32xf32, #tpu.memory_space<vmem>>, vector<1x1x32xf32>
    %868 = vector.shape_cast %867 : vector<1x1x32xf32> to vector<1x32xf32>
    %869 = vector.broadcast %868 : vector<1x32xf32> to vector<32x32xf32>
    %870 = arith.addf %866, %869 : vector<32x32xf32>
    %c2_635 = arith.constant 2 : index
    %c0_636 = arith.constant 0 : index
    %c0_637 = arith.constant 0 : index
    %871 = vector.load %arg15[%c2_635, %c0_636, %c0_637] : memref<3x1x32xf32, #tpu.memory_space<vmem>>, vector<1x1x32xf32>
    %872 = vector.shape_cast %871 : vector<1x1x32xf32> to vector<1x32xf32>
    %873 = vector.broadcast %774 : vector<32x1xf32> to vector<32x32xf32>
    %874 = vector.broadcast %872 : vector<1x32xf32> to vector<32x32xf32>
    %875 = arith.mulf %873, %874 : vector<32x32xf32>
    %c2_638 = arith.constant 2 : index
    %c0_639 = arith.constant 0 : index
    %c0_640 = arith.constant 0 : index
    %876 = vector.load %arg16[%c2_638, %c0_639, %c0_640] : memref<3x1x32xf32, #tpu.memory_space<vmem>>, vector<1x1x32xf32>
    %877 = vector.shape_cast %876 : vector<1x1x32xf32> to vector<1x32xf32>
    %878 = vector.broadcast %877 : vector<1x32xf32> to vector<32x32xf32>
    %879 = arith.addf %875, %878 : vector<32x32xf32>
    %880 = arith.truncf %769 : vector<32x32xf32> to vector<32x32xbf16>
    %c0_641 = arith.constant 0 : index
    %c0_642 = arith.constant 0 : index
    %c0_643 = arith.constant 0 : index
    %881 = vector.load %arg17[%c0_641, %c0_642, %c0_643] : memref<3x32x32xbf16, #tpu.memory_space<vmem>>, vector<1x32x32xbf16>
    %882 = vector.shape_cast %881 : vector<1x32x32xbf16> to vector<32x32xbf16>
    %cst_644 = arith.constant dense<0.000000e+00> : vector<32x32xf32>
    %883 = tpu.matmul %880, %882, %cst_644 {dimension_numbers = #tpu.dot_dimension_numbers<[1], [0], [0], [1], [0, 0, 1, 1], [], []>} : vector<32x32xbf16>, vector<32x32xbf16>, vector<32x32xf32> -> vector<32x32xf32>
    %c0_645 = arith.constant 0 : index
    %c0_646 = arith.constant 0 : index
    %c0_647 = arith.constant 0 : index
    %884 = vector.load %arg18[%c0_645, %c0_646, %c0_647] : memref<3x1x32xf32, #tpu.memory_space<vmem>>, vector<1x1x32xf32>
    %885 = vector.shape_cast %884 : vector<1x1x32xf32> to vector<1x32xf32>
    %886 = vector.broadcast %885 : vector<1x32xf32> to vector<32x32xf32>
    %887 = arith.addf %883, %886 : vector<32x32xf32>
    %c1_648 = arith.constant 1 : index
    %c0_649 = arith.constant 0 : index
    %c0_650 = arith.constant 0 : index
    %888 = vector.load %arg17[%c1_648, %c0_649, %c0_650] : memref<3x32x32xbf16, #tpu.memory_space<vmem>>, vector<1x32x32xbf16>
    %889 = vector.shape_cast %888 : vector<1x32x32xbf16> to vector<32x32xbf16>
    %cst_651 = arith.constant dense<0.000000e+00> : vector<32x32xf32>
    %890 = tpu.matmul %880, %889, %cst_651 {dimension_numbers = #tpu.dot_dimension_numbers<[1], [0], [0], [1], [0, 0, 1, 1], [], []>} : vector<32x32xbf16>, vector<32x32xbf16>, vector<32x32xf32> -> vector<32x32xf32>
    %c1_652 = arith.constant 1 : index
    %c0_653 = arith.constant 0 : index
    %c0_654 = arith.constant 0 : index
    %891 = vector.load %arg18[%c1_652, %c0_653, %c0_654] : memref<3x1x32xf32, #tpu.memory_space<vmem>>, vector<1x1x32xf32>
    %892 = vector.shape_cast %891 : vector<1x1x32xf32> to vector<1x32xf32>
    %893 = vector.broadcast %892 : vector<1x32xf32> to vector<32x32xf32>
    %894 = arith.addf %890, %893 : vector<32x32xf32>
    %c2_655 = arith.constant 2 : index
    %c0_656 = arith.constant 0 : index
    %c0_657 = arith.constant 0 : index
    %895 = vector.load %arg17[%c2_655, %c0_656, %c0_657] : memref<3x32x32xbf16, #tpu.memory_space<vmem>>, vector<1x32x32xbf16>
    %896 = vector.shape_cast %895 : vector<1x32x32xbf16> to vector<32x32xbf16>
    %cst_658 = arith.constant dense<0.000000e+00> : vector<32x32xf32>
    %897 = tpu.matmul %880, %896, %cst_658 {dimension_numbers = #tpu.dot_dimension_numbers<[1], [0], [0], [1], [0, 0, 1, 1], [], []>} : vector<32x32xbf16>, vector<32x32xbf16>, vector<32x32xf32> -> vector<32x32xf32>
    %c2_659 = arith.constant 2 : index
    %c0_660 = arith.constant 0 : index
    %c0_661 = arith.constant 0 : index
    %898 = vector.load %arg18[%c2_659, %c0_660, %c0_661] : memref<3x1x32xf32, #tpu.memory_space<vmem>>, vector<1x1x32xf32>
    %899 = vector.shape_cast %898 : vector<1x1x32xf32> to vector<1x32xf32>
    %900 = vector.broadcast %899 : vector<1x32xf32> to vector<32x32xf32>
    %901 = arith.addf %897, %900 : vector<32x32xf32>
    %902 = arith.addf %861, %887 : vector<32x32xf32>
    %903 = arith.negf %902 : vector<32x32xf32>
    %904 = math.exp %903 : vector<32x32xf32>
    %cst_662 = arith.constant 1.000000e+00 : f32
    %905 = vector.broadcast %cst_662 : f32 to vector<32x32xf32>
    %906 = arith.addf %905, %904 : vector<32x32xf32>
    %907 = arith.divf %905, %906 : vector<32x32xf32>
    %908 = arith.addf %870, %894 : vector<32x32xf32>
    %909 = arith.negf %908 : vector<32x32xf32>
    %910 = math.exp %909 : vector<32x32xf32>
    %cst_663 = arith.constant 1.000000e+00 : f32
    %911 = vector.broadcast %cst_663 : f32 to vector<32x32xf32>
    %912 = arith.addf %911, %910 : vector<32x32xf32>
    %913 = arith.divf %911, %912 : vector<32x32xf32>
    %914 = arith.mulf %907, %901 : vector<32x32xf32>
    %915 = arith.addf %879, %914 : vector<32x32xf32>
    %916 = math.tanh %915 : vector<32x32xf32>
    %cst_664 = arith.constant 1.000000e+00 : f32
    %917 = vector.broadcast %cst_664 : f32 to vector<32x32xf32>
    %918 = arith.subf %917, %913 : vector<32x32xf32>
    %919 = arith.mulf %918, %916 : vector<32x32xf32>
    %920 = arith.mulf %913, %769 : vector<32x32xf32>
    %921 = arith.addf %919, %920 : vector<32x32xf32>
    %c0_665 = arith.constant 0 : index
    %c0_666 = arith.constant 0 : index
    %922 = vector.load %arg19[%c0_665, %c0_666] : memref<1x32xf32, #tpu.memory_space<vmem>>, vector<1x32xf32>
    %923 = vector.broadcast %922 : vector<1x32xf32> to vector<32x32xf32>
    %924 = arith.mulf %921, %923 : vector<32x32xf32>
    %cst_667 = arith.constant dense<0.000000e+00> : vector<32xf32>
    %925 = vector.multi_reduction <add>, %924, %cst_667 [1] : vector<32x32xf32> to vector<32xf32>
    %926 = vector.shape_cast %925 : vector<32xf32> to vector<32x1xf32>
    %927 = vector.broadcast %772 : f32 to vector<32x1xf32>
    %928 = arith.addf %926, %927 : vector<32x1xf32>
    %929 = arith.addf %928, %852 : vector<32x1xf32>
    %c0_668 = arith.constant 0 : index
    %c0_669 = arith.constant 0 : index
    %c0_670 = arith.constant 0 : index
    %930 = vector.load %arg7[%c0_668, %c0_669, %c0_670] : memref<3x1x32xf32, #tpu.memory_space<vmem>>, vector<1x1x32xf32>
    %931 = vector.shape_cast %930 : vector<1x1x32xf32> to vector<1x32xf32>
    %932 = vector.broadcast %850 : vector<8x1xf32> to vector<8x32xf32>
    %933 = vector.broadcast %931 : vector<1x32xf32> to vector<8x32xf32>
    %934 = arith.mulf %932, %933 : vector<8x32xf32>
    %c0_671 = arith.constant 0 : index
    %c0_672 = arith.constant 0 : index
    %c0_673 = arith.constant 0 : index
    %935 = vector.load %arg8[%c0_671, %c0_672, %c0_673] : memref<3x1x32xf32, #tpu.memory_space<vmem>>, vector<1x1x32xf32>
    %936 = vector.shape_cast %935 : vector<1x1x32xf32> to vector<1x32xf32>
    %937 = vector.broadcast %936 : vector<1x32xf32> to vector<8x32xf32>
    %938 = arith.addf %934, %937 : vector<8x32xf32>
    %c1_674 = arith.constant 1 : index
    %c0_675 = arith.constant 0 : index
    %c0_676 = arith.constant 0 : index
    %939 = vector.load %arg7[%c1_674, %c0_675, %c0_676] : memref<3x1x32xf32, #tpu.memory_space<vmem>>, vector<1x1x32xf32>
    %940 = vector.shape_cast %939 : vector<1x1x32xf32> to vector<1x32xf32>
    %941 = vector.broadcast %850 : vector<8x1xf32> to vector<8x32xf32>
    %942 = vector.broadcast %940 : vector<1x32xf32> to vector<8x32xf32>
    %943 = arith.mulf %941, %942 : vector<8x32xf32>
    %c1_677 = arith.constant 1 : index
    %c0_678 = arith.constant 0 : index
    %c0_679 = arith.constant 0 : index
    %944 = vector.load %arg8[%c1_677, %c0_678, %c0_679] : memref<3x1x32xf32, #tpu.memory_space<vmem>>, vector<1x1x32xf32>
    %945 = vector.shape_cast %944 : vector<1x1x32xf32> to vector<1x32xf32>
    %946 = vector.broadcast %945 : vector<1x32xf32> to vector<8x32xf32>
    %947 = arith.addf %943, %946 : vector<8x32xf32>
    %c2_680 = arith.constant 2 : index
    %c0_681 = arith.constant 0 : index
    %c0_682 = arith.constant 0 : index
    %948 = vector.load %arg7[%c2_680, %c0_681, %c0_682] : memref<3x1x32xf32, #tpu.memory_space<vmem>>, vector<1x1x32xf32>
    %949 = vector.shape_cast %948 : vector<1x1x32xf32> to vector<1x32xf32>
    %950 = vector.broadcast %850 : vector<8x1xf32> to vector<8x32xf32>
    %951 = vector.broadcast %949 : vector<1x32xf32> to vector<8x32xf32>
    %952 = arith.mulf %950, %951 : vector<8x32xf32>
    %c2_683 = arith.constant 2 : index
    %c0_684 = arith.constant 0 : index
    %c0_685 = arith.constant 0 : index
    %953 = vector.load %arg8[%c2_683, %c0_684, %c0_685] : memref<3x1x32xf32, #tpu.memory_space<vmem>>, vector<1x1x32xf32>
    %954 = vector.shape_cast %953 : vector<1x1x32xf32> to vector<1x32xf32>
    %955 = vector.broadcast %954 : vector<1x32xf32> to vector<8x32xf32>
    %956 = arith.addf %952, %955 : vector<8x32xf32>
    %957 = arith.truncf %843 : vector<8x32xf32> to vector<8x32xbf16>
    %c0_686 = arith.constant 0 : index
    %c0_687 = arith.constant 0 : index
    %c0_688 = arith.constant 0 : index
    %958 = vector.load %arg9[%c0_686, %c0_687, %c0_688] : memref<3x32x32xbf16, #tpu.memory_space<vmem>>, vector<1x32x32xbf16>
    %959 = vector.shape_cast %958 : vector<1x32x32xbf16> to vector<32x32xbf16>
    %cst_689 = arith.constant dense<0.000000e+00> : vector<8x32xf32>
    %960 = tpu.matmul %957, %959, %cst_689 {dimension_numbers = #tpu.dot_dimension_numbers<[1], [0], [0], [1], [0, 0, 1, 1], [], []>} : vector<8x32xbf16>, vector<32x32xbf16>, vector<8x32xf32> -> vector<8x32xf32>
    %c0_690 = arith.constant 0 : index
    %c0_691 = arith.constant 0 : index
    %c0_692 = arith.constant 0 : index
    %961 = vector.load %arg10[%c0_690, %c0_691, %c0_692] : memref<3x1x32xf32, #tpu.memory_space<vmem>>, vector<1x1x32xf32>
    %962 = vector.shape_cast %961 : vector<1x1x32xf32> to vector<1x32xf32>
    %963 = vector.broadcast %962 : vector<1x32xf32> to vector<8x32xf32>
    %964 = arith.addf %960, %963 : vector<8x32xf32>
    %c1_693 = arith.constant 1 : index
    %c0_694 = arith.constant 0 : index
    %c0_695 = arith.constant 0 : index
    %965 = vector.load %arg9[%c1_693, %c0_694, %c0_695] : memref<3x32x32xbf16, #tpu.memory_space<vmem>>, vector<1x32x32xbf16>
    %966 = vector.shape_cast %965 : vector<1x32x32xbf16> to vector<32x32xbf16>
    %cst_696 = arith.constant dense<0.000000e+00> : vector<8x32xf32>
    %967 = tpu.matmul %957, %966, %cst_696 {dimension_numbers = #tpu.dot_dimension_numbers<[1], [0], [0], [1], [0, 0, 1, 1], [], []>} : vector<8x32xbf16>, vector<32x32xbf16>, vector<8x32xf32> -> vector<8x32xf32>
    %c1_697 = arith.constant 1 : index
    %c0_698 = arith.constant 0 : index
    %c0_699 = arith.constant 0 : index
    %968 = vector.load %arg10[%c1_697, %c0_698, %c0_699] : memref<3x1x32xf32, #tpu.memory_space<vmem>>, vector<1x1x32xf32>
    %969 = vector.shape_cast %968 : vector<1x1x32xf32> to vector<1x32xf32>
    %970 = vector.broadcast %969 : vector<1x32xf32> to vector<8x32xf32>
    %971 = arith.addf %967, %970 : vector<8x32xf32>
    %c2_700 = arith.constant 2 : index
    %c0_701 = arith.constant 0 : index
    %c0_702 = arith.constant 0 : index
    %972 = vector.load %arg9[%c2_700, %c0_701, %c0_702] : memref<3x32x32xbf16, #tpu.memory_space<vmem>>, vector<1x32x32xbf16>
    %973 = vector.shape_cast %972 : vector<1x32x32xbf16> to vector<32x32xbf16>
    %cst_703 = arith.constant dense<0.000000e+00> : vector<8x32xf32>
    %974 = tpu.matmul %957, %973, %cst_703 {dimension_numbers = #tpu.dot_dimension_numbers<[1], [0], [0], [1], [0, 0, 1, 1], [], []>} : vector<8x32xbf16>, vector<32x32xbf16>, vector<8x32xf32> -> vector<8x32xf32>
    %c2_704 = arith.constant 2 : index
    %c0_705 = arith.constant 0 : index
    %c0_706 = arith.constant 0 : index
    %975 = vector.load %arg10[%c2_704, %c0_705, %c0_706] : memref<3x1x32xf32, #tpu.memory_space<vmem>>, vector<1x1x32xf32>
    %976 = vector.shape_cast %975 : vector<1x1x32xf32> to vector<1x32xf32>
    %977 = vector.broadcast %976 : vector<1x32xf32> to vector<8x32xf32>
    %978 = arith.addf %974, %977 : vector<8x32xf32>
    %979 = arith.addf %938, %964 : vector<8x32xf32>
    %980 = arith.negf %979 : vector<8x32xf32>
    %981 = math.exp %980 : vector<8x32xf32>
    %cst_707 = arith.constant 1.000000e+00 : f32
    %982 = vector.broadcast %cst_707 : f32 to vector<8x32xf32>
    %983 = arith.addf %982, %981 : vector<8x32xf32>
    %984 = arith.divf %982, %983 : vector<8x32xf32>
    %985 = arith.addf %947, %971 : vector<8x32xf32>
    %986 = arith.negf %985 : vector<8x32xf32>
    %987 = math.exp %986 : vector<8x32xf32>
    %cst_708 = arith.constant 1.000000e+00 : f32
    %988 = vector.broadcast %cst_708 : f32 to vector<8x32xf32>
    %989 = arith.addf %988, %987 : vector<8x32xf32>
    %990 = arith.divf %988, %989 : vector<8x32xf32>
    %991 = arith.mulf %984, %978 : vector<8x32xf32>
    %992 = arith.addf %956, %991 : vector<8x32xf32>
    %993 = math.tanh %992 : vector<8x32xf32>
    %cst_709 = arith.constant 1.000000e+00 : f32
    %994 = vector.broadcast %cst_709 : f32 to vector<8x32xf32>
    %995 = arith.subf %994, %990 : vector<8x32xf32>
    %996 = arith.mulf %995, %993 : vector<8x32xf32>
    %997 = arith.mulf %990, %843 : vector<8x32xf32>
    %998 = arith.addf %996, %997 : vector<8x32xf32>
    %c0_710 = arith.constant 0 : index
    %c0_711 = arith.constant 0 : index
    %999 = vector.load %arg11[%c0_710, %c0_711] : memref<1x32xf32, #tpu.memory_space<vmem>>, vector<1x32xf32>
    %1000 = vector.broadcast %999 : vector<1x32xf32> to vector<8x32xf32>
    %1001 = arith.mulf %998, %1000 : vector<8x32xf32>
    %cst_712 = arith.constant dense<0.000000e+00> : vector<8xf32>
    %1002 = vector.multi_reduction <add>, %1001, %cst_712 [1] : vector<8x32xf32> to vector<8xf32>
    %1003 = vector.shape_cast %1002 : vector<8xf32> to vector<8x1xf32>
    %1004 = vector.broadcast %771 : f32 to vector<8x1xf32>
    %1005 = arith.addf %1003, %1004 : vector<8x1xf32>
    %1006 = arith.subf %1005, %850 : vector<8x1xf32>
    %cst_713 = arith.constant dense<0.000000e+00> : vector<32x1xf32>
    %1007 = tpu.matmul %770, %1006, %cst_713 {dimension_numbers = #tpu.dot_dimension_numbers<[1], [0], [0], [1], [0, 0, 1, 1], [], []>} : vector<32x8xf32>, vector<8x1xf32>, vector<32x1xf32> -> vector<32x1xf32>
    %c0_714 = arith.constant 0 : index
    %c0_715 = arith.constant 0 : index
    %c0_716 = arith.constant 0 : index
    %1008 = vector.load %arg15[%c0_714, %c0_715, %c0_716] : memref<3x1x32xf32, #tpu.memory_space<vmem>>, vector<1x1x32xf32>
    %1009 = vector.shape_cast %1008 : vector<1x1x32xf32> to vector<1x32xf32>
    %1010 = vector.broadcast %929 : vector<32x1xf32> to vector<32x32xf32>
    %1011 = vector.broadcast %1009 : vector<1x32xf32> to vector<32x32xf32>
    %1012 = arith.mulf %1010, %1011 : vector<32x32xf32>
    %c0_717 = arith.constant 0 : index
    %c0_718 = arith.constant 0 : index
    %c0_719 = arith.constant 0 : index
    %1013 = vector.load %arg16[%c0_717, %c0_718, %c0_719] : memref<3x1x32xf32, #tpu.memory_space<vmem>>, vector<1x1x32xf32>
    %1014 = vector.shape_cast %1013 : vector<1x1x32xf32> to vector<1x32xf32>
    %1015 = vector.broadcast %1014 : vector<1x32xf32> to vector<32x32xf32>
    %1016 = arith.addf %1012, %1015 : vector<32x32xf32>
    %c1_720 = arith.constant 1 : index
    %c0_721 = arith.constant 0 : index
    %c0_722 = arith.constant 0 : index
    %1017 = vector.load %arg15[%c1_720, %c0_721, %c0_722] : memref<3x1x32xf32, #tpu.memory_space<vmem>>, vector<1x1x32xf32>
    %1018 = vector.shape_cast %1017 : vector<1x1x32xf32> to vector<1x32xf32>
    %1019 = vector.broadcast %929 : vector<32x1xf32> to vector<32x32xf32>
    %1020 = vector.broadcast %1018 : vector<1x32xf32> to vector<32x32xf32>
    %1021 = arith.mulf %1019, %1020 : vector<32x32xf32>
    %c1_723 = arith.constant 1 : index
    %c0_724 = arith.constant 0 : index
    %c0_725 = arith.constant 0 : index
    %1022 = vector.load %arg16[%c1_723, %c0_724, %c0_725] : memref<3x1x32xf32, #tpu.memory_space<vmem>>, vector<1x1x32xf32>
    %1023 = vector.shape_cast %1022 : vector<1x1x32xf32> to vector<1x32xf32>
    %1024 = vector.broadcast %1023 : vector<1x32xf32> to vector<32x32xf32>
    %1025 = arith.addf %1021, %1024 : vector<32x32xf32>
    %c2_726 = arith.constant 2 : index
    %c0_727 = arith.constant 0 : index
    %c0_728 = arith.constant 0 : index
    %1026 = vector.load %arg15[%c2_726, %c0_727, %c0_728] : memref<3x1x32xf32, #tpu.memory_space<vmem>>, vector<1x1x32xf32>
    %1027 = vector.shape_cast %1026 : vector<1x1x32xf32> to vector<1x32xf32>
    %1028 = vector.broadcast %929 : vector<32x1xf32> to vector<32x32xf32>
    %1029 = vector.broadcast %1027 : vector<1x32xf32> to vector<32x32xf32>
    %1030 = arith.mulf %1028, %1029 : vector<32x32xf32>
    %c2_729 = arith.constant 2 : index
    %c0_730 = arith.constant 0 : index
    %c0_731 = arith.constant 0 : index
    %1031 = vector.load %arg16[%c2_729, %c0_730, %c0_731] : memref<3x1x32xf32, #tpu.memory_space<vmem>>, vector<1x1x32xf32>
    %1032 = vector.shape_cast %1031 : vector<1x1x32xf32> to vector<1x32xf32>
    %1033 = vector.broadcast %1032 : vector<1x32xf32> to vector<32x32xf32>
    %1034 = arith.addf %1030, %1033 : vector<32x32xf32>
    %1035 = arith.truncf %921 : vector<32x32xf32> to vector<32x32xbf16>
    %c0_732 = arith.constant 0 : index
    %c0_733 = arith.constant 0 : index
    %c0_734 = arith.constant 0 : index
    %1036 = vector.load %arg17[%c0_732, %c0_733, %c0_734] : memref<3x32x32xbf16, #tpu.memory_space<vmem>>, vector<1x32x32xbf16>
    %1037 = vector.shape_cast %1036 : vector<1x32x32xbf16> to vector<32x32xbf16>
    %cst_735 = arith.constant dense<0.000000e+00> : vector<32x32xf32>
    %1038 = tpu.matmul %1035, %1037, %cst_735 {dimension_numbers = #tpu.dot_dimension_numbers<[1], [0], [0], [1], [0, 0, 1, 1], [], []>} : vector<32x32xbf16>, vector<32x32xbf16>, vector<32x32xf32> -> vector<32x32xf32>
    %c0_736 = arith.constant 0 : index
    %c0_737 = arith.constant 0 : index
    %c0_738 = arith.constant 0 : index
    %1039 = vector.load %arg18[%c0_736, %c0_737, %c0_738] : memref<3x1x32xf32, #tpu.memory_space<vmem>>, vector<1x1x32xf32>
    %1040 = vector.shape_cast %1039 : vector<1x1x32xf32> to vector<1x32xf32>
    %1041 = vector.broadcast %1040 : vector<1x32xf32> to vector<32x32xf32>
    %1042 = arith.addf %1038, %1041 : vector<32x32xf32>
    %c1_739 = arith.constant 1 : index
    %c0_740 = arith.constant 0 : index
    %c0_741 = arith.constant 0 : index
    %1043 = vector.load %arg17[%c1_739, %c0_740, %c0_741] : memref<3x32x32xbf16, #tpu.memory_space<vmem>>, vector<1x32x32xbf16>
    %1044 = vector.shape_cast %1043 : vector<1x32x32xbf16> to vector<32x32xbf16>
    %cst_742 = arith.constant dense<0.000000e+00> : vector<32x32xf32>
    %1045 = tpu.matmul %1035, %1044, %cst_742 {dimension_numbers = #tpu.dot_dimension_numbers<[1], [0], [0], [1], [0, 0, 1, 1], [], []>} : vector<32x32xbf16>, vector<32x32xbf16>, vector<32x32xf32> -> vector<32x32xf32>
    %c1_743 = arith.constant 1 : index
    %c0_744 = arith.constant 0 : index
    %c0_745 = arith.constant 0 : index
    %1046 = vector.load %arg18[%c1_743, %c0_744, %c0_745] : memref<3x1x32xf32, #tpu.memory_space<vmem>>, vector<1x1x32xf32>
    %1047 = vector.shape_cast %1046 : vector<1x1x32xf32> to vector<1x32xf32>
    %1048 = vector.broadcast %1047 : vector<1x32xf32> to vector<32x32xf32>
    %1049 = arith.addf %1045, %1048 : vector<32x32xf32>
    %c2_746 = arith.constant 2 : index
    %c0_747 = arith.constant 0 : index
    %c0_748 = arith.constant 0 : index
    %1050 = vector.load %arg17[%c2_746, %c0_747, %c0_748] : memref<3x32x32xbf16, #tpu.memory_space<vmem>>, vector<1x32x32xbf16>
    %1051 = vector.shape_cast %1050 : vector<1x32x32xbf16> to vector<32x32xbf16>
    %cst_749 = arith.constant dense<0.000000e+00> : vector<32x32xf32>
    %1052 = tpu.matmul %1035, %1051, %cst_749 {dimension_numbers = #tpu.dot_dimension_numbers<[1], [0], [0], [1], [0, 0, 1, 1], [], []>} : vector<32x32xbf16>, vector<32x32xbf16>, vector<32x32xf32> -> vector<32x32xf32>
    %c2_750 = arith.constant 2 : index
    %c0_751 = arith.constant 0 : index
    %c0_752 = arith.constant 0 : index
    %1053 = vector.load %arg18[%c2_750, %c0_751, %c0_752] : memref<3x1x32xf32, #tpu.memory_space<vmem>>, vector<1x1x32xf32>
    %1054 = vector.shape_cast %1053 : vector<1x1x32xf32> to vector<1x32xf32>
    %1055 = vector.broadcast %1054 : vector<1x32xf32> to vector<32x32xf32>
    %1056 = arith.addf %1052, %1055 : vector<32x32xf32>
    %1057 = arith.addf %1016, %1042 : vector<32x32xf32>
    %1058 = arith.negf %1057 : vector<32x32xf32>
    %1059 = math.exp %1058 : vector<32x32xf32>
    %cst_753 = arith.constant 1.000000e+00 : f32
    %1060 = vector.broadcast %cst_753 : f32 to vector<32x32xf32>
    %1061 = arith.addf %1060, %1059 : vector<32x32xf32>
    %1062 = arith.divf %1060, %1061 : vector<32x32xf32>
    %1063 = arith.addf %1025, %1049 : vector<32x32xf32>
    %1064 = arith.negf %1063 : vector<32x32xf32>
    %1065 = math.exp %1064 : vector<32x32xf32>
    %cst_754 = arith.constant 1.000000e+00 : f32
    %1066 = vector.broadcast %cst_754 : f32 to vector<32x32xf32>
    %1067 = arith.addf %1066, %1065 : vector<32x32xf32>
    %1068 = arith.divf %1066, %1067 : vector<32x32xf32>
    %1069 = arith.mulf %1062, %1056 : vector<32x32xf32>
    %1070 = arith.addf %1034, %1069 : vector<32x32xf32>
    %1071 = math.tanh %1070 : vector<32x32xf32>
    %cst_755 = arith.constant 1.000000e+00 : f32
    %1072 = vector.broadcast %cst_755 : f32 to vector<32x32xf32>
    %1073 = arith.subf %1072, %1068 : vector<32x32xf32>
    %1074 = arith.mulf %1073, %1071 : vector<32x32xf32>
    %1075 = arith.mulf %1068, %921 : vector<32x32xf32>
    %1076 = arith.addf %1074, %1075 : vector<32x32xf32>
    %c0_756 = arith.constant 0 : index
    %c0_757 = arith.constant 0 : index
    %1077 = vector.load %arg19[%c0_756, %c0_757] : memref<1x32xf32, #tpu.memory_space<vmem>>, vector<1x32xf32>
    %1078 = vector.broadcast %1077 : vector<1x32xf32> to vector<32x32xf32>
    %1079 = arith.mulf %1076, %1078 : vector<32x32xf32>
    %cst_758 = arith.constant dense<0.000000e+00> : vector<32xf32>
    %1080 = vector.multi_reduction <add>, %1079, %cst_758 [1] : vector<32x32xf32> to vector<32xf32>
    %1081 = vector.shape_cast %1080 : vector<32xf32> to vector<32x1xf32>
    %1082 = vector.broadcast %772 : f32 to vector<32x1xf32>
    %1083 = arith.addf %1081, %1082 : vector<32x1xf32>
    %1084 = arith.addf %1083, %1007 : vector<32x1xf32>
    %c0_759 = arith.constant 0 : index
    %c0_760 = arith.constant 0 : index
    %c0_761 = arith.constant 0 : index
    %1085 = vector.load %arg7[%c0_759, %c0_760, %c0_761] : memref<3x1x32xf32, #tpu.memory_space<vmem>>, vector<1x1x32xf32>
    %1086 = vector.shape_cast %1085 : vector<1x1x32xf32> to vector<1x32xf32>
    %1087 = vector.broadcast %1005 : vector<8x1xf32> to vector<8x32xf32>
    %1088 = vector.broadcast %1086 : vector<1x32xf32> to vector<8x32xf32>
    %1089 = arith.mulf %1087, %1088 : vector<8x32xf32>
    %c0_762 = arith.constant 0 : index
    %c0_763 = arith.constant 0 : index
    %c0_764 = arith.constant 0 : index
    %1090 = vector.load %arg8[%c0_762, %c0_763, %c0_764] : memref<3x1x32xf32, #tpu.memory_space<vmem>>, vector<1x1x32xf32>
    %1091 = vector.shape_cast %1090 : vector<1x1x32xf32> to vector<1x32xf32>
    %1092 = vector.broadcast %1091 : vector<1x32xf32> to vector<8x32xf32>
    %1093 = arith.addf %1089, %1092 : vector<8x32xf32>
    %c1_765 = arith.constant 1 : index
    %c0_766 = arith.constant 0 : index
    %c0_767 = arith.constant 0 : index
    %1094 = vector.load %arg7[%c1_765, %c0_766, %c0_767] : memref<3x1x32xf32, #tpu.memory_space<vmem>>, vector<1x1x32xf32>
    %1095 = vector.shape_cast %1094 : vector<1x1x32xf32> to vector<1x32xf32>
    %1096 = vector.broadcast %1005 : vector<8x1xf32> to vector<8x32xf32>
    %1097 = vector.broadcast %1095 : vector<1x32xf32> to vector<8x32xf32>
    %1098 = arith.mulf %1096, %1097 : vector<8x32xf32>
    %c1_768 = arith.constant 1 : index
    %c0_769 = arith.constant 0 : index
    %c0_770 = arith.constant 0 : index
    %1099 = vector.load %arg8[%c1_768, %c0_769, %c0_770] : memref<3x1x32xf32, #tpu.memory_space<vmem>>, vector<1x1x32xf32>
    %1100 = vector.shape_cast %1099 : vector<1x1x32xf32> to vector<1x32xf32>
    %1101 = vector.broadcast %1100 : vector<1x32xf32> to vector<8x32xf32>
    %1102 = arith.addf %1098, %1101 : vector<8x32xf32>
    %c2_771 = arith.constant 2 : index
    %c0_772 = arith.constant 0 : index
    %c0_773 = arith.constant 0 : index
    %1103 = vector.load %arg7[%c2_771, %c0_772, %c0_773] : memref<3x1x32xf32, #tpu.memory_space<vmem>>, vector<1x1x32xf32>
    %1104 = vector.shape_cast %1103 : vector<1x1x32xf32> to vector<1x32xf32>
    %1105 = vector.broadcast %1005 : vector<8x1xf32> to vector<8x32xf32>
    %1106 = vector.broadcast %1104 : vector<1x32xf32> to vector<8x32xf32>
    %1107 = arith.mulf %1105, %1106 : vector<8x32xf32>
    %c2_774 = arith.constant 2 : index
    %c0_775 = arith.constant 0 : index
    %c0_776 = arith.constant 0 : index
    %1108 = vector.load %arg8[%c2_774, %c0_775, %c0_776] : memref<3x1x32xf32, #tpu.memory_space<vmem>>, vector<1x1x32xf32>
    %1109 = vector.shape_cast %1108 : vector<1x1x32xf32> to vector<1x32xf32>
    %1110 = vector.broadcast %1109 : vector<1x32xf32> to vector<8x32xf32>
    %1111 = arith.addf %1107, %1110 : vector<8x32xf32>
    %1112 = arith.truncf %998 : vector<8x32xf32> to vector<8x32xbf16>
    %c0_777 = arith.constant 0 : index
    %c0_778 = arith.constant 0 : index
    %c0_779 = arith.constant 0 : index
    %1113 = vector.load %arg9[%c0_777, %c0_778, %c0_779] : memref<3x32x32xbf16, #tpu.memory_space<vmem>>, vector<1x32x32xbf16>
    %1114 = vector.shape_cast %1113 : vector<1x32x32xbf16> to vector<32x32xbf16>
    %cst_780 = arith.constant dense<0.000000e+00> : vector<8x32xf32>
    %1115 = tpu.matmul %1112, %1114, %cst_780 {dimension_numbers = #tpu.dot_dimension_numbers<[1], [0], [0], [1], [0, 0, 1, 1], [], []>} : vector<8x32xbf16>, vector<32x32xbf16>, vector<8x32xf32> -> vector<8x32xf32>
    %c0_781 = arith.constant 0 : index
    %c0_782 = arith.constant 0 : index
    %c0_783 = arith.constant 0 : index
    %1116 = vector.load %arg10[%c0_781, %c0_782, %c0_783] : memref<3x1x32xf32, #tpu.memory_space<vmem>>, vector<1x1x32xf32>
    %1117 = vector.shape_cast %1116 : vector<1x1x32xf32> to vector<1x32xf32>
    %1118 = vector.broadcast %1117 : vector<1x32xf32> to vector<8x32xf32>
    %1119 = arith.addf %1115, %1118 : vector<8x32xf32>
    %c1_784 = arith.constant 1 : index
    %c0_785 = arith.constant 0 : index
    %c0_786 = arith.constant 0 : index
    %1120 = vector.load %arg9[%c1_784, %c0_785, %c0_786] : memref<3x32x32xbf16, #tpu.memory_space<vmem>>, vector<1x32x32xbf16>
    %1121 = vector.shape_cast %1120 : vector<1x32x32xbf16> to vector<32x32xbf16>
    %cst_787 = arith.constant dense<0.000000e+00> : vector<8x32xf32>
    %1122 = tpu.matmul %1112, %1121, %cst_787 {dimension_numbers = #tpu.dot_dimension_numbers<[1], [0], [0], [1], [0, 0, 1, 1], [], []>} : vector<8x32xbf16>, vector<32x32xbf16>, vector<8x32xf32> -> vector<8x32xf32>
    %c1_788 = arith.constant 1 : index
    %c0_789 = arith.constant 0 : index
    %c0_790 = arith.constant 0 : index
    %1123 = vector.load %arg10[%c1_788, %c0_789, %c0_790] : memref<3x1x32xf32, #tpu.memory_space<vmem>>, vector<1x1x32xf32>
    %1124 = vector.shape_cast %1123 : vector<1x1x32xf32> to vector<1x32xf32>
    %1125 = vector.broadcast %1124 : vector<1x32xf32> to vector<8x32xf32>
    %1126 = arith.addf %1122, %1125 : vector<8x32xf32>
    %c2_791 = arith.constant 2 : index
    %c0_792 = arith.constant 0 : index
    %c0_793 = arith.constant 0 : index
    %1127 = vector.load %arg9[%c2_791, %c0_792, %c0_793] : memref<3x32x32xbf16, #tpu.memory_space<vmem>>, vector<1x32x32xbf16>
    %1128 = vector.shape_cast %1127 : vector<1x32x32xbf16> to vector<32x32xbf16>
    %cst_794 = arith.constant dense<0.000000e+00> : vector<8x32xf32>
    %1129 = tpu.matmul %1112, %1128, %cst_794 {dimension_numbers = #tpu.dot_dimension_numbers<[1], [0], [0], [1], [0, 0, 1, 1], [], []>} : vector<8x32xbf16>, vector<32x32xbf16>, vector<8x32xf32> -> vector<8x32xf32>
    %c2_795 = arith.constant 2 : index
    %c0_796 = arith.constant 0 : index
    %c0_797 = arith.constant 0 : index
    %1130 = vector.load %arg10[%c2_795, %c0_796, %c0_797] : memref<3x1x32xf32, #tpu.memory_space<vmem>>, vector<1x1x32xf32>
    %1131 = vector.shape_cast %1130 : vector<1x1x32xf32> to vector<1x32xf32>
    %1132 = vector.broadcast %1131 : vector<1x32xf32> to vector<8x32xf32>
    %1133 = arith.addf %1129, %1132 : vector<8x32xf32>
    %1134 = arith.addf %1093, %1119 : vector<8x32xf32>
    %1135 = arith.negf %1134 : vector<8x32xf32>
    %1136 = math.exp %1135 : vector<8x32xf32>
    %cst_798 = arith.constant 1.000000e+00 : f32
    %1137 = vector.broadcast %cst_798 : f32 to vector<8x32xf32>
    %1138 = arith.addf %1137, %1136 : vector<8x32xf32>
    %1139 = arith.divf %1137, %1138 : vector<8x32xf32>
    %1140 = arith.addf %1102, %1126 : vector<8x32xf32>
    %1141 = arith.negf %1140 : vector<8x32xf32>
    %1142 = math.exp %1141 : vector<8x32xf32>
    %cst_799 = arith.constant 1.000000e+00 : f32
    %1143 = vector.broadcast %cst_799 : f32 to vector<8x32xf32>
    %1144 = arith.addf %1143, %1142 : vector<8x32xf32>
    %1145 = arith.divf %1143, %1144 : vector<8x32xf32>
    %1146 = arith.mulf %1139, %1133 : vector<8x32xf32>
    %1147 = arith.addf %1111, %1146 : vector<8x32xf32>
    %1148 = math.tanh %1147 : vector<8x32xf32>
    %cst_800 = arith.constant 1.000000e+00 : f32
    %1149 = vector.broadcast %cst_800 : f32 to vector<8x32xf32>
    %1150 = arith.subf %1149, %1145 : vector<8x32xf32>
    %1151 = arith.mulf %1150, %1148 : vector<8x32xf32>
    %1152 = arith.mulf %1145, %998 : vector<8x32xf32>
    %1153 = arith.addf %1151, %1152 : vector<8x32xf32>
    %c0_801 = arith.constant 0 : index
    %c0_802 = arith.constant 0 : index
    %1154 = vector.load %arg11[%c0_801, %c0_802] : memref<1x32xf32, #tpu.memory_space<vmem>>, vector<1x32xf32>
    %1155 = vector.broadcast %1154 : vector<1x32xf32> to vector<8x32xf32>
    %1156 = arith.mulf %1153, %1155 : vector<8x32xf32>
    %cst_803 = arith.constant dense<0.000000e+00> : vector<8xf32>
    %1157 = vector.multi_reduction <add>, %1156, %cst_803 [1] : vector<8x32xf32> to vector<8xf32>
    %1158 = vector.shape_cast %1157 : vector<8xf32> to vector<8x1xf32>
    %1159 = vector.broadcast %771 : f32 to vector<8x1xf32>
    %1160 = arith.addf %1158, %1159 : vector<8x1xf32>
    %1161 = arith.subf %1160, %1005 : vector<8x1xf32>
    %cst_804 = arith.constant dense<0.000000e+00> : vector<32x1xf32>
    %1162 = tpu.matmul %770, %1161, %cst_804 {dimension_numbers = #tpu.dot_dimension_numbers<[1], [0], [0], [1], [0, 0, 1, 1], [], []>} : vector<32x8xf32>, vector<8x1xf32>, vector<32x1xf32> -> vector<32x1xf32>
    %c0_805 = arith.constant 0 : index
    %c0_806 = arith.constant 0 : index
    %c0_807 = arith.constant 0 : index
    %1163 = vector.load %arg15[%c0_805, %c0_806, %c0_807] : memref<3x1x32xf32, #tpu.memory_space<vmem>>, vector<1x1x32xf32>
    %1164 = vector.shape_cast %1163 : vector<1x1x32xf32> to vector<1x32xf32>
    %1165 = vector.broadcast %1084 : vector<32x1xf32> to vector<32x32xf32>
    %1166 = vector.broadcast %1164 : vector<1x32xf32> to vector<32x32xf32>
    %1167 = arith.mulf %1165, %1166 : vector<32x32xf32>
    %c0_808 = arith.constant 0 : index
    %c0_809 = arith.constant 0 : index
    %c0_810 = arith.constant 0 : index
    %1168 = vector.load %arg16[%c0_808, %c0_809, %c0_810] : memref<3x1x32xf32, #tpu.memory_space<vmem>>, vector<1x1x32xf32>
    %1169 = vector.shape_cast %1168 : vector<1x1x32xf32> to vector<1x32xf32>
    %1170 = vector.broadcast %1169 : vector<1x32xf32> to vector<32x32xf32>
    %1171 = arith.addf %1167, %1170 : vector<32x32xf32>
    %c1_811 = arith.constant 1 : index
    %c0_812 = arith.constant 0 : index
    %c0_813 = arith.constant 0 : index
    %1172 = vector.load %arg15[%c1_811, %c0_812, %c0_813] : memref<3x1x32xf32, #tpu.memory_space<vmem>>, vector<1x1x32xf32>
    %1173 = vector.shape_cast %1172 : vector<1x1x32xf32> to vector<1x32xf32>
    %1174 = vector.broadcast %1084 : vector<32x1xf32> to vector<32x32xf32>
    %1175 = vector.broadcast %1173 : vector<1x32xf32> to vector<32x32xf32>
    %1176 = arith.mulf %1174, %1175 : vector<32x32xf32>
    %c1_814 = arith.constant 1 : index
    %c0_815 = arith.constant 0 : index
    %c0_816 = arith.constant 0 : index
    %1177 = vector.load %arg16[%c1_814, %c0_815, %c0_816] : memref<3x1x32xf32, #tpu.memory_space<vmem>>, vector<1x1x32xf32>
    %1178 = vector.shape_cast %1177 : vector<1x1x32xf32> to vector<1x32xf32>
    %1179 = vector.broadcast %1178 : vector<1x32xf32> to vector<32x32xf32>
    %1180 = arith.addf %1176, %1179 : vector<32x32xf32>
    %c2_817 = arith.constant 2 : index
    %c0_818 = arith.constant 0 : index
    %c0_819 = arith.constant 0 : index
    %1181 = vector.load %arg15[%c2_817, %c0_818, %c0_819] : memref<3x1x32xf32, #tpu.memory_space<vmem>>, vector<1x1x32xf32>
    %1182 = vector.shape_cast %1181 : vector<1x1x32xf32> to vector<1x32xf32>
    %1183 = vector.broadcast %1084 : vector<32x1xf32> to vector<32x32xf32>
    %1184 = vector.broadcast %1182 : vector<1x32xf32> to vector<32x32xf32>
    %1185 = arith.mulf %1183, %1184 : vector<32x32xf32>
    %c2_820 = arith.constant 2 : index
    %c0_821 = arith.constant 0 : index
    %c0_822 = arith.constant 0 : index
    %1186 = vector.load %arg16[%c2_820, %c0_821, %c0_822] : memref<3x1x32xf32, #tpu.memory_space<vmem>>, vector<1x1x32xf32>
    %1187 = vector.shape_cast %1186 : vector<1x1x32xf32> to vector<1x32xf32>
    %1188 = vector.broadcast %1187 : vector<1x32xf32> to vector<32x32xf32>
    %1189 = arith.addf %1185, %1188 : vector<32x32xf32>
    %1190 = arith.truncf %1076 : vector<32x32xf32> to vector<32x32xbf16>
    %c0_823 = arith.constant 0 : index
    %c0_824 = arith.constant 0 : index
    %c0_825 = arith.constant 0 : index
    %1191 = vector.load %arg17[%c0_823, %c0_824, %c0_825] : memref<3x32x32xbf16, #tpu.memory_space<vmem>>, vector<1x32x32xbf16>
    %1192 = vector.shape_cast %1191 : vector<1x32x32xbf16> to vector<32x32xbf16>
    %cst_826 = arith.constant dense<0.000000e+00> : vector<32x32xf32>
    %1193 = tpu.matmul %1190, %1192, %cst_826 {dimension_numbers = #tpu.dot_dimension_numbers<[1], [0], [0], [1], [0, 0, 1, 1], [], []>} : vector<32x32xbf16>, vector<32x32xbf16>, vector<32x32xf32> -> vector<32x32xf32>
    %c0_827 = arith.constant 0 : index
    %c0_828 = arith.constant 0 : index
    %c0_829 = arith.constant 0 : index
    %1194 = vector.load %arg18[%c0_827, %c0_828, %c0_829] : memref<3x1x32xf32, #tpu.memory_space<vmem>>, vector<1x1x32xf32>
    %1195 = vector.shape_cast %1194 : vector<1x1x32xf32> to vector<1x32xf32>
    %1196 = vector.broadcast %1195 : vector<1x32xf32> to vector<32x32xf32>
    %1197 = arith.addf %1193, %1196 : vector<32x32xf32>
    %c1_830 = arith.constant 1 : index
    %c0_831 = arith.constant 0 : index
    %c0_832 = arith.constant 0 : index
    %1198 = vector.load %arg17[%c1_830, %c0_831, %c0_832] : memref<3x32x32xbf16, #tpu.memory_space<vmem>>, vector<1x32x32xbf16>
    %1199 = vector.shape_cast %1198 : vector<1x32x32xbf16> to vector<32x32xbf16>
    %cst_833 = arith.constant dense<0.000000e+00> : vector<32x32xf32>
    %1200 = tpu.matmul %1190, %1199, %cst_833 {dimension_numbers = #tpu.dot_dimension_numbers<[1], [0], [0], [1], [0, 0, 1, 1], [], []>} : vector<32x32xbf16>, vector<32x32xbf16>, vector<32x32xf32> -> vector<32x32xf32>
    %c1_834 = arith.constant 1 : index
    %c0_835 = arith.constant 0 : index
    %c0_836 = arith.constant 0 : index
    %1201 = vector.load %arg18[%c1_834, %c0_835, %c0_836] : memref<3x1x32xf32, #tpu.memory_space<vmem>>, vector<1x1x32xf32>
    %1202 = vector.shape_cast %1201 : vector<1x1x32xf32> to vector<1x32xf32>
    %1203 = vector.broadcast %1202 : vector<1x32xf32> to vector<32x32xf32>
    %1204 = arith.addf %1200, %1203 : vector<32x32xf32>
    %c2_837 = arith.constant 2 : index
    %c0_838 = arith.constant 0 : index
    %c0_839 = arith.constant 0 : index
    %1205 = vector.load %arg17[%c2_837, %c0_838, %c0_839] : memref<3x32x32xbf16, #tpu.memory_space<vmem>>, vector<1x32x32xbf16>
    %1206 = vector.shape_cast %1205 : vector<1x32x32xbf16> to vector<32x32xbf16>
    %cst_840 = arith.constant dense<0.000000e+00> : vector<32x32xf32>
    %1207 = tpu.matmul %1190, %1206, %cst_840 {dimension_numbers = #tpu.dot_dimension_numbers<[1], [0], [0], [1], [0, 0, 1, 1], [], []>} : vector<32x32xbf16>, vector<32x32xbf16>, vector<32x32xf32> -> vector<32x32xf32>
    %c2_841 = arith.constant 2 : index
    %c0_842 = arith.constant 0 : index
    %c0_843 = arith.constant 0 : index
    %1208 = vector.load %arg18[%c2_841, %c0_842, %c0_843] : memref<3x1x32xf32, #tpu.memory_space<vmem>>, vector<1x1x32xf32>
    %1209 = vector.shape_cast %1208 : vector<1x1x32xf32> to vector<1x32xf32>
    %1210 = vector.broadcast %1209 : vector<1x32xf32> to vector<32x32xf32>
    %1211 = arith.addf %1207, %1210 : vector<32x32xf32>
    %1212 = arith.addf %1171, %1197 : vector<32x32xf32>
    %1213 = arith.negf %1212 : vector<32x32xf32>
    %1214 = math.exp %1213 : vector<32x32xf32>
    %cst_844 = arith.constant 1.000000e+00 : f32
    %1215 = vector.broadcast %cst_844 : f32 to vector<32x32xf32>
    %1216 = arith.addf %1215, %1214 : vector<32x32xf32>
    %1217 = arith.divf %1215, %1216 : vector<32x32xf32>
    %1218 = arith.addf %1180, %1204 : vector<32x32xf32>
    %1219 = arith.negf %1218 : vector<32x32xf32>
    %1220 = math.exp %1219 : vector<32x32xf32>
    %cst_845 = arith.constant 1.000000e+00 : f32
    %1221 = vector.broadcast %cst_845 : f32 to vector<32x32xf32>
    %1222 = arith.addf %1221, %1220 : vector<32x32xf32>
    %1223 = arith.divf %1221, %1222 : vector<32x32xf32>
    %1224 = arith.mulf %1217, %1211 : vector<32x32xf32>
    %1225 = arith.addf %1189, %1224 : vector<32x32xf32>
    %1226 = math.tanh %1225 : vector<32x32xf32>
    %cst_846 = arith.constant 1.000000e+00 : f32
    %1227 = vector.broadcast %cst_846 : f32 to vector<32x32xf32>
    %1228 = arith.subf %1227, %1223 : vector<32x32xf32>
    %1229 = arith.mulf %1228, %1226 : vector<32x32xf32>
    %1230 = arith.mulf %1223, %1076 : vector<32x32xf32>
    %1231 = arith.addf %1229, %1230 : vector<32x32xf32>
    %c0_847 = arith.constant 0 : index
    %c0_848 = arith.constant 0 : index
    %1232 = vector.load %arg19[%c0_847, %c0_848] : memref<1x32xf32, #tpu.memory_space<vmem>>, vector<1x32xf32>
    %1233 = vector.broadcast %1232 : vector<1x32xf32> to vector<32x32xf32>
    %1234 = arith.mulf %1231, %1233 : vector<32x32xf32>
    %cst_849 = arith.constant dense<0.000000e+00> : vector<32xf32>
    %1235 = vector.multi_reduction <add>, %1234, %cst_849 [1] : vector<32x32xf32> to vector<32xf32>
    %1236 = vector.shape_cast %1235 : vector<32xf32> to vector<32x1xf32>
    %1237 = vector.broadcast %772 : f32 to vector<32x1xf32>
    %1238 = arith.addf %1236, %1237 : vector<32x1xf32>
    %1239 = arith.addf %1238, %1162 : vector<32x1xf32>
    %cst_850 = arith.constant 0.000000e+00 : f32
    %1240 = vector.broadcast %cst_850 : f32 to vector<8x125xf32>
    %cst_851 = arith.constant 0.000000e+00 : f32
    %1241 = vector.broadcast %cst_851 : f32 to vector<32x125xf32>
    %1242 = tpu.concatenate %850, %1005, %1160, %1240 in 1 : vector<8x1xf32>, vector<8x1xf32>, vector<8x1xf32>, vector<8x125xf32> -> vector<8x128xf32>
    %c0_852 = arith.constant 0 : index
    %c0_853 = arith.constant 0 : index
    %1243 = vector.load %arg22[%c0_852, %c0_853] : memref<8x128xf32, #tpu.memory_space<vmem>>, vector<8x128xf32>
    tpu.vector_store %arg22[%c0_852, %c0_853], %1242 {strides = array<i32>} : memref<8x128xf32, #tpu.memory_space<vmem>>, vector<8x128xf32>,
    %1244 = tpu.concatenate %929, %1084, %1239, %1241 in 1 : vector<32x1xf32>, vector<32x1xf32>, vector<32x1xf32>, vector<32x125xf32> -> vector<32x128xf32>
    %c0_854 = arith.constant 0 : index
    %c0_855 = arith.constant 0 : index
    %1245 = vector.load %arg21[%c0_854, %c0_855] : memref<32x128xf32, #tpu.memory_space<vmem>>, vector<32x128xf32>
    tpu.vector_store %arg21[%c0_854, %c0_855], %1244 {strides = array<i32>} : memref<32x128xf32, #tpu.memory_space<vmem>>, vector<32x128xf32>,
    return
  }
}

</mosaic_0001>

<bundles_post_ra>
// kernel: squeeze.0
= control target key start
LH: loop header
LB: loop body
LE: loop exit
PB: predicated region body
PF: predicated region fallthrough
CT: control target
= control target key end

     0   :  { %s130_s8 = smov 125   ;;  %s131_s9 = smov 126   ;;  %vm7_vm0 = vcmask 7168   ;;  %s221_s0 = inlined_call_operand.vmem [shape: f32[2,16], index: 0, kind: input, shape index: {}]   ;;  %s222_s1 = inlined_call_operand.vmem [shape: f32[32,1], index: 1, kind: output, shape index: {}]  }
   0x1   :  { %v4_v0 = vld [vmem:[%s221_s0] sm:$0x3]  ;;  %s129_s0 = smov 127   ;;  %s132_s10 = smov 124  }
   0x2   :  { %5 = vst [vmem:[#allocation0] sm:$0x3] %v4_v0  ;;  %s133_s11 = smov 123   ;;  %s134_s12 = smov 122  }
   0x3   :  { %s135_s13 = smov 121   ;;  %s136_s14 = smov 120  }
   0x4   :  { %s137_s17 = smov 119   ;;  %s138_s18 = smov 118  }
   0x5   :  { %s139_s19 = smov 117   ;;  %s140_s20 = smov 116  }
   0x6   :  { %s141_s21 = smov 115   ;;  %s142_s22 = smov 114  }
   0x7   :  { %s143_s23 = smov 113  }
   0x9   :  { %v9_v1 = vld [vmem:[#allocation0] sm:$0x3]  }
   0xa   :  { %v21_v2 = vld [vmem:[#allocation0] sm:$0x3]   ;;  %10 = vrot.lane.b32.xlu0 %v9_v1, %s129_s0 }
   0xb   :  { %22 = vrot.lane.b32.xlu1 %v21_v2, %s130_s8  ;;  %v15_v3 = vld [vmem:[#allocation0] sm:$0x3]  }
   0xc   :  { %v27_v4 = vld [vmem:[#allocation0] sm:$0x3]  }
   0xd   :  { %v33_v5 = vld [vmem:[#allocation0] sm:$0x3]  }
   0xe   :  { %16 = vrot.lane.b32.xlu0 %v15_v3, %s131_s9  ;;  %v39_v6 = vld [vmem:[#allocation0] sm:$0x3]  }
   0xf   :  { %28 = vrot.lane.b32.xlu1 %v27_v4, %s132_s10  ;;  %v45_v7 = vld [vmem:[#allocation0] sm:$0x3]  }
  0x10   :  { %v51_v8 = vld [vmem:[#allocation0] sm:$0x3]  }
  0x11   :  { %v57_v9 = vld [vmem:[#allocation0] sm:$0x3]  }
  0x12   :  { %34 = vrot.lane.b32.xlu0 %v33_v5, %s133_s11  ;;  %v63_v10 = vld [vmem:[#allocation0] sm:$0x3]  }
  0x13   :  { %40 = vrot.lane.b32.xlu1 %v39_v6, %s134_s12  ;;  %v6_v11 = vld [vmem:[#allocation0] sm:$0x3]  }
  0x14   :  { %8 = vst.msk [vmem:[%s222_s1] ss:$16 sm:$0x3] %vm7_vm0, %v6_v11   ;;  %v69_v12 = vld [vmem:[#allocation0] sm:$0x3]  }
  0x15   :  { %v75_v13 = vld [vmem:[#allocation0] sm:$0x3]  }
  0x16   :  { %46 = vrot.lane.b32.xlu0 %v45_v7, %s135_s13  ;;  %v81_v14 = vld [vmem:[#allocation0] sm:$0x3]  }
  0x17   :  { %52 = vrot.lane.b32.xlu1 %v51_v8, %s136_s14  ;;  %v87_v15 = vld [vmem:[#allocation0] sm:$0x3]  }
  0x18   :  { %v93_v16 = vld [vmem:[#allocation0] sm:$0x3]  }
  0x1a   :  { %58 = vrot.lane.b32.xlu0 %v57_v9, %s137_s17 }
  0x1b   :  { %64 = vrot.lane.b32.xlu1 %v63_v10, %s138_s18 }
  0x1e   :  { %70 = vrot.lane.b32.xlu0 %v69_v12, %s139_s19 }
  0x1f   :  { %76 = vrot.lane.b32.xlu1 %v75_v13, %s140_s20 }
  0x22   :  { %82 = vrot.lane.b32.xlu0 %v81_v14, %s141_s21 }
  0x23   :  { %88 = vrot.lane.b32.xlu1 %v87_v15, %s142_s22 }
  0x26   :  { %94 = vrot.lane.b32.xlu0 %v93_v16, %s143_s23 }
  0x7c   :  { %v11_v17 = vpop.permute.xlu0 %10  }
  0x7d   :  { %v23_v18 = vpop.permute.xlu1 %22   ;;  %99 = vst.msk [vmem:[%s222_s1 + $0x1] ss:$16 sm:$0x3] %vm7_vm0, %v11_v17  }
  0x7e   :  { %101 = vst.msk [vmem:[%s222_s1 + $0x3] ss:$16 sm:$0x3] %vm7_vm0, %v23_v18  }
  0x80   :  { %v17_v19 = vpop.permute.xlu0 %16  }
  0x81   :  { %v29_v20 = vpop.permute.xlu1 %28   ;;  %100 = vst.msk [vmem:[%s222_s1 + $0x2] ss:$16 sm:$0x3] %vm7_vm0, %v17_v19  }
  0x82   :  { %102 = vst.msk [vmem:[%s222_s1 + $0x4] ss:$16 sm:$0x3] %vm7_vm0, %v29_v20  }
  0x84   :  { %v35_v21 = vpop.permute.xlu0 %34  }
  0x85   :  { %v41_v22 = vpop.permute.xlu1 %40   ;;  %103 = vst.msk [vmem:[%s222_s1 + $0x5] ss:$16 sm:$0x3] %vm7_vm0, %v35_v21  }
  0x86   :  { %104 = vst.msk [vmem:[%s222_s1 + $0x6] ss:$16 sm:$0x3] %vm7_vm0, %v41_v22  }
  0x88   :  { %v47_v23 = vpop.permute.xlu0 %46  }
  0x89   :  { %v53_v24 = vpop.permute.xlu1 %52   ;;  %105 = vst.msk [vmem:[%s222_s1 + $0x7] ss:$16 sm:$0x3] %vm7_vm0, %v47_v23  }
  0x8a   :  { %106 = vst.msk [vmem:[%s222_s1 + $0x8] ss:$16 sm:$0x3] %vm7_vm0, %v53_v24  }
  0x8c   :  { %v59_v25 = vpop.permute.xlu0 %58  }
  0x8d   :  { %v65_v26 = vpop.permute.xlu1 %64   ;;  %107 = vst.msk [vmem:[%s222_s1 + $0x9] ss:$16 sm:$0x3] %vm7_vm0, %v59_v25  }
  0x8e   :  { %108 = vst.msk [vmem:[%s222_s1 + $0xa] ss:$16 sm:$0x3] %vm7_vm0, %v65_v26  }
  0x90   :  { %v71_v27 = vpop.permute.xlu0 %70  }
  0x91   :  { %v77_v28 = vpop.permute.xlu1 %76   ;;  %109 = vst.msk [vmem:[%s222_s1 + $0xb] ss:$16 sm:$0x3] %vm7_vm0, %v71_v27  }
  0x92   :  { %110 = vst.msk [vmem:[%s222_s1 + $0xc] ss:$16 sm:$0x3] %vm7_vm0, %v77_v28  }
  0x94   :  { %v83_v29 = vpop.permute.xlu0 %82  }
  0x95   :  { %v89_v30 = vpop.permute.xlu1 %88   ;;  %111 = vst.msk [vmem:[%s222_s1 + $0xd] ss:$16 sm:$0x3] %vm7_vm0, %v83_v29  }
  0x96   :  { %112 = vst.msk [vmem:[%s222_s1 + $0xe] ss:$16 sm:$0x3] %vm7_vm0, %v89_v30  }
  0x98   :  { %v95_v31 = vpop.permute.xlu0 %94  }
  0x99   :  { %113 = vst.msk [vmem:[%s222_s1 + $0xf] ss:$16 sm:$0x3] %vm7_vm0, %v95_v31  }

// kernel: two_resnet_forward.1
= control target key start
LH: loop header
LB: loop body
LE: loop exit
PB: predicated region body
PF: predicated region fallthrough
CT: control target
= control target key end

     0   :  { %v9514_v0 = vmov 0.0   ;;  %vm7300_vm0 = vmmov 0   ;;  %v7301_v4 = vmov 0   ;;  %vm101_vm1 = vcmask 261120   ;;  %s9484_s5 = inlined_call_operand.vmem [shape: bf16[3,32,32], index: 5, kind: input, shape index: {}]   ;;  %s9485_s13 = inlined_call_operand.vmem [shape: bf16[3,32,32], index: 13, kind: input, shape index: {}]   ;;  %s9486_s6 = inlined_call_operand.vmem [shape: f32[3,1,32], index: 6, kind: input, shape index: {}]   ;;  %s9487_s0 = inlined_call_operand.vmem [shape: f32[3,8,8,32], index: 0, kind: input, shape index: {}]   ;;  %s9488_s14 = inlined_call_operand.vmem [shape: f32[3,1,32], index: 14, kind: input, shape index: {}]   ;;  %s9489_s2 = inlined_call_operand.vmem [shape: f32[3,8,32,32], index: 2, kind: input, shape index: {}]   ;;  %s9490_s9 = inlined_call_operand.vmem [shape: bf16[3,32,32], index: 9, kind: input, shape index: {}]   ;;  %s9491_s17 = inlined_call_operand.vmem [shape: bf16[3,32,32], index: 17, kind: input, shape index: {}]   ;;  %s9492_s1 = inlined_call_operand.vmem [shape: f32[8,1], index: 1, kind: input, shape index: {}]   ;;  %s9493_s3 = inlined_call_operand.vmem [shape: f32[32,1], index: 3, kind: input, shape index: {}]   ;;  %s9494_s7 = inlined_call_operand.vmem [shape: f32[3,1,32], index: 7, kind: input, shape index: {}]   ;;  %s9495_s8 = inlined_call_operand.vmem [shape: f32[3,1,32], index: 8, kind: input, shape index: {}]   ;;  %s9496_s10 = inlined_call_operand.vmem [shape: f32[3,1,32], index: 10, kind: input, shape index: {}]   ;;  %s9497_s11 = inlined_call_operand.vmem [shape: f32[1,32], index: 11, kind: input, shape index: {}]   ;;  %s9498_s15 = inlined_call_operand.vmem [shape: f32[3,1,32], index: 15, kind: input, shape index: {}]   ;;  %s9499_s16 = inlined_call_operand.vmem [shape: f32[3,1,32], index: 16, kind: input, shape index: {}]   ;;  %s9500_s18 = inlined_call_operand.vmem [shape: f32[3,1,32], index: 18, kind: input, shape index: {}]   ;;  %s9501_s4 = inlined_call_operand.vmem [shape: f32[32,8], index: 4, kind: input, shape index: {}]   ;;  %s9502_s12 = inlined_call_operand.<no memory space> [shape: f32[1], index: 12, kind: input, shape index: {}]   ;;  %s9503_s19 = inlined_call_operand.vmem [shape: f32[1,32], index: 19, kind: input, shape index: {}]   ;;  %s9504_s20 = inlined_call_operand.<no memory space> [shape: f32[1], index: 20, kind: input, shape index: {}]   ;;  %s9505_s22 = inlined_call_operand.vmem [shape: f32[8,128], index: 22, kind: output, shape index: {1}]   ;;  %s9506_s21 = inlined_call_operand.vmem [shape: f32[32,128], index: 21, kind: output, shape index: {0}]  }
   0x1   :  { %9523 = sst [smem:[#allocation8_spill]] %s9484_s5  ;;  %6109 = vmatprep.subr.bf16.mxu0 %v9514_v0  ;;  %6117 = vmatprep.subr.bf16.mxu1 %v9514_v0  ;;  %vm3749_vm2 = vcmask 64512   ;;  %vm5379_vm3 = vcmask 7168   ;;  %vm5381_vm4 = vcmask 15360   ;;  %vm5383_vm5 = vcmask 23552  }
   0x2   :  { %9524 = sst [smem:[#allocation9_spill]] %s9485_s13  ;;  %s9530_s29 = sld [smem:[#allocation8_spill]]  ;;  %6113 = vmatprep.mubr.msk.bf16.mxu0 %vm7300_vm0, %v9514_v0  ;;  %6121 = vmatprep.mubr.msk.bf16.mxu1 %vm7300_vm0, %v9514_v0 }
   0x3   :  { %9525 = sst [smem:[#allocation10_spill]] %s9486_s6  ;;  %6666 = vset.pattern.permute.xlu0 %v7301_v4  ;;  %s9531_s25 = sld [smem:[#allocation9_spill]]  ;;  %6667 = vset.pattern.permute.xlu1 %v7301_v4 }
   0x4   :  { %9526 = sst [smem:[#allocation11_spill]] %s9487_s0  ;;  %s9532_s0 = sld [smem:[#allocation10_spill]] }
   0x5   :  { %9527 = sst [smem:[#allocation12_spill]] %s9488_s14 }
   0x6   :  { %9528 = sst [smem:[#allocation13_spill]] %s9489_s2  ;;  %s9533_s2 = sld [smem:[#allocation11_spill]] }
   0x7   :  { %9529 = sst [smem:[#allocation14_spill]] %s9490_s9  ;;  %s9534_s26 = sld [smem:[#allocation12_spill]] }
   0x8   :  { %v7424_v1 = vld [vmem:[%s9530_s29] sm:$0xff]   ;;  %v7429_v2 = vld [vmem:[%s9530_s29 + $0x10] sm:$0xff]   ;;  %v7439_v3 = vld [vmem:[%s9530_s29 + $0x8] sm:$0xff]   ;;  %s9535_s28 = sld [smem:[#allocation13_spill]] }
   0x9   :  { %6110 = vmatpush3.bf16.msra.mxu0 %v7424_v1  ;;  %6118 = vmatpush3.bf16.msra.mxu1 %v7429_v2  ;;  %v7446_v5 = vld [vmem:[%s9530_s29 + $0x18] sm:$0xff]   ;;  %v7452_v6 = vld [vmem:[%s9531_s25] sm:$0xff]   ;;  %v7466_v8 = vld [vmem:[%s9531_s25 + $0x8] sm:$0xff]  }
   0xa   :  { %6111 = vmatprep.subr.bf16.mxu0 %v9514_v0  ;;  %6119 = vmatprep.subr.bf16.mxu1 %v9514_v0  ;;  %v7458_v7 = vld [vmem:[%s9530_s29 + $0x20] sm:$0xff]   ;;  %v7472_v9 = vld [vmem:[%s9530_s29 + $0x28] sm:$0xff]   ;;  %v7478_v10 = vld [vmem:[%s9531_s25 + $0x10] sm:$0xff]  }
   0xb   :  { %v7485_v11 = vld [vmem:[%s9531_s25 + $0x20] sm:$0xff]   ;;  %v7495_v12 = vld [vmem:[%s9531_s25 + $0x18] sm:$0xff]   ;;  %v7501_v13 = vld [vmem:[%s9531_s25 + $0x28] sm:$0xff]  }
   0xc   :  { %v7526_v14 = vld [vmem:[%s9532_s0] ss:$0 sm:$0xff]  ;;  %v7531_v15 = vld [vmem:[%s9532_s0 + $0x1] ss:$0 sm:$0xff] }
   0xd   :  { %6112 = vmatpush3.bf16.msra.mxu0 %v7439_v3  ;;  %6120 = vmatpush3.bf16.msra.mxu1 %v7446_v5  ;;  %v73_v16 = vld [vmem:[%s9533_s2] sm:$0xff] }
   0xe   :  { %6125 = vmatprep.subr.bf16.mxu0 %v9514_v0  ;;  %6133 = vmatprep.subr.bf16.mxu1 %v7452_v6  ;;  %v5438_v20 = vld [vmem:[%s9533_s2 + $0x40] sm:$0xff]  ;;  %v298_v34 = vld [vmem:[%s9535_s28 + $0x10] sm:$0xff]  ;;  %v299_v42 = vld [vmem:[%s9535_s28 + $0x18] sm:$0xff] }
   0xf   :  { %v7544_v32 = vld [vmem:[%s9534_s26] ss:$0 sm:$0xff]  ;;  %v297_v47 = vld [vmem:[%s9535_s28 + $0x8] sm:$0xff]  ;;  %v7567_v53 = vld [vmem:[%s9534_s26 + $0x1] ss:$0 sm:$0xff] }
  0x10   :  { %6114 = vmatmul.mubr.bf16.vlgmr.msra.gmra.mrb[0].mxu0 %v7301_v4  ;;  %6122 = vmatmul.mubr.bf16.vlgmr.msra.gmra.mrb[0].mxu1 %v7301_v4  ;;  %v296_v38 = vld [vmem:[%s9535_s28] sm:$0xff]  ;;  %v5463_v57 = vld [vmem:[%s9535_s28 + $0x110] sm:$0xff] }
  0x11   :  { %6126 = vmatpush3.bf16.msra.mxu0 %v7458_v7  ;;  %6134 = vmatpush3.bf16.msra.mxu1 %v7452_v6  ;;  %v5461_v62 = vld [vmem:[%s9535_s28 + $0x100] sm:$0xff] }
  0x12   :  { %6137 = vmatprep.mubr.bf16.mxu1 %v7301_v4  ;;  %6135 = vmatprep.subr.bf16.mxu1 %v7466_v8 }
  0x13   :  { %6127 = vmatprep.subr.bf16.mxu0 %v9514_v0  ;;  %6129 = vmatprep.mubr.msk.bf16.mxu0 %vm7300_vm0, %v9514_v0 }
  0x15   :  { %6128 = vmatpush3.bf16.msra.mxu0 %v7472_v9  ;;  %6136 = vmatpush3.bf16.msra.mxu1 %v7466_v8 }
  0x16   :  { %6141 = vmatprep.subr.bf16.mxu0 %v7478_v10  ;;  %6149 = vmatprep.subr.bf16.mxu1 %v7485_v11 }
  0x18   :  { %6130 = vmatmul.mubr.bf16.vlgmr.msra.gmra.mrb[4].mxu0 %v7301_v4  ;;  %6138 = vmatmul.mubr.bf16.vlgmr.msra.gmra.mrb[4].mxu1 %v7301_v4 }
  0x19   :  { %6142 = vmatpush3.bf16.msra.mxu0 %v7478_v10  ;;  %6145 = vmatprep.mubr.bf16.mxu0 %v7301_v4 }
  0x1a   :  { %6143 = vmatprep.subr.bf16.mxu0 %v7495_v12  ;;  %6150 = vmatpush3.bf16.msra.mxu1 %v7485_v11 }
  0x1b   :  { %6153 = vmatprep.mubr.bf16.mxu1 %v7301_v4  ;;  %6151 = vmatprep.subr.bf16.mxu1 %v7501_v13 }
  0x1d   :  { %6144 = vmatpush3.bf16.msra.mxu0 %v7495_v12 }
  0x1e   :  { %6157 = vmatprep.subr.bf16.mxu0 %v9514_v0  ;;  %6152 = vmatpush3.bf16.msra.mxu1 %v7501_v13 }
  0x1f   :  { %6165 = vmatprep.subr.bf16.mxu1 %v9514_v0 }
  0x20   :  { %6146 = vmatmul.mubr.bf16.vlgmr.msra.gmra.mrb[8].mxu0 %v7301_v4 }
  0x21   :  { %6158 = vmatpush3.bf16.msra.mxu0 %v7424_v1  ;;  %6161 = vmatprep.mubr.msk.bf16.mxu0 %vm7300_vm0, %v9514_v0 }
  0x22   :  { %6154 = vmatmul.mubr.bf16.vlgmr.msra.gmra.mrb[8].mxu1 %v7301_v4  ;;  %6159 = vmatprep.subr.bf16.mxu0 %v9514_v0 }
  0x23   :  { %6166 = vmatpush3.bf16.msra.mxu1 %v7429_v2  ;;  %6169 = vmatprep.mubr.msk.bf16.mxu1 %vm7300_vm0, %v9514_v0 }
  0x24   :  { %6167 = vmatprep.subr.bf16.mxu1 %v9514_v0 }
  0x25   :  { %6160 = vmatpush3.bf16.msra.mxu0 %v7439_v3 }
  0x26   :  { %6173 = vmatprep.subr.bf16.mxu0 %v9514_v0 }
  0x27   :  { %6168 = vmatpush3.bf16.msra.mxu1 %v7446_v5 }
  0x28   :  { %6181 = vmatprep.subr.bf16.mxu1 %v7452_v6 }
  0xe3   :  { %v139_v17 = vpop.f32.mrb[0].mxu0  ;;  %v204_v21 = vpop.f32.mrb[0].mxu1 }
  0xe4   :  { %v140_v18 = vadd.f32 %v7526_v14, %v139_v17  ;;  %v6115_v19 = vpop.f32.mrb[1].mxu0  ;;  %v205_v23 = vadd.f32 %v7531_v15, %v204_v21  ;;  %v6123_v24 = vpop.f32.mrb[1].mxu1  ;;  %v5464_v17 = vld [vmem:[%s9535_s28 + $0x118] sm:$0xff] }
  0xe5   :  { %v142_v22 = vpop.f32.mrb[2].mxu0  ;;  %v207_v27 = vpop.f32.mrb[2].mxu1 }
  0xe6   :  { %v275_v25 = vadd.f32 %v140_v18, %v73_v16  ;;  %v6116_v26 = vpop.f32.mrb[3].mxu0  ;;  %v282_v28 = vadd.f32 %v5438_v20, %v205_v23  ;;  %v6124_v29 = vpop.f32.mrb[3].mxu1  ;;  %v5462_v22 = vld [vmem:[%s9535_s28 + $0x108] sm:$0xff] }
  0xe8   :  { %v5459_v30 = vmul.f32 -1.442695, %v275_v25  ;;  %v5460_v31 = vmul.f32 -1.442695, %v282_v28 }
  0xea   :  { %6692 = vpow2.f32 %v5459_v30 }
  0xeb   :  { %v7546_v33 = vpop.f32.mrb[4].mxu0  ;;  %v6139_v35 = vpop.f32.mrb[4].mxu1  ;;  %6694 = vpow2.f32 %v5460_v31 }
  0xec   :  { %v6131_v36 = vpop.f32.mrb[5].mxu0  ;;  %v376_v37 = vadd.f32 %v6139_v35, %v7544_v32  ;;  %v367_v39 = vpop.f32.mrb[5].mxu1 }
  0xed   :  { %v272_v40 = vpop.f32.mrb[6].mxu0  ;;  %v368_v41 = vadd.f32 %v7544_v32, %v367_v39  ;;  %v6140_v43 = vpop.f32.mrb[6].mxu1 }
  0xee   :  { %v6132_v44 = vpop.f32.mrb[7].mxu0  ;;  %v532_v45 = vadd.f32 %v376_v37, %v298_v34  ;;  %v379_v46 = vadd.f32 %v6140_v43, %v7544_v32  ;;  %v370_v48 = vpop.f32.mrb[7].mxu1 }
  0xef   :  { %v530_v49 = vadd.f32 %v368_v41, %v296_v38  ;;  %v371_v50 = vadd.f32 %v7544_v32, %v370_v48  ;;  %v7588_v38 = vld [vmem:[%s9532_s0 + $0x2] ss:$0 sm:$0xff] }
  0xf0   :  { %v5490_v51 = vmul.f32 -1.442695, %v532_v45  ;;  %v533_v52 = vadd.f32 %v379_v46, %v299_v42  ;;  %v270_v43 = vadd.f32 %v7588_v38, %v7546_v33  ;;  %v7598_v33 = vld [vmem:[%s9534_s26 + $0x2] ss:$0 sm:$0xff] }
  0xf1   :  { %v5488_v54 = vmul.f32 -1.442695, %v530_v49  ;;  %v531_v55 = vadd.f32 %v371_v50, %v297_v47  ;;  %v5439_v50 = vld [vmem:[%s9533_s2 + $0x80] sm:$0xff] }
  0xf2   :  { %6696 = vpow2.f32 %v5490_v51  ;;  %v5491_v56 = vmul.f32 -1.442695, %v533_v52 }
  0xf3   :  { %v6147_v58 = vpop.f32.mrb[8].mxu0  ;;  %6698 = vpow2.f32 %v5488_v54  ;;  %v5489_v60 = vmul.f32 -1.442695, %v531_v55 }
  0xf4   :  { %v6693_v59 = vpop.eup %6692  ;;  %v450_v61 = vadd.f32 %v6147_v58, %v7567_v53  ;;  %v441_v63 = vpop.f32.mrb[9].mxu0  ;;  %6700 = vpow2.f32 %v5491_v56 }
  0xf5   :  { %v279_v4 = vadd.f32 1.0, %v6693_v59  ;;  %v442_v16 = vadd.f32 %v7567_v53, %v441_v63  ;;  %v6148_v18 = vpop.f32.mrb[10].mxu0  ;;  %v6155_v19 = vpop.f32.mrb[8].mxu1  ;;  %6702 = vpow2.f32 %v5489_v60 }
  0xf6   :  { %v560_v20 = vadd.f32 %v5463_v57, %v450_v61  ;;  %v453_v21 = vadd.f32 %v6148_v18, %v7567_v53  ;;  %v444_v23 = vpop.f32.mrb[11].mxu0  ;;  %v515_v24 = vpop.f32.mrb[9].mxu1  ;;  %v524_v61 = vadd.f32 %v6155_v19, %v7598_v33  ;;  %v5467_v18 = vld [vmem:[%s9535_s28 + $0x210] sm:$0xff]  ;;  %v5465_v19 = vld [vmem:[%s9535_s28 + $0x200] sm:$0xff] }
  0xf7   :  { %6704 = vrcp.f32 %v279_v4  ;;  %v558_v25 = vadd.f32 %v5461_v62, %v442_v16  ;;  %v445_v26 = vadd.f32 %v7567_v53, %v444_v23  ;;  %v6156_v27 = vpop.f32.mrb[10].mxu1  ;;  %v6695_v28 = vpop.eup %6694  ;;  %v516_v63 = vadd.f32 %v7598_v33, %v515_v24 }
  0xf8   :  { %v5494_v29 = vmul.f32 -1.442695, %v560_v20  ;;  %v561_v30 = vadd.f32 %v5464_v17, %v453_v21  ;;  %v518_v31 = vpop.f32.mrb[11].mxu1  ;;  %v286_v37 = vadd.f32 1.0, %v6695_v28  ;;  %v527_v16 = vadd.f32 %v6156_v27, %v7598_v33 }
  0xf9   :  { %v5492_v34 = vmul.f32 -1.442695, %v558_v25  ;;  %v559_v35 = vadd.f32 %v5462_v22, %v445_v26  ;;  %v519_v20 = vadd.f32 %v7598_v33, %v518_v31  ;;  %v5468_v25 = vld [vmem:[%s9535_s28 + $0x218] sm:$0xff] }
  0xfa   :  { %6706 = vpow2.f32 %v5494_v29  ;;  %v5495_v36 = vmul.f32 -1.442695, %v561_v30  ;;  %v5466_v30 = vld [vmem:[%s9535_s28 + $0x208] sm:$0xff] }
  0xfb   :  { %6708 = vpow2.f32 %v5492_v34  ;;  %v5493_v39 = vmul.f32 -1.442695, %v559_v35 }
  0xfc   :  { %6710 = vpow2.f32 %v5495_v36  ;;  %v6697_v40 = vpop.eup %6696 }
  0xfd   :  { %6712 = vpow2.f32 %v5493_v39  ;;  %v6699_v41 = vpop.eup %6698  ;;  %v548_v42 = vadd.f32 1.0, %v6697_v40 }
  0xfe   :  { %v6701_v44 = vpop.eup %6700  ;;  %6714 = vrcp.f32 %v286_v37  ;;  %v546_v45 = vadd.f32 1.0, %v6699_v41 }
  0xff   :  { %v6703_v46 = vpop.eup %6702  ;;  %6716 = vrcp.f32 %v548_v42  ;;  %v549_v47 = vadd.f32 1.0, %v6701_v44 }
 0x100   :  { %6718 = vrcp.f32 %v546_v45  ;;  %v547_v49 = vadd.f32 1.0, %v6703_v46 }
 0x101   :  { %v6705_v48 = vpop.eup %6704  ;;  %6720 = vrcp.f32 %v549_v47 }
 0x102   :  { %v289_v51 = vmul.f32 %v6705_v48, %v270_v43  ;;  %6722 = vrcp.f32 %v547_v49 }
 0x104   :  { %v6707_v52 = vpop.eup %6706  ;;  %v290_v54 = vadd.f32 %v5439_v50, %v289_v51 }
 0x105   :  { %v6709_v55 = vpop.eup %6708  ;;  %v576_v56 = vadd.f32 1.0, %v6707_v52 }
 0x106   :  { %v6711_v57 = vpop.eup %6710  ;;  %6724 = vtanh.f32 %v290_v54  ;;  %v574_v58 = vadd.f32 1.0, %v6709_v55 }
 0x107   :  { %v6713_v59 = vpop.eup %6712  ;;  %v577_v60 = vadd.f32 1.0, %v6711_v57  ;;  %6726 = vrcp.f32 %v576_v56 }
 0x108   :  { %v575_v62 = vadd.f32 1.0, %v6713_v59  ;;  %v6715_v4 = vpop.eup %6714  ;;  %6728 = vrcp.f32 %v574_v58 }
 0x109   :  { %v6717_v17 = vpop.eup %6716  ;;  %6730 = vrcp.f32 %v577_v60  ;;  %v292_v27 = vsub.f32 1.0, %v6715_v4  ;;  %v294_v40 = vmul.f32 0.0, %v6715_v4 }
 0x10a   :  { %v6719_v21 = vpop.eup %6718  ;;  %v588_v22 = vmul.f32 %v6717_v17, %v524_v61  ;;  %6732 = vrcp.f32 %v575_v62 }
 0x10b   :  { %v6721_v23 = vpop.eup %6720  ;;  %v586_v24 = vmul.f32 %v6719_v21, %v516_v63 }
 0x10c   :  { %v6723_v26 = vpop.eup %6722  ;;  %v592_v28 = vadd.f32 %v5467_v18, %v588_v22  ;;  %v589_v29 = vmul.f32 %v6721_v23, %v527_v16  ;;  %v5496_v22 = vld [vmem:[%s9533_s2 + $0x8] sm:$0xff] }
 0x10d   :  { %v590_v31 = vadd.f32 %v5465_v19, %v586_v24  ;;  %v587_v34 = vmul.f32 %v6723_v26, %v519_v20 }
 0x10e   :  { %6734 = vtanh.f32 %v592_v28  ;;  %v593_v35 = vadd.f32 %v5468_v25, %v589_v29  ;;  %v5497_v25 = vld [vmem:[%s9533_s2 + $0x48] sm:$0xff] }
 0x10f   :  { %6736 = vtanh.f32 %v590_v31  ;;  %v591_v37 = vadd.f32 %v5466_v30, %v587_v34 }
 0x110   :  { %v6725_v36 = vpop.eup %6724  ;;  %6738 = vtanh.f32 %v593_v35 }
 0x111   :  { %v293_v39 = vmul.f32 %v6725_v36, %v292_v27  ;;  %6740 = vtanh.f32 %v591_v37  ;;  %v6727_v41 = vpop.eup %6726 }
 0x112   :  { %v6729_v43 = vpop.eup %6728  ;;  %v600_v47 = vsub.f32 1.0, %v6727_v41  ;;  %v608_v50 = vmul.f32 0.0, %v6727_v41 }
 0x113   :  { %v7616_v42 = vadd.f32 %v294_v40, %v293_v39  ;;  %v6731_v44 = vpop.eup %6730  ;;  %v598_v48 = vsub.f32 1.0, %v6729_v43  ;;  %v606_v54 = vmul.f32 0.0, %v6729_v43 }
 0x114   :  { %v6733_v46 = vpop.eup %6732  ;;  %v601_v49 = vsub.f32 1.0, %v6731_v44  ;;  %v609_v57 = vmul.f32 0.0, %v6731_v44 }
 0x115   :  { %v620_v45 = vpack.c.bf16 %v7616_v42, %v7616_v42  ;;  %v599_v52 = vsub.f32 1.0, %v6733_v46  ;;  %v607_v60 = vmul.f32 0.0, %v6733_v46 }
 0x117   :  { %6162 = vmatmul.mubr.msk.bf16.vlgmr.msra.gmra.mrb[12].mxu0 %vm101_vm1, %v620_v45  ;;  %6170 = vmatmul.mubr.msk.bf16.vlgmr.msra.gmra.mrb[12].mxu1 %vm101_vm1, %v620_v45 }
 0x118   :  { %6174 = vmatpush3.bf16.msra.mxu0 %v7458_v7  ;;  %6182 = vmatpush3.bf16.msra.mxu1 %v7452_v6  ;;  %v6735_v51 = vpop.eup %6734 }
 0x119   :  { %6175 = vmatprep.subr.bf16.mxu0 %v9514_v0  ;;  %6177 = vmatprep.mubr.msk.bf16.mxu0 %vm7300_vm0, %v9514_v0  ;;  %v6737_v55 = vpop.eup %6736  ;;  %v604_v56 = vmul.f32 %v6735_v51, %v600_v47  ;;  %v5507_v51 = vld [vmem:[%s9535_s28 + $0x38] sm:$0xff] }
 0x11a   :  { %6183 = vmatprep.subr.bf16.mxu1 %v7466_v8  ;;  %v6739_v58 = vpop.eup %6738  ;;  %v602_v59 = vmul.f32 %v6737_v55, %v598_v48  ;;  %v5504_v48 = vld [vmem:[%s9535_s28 + $0x20] sm:$0xff] }
 0x11b   :  { %v6741_v61 = vpop.eup %6740  ;;  %v605_v62 = vmul.f32 %v6739_v58, %v601_v49  ;;  %v7630_v63 = vadd.f32 %v608_v50, %v604_v56  ;;  %v5505_v56 = vld [vmem:[%s9535_s28 + $0x28] sm:$0xff] }
 0x11c   :  { %6176 = vmatpush3.bf16.msra.mxu0 %v7472_v9  ;;  %6184 = vmatpush3.bf16.msra.mxu1 %v7466_v8  ;;  %v603_v4 = vmul.f32 %v6741_v61, %v599_v52  ;;  %v7633_v16 = vadd.f32 %v606_v54, %v602_v59 }
 0x11d   :  { %6189 = vmatprep.subr.bf16.mxu0 %v7478_v10  ;;  %6197 = vmatprep.subr.bf16.mxu1 %v7485_v11  ;;  %v7636_v17 = vadd.f32 %v609_v57, %v605_v62 }
 0x11e   :  { %v7639_v18 = vadd.f32 %v607_v60, %v603_v4 }
 0x11f   :  { %6178 = vmatmul.mubr.msk.bf16.vlgmr.msra.gmra.mrb[16].mxu0 %vm101_vm1, %v620_v45  ;;  %v781_v20 = vpack.c.bf16 %v7636_v17, %v7630_v63  ;;  %v5506_v45 = vld [vmem:[%s9535_s28 + $0x30] sm:$0xff] }
 0x120   :  { %6190 = vmatpush3.bf16.msra.mxu0 %v7478_v10  ;;  %v780_v21 = vpack.c.bf16 %v7639_v18, %v7633_v16 }
 0x121   :  { %6191 = vmatprep.subr.bf16.mxu0 %v7495_v12 }
 0x122   :  { %6185 = vmatprep.mubr.msk.bf16.mxu1 %vm101_vm1, %v780_v21  ;;  %6193 = vmatprep.mubr.msk.bf16.mxu0 %vm101_vm1, %v780_v21 }
 0x123   :  { %6186 = vmatmul.mubr.msk.bf16.vlgmr.msra.gmra.mrb[16].mxu1 %vm101_vm1, %v781_v20 }
 0x124   :  { %6192 = vmatpush3.bf16.msra.mxu0 %v7495_v12  ;;  %6198 = vmatpush3.bf16.msra.mxu1 %v7485_v11 }
 0x125   :  { %6201 = vmatprep.mubr.msk.bf16.mxu1 %vm101_vm1, %v780_v21  ;;  %6199 = vmatprep.subr.bf16.mxu1 %v7501_v13 }
 0x126   :  { %6205 = vmatprep.subr.bf16.mxu0 %v9514_v0 }
 0x127   :  { %6194 = vmatmul.mubr.msk.bf16.vlgmr.msra.gmra.mrb[20].mxu0 %vm101_vm1, %v781_v20 }
 0x128   :  { %6206 = vmatpush3.bf16.msra.mxu0 %v7424_v1  ;;  %6209 = vmatprep.mubr.msk.bf16.mxu0 %vm7300_vm0, %v9514_v0 }
 0x129   :  { %6200 = vmatpush3.bf16.msra.mxu1 %v7501_v13  ;;  %6207 = vmatprep.subr.bf16.mxu0 %v9514_v0 }
 0x12a   :  { %6213 = vmatprep.subr.bf16.mxu1 %v9514_v0 }
 0x12c   :  { %6202 = vmatmul.mubr.msk.bf16.vlgmr.msra.gmra.mrb[20].mxu1 %vm101_vm1, %v781_v20  ;;  %6208 = vmatpush3.bf16.msra.mxu0 %v7439_v3 }
 0x12d   :  { %6214 = vmatpush3.bf16.msra.mxu1 %v7429_v2  ;;  %6217 = vmatprep.mubr.msk.bf16.mxu1 %vm7300_vm0, %v9514_v0 }
 0x12e   :  { %6215 = vmatprep.subr.bf16.mxu1 %v9514_v0  ;;  %6221 = vmatprep.subr.bf16.mxu0 %v9514_v0 }
 0x131   :  { %6216 = vmatpush3.bf16.msra.mxu1 %v7446_v5 }
 0x132   :  { %6229 = vmatprep.subr.bf16.mxu1 %v7452_v6 }
 0x1ea   :  { %v658_v19 = vpop.f32.mrb[12].mxu0  ;;  %v698_v23 = vpop.f32.mrb[12].mxu1 }
 0x1eb   :  { %v659_v24 = vadd.f32 %v7526_v14, %v658_v19  ;;  %v699_v26 = vadd.f32 %v7531_v15, %v698_v23  ;;  %v6163_v27 = vpop.f32.mrb[13].mxu0  ;;  %v6171_v28 = vpop.f32.mrb[13].mxu1 }
 0x1ec   :  { %v661_v29 = vpop.f32.mrb[14].mxu0  ;;  %v701_v30 = vpop.f32.mrb[14].mxu1 }
 0x1ed   :  { %v744_v31 = vadd.f32 %v5496_v22, %v659_v24  ;;  %v6164_v34 = vpop.f32.mrb[15].mxu0  ;;  %v6172_v35 = vpop.f32.mrb[15].mxu1  ;;  %v751_v36 = vadd.f32 %v5497_v25, %v699_v26  ;;  %v5510_v25 = vld [vmem:[%s9535_s28 + $0x130] sm:$0xff]  ;;  %v5508_v29 = vld [vmem:[%s9535_s28 + $0x120] sm:$0xff] }
 0x1ee   :  { %v5511_v34 = vld [vmem:[%s9535_s28 + $0x138] sm:$0xff] }
 0x1ef   :  { %v5502_v37 = vmul.f32 -1.442695, %v744_v31  ;;  %v5503_v39 = vmul.f32 -1.442695, %v751_v36 }
 0x1f1   :  { %6742 = vpow2.f32 %v5502_v37 }
 0x1f2   :  { %v738_v40 = vpop.f32.mrb[16].mxu0  ;;  %6744 = vpow2.f32 %v5503_v39 }
 0x1f3   :  { %v6179_v41 = vpop.f32.mrb[17].mxu0 }
 0x1f4   :  { %v741_v43 = vpop.f32.mrb[18].mxu0  ;;  %v5509_v41 = vld [vmem:[%s9535_s28 + $0x128] sm:$0xff] }
 0x1f5   :  { %v6180_v44 = vpop.f32.mrb[19].mxu0 }
 0x1f6   :  { %v6187_v46 = vpop.f32.mrb[16].mxu1 }
 0x1f7   :  { %v831_v47 = vadd.f32 %v6187_v46, %v7544_v32  ;;  %v822_v49 = vpop.f32.mrb[17].mxu1 }
 0x1f8   :  { %v823_v50 = vadd.f32 %v7544_v32, %v822_v49  ;;  %v6188_v52 = vpop.f32.mrb[18].mxu1 }
 0x1f9   :  { %v937_v54 = vadd.f32 %v5506_v45, %v831_v47  ;;  %v834_v55 = vadd.f32 %v6188_v52, %v7544_v32  ;;  %v825_v57 = vpop.f32.mrb[19].mxu1 }
 0x1fa   :  { %v6195_v58 = vpop.f32.mrb[20].mxu0  ;;  %v935_v60 = vadd.f32 %v5504_v48, %v823_v50  ;;  %v826_v61 = vadd.f32 %v7544_v32, %v825_v57  ;;  %v5498_v57 = vld [vmem:[%s9533_s2 + $0x88] sm:$0xff] }
 0x1fb   :  { %v6743_v59 = vpop.eup %6742  ;;  %v871_v62 = vpop.f32.mrb[21].mxu0  ;;  %v5524_v20 = vmul.f32 -1.442695, %v937_v54  ;;  %v938_v21 = vadd.f32 %v5507_v51, %v834_v55  ;;  %v880_v22 = vadd.f32 %v6195_v58, %v7567_v53  ;;  %v739_v54 = vadd.f32 %v7588_v38, %v738_v40 }
 0x1fc   :  { %v748_v4 = vadd.f32 1.0, %v6743_v59  ;;  %v6196_v19 = vpop.f32.mrb[22].mxu0  ;;  %v5522_v23 = vmul.f32 -1.442695, %v935_v60  ;;  %v936_v24 = vadd.f32 %v5505_v56, %v826_v61  ;;  %v872_v26 = vadd.f32 %v7567_v53, %v871_v62  ;;  %v6745_v37 = vpop.eup %6744 }
 0x1fd   :  { %v874_v27 = vpop.f32.mrb[23].mxu0  ;;  %v5525_v28 = vmul.f32 -1.442695, %v938_v21  ;;  %v883_v30 = vadd.f32 %v6196_v19, %v7567_v53  ;;  %v965_v39 = vadd.f32 %v5510_v25, %v880_v22  ;;  %v755_v48 = vadd.f32 1.0, %v6745_v37 }
 0x1fe   :  { %6746 = vrcp.f32 %v748_v4  ;;  %v5523_v31 = vmul.f32 -1.442695, %v936_v24  ;;  %v875_v35 = vadd.f32 %v7567_v53, %v874_v27  ;;  %v963_v44 = vadd.f32 %v5508_v29, %v872_v26 }
 0x1ff   :  { %v6203_v36 = vpop.f32.mrb[20].mxu1  ;;  %6748 = vpow2.f32 %v5524_v20  ;;  %v966_v46 = vadd.f32 %v5511_v34, %v883_v30  ;;  %v5528_v50 = vmul.f32 -1.442695, %v965_v39 }
 0x200   :  { %v920_v43 = vpop.f32.mrb[21].mxu1  ;;  %6750 = vpow2.f32 %v5522_v23  ;;  %v964_v49 = vadd.f32 %v5509_v41, %v875_v35  ;;  %v5526_v51 = vmul.f32 -1.442695, %v963_v44  ;;  %v5514_v44 = vld [vmem:[%s9535_s28 + $0x230] sm:$0xff] }
 0x201   :  { %v6204_v45 = vpop.f32.mrb[22].mxu1  ;;  %6752 = vpow2.f32 %v5525_v28  ;;  %v5529_v52 = vmul.f32 -1.442695, %v966_v46  ;;  %v929_v28 = vadd.f32 %v6203_v36, %v7598_v33 }
 0x202   :  { %v923_v47 = vpop.f32.mrb[23].mxu1  ;;  %6754 = vpow2.f32 %v5523_v31  ;;  %v5527_v55 = vmul.f32 -1.442695, %v964_v49  ;;  %v921_v31 = vadd.f32 %v7598_v33, %v920_v43  ;;  %v932_v37 = vadd.f32 %v6204_v45, %v7598_v33  ;;  %v5512_v43 = vld [vmem:[%s9535_s28 + $0x220] sm:$0xff] }
 0x203   :  { %6756 = vrcp.f32 %v755_v48  ;;  %v924_v46 = vadd.f32 %v7598_v33, %v923_v47 }
 0x204   :  { %6758 = vpow2.f32 %v5528_v50 }
 0x205   :  { %6760 = vpow2.f32 %v5526_v51 }
 0x206   :  { %6762 = vpow2.f32 %v5529_v52  ;;  %v5515_v52 = vld [vmem:[%s9535_s28 + $0x238] sm:$0xff] }
 0x207   :  { %6764 = vpow2.f32 %v5527_v55 }
 0x208   :  { %v6747_v56 = vpop.eup %6746 }
 0x209   :  { %v758_v58 = vmul.f32 %v6747_v56, %v739_v54  ;;  %v6749_v59 = vpop.eup %6748  ;;  %v5513_v56 = vld [vmem:[%s9535_s28 + $0x228] sm:$0xff] }
 0x20a   :  { %v6751_v60 = vpop.eup %6750  ;;  %v953_v62 = vadd.f32 1.0, %v6749_v59 }
 0x20b   :  { %v759_v61 = vadd.f32 %v5498_v57, %v758_v58  ;;  %v6753_v4 = vpop.eup %6752  ;;  %v951_v20 = vadd.f32 1.0, %v6751_v60 }
 0x20c   :  { %v6755_v21 = vpop.eup %6754  ;;  %v954_v40 = vadd.f32 1.0, %v6753_v4 }
 0x20d   :  { %6766 = vtanh.f32 %v759_v61  ;;  %v952_v22 = vadd.f32 1.0, %v6755_v21  ;;  %v6757_v19 = vpop.eup %6756 }
 0x20e   :  { %6768 = vrcp.f32 %v953_v62  ;;  %v6759_v23 = vpop.eup %6758  ;;  %v761_v29 = vsub.f32 1.0, %v6757_v19  ;;  %v763_v49 = vmul.f32 %v6757_v19, %v7616_v42 }
 0x20f   :  { %6770 = vrcp.f32 %v951_v20  ;;  %v6761_v24 = vpop.eup %6760  ;;  %v981_v27 = vadd.f32 1.0, %v6759_v23 }
 0x210   :  { %6772 = vrcp.f32 %v954_v40  ;;  %v6763_v25 = vpop.eup %6762  ;;  %v979_v30 = vadd.f32 1.0, %v6761_v24 }
 0x211   :  { %6774 = vrcp.f32 %v952_v22  ;;  %v6765_v26 = vpop.eup %6764  ;;  %v982_v35 = vadd.f32 1.0, %v6763_v25 }
 0x212   :  { %v980_v41 = vadd.f32 1.0, %v6765_v26  ;;  %6776 = vrcp.f32 %v981_v27 }
 0x213   :  { %6778 = vrcp.f32 %v979_v30 }
 0x214   :  { %6780 = vrcp.f32 %v982_v35 }
 0x215   :  { %6782 = vrcp.f32 %v980_v41 }
 0x217   :  { %v6767_v34 = vpop.eup %6766 }
 0x218   :  { %v6769_v39 = vpop.eup %6768  ;;  %v762_v48 = vmul.f32 %v6767_v34, %v761_v29 }
 0x219   :  { %v6771_v36 = vpop.eup %6770  ;;  %v993_v50 = vmul.f32 %v6769_v39, %v929_v28  ;;  %v5531_v39 = vld [vmem:[%s9533_s2 + $0x50] sm:$0xff] }
 0x21a   :  { %v6773_v51 = vpop.eup %6772  ;;  %v991_v45 = vmul.f32 %v6771_v36, %v921_v31  ;;  %v7729_v54 = vadd.f32 %v763_v49, %v762_v48 }
 0x21b   :  { %v6775_v47 = vpop.eup %6774  ;;  %v997_v55 = vadd.f32 %v5514_v44, %v993_v50  ;;  %v994_v42 = vmul.f32 %v6773_v51, %v932_v37 }
 0x21c   :  { %v995_v57 = vadd.f32 %v5512_v43, %v991_v45  ;;  %v992_v58 = vmul.f32 %v6775_v47, %v924_v46  ;;  %v1025_v59 = vpack.c.bf16 %v7729_v54, %v7729_v54  ;;  %v6777_v62 = vpop.eup %6776 }
 0x21d   :  { %6784 = vtanh.f32 %v997_v55  ;;  %v998_v60 = vadd.f32 %v5515_v52, %v994_v42  ;;  %v6779_v4 = vpop.eup %6778  ;;  %v1005_v20 = vsub.f32 1.0, %v6777_v62  ;;  %v1013_v25 = vmul.f32 %v6777_v62, %v7630_v63  ;;  %v5540_v52 = vld [vmem:[%s9535_s28 + $0x50] sm:$0xff] }
 0x21e   :  { %6786 = vtanh.f32 %v995_v57  ;;  %v996_v61 = vadd.f32 %v5513_v56, %v992_v58  ;;  %6210 = vmatmul.mubr.msk.bf16.vlgmr.msra.gmra.mrb[24].mxu0 %vm101_vm1, %v1025_v59  ;;  %6218 = vmatmul.mubr.msk.bf16.vlgmr.msra.gmra.mrb[24].mxu1 %vm101_vm1, %v1025_v59  ;;  %v1003_v21 = vsub.f32 1.0, %v6779_v4  ;;  %v1011_v27 = vmul.f32 %v6779_v4, %v7633_v16  ;;  %v5538_v56 = vld [vmem:[%s9535_s28 + $0x40] sm:$0xff] }
 0x21f   :  { %6788 = vtanh.f32 %v998_v60  ;;  %6222 = vmatpush3.bf16.msra.mxu0 %v7458_v7  ;;  %6225 = vmatprep.mubr.msk.bf16.mxu0 %vm7300_vm0, %v9514_v0  ;;  %v6781_v7 = vpop.eup %6780 }
 0x220   :  { %6790 = vtanh.f32 %v996_v61  ;;  %6223 = vmatprep.subr.bf16.mxu0 %v9514_v0  ;;  %6230 = vmatpush3.bf16.msra.mxu1 %v7452_v6  ;;  %v6783_v40 = vpop.eup %6782  ;;  %v1006_v22 = vsub.f32 1.0, %v6781_v7  ;;  %v1014_v30 = vmul.f32 %v6781_v7, %v7636_v17  ;;  %v5541_v61 = vld [vmem:[%s9535_s28 + $0x58] sm:$0xff] }
 0x221   :  { %6231 = vmatprep.subr.bf16.mxu1 %v7466_v8  ;;  %v1004_v23 = vsub.f32 1.0, %v6783_v40  ;;  %v1012_v34 = vmul.f32 %v6783_v40, %v7639_v18 }
 0x223   :  { %6224 = vmatpush3.bf16.msra.mxu0 %v7472_v9 }
 0x224   :  { %6237 = vmatprep.subr.bf16.mxu0 %v7478_v10  ;;  %6232 = vmatpush3.bf16.msra.mxu1 %v7466_v8 }
 0x225   :  { %6245 = vmatprep.subr.bf16.mxu1 %v7485_v11 }
 0x226   :  { %6226 = vmatmul.mubr.msk.bf16.vlgmr.msra.gmra.mrb[28].mxu0 %vm101_vm1, %v1025_v59 }
 0x227   :  { %v6785_v19 = vpop.eup %6784  ;;  %6238 = vmatpush3.bf16.msra.mxu0 %v7478_v10 }
 0x228   :  { %v6787_v24 = vpop.eup %6786  ;;  %6239 = vmatprep.subr.bf16.mxu0 %v7495_v12  ;;  %v1009_v9 = vmul.f32 %v6785_v19, %v1005_v20 }
 0x229   :  { %v6789_v26 = vpop.eup %6788  ;;  %v1007_v8 = vmul.f32 %v6787_v24, %v1003_v21  ;;  %v5544_v21 = vld [vmem:[%s9535_s28 + $0x150] sm:$0xff] }
 0x22a   :  { %v6791_v28 = vpop.eup %6790  ;;  %v1010_v29 = vmul.f32 %v6789_v26, %v1006_v22  ;;  %v7754_v31 = vadd.f32 %v1013_v25, %v1009_v9  ;;  %v5539_v22 = vld [vmem:[%s9535_s28 + $0x48] sm:$0xff] }
 0x22b   :  { %6240 = vmatpush3.bf16.msra.mxu0 %v7495_v12  ;;  %v1008_v10 = vmul.f32 %v6791_v28, %v1004_v23  ;;  %v7758_v35 = vadd.f32 %v1011_v27, %v1007_v8  ;;  %v5542_v8 = vld [vmem:[%s9535_s28 + $0x140] sm:$0xff] }
 0x22c   :  { %v7760_v37 = vadd.f32 %v1014_v30, %v1010_v29  ;;  %6253 = vmatprep.subr.bf16.mxu0 %v9514_v0 }
 0x22d   :  { %v7763_v63 = vadd.f32 %v1012_v34, %v1008_v10  ;;  %v5545_v34 = vld [vmem:[%s9535_s28 + $0x158] sm:$0xff] }
 0x22e   :  { %v1186_v17 = vpack.c.bf16 %v7760_v37, %v7754_v31 }
 0x22f   :  { %v1185_v16 = vpack.c.bf16 %v7763_v63, %v7758_v35 }
 0x231   :  { %6233 = vmatprep.mubr.msk.bf16.mxu1 %vm101_vm1, %v1185_v16  ;;  %6241 = vmatprep.mubr.msk.bf16.mxu0 %vm101_vm1, %v1185_v16 }
 0x232   :  { %6234 = vmatmul.mubr.msk.bf16.vlgmr.msra.gmra.mrb[28].mxu1 %vm101_vm1, %v1186_v17  ;;  %6242 = vmatmul.mubr.msk.bf16.vlgmr.msra.gmra.mrb[32].mxu0 %vm101_vm1, %v1186_v17 }
 0x233   :  { %6246 = vmatpush3.bf16.msra.mxu1 %v7485_v11  ;;  %6249 = vmatprep.mubr.msk.bf16.mxu1 %vm101_vm1, %v1185_v16 }
 0x234   :  { %6247 = vmatprep.subr.bf16.mxu1 %v7501_v13  ;;  %6254 = vmatpush3.bf16.msra.mxu0 %v7424_v1  ;;  %v5530_v1 = vld [vmem:[%s9533_s2 + $0x10] sm:$0xff] }
 0x235   :  { %6255 = vmatprep.subr.bf16.mxu0 %v9514_v0  ;;  %6257 = vmatprep.mubr.msk.bf16.mxu0 %vm7300_vm0, %v9514_v0 }
 0x237   :  { %6248 = vmatpush3.bf16.msra.mxu1 %v7501_v13 }
 0x238   :  { %6261 = vmatprep.subr.bf16.mxu1 %v9514_v0  ;;  %6256 = vmatpush3.bf16.msra.mxu0 %v7439_v3 }
 0x239   :  { %6269 = vmatprep.subr.bf16.mxu0 %v9514_v0 }
 0x23a   :  { %6250 = vmatmul.mubr.msk.bf16.vlgmr.msra.gmra.mrb[32].mxu1 %vm101_vm1, %v1186_v17 }
 0x23b   :  { %6262 = vmatpush3.bf16.msra.mxu1 %v7429_v2  ;;  %6265 = vmatprep.mubr.msk.bf16.mxu1 %vm7300_vm0, %v9514_v0 }
 0x23c   :  { %6263 = vmatprep.subr.bf16.mxu1 %v9514_v0 }
 0x23f   :  { %6264 = vmatpush3.bf16.msra.mxu1 %v7446_v5 }
 0x240   :  { %6277 = vmatprep.subr.bf16.mxu1 %v7452_v6 }
 0x2f1   :  { %v1063_v3 = vpop.f32.mrb[24].mxu0  ;;  %v1103_v11 = vpop.f32.mrb[24].mxu1 }
 0x2f2   :  { %v1064_v12 = vadd.f32 %v7526_v14, %v1063_v3  ;;  %v1104_v13 = vadd.f32 %v7531_v15, %v1103_v11  ;;  %v6211_v2 = vpop.f32.mrb[25].mxu0  ;;  %v6219_v18 = vpop.f32.mrb[25].mxu1  ;;  %v5543_v3 = vld [vmem:[%s9535_s28 + $0x148] sm:$0xff] }
 0x2f3   :  { %v1066_v41 = vpop.f32.mrb[26].mxu0  ;;  %v1106_v5 = vpop.f32.mrb[26].mxu1 }
 0x2f4   :  { %v1149_v44 = vadd.f32 %v5530_v1, %v1064_v12  ;;  %v6212_v6 = vpop.f32.mrb[27].mxu0  ;;  %v6220_v46 = vpop.f32.mrb[27].mxu1  ;;  %v1156_v49 = vadd.f32 %v5531_v39, %v1104_v13  ;;  %v5532_v41 = vld [vmem:[%s9533_s2 + $0x90] sm:$0xff] }
 0x2f6   :  { %v5536_v48 = vmul.f32 -1.442695, %v1149_v44  ;;  %v5537_v50 = vmul.f32 -1.442695, %v1156_v49 }
 0x2f8   :  { %6792 = vpow2.f32 %v5536_v48 }
 0x2f9   :  { %v1143_v36 = vpop.f32.mrb[28].mxu0  ;;  %6794 = vpow2.f32 %v5537_v50 }
 0x2fa   :  { %v6227_v43 = vpop.f32.mrb[29].mxu0  ;;  %v1144_v12 = vadd.f32 %v7588_v38, %v1143_v36 }
 0x2fb   :  { %v1146_v14 = vpop.f32.mrb[30].mxu0 }
 0x2fc   :  { %v6228_v51 = vpop.f32.mrb[31].mxu0 }
 0x302   :  { %v6793_v15 = vpop.eup %6792 }
 0x303   :  { %v1153_v45 = vadd.f32 1.0, %v6793_v15  ;;  %v6795_v20 = vpop.eup %6794 }
 0x304   :  { %v1160_v29 = vadd.f32 1.0, %v6795_v20 }
 0x305   :  { %6796 = vrcp.f32 %v1153_v45  ;;  %v6235_v47 = vpop.f32.mrb[28].mxu1  ;;  %v6243_v55 = vpop.f32.mrb[32].mxu0 }
 0x306   :  { %v1236_v42 = vadd.f32 %v6235_v47, %v7544_v32  ;;  %v1227_v57 = vpop.f32.mrb[29].mxu1  ;;  %v1276_v58 = vpop.f32.mrb[33].mxu0  ;;  %v1285_v59 = vadd.f32 %v6243_v55, %v7567_v53 }
 0x307   :  { %v1228_v60 = vadd.f32 %v7544_v32, %v1227_v57  ;;  %v6236_v62 = vpop.f32.mrb[30].mxu1  ;;  %v6244_v4 = vpop.f32.mrb[34].mxu0  ;;  %v1277_v9 = vadd.f32 %v7567_v53, %v1276_v58 }
 0x308   :  { %v1342_v7 = vadd.f32 %v5540_v52, %v1236_v42  ;;  %v1239_v40 = vadd.f32 %v6236_v62, %v7544_v32  ;;  %v1230_v19 = vpop.f32.mrb[31].mxu1  ;;  %v1279_v23 = vpop.f32.mrb[35].mxu0  ;;  %v1288_v28 = vadd.f32 %v6244_v4, %v7567_v53  ;;  %v1370_v30 = vadd.f32 %v5544_v21, %v1285_v59 }
 0x309   :  { %v1340_v24 = vadd.f32 %v5538_v56, %v1228_v60  ;;  %v1231_v25 = vadd.f32 %v7544_v32, %v1230_v19  ;;  %v1280_v32 = vadd.f32 %v7567_v53, %v1279_v23  ;;  %v1368_v1 = vadd.f32 %v5542_v8, %v1277_v9  ;;  %v5548_v19 = vld [vmem:[%s9535_s28 + $0x250] sm:$0xff] }
 0x30a   :  { %v5558_v26 = vmul.f32 -1.442695, %v1342_v7  ;;  %v1343_v27 = vadd.f32 %v5541_v61, %v1239_v40  ;;  %v1371_v13 = vadd.f32 %v5545_v34, %v1288_v28  ;;  %v5562_v5 = vmul.f32 -1.442695, %v1370_v30  ;;  %v7868_v34 = vld [vmem:[%s9531_s25] sm:$0xff]  }
 0x30b   :  { %v5556_v10 = vmul.f32 -1.442695, %v1340_v24  ;;  %v1341_v16 = vadd.f32 %v5539_v22, %v1231_v25  ;;  %v1369_v6 = vadd.f32 %v5543_v3, %v1280_v32  ;;  %v5560_v48 = vmul.f32 -1.442695, %v1368_v1  ;;  %v7876_v1 = vld [vmem:[%s9531_s25 + $0x8] sm:$0xff]  }
 0x30c   :  { %6798 = vpow2.f32 %v5558_v26  ;;  %v5559_v17 = vmul.f32 -1.442695, %v1343_v27  ;;  %v5563_v38 = vmul.f32 -1.442695, %v1371_v13  ;;  %v5546_v26 = vld [vmem:[%s9535_s28 + $0x240] sm:$0xff] }
 0x30d   :  { %v6251_v11 = vpop.f32.mrb[32].mxu1  ;;  %6800 = vpow2.f32 %v5556_v10  ;;  %v5557_v2 = vmul.f32 -1.442695, %v1341_v16  ;;  %v5561_v36 = vmul.f32 -1.442695, %v1369_v6  ;;  %v5549_v10 = vld [vmem:[%s9535_s28 + $0x258] sm:$0xff] }
 0x30e   :  { %v1325_v18 = vpop.f32.mrb[33].mxu1  ;;  %6802 = vrcp.f32 %v1160_v29  ;;  %v1334_v21 = vadd.f32 %v6251_v11, %v7598_v33  ;;  %v7856_v29 = vld [vmem:[%s9530_s29 + $0x20] sm:$0xff]   ;;  %v5547_v11 = vld [vmem:[%s9535_s28 + $0x248] sm:$0xff] }
 0x30f   :  { %v6797_v39 = vpop.eup %6796  ;;  %v6252_v53 = vpop.f32.mrb[34].mxu1  ;;  %6804 = vpow2.f32 %v5559_v17 }
 0x310   :  { %v1163_v44 = vmul.f32 %v6797_v39, %v1144_v12  ;;  %v7835_v46 = vpop.f32.mrb[35].mxu1  ;;  %6806 = vpow2.f32 %v5557_v2  ;;  %v1337_v28 = vadd.f32 %v6252_v53, %v7598_v33  ;;  %v7891_v2 = vld [vmem:[%s9531_s25 + $0x10] sm:$0xff]   ;;  %v7898_v39 = vld [vmem:[%s9531_s25 + $0x20] sm:$0xff]  }
 0x311   :  { %6808 = vpow2.f32 %v5562_v5  ;;  %v1329_v32 = vadd.f32 %v7598_v33, %v7835_v46  ;;  %v7906_v5 = vld [vmem:[%s9531_s25 + $0x18] sm:$0xff]  }
 0x312   :  { %v1164_v49 = vadd.f32 %v5532_v41, %v1163_v44 }
 0x314   :  { %6810 = vtanh.f32 %v1164_v49 }
 0x315   :  { %6812 = vpow2.f32 %v5560_v48 }
 0x316   :  { %v6799_v50 = vpop.eup %6798  ;;  %6814 = vpow2.f32 %v5563_v38 }
 0x317   :  { %v1358_v43 = vadd.f32 1.0, %v6799_v50  ;;  %v6801_v14 = vpop.eup %6800  ;;  %6816 = vpow2.f32 %v5561_v36 }
 0x318   :  { %v6803_v51 = vpop.eup %6802  ;;  %v1356_v15 = vadd.f32 1.0, %v6801_v14 }
 0x319   :  { %6818 = vrcp.f32 %v1358_v43  ;;  %v6805_v45 = vpop.eup %6804  ;;  %v1166_v42 = vsub.f32 1.0, %v6803_v51  ;;  %v1168_v60 = vmul.f32 %v6803_v51, %v7729_v54  ;;  %v1326_v54 = vadd.f32 %v7598_v33, %v1325_v18  ;;  %v7885_v33 = vld [vmem:[%s9530_s29 + $0x28] sm:$0xff]  }
 0x31a   :  { %6820 = vrcp.f32 %v1356_v15  ;;  %v1359_v52 = vadd.f32 1.0, %v6805_v45  ;;  %v6807_v47 = vpop.eup %6806 }
 0x31b   :  { %v6809_v55 = vpop.eup %6808  ;;  %v1357_v56 = vadd.f32 1.0, %v6807_v47 }
 0x31c   :  { %6822 = vrcp.f32 %v1359_v52  ;;  %v1386_v62 = vadd.f32 1.0, %v6809_v55 }
 0x31d   :  { %6824 = vrcp.f32 %v1357_v56 }
 0x31e   :  { %v6811_v57 = vpop.eup %6810  ;;  %6826 = vrcp.f32 %v1386_v62  ;;  %v7961_v62 = vld [vmem:[%s9530_s29 + $0x10] sm:$0xff]  }
 0x31f   :  { %v6813_v58 = vpop.eup %6812  ;;  %v1167_v59 = vmul.f32 %v6811_v57, %v1166_v42 }
 0x320   :  { %v6815_v61 = vpop.eup %6814  ;;  %v1384_v7 = vadd.f32 1.0, %v6813_v58 }
 0x321   :  { %v7838_v4 = vadd.f32 %v1168_v60, %v1167_v59  ;;  %v6817_v20 = vpop.eup %6816  ;;  %v1387_v22 = vadd.f32 1.0, %v6815_v61  ;;  %v7953_v61 = vld [vmem:[%s9530_s29 + $0x8] sm:$0xff]  }
 0x322   :  { %v1385_v25 = vadd.f32 1.0, %v6817_v20  ;;  %6828 = vrcp.f32 %v1384_v7  ;;  %v7970_v20 = vld [vmem:[%s9530_s29 + $0x18] sm:$0xff]  }
 0x323   :  { %v6819_v40 = vpop.eup %6818  ;;  %v1430_v23 = vpack.c.bf16 %v7838_v4, %v7838_v4  ;;  %6830 = vrcp.f32 %v1387_v22  ;;  %v5564_v7 = vld [vmem:[%s9533_s2 + $0x18] sm:$0xff]  ;;  %v7980_v22 = vld [vmem:[%s9532_s0] ss:$0 sm:$0xff] }
 0x324   :  { %v1398_v24 = vmul.f32 %v6819_v40, %v1334_v21  ;;  %v6821_v9 = vpop.eup %6820 }
 0x325   :  { %6258 = vmatmul.mubr.msk.bf16.vlgmr.msra.gmra.mrb[36].mxu0 %vm101_vm1, %v1430_v23  ;;  %6266 = vmatmul.mubr.msk.bf16.vlgmr.msra.gmra.mrb[36].mxu1 %vm101_vm1, %v1430_v23  ;;  %v1396_v27 = vmul.f32 %v6821_v9, %v1326_v54  ;;  %v7986_v54 = vld [vmem:[%s9532_s0 + $0x1] ss:$0 sm:$0xff] }
 0x326   :  { %v1402_v8 = vadd.f32 %v5548_v19, %v1398_v24  ;;  %6270 = vmatpush3.bf16.msra.mxu0 %v7856_v29  ;;  %6273 = vmatprep.mubr.msk.bf16.mxu0 %vm7300_vm0, %v9514_v0  ;;  %v6823_v30 = vpop.eup %6822 }
 0x327   :  { %6271 = vmatprep.subr.bf16.mxu0 %v9514_v0  ;;  %6278 = vmatpush3.bf16.msra.mxu1 %v7868_v34  ;;  %v1400_v16 = vadd.f32 %v5546_v26, %v1396_v27  ;;  %v1399_v17 = vmul.f32 %v6823_v30, %v1337_v28  ;;  %v6825_v3 = vpop.eup %6824  ;;  %v5565_v27 = vld [vmem:[%s9533_s2 + $0x58] sm:$0xff] }
 0x328   :  { %6832 = vtanh.f32 %v1402_v8  ;;  %6279 = vmatprep.subr.bf16.mxu1 %v7876_v1  ;;  %v1397_v13 = vmul.f32 %v6825_v3, %v1329_v32  ;;  %v6827_v41 = vpop.eup %6826 }
 0x329   :  { %6834 = vrcp.f32 %v1385_v25  ;;  %v1403_v12 = vadd.f32 %v5549_v10, %v1399_v17  ;;  %v1410_v6 = vsub.f32 1.0, %v6827_v41  ;;  %v1418_v36 = vmul.f32 %v6827_v41, %v7754_v31 }
 0x32a   :  { %6836 = vtanh.f32 %v1400_v16  ;;  %6272 = vmatpush3.bf16.msra.mxu0 %v7885_v33  ;;  %v1401_v18 = vadd.f32 %v5547_v11, %v1397_v13 }
 0x32b   :  { %6285 = vmatprep.subr.bf16.mxu0 %v7891_v2  ;;  %6280 = vmatpush3.bf16.msra.mxu1 %v7876_v1  ;;  %6838 = vtanh.f32 %v1403_v12 }
 0x32c   :  { %6293 = vmatprep.subr.bf16.mxu1 %v7898_v39  ;;  %6840 = vtanh.f32 %v1401_v18  ;;  %v6829_v53 = vpop.eup %6828 }
 0x32d   :  { %6274 = vmatmul.mubr.msk.bf16.vlgmr.msra.gmra.mrb[40].mxu0 %vm101_vm1, %v1430_v23  ;;  %v6831_v44 = vpop.eup %6830  ;;  %v1408_v49 = vsub.f32 1.0, %v6829_v53  ;;  %v1416_v51 = vmul.f32 %v6829_v53, %v7758_v35 }
 0x32e   :  { %6286 = vmatpush3.bf16.msra.mxu0 %v7891_v2  ;;  %v1411_v43 = vsub.f32 1.0, %v6831_v44  ;;  %v1419_v42 = vmul.f32 %v6831_v44, %v7760_v37  ;;  %v7936_v37 = vld [vmem:[%s9531_s25 + $0x28] sm:$0xff]   ;;  %v5574_v44 = vld [vmem:[%s9535_s28 + $0x70] sm:$0xff] }
 0x32f   :  { %6287 = vmatprep.subr.bf16.mxu0 %v7906_v5 }
 0x332   :  { %v6833_v46 = vpop.eup %6832  ;;  %6288 = vmatpush3.bf16.msra.mxu0 %v7906_v5 }
 0x333   :  { %v6835_v48 = vpop.eup %6834  ;;  %v1414_v38 = vmul.f32 %v6833_v46, %v1410_v6  ;;  %6301 = vmatprep.subr.bf16.mxu0 %v9514_v0 }
 0x334   :  { %v6837_v50 = vpop.eup %6836  ;;  %v1409_v52 = vsub.f32 1.0, %v6835_v48  ;;  %v1417_v31 = vmul.f32 %v6835_v48, %v7763_v63  ;;  %v7942_v63 = vld [vmem:[%s9530_s29] sm:$0xff]  }
 0x335   :  { %v1412_v14 = vmul.f32 %v6837_v50, %v1408_v49  ;;  %v7913_v15 = vadd.f32 %v1418_v36, %v1414_v38  ;;  %v6839_v45 = vpop.eup %6838  ;;  %v7998_v48 = vld [vmem:[%s9534_s26] ss:$0 sm:$0xff]  ;;  %v8004_v38 = vld [vmem:[%s9534_s26 + $0x1] ss:$0 sm:$0xff] }
 0x336   :  { %v1415_v55 = vmul.f32 %v6839_v45, %v1411_v43  ;;  %v6841_v56 = vpop.eup %6840  ;;  %v5572_v50 = vld [vmem:[%s9535_s28 + $0x60] sm:$0xff] }
 0x337   :  { %v7915_v47 = vadd.f32 %v1416_v51, %v1412_v14  ;;  %v1413_v57 = vmul.f32 %v6841_v56, %v1409_v52  ;;  %v8013_v51 = vld [vmem:[%s9532_s0 + $0x2] ss:$0 sm:$0xff]  ;;  %v5578_v52 = vld [vmem:[%s9535_s28 + $0x170] sm:$0xff] }
 0x338   :  { %v7919_v58 = vadd.f32 %v1419_v42, %v1415_v55  ;;  %v5575_v42 = vld [vmem:[%s9535_s28 + $0x78] sm:$0xff] }
 0x339   :  { %v7921_v59 = vadd.f32 %v1417_v31, %v1413_v57 }
 0x33a   :  { %v1591_v60 = vpack.c.bf16 %v7919_v58, %v7913_v15 }
 0x33b   :  { %v1590_v35 = vpack.c.bf16 %v7921_v59, %v7915_v47 }
 0x33d   :  { %6281 = vmatprep.mubr.msk.bf16.mxu1 %vm101_vm1, %v1590_v35  ;;  %6289 = vmatprep.mubr.msk.bf16.mxu0 %vm101_vm1, %v1590_v35 }
 0x33e   :  { %6282 = vmatmul.mubr.msk.bf16.vlgmr.msra.gmra.mrb[40].mxu1 %vm101_vm1, %v1591_v60  ;;  %6290 = vmatmul.mubr.msk.bf16.vlgmr.msra.gmra.mrb[44].mxu0 %vm101_vm1, %v1591_v60 }
 0x33f   :  { %6294 = vmatpush3.bf16.msra.mxu1 %v7898_v39  ;;  %6297 = vmatprep.mubr.msk.bf16.mxu1 %vm101_vm1, %v1590_v35  ;;  %v5566_v35 = vld [vmem:[%s9533_s2 + $0x98] sm:$0xff] }
 0x340   :  { %6295 = vmatprep.subr.bf16.mxu1 %v7936_v37  ;;  %6302 = vmatpush3.bf16.msra.mxu0 %v7942_v63 }
 0x341   :  { %6303 = vmatprep.subr.bf16.mxu0 %v9514_v0  ;;  %6305 = vmatprep.mubr.msk.bf16.mxu0 %vm7300_vm0, %v9514_v0 }
 0x343   :  { %6296 = vmatpush3.bf16.msra.mxu1 %v7936_v37 }
 0x344   :  { %6309 = vmatprep.subr.bf16.mxu1 %v9514_v0  ;;  %6304 = vmatpush3.bf16.msra.mxu0 %v7953_v61 }
 0x345   :  { %6317 = vmatprep.subr.bf16.mxu0 %v9514_v0 }
 0x346   :  { %6298 = vmatmul.mubr.msk.bf16.vlgmr.msra.gmra.mrb[44].mxu1 %vm101_vm1, %v1591_v60 }
 0x347   :  { %6310 = vmatpush3.bf16.msra.mxu1 %v7961_v62  ;;  %6313 = vmatprep.mubr.msk.bf16.mxu1 %vm7300_vm0, %v9514_v0 }
 0x348   :  { %6311 = vmatprep.subr.bf16.mxu1 %v9514_v0 }
 0x34b   :  { %6312 = vmatpush3.bf16.msra.mxu1 %v7970_v20 }
 0x34c   :  { %6325 = vmatprep.subr.bf16.mxu1 %v7868_v34 }
 0x3f8   :  { %v1468_v21 = vpop.f32.mrb[36].mxu0  ;;  %v1508_v40 = vpop.f32.mrb[36].mxu1 }
 0x3f9   :  { %v1469_v19 = vadd.f32 %v7980_v22, %v1468_v21  ;;  %v6259_v23 = vpop.f32.mrb[37].mxu0  ;;  %v6267_v24 = vpop.f32.mrb[37].mxu1  ;;  %v1509_v9 = vadd.f32 %v7986_v54, %v1508_v40 }
 0x3fa   :  { %v1471_v25 = vpop.f32.mrb[38].mxu0  ;;  %v1511_v26 = vpop.f32.mrb[38].mxu1  ;;  %v5573_v24 = vld [vmem:[%s9535_s28 + $0x68] sm:$0xff] }
 0x3fb   :  { %v1554_v8 = vadd.f32 %v5564_v7, %v1469_v19  ;;  %v6260_v28 = vpop.f32.mrb[39].mxu0  ;;  %v6268_v30 = vpop.f32.mrb[39].mxu1  ;;  %v1561_v16 = vadd.f32 %v5565_v27, %v1509_v9 }
 0x3fd   :  { %v5570_v10 = vmul.f32 -1.442695, %v1554_v8  ;;  %v5571_v3 = vmul.f32 -1.442695, %v1561_v16 }
 0x3ff   :  { %6842 = vpow2.f32 %v5570_v10  ;;  %v5576_v10 = vld [vmem:[%s9535_s28 + $0x160] sm:$0xff] }
 0x400   :  { %v1548_v17 = vpop.f32.mrb[40].mxu0  ;;  %6844 = vpow2.f32 %v5571_v3 }
 0x401   :  { %v6275_v32 = vpop.f32.mrb[41].mxu0  ;;  %v1549_v45 = vadd.f32 %v8013_v51, %v1548_v17  ;;  %v5579_v17 = vld [vmem:[%s9535_s28 + $0x178] sm:$0xff] }
 0x402   :  { %v1551_v11 = vpop.f32.mrb[42].mxu0 }
 0x403   :  { %v6276_v12 = vpop.f32.mrb[43].mxu0 }
 0x404   :  { %v5577_v12 = vld [vmem:[%s9535_s28 + $0x168] sm:$0xff] }
 0x409   :  { %v6843_v13 = vpop.eup %6842 }
 0x40a   :  { %v1558_v18 = vadd.f32 1.0, %v6843_v13  ;;  %v6845_v41 = vpop.eup %6844 }
 0x40b   :  { %v1565_v53 = vadd.f32 1.0, %v6845_v41 }
 0x40c   :  { %6846 = vrcp.f32 %v1558_v18 }
 0x40d   :  { %6848 = vrcp.f32 %v1565_v53 }
 0x411   :  { %v6283_v6 = vpop.f32.mrb[40].mxu1  ;;  %v6291_v46 = vpop.f32.mrb[44].mxu0 }
 0x412   :  { %v1641_v49 = vadd.f32 %v7998_v48, %v6283_v6  ;;  %v1690_v36 = vadd.f32 %v8004_v38, %v6291_v46  ;;  %v1632_v43 = vpop.f32.mrb[41].mxu1  ;;  %v1681_v14 = vpop.f32.mrb[45].mxu0 }
 0x413   :  { %v1633_v55 = vadd.f32 %v7998_v48, %v1632_v43  ;;  %v6284_v56 = vpop.f32.mrb[42].mxu1  ;;  %v6292_v57 = vpop.f32.mrb[46].mxu0  ;;  %v1682_v8 = vadd.f32 %v8004_v38, %v1681_v14 }
 0x414   :  { %v1747_v60 = vadd.f32 %v5574_v44, %v1641_v49  ;;  %v1644_v7 = vadd.f32 %v7998_v48, %v6284_v56  ;;  %v1635_v21 = vpop.f32.mrb[43].mxu1  ;;  %v1684_v40 = vpop.f32.mrb[47].mxu0  ;;  %v1775_v26 = vadd.f32 %v5578_v52, %v1690_v36  ;;  %v1693_v16 = vadd.f32 %v8004_v38, %v6292_v57 }
 0x415   :  { %v1745_v23 = vadd.f32 %v5572_v50, %v1633_v55  ;;  %v1636_v9 = vadd.f32 %v7998_v48, %v1635_v21  ;;  %v1685_v3 = vadd.f32 %v8004_v38, %v1684_v40  ;;  %v1773_v41 = vadd.f32 %v5576_v10, %v1682_v8 }
 0x416   :  { %v6847_v31 = vpop.eup %6846  ;;  %v5592_v25 = vmul.f32 -1.442695, %v1747_v60  ;;  %v1748_v27 = vadd.f32 %v5575_v42, %v1644_v7  ;;  %v5596_v18 = vmul.f32 -1.442695, %v1775_v26  ;;  %v1776_v44 = vadd.f32 %v5579_v17, %v1693_v16  ;;  %v5582_v16 = vld [vmem:[%s9535_s28 + $0x270] sm:$0xff] }
 0x417   :  { %v1568_v19 = vmul.f32 %v6847_v31, %v1549_v45  ;;  %v5590_v30 = vmul.f32 -1.442695, %v1745_v23  ;;  %v1746_v32 = vadd.f32 %v5573_v24, %v1636_v9  ;;  %v1774_v49 = vadd.f32 %v5577_v12, %v1685_v3  ;;  %v6849_v43 = vpop.eup %6848 }
 0x418   :  { %6850 = vpow2.f32 %v5592_v25  ;;  %v5593_v11 = vmul.f32 -1.442695, %v1748_v27  ;;  %v5594_v50 = vmul.f32 -1.442695, %v1773_v41  ;;  %v5597_v14 = vmul.f32 -1.442695, %v1776_v44 }
 0x419   :  { %v1569_v28 = vadd.f32 %v5566_v35, %v1568_v19  ;;  %v6299_v13 = vpop.f32.mrb[44].mxu1  ;;  %v5591_v6 = vmul.f32 -1.442695, %v1746_v32  ;;  %v5595_v45 = vmul.f32 -1.442695, %v1774_v49  ;;  %v1571_v55 = vsub.f32 1.0, %v6849_v43 }
 0x41a   :  { %v1730_v53 = vpop.f32.mrb[45].mxu1  ;;  %v1573_v31 = vmul.f32 %v6849_v43, %v7838_v4  ;;  %v8063_v27 = vld [vmem:[%s9534_s26 + $0x2] ss:$0 sm:$0xff] }
 0x41b   :  { %6852 = vtanh.f32 %v1569_v28  ;;  %v8043_v46 = vpop.f32.mrb[46].mxu1  ;;  %v1739_v28 = vadd.f32 %v8063_v27, %v6299_v13  ;;  %v1731_v3 = vadd.f32 %v8063_v27, %v1730_v53  ;;  %v5583_v53 = vld [vmem:[%s9535_s28 + $0x278] sm:$0xff] }
 0x41c   :  { %6854 = vpow2.f32 %v5590_v30  ;;  %v8045_v36 = vpop.f32.mrb[47].mxu1  ;;  %v1742_v44 = vadd.f32 %v8063_v27, %v8043_v46  ;;  %v5581_v46 = vld [vmem:[%s9535_s28 + $0x268] sm:$0xff] }
 0x41d   :  { %6856 = vpow2.f32 %v5593_v11  ;;  %v1734_v43 = vadd.f32 %v8063_v27, %v8045_v36 }
 0x41e   :  { %6858 = vpow2.f32 %v5596_v18  ;;  %v5580_v18 = vld [vmem:[%s9535_s28 + $0x260] sm:$0xff] }
 0x41f   :  { %6860 = vpow2.f32 %v5591_v6 }
 0x420   :  { %6862 = vpow2.f32 %v5594_v50 }
 0x421   :  { %6864 = vpow2.f32 %v5597_v14 }
 0x422   :  { %v6851_v52 = vpop.eup %6850  ;;  %6866 = vpow2.f32 %v5595_v45 }
 0x423   :  { %v1763_v56 = vadd.f32 1.0, %v6851_v52 }
 0x425   :  { %v6853_v42 = vpop.eup %6852  ;;  %6868 = vrcp.f32 %v1763_v56 }
 0x426   :  { %v1572_v57 = vmul.f32 %v6853_v42, %v1571_v55  ;;  %v6855_v35 = vpop.eup %6854 }
 0x427   :  { %v1761_v60 = vadd.f32 1.0, %v6855_v35  ;;  %v6857_v21 = vpop.eup %6856 }
 0x428   :  { %v8048_v7 = vadd.f32 %v1573_v31, %v1572_v57  ;;  %v6859_v40 = vpop.eup %6858  ;;  %v1764_v19 = vadd.f32 1.0, %v6857_v21 }
 0x429   :  { %6870 = vrcp.f32 %v1761_v60  ;;  %v6861_v24 = vpop.eup %6860  ;;  %v1791_v25 = vadd.f32 1.0, %v6859_v40 }
 0x42a   :  { %v1835_v23 = vpack.c.bf16 %v8048_v7, %v8048_v7  ;;  %6872 = vrcp.f32 %v1764_v19  ;;  %v1762_v9 = vadd.f32 1.0, %v6861_v24  ;;  %v6863_v4 = vpop.eup %6862 }
 0x42b   :  { %v6865_v26 = vpop.eup %6864  ;;  %v1789_v10 = vadd.f32 1.0, %v6863_v4 }
 0x42c   :  { %6306 = vmatmul.mubr.msk.bf16.vlgmr.msra.gmra.mrb[48].mxu0 %vm101_vm1, %v1835_v23  ;;  %6314 = vmatmul.mubr.msk.bf16.vlgmr.msra.gmra.mrb[48].mxu1 %vm101_vm1, %v1835_v23  ;;  %6874 = vrcp.f32 %v1762_v9  ;;  %v6867_v8 = vpop.eup %6866  ;;  %v1792_v32 = vadd.f32 1.0, %v6865_v26 }
 0x42d   :  { %6318 = vmatpush3.bf16.msra.mxu0 %v7856_v29  ;;  %6321 = vmatprep.mubr.msk.bf16.mxu0 %vm7300_vm0, %v9514_v0  ;;  %6876 = vrcp.f32 %v1791_v25  ;;  %v1790_v12 = vadd.f32 1.0, %v6867_v8 }
 0x42e   :  { %6319 = vmatprep.subr.bf16.mxu0 %v9514_v0  ;;  %6326 = vmatpush3.bf16.msra.mxu1 %v7868_v34  ;;  %6878 = vrcp.f32 %v1789_v10 }
 0x42f   :  { %6327 = vmatprep.subr.bf16.mxu1 %v7876_v1  ;;  %v6869_v30 = vpop.eup %6868 }
 0x430   :  { %v1803_v17 = vmul.f32 %v6869_v30, %v1739_v28 }
 0x431   :  { %6320 = vmatpush3.bf16.msra.mxu0 %v7885_v33 }
 0x432   :  { %6333 = vmatprep.subr.bf16.mxu0 %v7891_v2  ;;  %6328 = vmatpush3.bf16.msra.mxu1 %v7876_v1  ;;  %v1807_v13 = vadd.f32 %v5582_v16, %v1803_v17 }
 0x433   :  { %6341 = vmatprep.subr.bf16.mxu1 %v7898_v39  ;;  %v6871_v11 = vpop.eup %6870 }
 0x434   :  { %6322 = vmatmul.mubr.msk.bf16.vlgmr.msra.gmra.mrb[52].mxu0 %vm101_vm1, %v1835_v23  ;;  %v1801_v41 = vmul.f32 %v6871_v11, %v1731_v3  ;;  %v6873_v6 = vpop.eup %6872  ;;  %6880 = vtanh.f32 %v1807_v13 }
 0x435   :  { %6334 = vmatpush3.bf16.msra.mxu0 %v7891_v2  ;;  %6882 = vrcp.f32 %v1792_v32  ;;  %v1804_v50 = vmul.f32 %v6873_v6, %v1742_v44 }
 0x436   :  { %6335 = vmatprep.subr.bf16.mxu0 %v7906_v5  ;;  %v1805_v49 = vadd.f32 %v5580_v18, %v1801_v41  ;;  %v6875_v14 = vpop.eup %6874  ;;  %6884 = vrcp.f32 %v1790_v12 }
 0x437   :  { %v1808_v45 = vadd.f32 %v5583_v53, %v1804_v50  ;;  %v1802_v52 = vmul.f32 %v6875_v14, %v1734_v43  ;;  %v6877_v42 = vpop.eup %6876 }
 0x438   :  { %6886 = vtanh.f32 %v1805_v49  ;;  %v6879_v56 = vpop.eup %6878  ;;  %v1815_v57 = vsub.f32 1.0, %v6877_v42  ;;  %v1823_v60 = vmul.f32 %v6877_v42, %v7913_v15  ;;  %v5599_v49 = vld [vmem:[%s9533_s2 + $0x60] sm:$0xff] }
 0x439   :  { %6336 = vmatpush3.bf16.msra.mxu0 %v7906_v5  ;;  %6888 = vtanh.f32 %v1808_v45  ;;  %v1806_v55 = vadd.f32 %v5581_v46, %v1802_v52  ;;  %v1813_v40 = vsub.f32 1.0, %v6879_v56  ;;  %v1821_v4 = vmul.f32 %v6879_v56, %v7915_v47 }
 0x43a   :  { %6349 = vmatprep.subr.bf16.mxu0 %v9514_v0 }
 0x43b   :  { %6890 = vtanh.f32 %v1806_v55 }
 0x43e   :  { %v6881_v36 = vpop.eup %6880 }
 0x43f   :  { %v6883_v31 = vpop.eup %6882  ;;  %v1819_v35 = vmul.f32 %v6881_v36, %v1815_v57 }
 0x440   :  { %v6885_v21 = vpop.eup %6884  ;;  %v1816_v24 = vsub.f32 1.0, %v6883_v31  ;;  %v1824_v30 = vmul.f32 %v6883_v31, %v7919_v58  ;;  %v5598_v58 = vld [vmem:[%s9533_s2 + $0x20] sm:$0xff] }
 0x441   :  { %v8093_v23 = vadd.f32 %v1823_v60, %v1819_v35  ;;  %v1814_v26 = vsub.f32 1.0, %v6885_v21  ;;  %v1822_v15 = vmul.f32 %v6885_v21, %v7921_v59 }
 0x442   :  { %v6887_v19 = vpop.eup %6886 }
 0x443   :  { %v1817_v9 = vmul.f32 %v6887_v19, %v1813_v40  ;;  %v6889_v25 = vpop.eup %6888  ;;  %v5600_v40 = vld [vmem:[%s9533_s2 + $0xa0] sm:$0xff] }
 0x444   :  { %v1820_v28 = vmul.f32 %v6889_v25, %v1816_v24 }
 0x445   :  { %v8096_v8 = vadd.f32 %v1821_v4, %v1817_v9  ;;  %v6891_v10 = vpop.eup %6890  ;;  %v5608_v9 = vld [vmem:[%s9535_s28 + $0x90] sm:$0xff] }
 0x446   :  { %v1818_v16 = vmul.f32 %v6891_v10, %v1814_v26  ;;  %v8100_v17 = vadd.f32 %v1824_v30, %v1820_v28  ;;  %v5606_v28 = vld [vmem:[%s9535_s28 + $0x80] sm:$0xff] }
 0x448   :  { %v8102_v32 = vadd.f32 %v1822_v15, %v1818_v16  ;;  %v1996_v47 = vpack.c.bf16 %v8100_v17, %v8093_v23 }
 0x44a   :  { %v1995_v3 = vpack.c.bf16 %v8102_v32, %v8096_v8 }
 0x44c   :  { %6329 = vmatprep.mubr.msk.bf16.mxu1 %vm101_vm1, %v1995_v3  ;;  %6337 = vmatprep.mubr.msk.bf16.mxu0 %vm101_vm1, %v1995_v3 }
 0x44d   :  { %6330 = vmatmul.mubr.msk.bf16.vlgmr.msra.gmra.mrb[52].mxu1 %vm101_vm1, %v1996_v47  ;;  %6338 = vmatmul.mubr.msk.bf16.vlgmr.msra.gmra.mrb[56].mxu0 %vm101_vm1, %v1996_v47 }
 0x44e   :  { %6342 = vmatpush3.bf16.msra.mxu1 %v7898_v39  ;;  %6345 = vmatprep.mubr.msk.bf16.mxu1 %vm101_vm1, %v1995_v3  ;;  %v5609_v3 = vld [vmem:[%s9535_s28 + $0x98] sm:$0xff] }
 0x44f   :  { %6343 = vmatprep.subr.bf16.mxu1 %v7936_v37  ;;  %6350 = vmatpush3.bf16.msra.mxu0 %v7942_v63 }
 0x450   :  { %6351 = vmatprep.subr.bf16.mxu0 %v9514_v0  ;;  %6353 = vmatprep.mubr.msk.bf16.mxu0 %vm7300_vm0, %v9514_v0 }
 0x452   :  { %6344 = vmatpush3.bf16.msra.mxu1 %v7936_v37 }
 0x453   :  { %6357 = vmatprep.subr.bf16.mxu1 %v9514_v0  ;;  %6352 = vmatpush3.bf16.msra.mxu0 %v7953_v61 }
 0x454   :  { %6365 = vmatprep.subr.bf16.mxu0 %v9514_v0 }
 0x455   :  { %6346 = vmatmul.mubr.msk.bf16.vlgmr.msra.gmra.mrb[56].mxu1 %vm101_vm1, %v1996_v47 }
 0x456   :  { %6358 = vmatpush3.bf16.msra.mxu1 %v7961_v62  ;;  %6361 = vmatprep.mubr.msk.bf16.mxu1 %vm7300_vm0, %v9514_v0 }
 0x457   :  { %6359 = vmatprep.subr.bf16.mxu1 %v9514_v0 }
 0x45a   :  { %6360 = vmatpush3.bf16.msra.mxu1 %v7970_v20 }
 0x45b   :  { %6373 = vmatprep.subr.bf16.mxu1 %v7868_v34 }
 0x4ff   :  { %v1873_v59 = vpop.f32.mrb[48].mxu0  ;;  %v1913_v11 = vpop.f32.mrb[48].mxu1 }
 0x500   :  { %v1874_v12 = vadd.f32 %v7980_v22, %v1873_v59  ;;  %v6307_v13 = vpop.f32.mrb[49].mxu0  ;;  %v6315_v18 = vpop.f32.mrb[49].mxu1  ;;  %v1914_v41 = vadd.f32 %v7986_v54, %v1913_v11  ;;  %v5612_v11 = vld [vmem:[%s9535_s28 + $0x190] sm:$0xff] }
 0x501   :  { %v1876_v44 = vpop.f32.mrb[50].mxu0  ;;  %v1916_v6 = vpop.f32.mrb[50].mxu1  ;;  %v5607_v13 = vld [vmem:[%s9535_s28 + $0x88] sm:$0xff] }
 0x502   :  { %v1959_v53 = vadd.f32 %v5598_v58, %v1874_v12  ;;  %v6308_v50 = vpop.f32.mrb[51].mxu0  ;;  %v6316_v43 = vpop.f32.mrb[51].mxu1  ;;  %v1966_v46 = vadd.f32 %v5599_v49, %v1914_v41 }
 0x503   :  { %v5610_v50 = vld [vmem:[%s9535_s28 + $0x180] sm:$0xff] }
 0x504   :  { %v5604_v14 = vmul.f32 -1.442695, %v1959_v53  ;;  %v5605_v55 = vmul.f32 -1.442695, %v1966_v46 }
 0x506   :  { %6892 = vpow2.f32 %v5604_v14 }
 0x507   :  { %v1953_v45 = vpop.f32.mrb[52].mxu0  ;;  %6894 = vpow2.f32 %v5605_v55  ;;  %v5613_v55 = vld [vmem:[%s9535_s28 + $0x198] sm:$0xff] }
 0x508   :  { %v6323_v52 = vpop.f32.mrb[53].mxu0  ;;  %v1954_v60 = vadd.f32 %v8013_v51, %v1953_v45 }
 0x509   :  { %v1956_v42 = vpop.f32.mrb[54].mxu0 }
 0x50a   :  { %v6324_v56 = vpop.f32.mrb[55].mxu0 }
 0x510   :  { %v6893_v57 = vpop.eup %6892 }
 0x511   :  { %v1963_v36 = vadd.f32 1.0, %v6893_v57  ;;  %v6895_v31 = vpop.eup %6894 }
 0x512   :  { %v1970_v35 = vadd.f32 1.0, %v6895_v31  ;;  %v5611_v31 = vld [vmem:[%s9535_s28 + $0x188] sm:$0xff] }
 0x513   :  { %6896 = vrcp.f32 %v1963_v36 }
 0x514   :  { %6898 = vrcp.f32 %v1970_v35 }
 0x51d   :  { %v6897_v21 = vpop.eup %6896 }
 0x51e   :  { %v1973_v19 = vmul.f32 %v6897_v21, %v1954_v60  ;;  %v6899_v46 = vpop.eup %6898 }
 0x51f   :  { %v1976_v60 = vsub.f32 1.0, %v6899_v46 }
 0x520   :  { %v1974_v24 = vadd.f32 %v5600_v40, %v1973_v19  ;;  %v6331_v4 = vpop.f32.mrb[52].mxu1  ;;  %v6339_v25 = vpop.f32.mrb[56].mxu0 }
 0x521   :  { %v2046_v26 = vadd.f32 %v7998_v48, %v6331_v4  ;;  %v2037_v30 = vpop.f32.mrb[53].mxu1  ;;  %v2086_v10 = vpop.f32.mrb[57].mxu0  ;;  %v2095_v16 = vadd.f32 %v8004_v38, %v6339_v25 }
 0x522   :  { %6900 = vtanh.f32 %v1974_v24  ;;  %v2038_v15 = vadd.f32 %v7998_v48, %v2037_v30  ;;  %v6332_v47 = vpop.f32.mrb[54].mxu1  ;;  %v6340_v58 = vpop.f32.mrb[58].mxu0  ;;  %v2087_v6 = vadd.f32 %v8004_v38, %v2086_v10  ;;  %v1978_v30 = vmul.f32 %v6899_v46, %v8048_v7 }
 0x523   :  { %v2152_v59 = vadd.f32 %v5608_v9, %v2046_v26  ;;  %v2049_v12 = vadd.f32 %v7998_v48, %v6332_v47  ;;  %v2040_v18 = vpop.f32.mrb[55].mxu1  ;;  %v2089_v41 = vpop.f32.mrb[59].mxu0  ;;  %v2098_v14 = vadd.f32 %v8004_v38, %v6340_v58  ;;  %v2180_v45 = vadd.f32 %v5612_v11, %v2095_v16 }
 0x524   :  { %v2150_v44 = vadd.f32 %v5606_v28, %v2038_v15  ;;  %v2041_v53 = vadd.f32 %v7998_v48, %v2040_v18  ;;  %v2090_v57 = vadd.f32 %v8004_v38, %v2089_v41  ;;  %v2178_v36 = vadd.f32 %v5610_v50, %v2087_v6 }
 0x525   :  { %v5626_v49 = vmul.f32 -1.442695, %v2152_v59  ;;  %v2153_v43 = vadd.f32 %v5609_v3, %v2049_v12  ;;  %v2181_v21 = vadd.f32 %v5613_v55, %v2098_v14  ;;  %v5630_v9 = vmul.f32 -1.442695, %v2180_v45  ;;  %v5616_v14 = vld [vmem:[%s9535_s28 + $0x290] sm:$0xff]  ;;  %v5614_v55 = vld [vmem:[%s9535_s28 + $0x280] sm:$0xff] }
 0x526   :  { %v5624_v52 = vmul.f32 -1.442695, %v2150_v44  ;;  %v2151_v42 = vadd.f32 %v5607_v13, %v2041_v53  ;;  %v2179_v25 = vadd.f32 %v5611_v31, %v2090_v57  ;;  %v5628_v10 = vmul.f32 -1.442695, %v2178_v36 }
 0x527   :  { %6902 = vpow2.f32 %v5626_v49  ;;  %v5627_v56 = vmul.f32 -1.442695, %v2153_v43  ;;  %v5631_v16 = vmul.f32 -1.442695, %v2181_v21 }
 0x528   :  { %v6347_v35 = vpop.f32.mrb[56].mxu1  ;;  %6904 = vpow2.f32 %v5624_v52  ;;  %v5625_v40 = vmul.f32 -1.442695, %v2151_v42  ;;  %v5629_v3 = vmul.f32 -1.442695, %v2179_v25 }
 0x529   :  { %v2135_v19 = vpop.f32.mrb[57].mxu1  ;;  %6906 = vpow2.f32 %v5627_v56  ;;  %v2144_v50 = vadd.f32 %v8063_v27, %v6347_v35 }
 0x52a   :  { %v8174_v4 = vpop.f32.mrb[58].mxu1  ;;  %6908 = vpow2.f32 %v5625_v40  ;;  %v5615_v40 = vld [vmem:[%s9535_s28 + $0x288] sm:$0xff] }
 0x52b   :  { %v8176_v26 = vpop.f32.mrb[59].mxu1  ;;  %6910 = vpow2.f32 %v5630_v9  ;;  %v2147_v57 = vadd.f32 %v8063_v27, %v8174_v4 }
 0x52c   :  { %v6901_v24 = vpop.eup %6900  ;;  %6912 = vpow2.f32 %v5628_v10 }
 0x52d   :  { %v1977_v28 = vmul.f32 %v6901_v24, %v1976_v60  ;;  %6914 = vpow2.f32 %v5631_v16  ;;  %v2139_v60 = vadd.f32 %v8063_v27, %v8176_v26 }
 0x52e   :  { %6916 = vpow2.f32 %v5629_v3 }
 0x52f   :  { %v8179_v15 = vadd.f32 %v1978_v30, %v1977_v28 }
 0x531   :  { %v2240_v47 = vpack.c.bf16 %v8179_v15, %v8179_v15  ;;  %v6903_v58 = vpop.eup %6902 }
 0x532   :  { %v2168_v59 = vadd.f32 1.0, %v6903_v58  ;;  %v6905_v7 = vpop.eup %6904 }
 0x533   :  { %6354 = vmatmul.mubr.msk.bf16.vlgmr.msra.gmra.mrb[60].mxu0 %vm101_vm1, %v2240_v47  ;;  %6362 = vmatmul.mubr.msk.bf16.vlgmr.msra.gmra.mrb[60].mxu1 %vm101_vm1, %v2240_v47  ;;  %v2166_v11 = vadd.f32 1.0, %v6905_v7  ;;  %v6907_v12 = vpop.eup %6906 }
 0x534   :  { %6366 = vmatpush3.bf16.msra.mxu0 %v7856_v29  ;;  %6369 = vmatprep.mubr.msk.bf16.mxu0 %vm7300_vm0, %v9514_v0  ;;  %6918 = vrcp.f32 %v2168_v59  ;;  %v2169_v13 = vadd.f32 1.0, %v6907_v12  ;;  %v6909_v18 = vpop.eup %6908 }
 0x535   :  { %6367 = vmatprep.subr.bf16.mxu0 %v9514_v0  ;;  %6374 = vmatpush3.bf16.msra.mxu1 %v7868_v34  ;;  %6920 = vrcp.f32 %v2166_v11  ;;  %v6911_v29 = vpop.eup %6910  ;;  %v2167_v41 = vadd.f32 1.0, %v6909_v18 }
 0x536   :  { %6375 = vmatprep.subr.bf16.mxu1 %v7876_v1  ;;  %6922 = vrcp.f32 %v2169_v13  ;;  %v6913_v44 = vpop.eup %6912  ;;  %v2196_v53 = vadd.f32 1.0, %v6911_v29 }
 0x537   :  { %6924 = vrcp.f32 %v2167_v41  ;;  %v6915_v6 = vpop.eup %6914  ;;  %v2194_v49 = vadd.f32 1.0, %v6913_v44 }
 0x538   :  { %6368 = vmatpush3.bf16.msra.mxu0 %v7885_v33  ;;  %v6917_v33 = vpop.eup %6916  ;;  %v2197_v43 = vadd.f32 1.0, %v6915_v6  ;;  %6926 = vrcp.f32 %v2196_v53 }
 0x539   :  { %6381 = vmatprep.subr.bf16.mxu0 %v7891_v2  ;;  %6376 = vmatpush3.bf16.msra.mxu1 %v7876_v1  ;;  %v2195_v52 = vadd.f32 1.0, %v6917_v33  ;;  %6928 = vrcp.f32 %v2194_v49 }
 0x53a   :  { %6389 = vmatprep.subr.bf16.mxu1 %v7898_v39  ;;  %6930 = vrcp.f32 %v2197_v43 }
 0x53b   :  { %6370 = vmatmul.mubr.msk.bf16.vlgmr.msra.gmra.mrb[64].mxu0 %vm101_vm1, %v2240_v47 }
 0x53c   :  { %6382 = vmatpush3.bf16.msra.mxu0 %v7891_v2  ;;  %v2136_v2 = vadd.f32 %v8063_v27, %v2135_v19 }
 0x53d   :  { %6383 = vmatprep.subr.bf16.mxu0 %v7906_v5 }
 0x53e   :  { %v6919_v1 = vpop.eup %6918 }
 0x53f   :  { %v2208_v46 = vmul.f32 %v6919_v1, %v2144_v50  ;;  %v6921_v45 = vpop.eup %6920 }
 0x540   :  { %6384 = vmatpush3.bf16.msra.mxu0 %v7906_v5  ;;  %v2206_v56 = vmul.f32 %v6921_v45, %v2136_v2  ;;  %v6923_v36 = vpop.eup %6922  ;;  %v5617_v5 = vld [vmem:[%s9535_s28 + $0x298] sm:$0xff] }
 0x541   :  { %6397 = vmatprep.subr.bf16.mxu0 %v9514_v0  ;;  %v2212_v42 = vadd.f32 %v5616_v14, %v2208_v46  ;;  %v2209_v35 = vmul.f32 %v6923_v36, %v2147_v57  ;;  %v6925_v21 = vpop.eup %6924 }
 0x542   :  { %v2210_v31 = vadd.f32 %v5614_v55, %v2206_v56  ;;  %v2207_v24 = vmul.f32 %v6925_v21, %v2139_v60  ;;  %v6927_v4 = vpop.eup %6926  ;;  %v5634_v60 = vld [vmem:[%s9533_s2 + $0xa8] sm:$0xff] }
 0x543   :  { %6932 = vtanh.f32 %v2212_v42  ;;  %v2213_v19 = vadd.f32 %v5617_v5, %v2209_v35  ;;  %v6929_v25 = vpop.eup %6928  ;;  %v2220_v30 = vsub.f32 1.0, %v6927_v4  ;;  %v2228_v47 = vmul.f32 %v6927_v4, %v8093_v23 }
 0x544   :  { %6934 = vrcp.f32 %v2195_v52  ;;  %v2211_v9 = vadd.f32 %v5615_v40, %v2207_v24  ;;  %v6931_v28 = vpop.eup %6930  ;;  %v2218_v3 = vsub.f32 1.0, %v6929_v25  ;;  %v2226_v11 = vmul.f32 %v6929_v25, %v8096_v8 }
 0x545   :  { %6936 = vtanh.f32 %v2210_v31  ;;  %v2221_v59 = vsub.f32 1.0, %v6931_v28  ;;  %v2229_v44 = vmul.f32 %v6931_v28, %v8100_v17 }
 0x546   :  { %6938 = vtanh.f32 %v2213_v19  ;;  %v5642_v19 = vld [vmem:[%s9535_s28 + $0xb0] sm:$0xff] }
 0x547   :  { %6940 = vtanh.f32 %v2211_v9 }
 0x54d   :  { %v6933_v10 = vpop.eup %6932 }
 0x54e   :  { %v6935_v16 = vpop.eup %6934  ;;  %v2224_v26 = vmul.f32 %v6933_v10, %v2220_v30 }
 0x54f   :  { %v6937_v58 = vpop.eup %6936  ;;  %v2219_v18 = vsub.f32 1.0, %v6935_v16  ;;  %v2227_v33 = vmul.f32 %v6935_v16, %v8102_v32 }
 0x550   :  { %v2222_v7 = vmul.f32 %v6937_v58, %v2218_v3  ;;  %v8220_v12 = vadd.f32 %v2228_v47, %v2224_v26  ;;  %v6939_v13 = vpop.eup %6938  ;;  %v5643_v3 = vld [vmem:[%s9535_s28 + $0xb8] sm:$0xff] }
 0x551   :  { %v2225_v41 = vmul.f32 %v6939_v13, %v2221_v59  ;;  %v6941_v6 = vpop.eup %6940  ;;  %v5646_v59 = vld [vmem:[%s9535_s28 + $0x1b0] sm:$0xff] }
 0x552   :  { %v8222_v29 = vadd.f32 %v2226_v11, %v2222_v7  ;;  %v2223_v53 = vmul.f32 %v6941_v6, %v2219_v18  ;;  %v5641_v11 = vld [vmem:[%s9535_s28 + $0xa8] sm:$0xff] }
 0x553   :  { %v8226_v49 = vadd.f32 %v2229_v44, %v2225_v41 }
 0x554   :  { %v8228_v23 = vadd.f32 %v2227_v33, %v2223_v53 }
 0x555   :  { %v2401_v50 = vpack.c.bf16 %v8226_v49, %v8220_v12 }
 0x556   :  { %v2400_v8 = vpack.c.bf16 %v8228_v23, %v8222_v29 }
 0x558   :  { %6377 = vmatprep.mubr.msk.bf16.mxu1 %vm101_vm1, %v2400_v8  ;;  %6385 = vmatprep.mubr.msk.bf16.mxu0 %vm101_vm1, %v2400_v8 }
 0x559   :  { %6378 = vmatmul.mubr.msk.bf16.vlgmr.msra.gmra.mrb[64].mxu1 %vm101_vm1, %v2401_v50  ;;  %6386 = vmatmul.mubr.msk.bf16.vlgmr.msra.gmra.mrb[68].mxu0 %vm101_vm1, %v2401_v50 }
 0x55a   :  { %6390 = vmatpush3.bf16.msra.mxu1 %v7898_v39  ;;  %6393 = vmatprep.mubr.msk.bf16.mxu1 %vm101_vm1, %v2400_v8  ;;  %v5632_v39 = vld [vmem:[%s9533_s2 + $0x28] sm:$0xff] }
 0x55b   :  { %6391 = vmatprep.subr.bf16.mxu1 %v7936_v37  ;;  %6398 = vmatpush3.bf16.msra.mxu0 %v7942_v63 }
 0x55c   :  { %6399 = vmatprep.subr.bf16.mxu0 %v9514_v0  ;;  %6401 = vmatprep.mubr.msk.bf16.mxu0 %vm7300_vm0, %v9514_v0 }
 0x55e   :  { %6392 = vmatpush3.bf16.msra.mxu1 %v7936_v37 }
 0x55f   :  { %6405 = vmatprep.subr.bf16.mxu1 %v9514_v0  ;;  %6400 = vmatpush3.bf16.msra.mxu0 %v7953_v61 }
 0x560   :  { %6413 = vmatprep.subr.bf16.mxu0 %v9514_v0 }
 0x561   :  { %6394 = vmatmul.mubr.msk.bf16.vlgmr.msra.gmra.mrb[68].mxu1 %vm101_vm1, %v2401_v50  ;;  %v5644_v50 = vld [vmem:[%s9535_s28 + $0x1a0] sm:$0xff] }
 0x562   :  { %6406 = vmatpush3.bf16.msra.mxu1 %v7961_v62  ;;  %6409 = vmatprep.mubr.msk.bf16.mxu1 %vm7300_vm0, %v9514_v0 }
 0x563   :  { %6407 = vmatprep.subr.bf16.mxu1 %v9514_v0 }
 0x566   :  { %6408 = vmatpush3.bf16.msra.mxu1 %v7970_v20 }
 0x567   :  { %6421 = vmatprep.subr.bf16.mxu1 %v7868_v34  ;;  %v5633_v34 = vld [vmem:[%s9533_s2 + $0x68] sm:$0xff] }
 0x606   :  { %v2278_v37 = vpop.f32.mrb[60].mxu0  ;;  %v2318_v63 = vpop.f32.mrb[60].mxu1 }
 0x607   :  { %v2279_v61 = vadd.f32 %v7980_v22, %v2278_v37  ;;  %v6355_v17 = vpop.f32.mrb[61].mxu0  ;;  %v6363_v32 = vpop.f32.mrb[61].mxu1  ;;  %v2319_v20 = vadd.f32 %v7986_v54, %v2318_v63 }
 0x608   :  { %v2281_v62 = vpop.f32.mrb[62].mxu0  ;;  %v2321_v1 = vpop.f32.mrb[62].mxu1  ;;  %v5647_v17 = vld [vmem:[%s9535_s28 + $0x1b8] sm:$0xff] }
 0x609   :  { %v2364_v43 = vadd.f32 %v5632_v39, %v2279_v61  ;;  %v6356_v14 = vpop.f32.mrb[63].mxu0  ;;  %v6364_v46 = vpop.f32.mrb[63].mxu1  ;;  %v2371_v52 = vadd.f32 %v5633_v34, %v2319_v20 }
 0x60a   :  { %v5645_v46 = vld [vmem:[%s9535_s28 + $0x1a8] sm:$0xff] }
 0x60b   :  { %v5638_v2 = vmul.f32 -1.442695, %v2364_v43  ;;  %v5639_v56 = vmul.f32 -1.442695, %v2371_v52 }
 0x60d   :  { %6942 = vpow2.f32 %v5638_v2 }
 0x60e   :  { %v2358_v45 = vpop.f32.mrb[64].mxu0  ;;  %6944 = vpow2.f32 %v5639_v56 }
 0x60f   :  { %v6371_v55 = vpop.f32.mrb[65].mxu0  ;;  %v2359_v31 = vadd.f32 %v8013_v51, %v2358_v45  ;;  %v5640_v51 = vld [vmem:[%s9535_s28 + $0xa0] sm:$0xff] }
 0x610   :  { %v2361_v42 = vpop.f32.mrb[66].mxu0 }
 0x611   :  { %v6372_v22 = vpop.f32.mrb[67].mxu0 }
 0x617   :  { %v6943_v57 = vpop.eup %6942 }
 0x618   :  { %v2368_v36 = vadd.f32 1.0, %v6943_v57  ;;  %v6945_v5 = vpop.eup %6944 }
 0x619   :  { %v2375_v54 = vadd.f32 1.0, %v6945_v5 }
 0x61a   :  { %6946 = vrcp.f32 %v2368_v36  ;;  %v8316_v36 = vld [vmem:[%s9530_s29 + $0x20] sm:$0xff]  }
 0x61b   :  { %6948 = vrcp.f32 %v2375_v54 }
 0x624   :  { %v6947_v35 = vpop.eup %6946 }
 0x625   :  { %v2378_v21 = vmul.f32 %v6947_v35, %v2359_v31  ;;  %v6949_v30 = vpop.eup %6948  ;;  %v8325_v31 = vld [vmem:[%s9531_s25] sm:$0xff]   ;;  %v8331_v35 = vld [vmem:[%s9531_s25 + $0x8] sm:$0xff]  }
 0x626   :  { %v2381_v33 = vsub.f32 1.0, %v6949_v30  ;;  %v2383_v62 = vmul.f32 %v6949_v30, %v8179_v15 }
 0x627   :  { %v2379_v40 = vadd.f32 %v5634_v60, %v2378_v21  ;;  %v8337_v21 = vld [vmem:[%s9530_s29 + $0x28] sm:$0xff]  }
 0x629   :  { %6950 = vtanh.f32 %v2379_v40 }
 0x62c   :  { %v6379_v24 = vpop.f32.mrb[64].mxu1  ;;  %v6387_v9 = vpop.f32.mrb[68].mxu0 }
 0x62d   :  { %v2451_v4 = vadd.f32 %v7998_v48, %v6379_v24  ;;  %v2442_v25 = vpop.f32.mrb[65].mxu1  ;;  %v2491_v28 = vpop.f32.mrb[69].mxu0  ;;  %v2500_v10 = vadd.f32 %v8004_v38, %v6387_v9  ;;  %v8350_v9 = vld [vmem:[%s9531_s25 + $0x20] sm:$0xff]  }
 0x62e   :  { %v2443_v16 = vadd.f32 %v7998_v48, %v2442_v25  ;;  %v6380_v26 = vpop.f32.mrb[66].mxu1  ;;  %v6388_v47 = vpop.f32.mrb[70].mxu0  ;;  %v2492_v6 = vadd.f32 %v8004_v38, %v2491_v28  ;;  %v8358_v28 = vld [vmem:[%s9531_s25 + $0x18] sm:$0xff]  }
 0x62f   :  { %v2557_v58 = vadd.f32 %v5642_v19, %v2451_v4  ;;  %v2454_v7 = vadd.f32 %v7998_v48, %v6380_v26  ;;  %v2445_v13 = vpop.f32.mrb[67].mxu1  ;;  %v2494_v18 = vpop.f32.mrb[71].mxu0  ;;  %v2503_v37 = vadd.f32 %v8004_v38, %v6388_v47  ;;  %v2585_v63 = vadd.f32 %v5646_v59, %v2500_v10  ;;  %v8343_v19 = vld [vmem:[%s9531_s25 + $0x10] sm:$0xff]  }
 0x630   :  { %v2555_v44 = vadd.f32 %v5640_v51, %v2443_v16  ;;  %v2446_v53 = vadd.f32 %v7998_v48, %v2445_v13  ;;  %v2495_v1 = vadd.f32 %v8004_v38, %v2494_v18  ;;  %v2583_v14 = vadd.f32 %v5644_v50, %v2492_v6  ;;  %v5650_v13 = vld [vmem:[%s9535_s28 + $0x2b0] sm:$0xff] }
 0x631   :  { %v5660_v8 = vmul.f32 -1.442695, %v2557_v58  ;;  %v2558_v39 = vadd.f32 %v5643_v3, %v2454_v7  ;;  %v2586_v20 = vadd.f32 %v5647_v17, %v2503_v37  ;;  %v5664_v55 = vmul.f32 -1.442695, %v2585_v63  ;;  %v5651_v37 = vld [vmem:[%s9535_s28 + $0x2b8] sm:$0xff] }
 0x632   :  { %v5658_v61 = vmul.f32 -1.442695, %v2555_v44  ;;  %v2556_v32 = vadd.f32 %v5641_v11, %v2446_v53  ;;  %v2584_v42 = vadd.f32 %v5645_v46, %v2495_v1  ;;  %v5662_v56 = vmul.f32 -1.442695, %v2583_v14  ;;  %v5648_v53 = vld [vmem:[%s9535_s28 + $0x2a0] sm:$0xff] }
 0x633   :  { %v6951_v41 = vpop.eup %6950  ;;  %6952 = vpow2.f32 %v5660_v8  ;;  %v5661_v48 = vmul.f32 -1.442695, %v2558_v39  ;;  %v5665_v57 = vmul.f32 -1.442695, %v2586_v20 }
 0x634   :  { %v2382_v43 = vmul.f32 %v6951_v41, %v2381_v33  ;;  %v6395_v2 = vpop.f32.mrb[68].mxu1  ;;  %6954 = vpow2.f32 %v5658_v61  ;;  %v5659_v34 = vmul.f32 -1.442695, %v2556_v32  ;;  %v5663_v5 = vmul.f32 -1.442695, %v2584_v42 }
 0x635   :  { %v8301_v45 = vpop.f32.mrb[69].mxu1  ;;  %6956 = vpow2.f32 %v5661_v48  ;;  %v2549_v59 = vadd.f32 %v8063_v27, %v6395_v2 }
 0x636   :  { %v8303_v52 = vadd.f32 %v2383_v62, %v2382_v43  ;;  %v8305_v15 = vpop.f32.mrb[70].mxu1  ;;  %6958 = vpow2.f32 %v5659_v34  ;;  %v2541_v41 = vadd.f32 %v8063_v27, %v8301_v45  ;;  %v5649_v62 = vld [vmem:[%s9535_s28 + $0x2a8] sm:$0xff] }
 0x637   :  { %v8307_v38 = vpop.f32.mrb[71].mxu1  ;;  %6960 = vpow2.f32 %v5664_v55  ;;  %v2552_v50 = vadd.f32 %v8063_v27, %v8305_v15 }
 0x638   :  { %v2645_v22 = vpack.c.bf16 %v8303_v52, %v8303_v52  ;;  %6962 = vpow2.f32 %v5662_v56  ;;  %v2544_v17 = vadd.f32 %v8063_v27, %v8307_v38 }
 0x639   :  { %6964 = vpow2.f32 %v5665_v57 }
 0x63a   :  { %6402 = vmatmul.mubr.msk.bf16.vlgmr.msra.gmra.mrb[72].mxu0 %vm101_vm1, %v2645_v22  ;;  %6410 = vmatmul.mubr.msk.bf16.vlgmr.msra.gmra.mrb[72].mxu1 %vm101_vm1, %v2645_v22  ;;  %6966 = vpow2.f32 %v5663_v5 }
 0x63b   :  { %6414 = vmatpush3.bf16.msra.mxu0 %v8316_v36  ;;  %6417 = vmatprep.mubr.msk.bf16.mxu0 %vm7300_vm0, %v9514_v0 }
 0x63c   :  { %6415 = vmatprep.subr.bf16.mxu0 %v9514_v0  ;;  %6422 = vmatpush3.bf16.msra.mxu1 %v8325_v31 }
 0x63d   :  { %6423 = vmatprep.subr.bf16.mxu1 %v8331_v35  ;;  %v6953_v54 = vpop.eup %6952 }
 0x63e   :  { %v2573_v60 = vadd.f32 1.0, %v6953_v54  ;;  %v6955_v40 = vpop.eup %6954 }
 0x63f   :  { %6416 = vmatpush3.bf16.msra.mxu0 %v8337_v21  ;;  %v2571_v24 = vadd.f32 1.0, %v6955_v40  ;;  %v6957_v4 = vpop.eup %6956 }
 0x640   :  { %6429 = vmatprep.subr.bf16.mxu0 %v8343_v19  ;;  %6424 = vmatpush3.bf16.msra.mxu1 %v8331_v35  ;;  %6968 = vrcp.f32 %v2573_v60  ;;  %v2574_v51 = vadd.f32 1.0, %v6957_v4  ;;  %v6959_v25 = vpop.eup %6958 }
 0x641   :  { %6437 = vmatprep.subr.bf16.mxu1 %v8350_v9  ;;  %6970 = vrcp.f32 %v2571_v24  ;;  %v6961_v30 = vpop.eup %6960  ;;  %v2572_v10 = vadd.f32 1.0, %v6959_v25 }
 0x642   :  { %6418 = vmatmul.mubr.msk.bf16.vlgmr.msra.gmra.mrb[76].mxu0 %vm101_vm1, %v2645_v22  ;;  %6972 = vrcp.f32 %v2574_v51  ;;  %v6963_v16 = vpop.eup %6962  ;;  %v2601_v26 = vadd.f32 1.0, %v6961_v30 }
 0x643   :  { %6430 = vmatpush3.bf16.msra.mxu0 %v8343_v19  ;;  %6974 = vrcp.f32 %v2572_v10  ;;  %v6965_v3 = vpop.eup %6964  ;;  %v2599_v58 = vadd.f32 1.0, %v6963_v16  ;;  %v7269_v16 = vld [vmem:[%s9530_s29 + $0x8] sm:$0xff]  }
 0x644   :  { %6431 = vmatprep.subr.bf16.mxu0 %v8358_v28  ;;  %v6967_v47 = vpop.eup %6966  ;;  %v2602_v11 = vadd.f32 1.0, %v6965_v3  ;;  %6976 = vrcp.f32 %v2601_v26  ;;  %v7270_v3 = vld [vmem:[%s9530_s29 + $0x10] sm:$0xff]   ;;  %v7271_v26 = vld [vmem:[%s9530_s29 + $0x18] sm:$0xff]  }
 0x645   :  { %v2600_v6 = vadd.f32 1.0, %v6967_v47  ;;  %6978 = vrcp.f32 %v2599_v58  ;;  %v5666_v47 = vld [vmem:[%s9533_s2 + $0x30] sm:$0xff] }
 0x646   :  { %6980 = vrcp.f32 %v2602_v11 }
 0x647   :  { %6432 = vmatpush3.bf16.msra.mxu0 %v8358_v28 }
 0x648   :  { %6445 = vmatprep.subr.bf16.mxu0 %v9514_v0 }
 0x64a   :  { %v6969_v7 = vpop.eup %6968 }
 0x64b   :  { %v2613_v18 = vmul.f32 %v6969_v7, %v2549_v59  ;;  %v6971_v44 = vpop.eup %6970  ;;  %v8439_v7 = vld [vmem:[%s9532_s0] ss:$0 sm:$0xff] }
 0x64c   :  { %v2611_v8 = vmul.f32 %v6971_v44, %v2541_v41  ;;  %v6973_v39 = vpop.eup %6972  ;;  %v8445_v41 = vld [vmem:[%s9532_s0 + $0x1] ss:$0 sm:$0xff] }
 0x64d   :  { %v2617_v33 = vadd.f32 %v5650_v13, %v2613_v18  ;;  %v2614_v61 = vmul.f32 %v6973_v39, %v2552_v50  ;;  %v6975_v32 = vpop.eup %6974 }
 0x64e   :  { %v2615_v63 = vadd.f32 %v5648_v53, %v2611_v8  ;;  %v2612_v1 = vmul.f32 %v6975_v32, %v2544_v17  ;;  %v6977_v14 = vpop.eup %6976  ;;  %v5667_v8 = vld [vmem:[%s9533_s2 + $0x70] sm:$0xff] }
 0x64f   :  { %6982 = vtanh.f32 %v2617_v33  ;;  %v2618_v48 = vadd.f32 %v5651_v37, %v2614_v61  ;;  %v6979_v46 = vpop.eup %6978  ;;  %v2625_v20 = vsub.f32 1.0, %v6977_v14  ;;  %v2633_v15 = vmul.f32 %v6977_v14, %v8220_v12 }
 0x650   :  { %6984 = vrcp.f32 %v2600_v6  ;;  %v2616_v43 = vadd.f32 %v5649_v62, %v2612_v1  ;;  %v6981_v2 = vpop.eup %6980  ;;  %v2623_v55 = vsub.f32 1.0, %v6979_v46  ;;  %v2631_v56 = vmul.f32 %v6979_v46, %v8222_v29 }
 0x651   :  { %6986 = vtanh.f32 %v2615_v63  ;;  %v2626_v38 = vsub.f32 1.0, %v6981_v2  ;;  %v2634_v24 = vmul.f32 %v6981_v2, %v8226_v49  ;;  %v8407_v49 = vld [vmem:[%s9531_s25 + $0x28] sm:$0xff]   ;;  %v8454_v2 = vld [vmem:[%s9532_s0 + $0x2] ss:$0 sm:$0xff]  ;;  %s9536_s25 = sld [smem:[#allocation14_spill]] }
 0x652   :  { %6988 = vtanh.f32 %v2618_v48 }
 0x653   :  { %6990 = vtanh.f32 %v2616_v43 }
 0x659   :  { %v6983_v34 = vpop.eup %6982 }
 0x65a   :  { %v6985_v45 = vpop.eup %6984  ;;  %v2629_v27 = vmul.f32 %v6983_v34, %v2625_v20 }
 0x65b   :  { %v6987_v42 = vpop.eup %6986  ;;  %v2624_v54 = vsub.f32 1.0, %v6985_v45  ;;  %v2632_v25 = vmul.f32 %v6985_v45, %v8228_v23  ;;  %v7268_v23 = vld [vmem:[%s9530_s29] sm:$0xff]   ;;  %v5668_v45 = vld [vmem:[%s9533_s2 + $0xb0] sm:$0xff] }
 0x65c   :  { %v2627_v22 = vmul.f32 %v6987_v42, %v2623_v55  ;;  %v8384_v57 = vadd.f32 %v2633_v15, %v2629_v27  ;;  %v6989_v5 = vpop.eup %6988 }
 0x65d   :  { %v2630_v40 = vmul.f32 %v6989_v5, %v2626_v38  ;;  %v6991_v4 = vpop.eup %6990 }
 0x65e   :  { %v8386_v60 = vadd.f32 %v2631_v56, %v2627_v22  ;;  %v2628_v51 = vmul.f32 %v6991_v4, %v2624_v54  ;;  %v5676_v22 = vld [vmem:[%s9535_s28 + $0xd0] sm:$0xff] }
 0x65f   :  { %v8390_v30 = vadd.f32 %v2634_v24, %v2630_v40  ;;  %v8467_v24 = vld [vmem:[%s9534_s26] ss:$0 sm:$0xff] }
 0x660   :  { %v8392_v12 = vadd.f32 %v2632_v25, %v2628_v51  ;;  %v5674_v51 = vld [vmem:[%s9535_s28 + $0xc0] sm:$0xff] }
 0x661   :  { %v2806_v10 = vpack.c.bf16 %v8390_v30, %v8384_v57 }
 0x662   :  { %v2805_v29 = vpack.c.bf16 %v8392_v12, %v8386_v60 }
 0x664   :  { %6425 = vmatprep.mubr.msk.bf16.mxu1 %vm101_vm1, %v2805_v29  ;;  %6433 = vmatprep.mubr.msk.bf16.mxu0 %vm101_vm1, %v2805_v29 }
 0x665   :  { %6426 = vmatmul.mubr.msk.bf16.vlgmr.msra.gmra.mrb[76].mxu1 %vm101_vm1, %v2806_v10  ;;  %6434 = vmatmul.mubr.msk.bf16.vlgmr.msra.gmra.mrb[80].mxu0 %vm101_vm1, %v2806_v10 }
 0x666   :  { %6438 = vmatpush3.bf16.msra.mxu1 %v8350_v9  ;;  %6441 = vmatprep.mubr.msk.bf16.mxu1 %vm101_vm1, %v2805_v29 }
 0x667   :  { %6439 = vmatprep.subr.bf16.mxu1 %v8407_v49  ;;  %6446 = vmatpush3.bf16.msra.mxu0 %v7268_v23 }
 0x668   :  { %6447 = vmatprep.subr.bf16.mxu0 %v9514_v0  ;;  %6449 = vmatprep.mubr.msk.bf16.mxu0 %vm7300_vm0, %v9514_v0 }
 0x66a   :  { %6440 = vmatpush3.bf16.msra.mxu1 %v8407_v49 }
 0x66b   :  { %6453 = vmatprep.subr.bf16.mxu1 %v9514_v0  ;;  %6448 = vmatpush3.bf16.msra.mxu0 %v7269_v16  ;;  %v5677_v16 = vld [vmem:[%s9535_s28 + $0xd8] sm:$0xff] }
 0x66c   :  { %6461 = vmatprep.subr.bf16.mxu0 %v9514_v0 }
 0x66d   :  { %6442 = vmatmul.mubr.msk.bf16.vlgmr.msra.gmra.mrb[80].mxu1 %vm101_vm1, %v2806_v10  ;;  %v8476_v10 = vld [vmem:[%s9534_s26 + $0x1] ss:$0 sm:$0xff] }
 0x66e   :  { %6454 = vmatpush3.bf16.msra.mxu1 %v7270_v3  ;;  %6457 = vmatprep.mubr.msk.bf16.mxu1 %vm7300_vm0, %v9514_v0 }
 0x66f   :  { %6455 = vmatprep.subr.bf16.mxu1 %v9514_v0 }
 0x672   :  { %6456 = vmatpush3.bf16.msra.mxu1 %v7271_v26 }
 0x673   :  { %6469 = vmatprep.subr.bf16.mxu1 %v8325_v31 }
 0x70d   :  { %v2683_v58 = vpop.f32.mrb[72].mxu0  ;;  %v2723_v59 = vpop.f32.mrb[72].mxu1 }
 0x70e   :  { %v2684_v11 = vadd.f32 %v8439_v7, %v2683_v58  ;;  %v6403_v13 = vpop.f32.mrb[73].mxu0  ;;  %v6411_v18 = vpop.f32.mrb[73].mxu1  ;;  %v2724_v44 = vadd.f32 %v8445_v41, %v2723_v59  ;;  %v5680_v59 = vld [vmem:[%s9535_s28 + $0x1d0] sm:$0xff] }
 0x70f   :  { %v2686_v6 = vpop.f32.mrb[74].mxu0  ;;  %v2726_v53 = vpop.f32.mrb[74].mxu1  ;;  %v5675_v13 = vld [vmem:[%s9535_s28 + $0xc8] sm:$0xff] }
 0x710   :  { %v2769_v33 = vadd.f32 %v5666_v47, %v2684_v11  ;;  %v6404_v50 = vpop.f32.mrb[75].mxu0  ;;  %v6412_v39 = vpop.f32.mrb[75].mxu1  ;;  %v2776_v63 = vadd.f32 %v5667_v8, %v2724_v44 }
 0x711   :  { %v5678_v50 = vld [vmem:[%s9535_s28 + $0x1c0] sm:$0xff] }
 0x712   :  { %v5672_v37 = vmul.f32 -1.442695, %v2769_v33  ;;  %v5673_v32 = vmul.f32 -1.442695, %v2776_v63 }
 0x714   :  { %6992 = vpow2.f32 %v5672_v37 }
 0x715   :  { %v2763_v61 = vpop.f32.mrb[76].mxu0  ;;  %6994 = vpow2.f32 %v5673_v32 }
 0x716   :  { %v6419_v17 = vpop.f32.mrb[77].mxu0  ;;  %v2764_v20 = vadd.f32 %v8454_v2, %v2763_v61 }
 0x717   :  { %v2766_v62 = vpop.f32.mrb[78].mxu0  ;;  %v5681_v17 = vld [vmem:[%s9535_s28 + $0x1d8] sm:$0xff] }
 0x718   :  { %v6420_v48 = vpop.f32.mrb[79].mxu0 }
 0x71e   :  { %v6993_v1 = vpop.eup %6992 }
 0x71f   :  { %v2773_v43 = vadd.f32 1.0, %v6993_v1  ;;  %v6995_v14 = vpop.eup %6994 }
 0x720   :  { %v2780_v46 = vadd.f32 1.0, %v6995_v14  ;;  %v5679_v14 = vld [vmem:[%s9535_s28 + $0x1c8] sm:$0xff] }
 0x721   :  { %6996 = vrcp.f32 %v2773_v43 }
 0x722   :  { %6998 = vrcp.f32 %v2780_v46 }
 0x72b   :  { %v6997_v34 = vpop.eup %6996 }
 0x72c   :  { %v2783_v55 = vmul.f32 %v6997_v34, %v2764_v20  ;;  %v6999_v15 = vpop.eup %6998 }
 0x72d   :  { %v2786_v42 = vsub.f32 1.0, %v6999_v15  ;;  %v2788_v40 = vmul.f32 %v6999_v15, %v8303_v52 }
 0x72e   :  { %v2784_v27 = vadd.f32 %v5668_v45, %v2783_v55 }
 0x730   :  { %7000 = vtanh.f32 %v2784_v27 }
 0x738   :  { %v6427_v56 = vpop.f32.mrb[76].mxu1  ;;  %v6435_v5 = vpop.f32.mrb[80].mxu0 }
 0x739   :  { %v2856_v4 = vadd.f32 %v8467_v24, %v6427_v56  ;;  %v2847_v25 = vpop.f32.mrb[77].mxu1  ;;  %v2896_v29 = vpop.f32.mrb[81].mxu0  ;;  %v2905_v52 = vadd.f32 %v8476_v10, %v6435_v5 }
 0x73a   :  { %v7001_v38 = vpop.eup %7000  ;;  %v2848_v23 = vadd.f32 %v8467_v24, %v2847_v25  ;;  %v6428_v3 = vpop.f32.mrb[78].mxu1  ;;  %v2897_v53 = vadd.f32 %v8476_v10, %v2896_v29 }
 0x73b   :  { %v2787_v54 = vmul.f32 %v7001_v38, %v2786_v42  ;;  %v6436_v26 = vpop.f32.mrb[82].mxu0  ;;  %v2962_v58 = vadd.f32 %v5676_v22, %v2856_v4  ;;  %v2859_v11 = vadd.f32 %v8467_v24, %v6428_v3  ;;  %v2850_v18 = vpop.f32.mrb[79].mxu1  ;;  %v2990_v63 = vadd.f32 %v5680_v59, %v2905_v52 }
 0x73c   :  { %v2899_v44 = vpop.f32.mrb[83].mxu0  ;;  %v2960_v6 = vadd.f32 %v5674_v51, %v2848_v23  ;;  %v2851_v33 = vadd.f32 %v8467_v24, %v2850_v18  ;;  %v2908_v37 = vadd.f32 %v8476_v10, %v6436_v26  ;;  %v2988_v43 = vadd.f32 %v5678_v50, %v2897_v53  ;;  %v5685_v50 = vld [vmem:[%s9535_s28 + $0x2d8] sm:$0xff] }
 0x73d   :  { %v8483_v47 = vadd.f32 %v2788_v40, %v2787_v54  ;;  %v5694_v8 = vmul.f32 -1.442695, %v2962_v58  ;;  %v2963_v39 = vadd.f32 %v5677_v16, %v2859_v11  ;;  %v2900_v48 = vadd.f32 %v8476_v10, %v2899_v44  ;;  %v8527_v16 = vld [vmem:[%s9534_s26 + $0x2] ss:$0 sm:$0xff]  ;;  %v5684_v58 = vld [vmem:[%s9535_s28 + $0x2d0] sm:$0xff] }
 0x73e   :  { %v5692_v61 = vmul.f32 -1.442695, %v2960_v6  ;;  %v2961_v32 = vadd.f32 %v5675_v13, %v2851_v33  ;;  %v2991_v20 = vadd.f32 %v5681_v17, %v2908_v37  ;;  %v5698_v55 = vmul.f32 -1.442695, %v2990_v63  ;;  %v5682_v44 = vld [vmem:[%s9535_s28 + $0x2c0] sm:$0xff]  ;;  %v5683_v17 = vld [vmem:[%s9535_s28 + $0x2c8] sm:$0xff] }
 0x73f   :  { %7002 = vpow2.f32 %v5694_v8  ;;  %v5695_v62 = vmul.f32 -1.442695, %v2963_v39  ;;  %v3050_v1 = vpack.c.bf16 %v8483_v47, %v8483_v47  ;;  %v2989_v15 = vadd.f32 %v5679_v14, %v2900_v48 }
 0x740   :  { %v6443_v46 = vpop.f32.mrb[80].mxu1  ;;  %7004 = vpow2.f32 %v5692_v61  ;;  %v5693_v34 = vmul.f32 -1.442695, %v2961_v32  ;;  %v5696_v38 = vmul.f32 -1.442695, %v2988_v43 }
 0x741   :  { %v2945_v45 = vpop.f32.mrb[81].mxu1  ;;  %6450 = vmatmul.mubr.msk.bf16.vlgmr.msra.gmra.mrb[84].mxu0 %vm101_vm1, %v3050_v1  ;;  %6458 = vmatmul.mubr.msk.bf16.vlgmr.msra.gmra.mrb[84].mxu1 %vm101_vm1, %v3050_v1  ;;  %7006 = vpow2.f32 %v5695_v62  ;;  %v5699_v22 = vmul.f32 -1.442695, %v2991_v20  ;;  %v5697_v56 = vmul.f32 -1.442695, %v2989_v15  ;;  %v2954_v3 = vadd.f32 %v8527_v16, %v6443_v46 }
 0x742   :  { %v6444_v27 = vpop.f32.mrb[82].mxu1  ;;  %6462 = vmatpush3.bf16.msra.mxu0 %v8316_v36  ;;  %6465 = vmatprep.mubr.msk.bf16.mxu0 %vm7300_vm0, %v9514_v0  ;;  %7008 = vpow2.f32 %v5693_v34  ;;  %v2946_v11 = vadd.f32 %v8527_v16, %v2945_v45 }
 0x743   :  { %v2948_v42 = vpop.f32.mrb[83].mxu1  ;;  %6463 = vmatprep.subr.bf16.mxu0 %v9514_v0  ;;  %6470 = vmatpush3.bf16.msra.mxu1 %v8325_v31  ;;  %7010 = vpow2.f32 %v5698_v55  ;;  %v2957_v33 = vadd.f32 %v8527_v16, %v6444_v27 }
 0x744   :  { %6471 = vmatprep.subr.bf16.mxu1 %v8331_v35  ;;  %7012 = vpow2.f32 %v5696_v38  ;;  %v2949_v63 = vadd.f32 %v8527_v16, %v2948_v42 }
 0x745   :  { %7014 = vpow2.f32 %v5699_v22 }
 0x746   :  { %6464 = vmatpush3.bf16.msra.mxu0 %v8337_v21  ;;  %7016 = vpow2.f32 %v5697_v56 }
 0x747   :  { %6477 = vmatprep.subr.bf16.mxu0 %v8343_v19  ;;  %6472 = vmatpush3.bf16.msra.mxu1 %v8331_v35 }
 0x748   :  { %6485 = vmatprep.subr.bf16.mxu1 %v8350_v9 }
 0x749   :  { %v7003_v36 = vpop.eup %7002  ;;  %6466 = vmatmul.mubr.msk.bf16.vlgmr.msra.gmra.mrb[88].mxu0 %vm101_vm1, %v3050_v1 }
 0x74a   :  { %v2978_v31 = vadd.f32 1.0, %v7003_v36  ;;  %6478 = vmatpush3.bf16.msra.mxu0 %v8343_v19  ;;  %v7005_v5 = vpop.eup %7004 }
 0x74b   :  { %6479 = vmatprep.subr.bf16.mxu0 %v8358_v28  ;;  %v2976_v21 = vadd.f32 1.0, %v7005_v5  ;;  %v7007_v54 = vpop.eup %7006 }
 0x74c   :  { %7018 = vrcp.f32 %v2978_v31  ;;  %v2979_v40 = vadd.f32 1.0, %v7007_v54  ;;  %v7009_v35 = vpop.eup %7008 }
 0x74d   :  { %7020 = vrcp.f32 %v2976_v21  ;;  %v7011_v4 = vpop.eup %7010  ;;  %v2977_v51 = vadd.f32 1.0, %v7009_v35 }
 0x74e   :  { %6480 = vmatpush3.bf16.msra.mxu0 %v8358_v28  ;;  %7022 = vrcp.f32 %v2979_v40  ;;  %v7013_v25 = vpop.eup %7012  ;;  %v3006_v29 = vadd.f32 1.0, %v7011_v4 }
 0x74f   :  { %6493 = vmatprep.subr.bf16.mxu0 %v9514_v0  ;;  %7024 = vrcp.f32 %v2977_v51  ;;  %v7015_v19 = vpop.eup %7014  ;;  %v3004_v23 = vadd.f32 1.0, %v7013_v25 }
 0x750   :  { %v7017_v52 = vpop.eup %7016  ;;  %v3007_v26 = vadd.f32 1.0, %v7015_v19  ;;  %7026 = vrcp.f32 %v3006_v29  ;;  %v8605_v19 = vld [vmem:[%s9492_s1] sm:$0xff] }
 0x751   :  { %v3005_v18 = vadd.f32 1.0, %v7017_v52  ;;  %7028 = vrcp.f32 %v3004_v23  ;;  %v3456_v29 = vld [vmem:[%s9493_s3] sm:$0xff]  ;;  %3463 = vperm.xlu0 %6666, %v8605_v19   ;;  %v3457_v52 = vld [vmem:[%s9493_s3 + $0x8] sm:$0xff]  ;;  %v3458_v23 = vld [vmem:[%s9493_s3 + $0x10] sm:$0xff] }
 0x752   :  { %7030 = vrcp.f32 %v3007_v26  ;;  %3850 = vperm.xlu1 %6667, %v3456_v29  }
 0x756   :  { %v7019_v28 = vpop.eup %7018  ;;  %3855 = vperm.xlu1 %6667, %v3457_v52  }
 0x757   :  { %v3018_v59 = vmul.f32 %v7019_v28, %v2954_v3  ;;  %v7021_v13 = vpop.eup %7020  ;;  %v5700_v3 = vld [vmem:[%s9533_s2 + $0x38] sm:$0xff] }
 0x758   :  { %v3016_v53 = vmul.f32 %v7021_v13, %v2946_v11  ;;  %v7023_v8 = vpop.eup %7022 }
 0x759   :  { %v3022_v6 = vadd.f32 %v5684_v58, %v3018_v59  ;;  %v3019_v37 = vmul.f32 %v7023_v8, %v2957_v33  ;;  %v7025_v61 = vpop.eup %7024  ;;  %v3459_v58 = vld [vmem:[%s9493_s3 + $0x18] sm:$0xff] }
 0x75a   :  { %v3020_v39 = vadd.f32 %v5682_v44, %v3016_v53  ;;  %v3017_v62 = vmul.f32 %v7025_v61, %v2949_v63  ;;  %v7027_v1 = vpop.eup %7026  ;;  %3860 = vperm.xlu1 %6667, %v3458_v23   ;;  %v5701_v33 = vld [vmem:[%s9533_s2 + $0x78] sm:$0xff] }
 0x75b   :  { %7032 = vtanh.f32 %v3022_v6  ;;  %v3023_v32 = vadd.f32 %v5685_v50, %v3019_v37  ;;  %v7029_v43 = vpop.eup %7028  ;;  %v3030_v46 = vsub.f32 1.0, %v7027_v1  ;;  %v3038_v27 = vmul.f32 %v7027_v1, %v8384_v57 }
 0x75c   :  { %7034 = vrcp.f32 %v3005_v18  ;;  %v3021_v48 = vadd.f32 %v5683_v17, %v3017_v62  ;;  %v7031_v14 = vpop.eup %7030  ;;  %v3028_v45 = vsub.f32 1.0, %v7029_v43  ;;  %v3036_v22 = vmul.f32 %v7029_v43, %v8386_v60 }
 0x75d   :  { %7036 = vtanh.f32 %v3020_v39  ;;  %v3031_v42 = vsub.f32 1.0, %v7031_v14  ;;  %v3039_v54 = vmul.f32 %v7031_v14, %v8390_v30  ;;  %v8583_v30 = vld [vmem:[%s9536_s25 + $0x10] sm:$0xff]  }
 0x75e   :  { %7038 = vtanh.f32 %v3023_v32  ;;  %3865 = vperm.xlu1 %6667, %v3459_v58  }
 0x75f   :  { %7040 = vtanh.f32 %v3021_v48 }
 0x765   :  { %v7033_v20 = vpop.eup %7032 }
 0x766   :  { %v7035_v34 = vpop.eup %7034  ;;  %v3034_v55 = vmul.f32 %v7033_v20, %v3030_v46  ;;  %v5702_v46 = vld [vmem:[%s9533_s2 + $0xb8] sm:$0xff] }
 0x767   :  { %v7037_v15 = vpop.eup %7036  ;;  %v3029_v31 = vsub.f32 1.0, %v7035_v34  ;;  %v3037_v4 = vmul.f32 %v7035_v34, %v8392_v12  ;;  %v8592_v12 = vld [vmem:[%s9536_s25 + $0x8] sm:$0xff]  }
 0x768   :  { %v3032_v38 = vmul.f32 %v7037_v15, %v3028_v45  ;;  %v8547_v56 = vadd.f32 %v3038_v27, %v3034_v55  ;;  %v7039_v36 = vpop.eup %7038 }
 0x769   :  { %v3035_v21 = vmul.f32 %v7039_v36, %v3031_v42  ;;  %v7041_v40 = vpop.eup %7040 }
 0x76a   :  { %v8549_v5 = vadd.f32 %v3036_v22, %v3032_v38  ;;  %v3033_v35 = vmul.f32 %v7041_v40, %v3029_v31  ;;  %v5710_v22 = vld [vmem:[%s9535_s28 + $0xf0] sm:$0xff] }
 0x76b   :  { %v8553_v51 = vadd.f32 %v3039_v54, %v3035_v21 }
 0x76c   :  { %v8555_v57 = vadd.f32 %v3037_v4, %v3033_v35 }
 0x76d   :  { %v3211_v25 = vpack.c.bf16 %v8553_v51, %v8547_v56 }
 0x76e   :  { %v3210_v60 = vpack.c.bf16 %v8555_v57, %v8549_v5 }
 0x770   :  { %6473 = vmatprep.mubr.msk.bf16.mxu1 %vm101_vm1, %v3210_v60  ;;  %6481 = vmatprep.mubr.msk.bf16.mxu0 %vm101_vm1, %v3210_v60 }
 0x771   :  { %6474 = vmatmul.mubr.msk.bf16.vlgmr.msra.gmra.mrb[88].mxu1 %vm101_vm1, %v3211_v25  ;;  %6482 = vmatmul.mubr.msk.bf16.vlgmr.msra.gmra.mrb[92].mxu0 %vm101_vm1, %v3211_v25 }
 0x772   :  { %6486 = vmatpush3.bf16.msra.mxu1 %v8350_v9  ;;  %6489 = vmatprep.mubr.msk.bf16.mxu1 %vm101_vm1, %v3210_v60  ;;  %v8578_v9 = vld [vmem:[%s9536_s25] sm:$0xff]  }
 0x773   :  { %6487 = vmatprep.subr.bf16.mxu1 %v8407_v49  ;;  %6497 = vmatprep.mubr.msk.bf16.mxu0 %vm7300_vm0, %v9514_v0 }
 0x774   :  { %6494 = vmatpush3.bf16.msra.mxu0 %v8578_v9 }
 0x775   :  { %6495 = vmatprep.subr.bf16.mxu0 %v9514_v0 }
 0x776   :  { %6488 = vmatpush3.bf16.msra.mxu1 %v8407_v49  ;;  %v8597_v49 = vld [vmem:[%s9536_s25 + $0x18] sm:$0xff]  }
 0x777   :  { %6501 = vmatprep.subr.bf16.mxu1 %v9514_v0 }
 0x778   :  { %6496 = vmatpush3.bf16.msra.mxu0 %v8592_v12 }
 0x779   :  { %6490 = vmatmul.mubr.msk.bf16.vlgmr.msra.gmra.mrb[92].mxu1 %vm101_vm1, %v3211_v25  ;;  %6509 = vmatprep.subr.bf16.mxu0 %v9514_v0  ;;  %v5711_v25 = vld [vmem:[%s9535_s28 + $0xf8] sm:$0xff] }
 0x77a   :  { %6505 = vmatprep.mubr.msk.bf16.mxu1 %vm7300_vm0, %v9514_v0  ;;  %6502 = vmatpush3.bf16.msra.mxu1 %v8583_v30 }
 0x77b   :  { %6503 = vmatprep.subr.bf16.mxu1 %v9514_v0 }
 0x77e   :  { %6504 = vmatpush3.bf16.msra.mxu1 %v8597_v49 }
 0x814   :  { %v3088_v28 = vpop.f32.mrb[84].mxu0  ;;  %v3128_v26 = vpop.f32.mrb[84].mxu1 }
 0x815   :  { %v3089_v59 = vadd.f32 %v8439_v7, %v3088_v28  ;;  %v6451_v11 = vpop.f32.mrb[85].mxu0  ;;  %v6459_v13 = vpop.f32.mrb[85].mxu1  ;;  %v3129_v18 = vadd.f32 %v8445_v41, %v3128_v26  ;;  %v5709_v26 = vld [vmem:[%s9535_s28 + $0xe8] sm:$0xff] }
 0x816   :  { %v3091_v44 = vpop.f32.mrb[86].mxu0  ;;  %v3131_v6 = vpop.f32.mrb[86].mxu1  ;;  %v8667_v11 = vld [vmem:[%s9536_s25 + $0x28] sm:$0xff]  }
 0x817   :  { %v3174_v53 = vadd.f32 %v5700_v3, %v3089_v59  ;;  %v6452_v8 = vpop.f32.mrb[87].mxu0  ;;  %v6460_v50 = vpop.f32.mrb[87].mxu1  ;;  %v3181_v37 = vadd.f32 %v5701_v33, %v3129_v18  ;;  %v5714_v3 = vld [vmem:[%s9535_s28 + $0x1f0] sm:$0xff]  ;;  %v8675_v6 = vld [vmem:[%s9491_s17] sm:$0xff]  }
 0x818   :  { %v5712_v33 = vld [vmem:[%s9535_s28 + $0x1e0] sm:$0xff] }
 0x819   :  { %v5706_v39 = vmul.f32 -1.442695, %v3174_v53  ;;  %v5707_v7 = vmul.f32 -1.442695, %v3181_v37  ;;  %v5715_v37 = vld [vmem:[%s9535_s28 + $0x1f8] sm:$0xff] }
 0x81b   :  { %7042 = vpow2.f32 %v5706_v39 }
 0x81c   :  { %v3168_v63 = vpop.f32.mrb[88].mxu0  ;;  %7044 = vpow2.f32 %v5707_v7 }
 0x81d   :  { %v6467_v61 = vpop.f32.mrb[89].mxu0  ;;  %v3169_v43 = vadd.f32 %v8454_v2, %v3168_v63  ;;  %v8638_v2 = vld [vmem:[%s9536_s25 + $0x20] sm:$0xff]  }
 0x81e   :  { %v3171_v17 = vpop.f32.mrb[90].mxu0 }
 0x81f   :  { %v6468_v32 = vpop.f32.mrb[91].mxu0 }
 0x820   :  { %v5713_v32 = vld [vmem:[%s9535_s28 + $0x1e8] sm:$0xff] }
 0x825   :  { %v7043_v41 = vpop.eup %7042 }
 0x826   :  { %v3178_v62 = vadd.f32 1.0, %v7043_v41  ;;  %v7045_v48 = vpop.eup %7044 }
 0x827   :  { %v3185_v1 = vadd.f32 1.0, %v7045_v48 }
 0x828   :  { %7046 = vrcp.f32 %v3178_v62  ;;  %v8695_v62 = vld [vmem:[%s9491_s17 + $0x8] sm:$0xff]  }
 0x829   :  { %7048 = vrcp.f32 %v3185_v1 }
 0x832   :  { %v7047_v14 = vpop.eup %7046 }
 0x833   :  { %v3188_v20 = vmul.f32 %v7047_v14, %v3169_v43  ;;  %v7049_v45 = vpop.eup %7048 }
 0x834   :  { %v3191_v55 = vsub.f32 1.0, %v7049_v45  ;;  %v3193_v42 = vmul.f32 %v7049_v45, %v8483_v47  ;;  %v5708_v47 = vld [vmem:[%s9535_s28 + $0xe0] sm:$0xff] }
 0x835   :  { %v3189_v34 = vadd.f32 %v5702_v46, %v3188_v20  ;;  %v8703_v45 = vld [vmem:[%s9491_s17 + $0x20] sm:$0xff]  }
 0x837   :  { %7050 = vtanh.f32 %v3189_v34 }
 0x841   :  { %v7051_v27 = vpop.eup %7050 }
 0x842   :  { %v3192_v15 = vmul.f32 %v7051_v27, %v3191_v55 }
 0x844   :  { %v8633_v38 = vadd.f32 %v3193_v42, %v3192_v15  ;;  %v6475_v36 = vpop.f32.mrb[88].mxu1  ;;  %v6483_v31 = vpop.f32.mrb[92].mxu0 }
 0x845   :  { %v3261_v54 = vadd.f32 %v8467_v24, %v6475_v36  ;;  %v3252_v40 = vpop.f32.mrb[89].mxu1  ;;  %v3301_v35 = vpop.f32.mrb[93].mxu0  ;;  %v3310_v4 = vadd.f32 %v8476_v10, %v6483_v31 }
 0x846   :  { %v3517_v21 = vpack.c.bf16 %v8633_v38, %v8633_v38  ;;  %v3253_v60 = vadd.f32 %v8467_v24, %v3252_v40  ;;  %v6476_v29 = vpop.f32.mrb[90].mxu1  ;;  %v6484_v52 = vpop.f32.mrb[94].mxu0  ;;  %v3302_v18 = vadd.f32 %v8476_v10, %v3301_v35 }
 0x847   :  { %v3367_v23 = vadd.f32 %v5710_v22, %v3261_v54  ;;  %v3264_v28 = vadd.f32 %v8467_v24, %v6476_v29  ;;  %v3255_v58 = vpop.f32.mrb[91].mxu1  ;;  %v3304_v59 = vpop.f32.mrb[95].mxu0  ;;  %v3313_v50 = vadd.f32 %v8476_v10, %v6484_v52  ;;  %v3395_v39 = vadd.f32 %v5714_v3, %v3310_v4 }
 0x848   :  { %6498 = vmatmul.mubr.msk.bf16.vlgmr.msra.gmra.mrb[96].mxu0 %vm101_vm1, %v3517_v21  ;;  %6506 = vmatmul.mubr.msk.bf16.vlgmr.msra.gmra.mrb[96].mxu1 %vm101_vm1, %v3517_v21  ;;  %v3365_v13 = vadd.f32 %v5708_v47, %v3253_v60  ;;  %v3256_v44 = vadd.f32 %v8467_v24, %v3255_v58  ;;  %v3305_v7 = vadd.f32 %v8476_v10, %v3304_v59 }
 0x849   :  { %6510 = vmatpush3.bf16.msra.mxu0 %v8638_v2  ;;  %v5728_v53 = vmul.f32 -1.442695, %v3367_v23  ;;  %v3368_v8 = vadd.f32 %v5711_v25, %v3264_v28  ;;  %6513 = vmatprep.mubr.msk.bf16.mxu0 %vm7300_vm0, %v9514_v0  ;;  %v3393_v17 = vadd.f32 %v5712_v33, %v3302_v18  ;;  %v3396_v48 = vadd.f32 %v5715_v37, %v3313_v50  ;;  %v5718_v28 = vld [vmem:[%s9535_s28 + $0x2f0] sm:$0xff]  ;;  %v5716_v18 = vld [vmem:[%s9535_s28 + $0x2e0] sm:$0xff]  ;;  %v5719_v50 = vld [vmem:[%s9535_s28 + $0x2f8] sm:$0xff] }
 0x84a   :  { %6511 = vmatprep.subr.bf16.mxu0 %v9514_v0  ;;  %v5726_v24 = vmul.f32 -1.442695, %v3365_v13  ;;  %v3366_v63 = vadd.f32 %v5709_v26, %v3256_v44  ;;  %v5732_v10 = vmul.f32 -1.442695, %v3395_v39  ;;  %v3394_v46 = vadd.f32 %v5713_v32, %v3305_v7 }
 0x84b   :  { %7052 = vpow2.f32 %v5728_v53  ;;  %v5729_v61 = vmul.f32 -1.442695, %v3368_v8  ;;  %v5730_v34 = vmul.f32 -1.442695, %v3393_v17  ;;  %v5733_v55 = vmul.f32 -1.442695, %v3396_v48 }
 0x84c   :  { %v6491_v41 = vpop.f32.mrb[92].mxu1  ;;  %7054 = vpow2.f32 %v5726_v24  ;;  %v5727_v1 = vmul.f32 -1.442695, %v3366_v63  ;;  %v5731_v27 = vmul.f32 -1.442695, %v3394_v46 }
 0x84d   :  { %6512 = vmatpush3.bf16.msra.mxu0 %v8667_v11  ;;  %v3350_v43 = vpop.f32.mrb[93].mxu1  ;;  %7056 = vpow2.f32 %v5729_v61  ;;  %v3359_v52 = vadd.f32 %v8527_v16, %v6491_v41  ;;  %v5717_v61 = vld [vmem:[%s9535_s28 + $0x2e8] sm:$0xff] }
 0x84e   :  { %6525 = vmatprep.subr.bf16.mxu0 %v8675_v6  ;;  %v6492_v14 = vpop.f32.mrb[94].mxu1  ;;  %7058 = vpow2.f32 %v5727_v1  ;;  %v3351_v58 = vadd.f32 %v8527_v16, %v3350_v43 }
 0x84f   :  { %v3353_v20 = vpop.f32.mrb[95].mxu1  ;;  %7060 = vpow2.f32 %v5732_v10  ;;  %v3362_v33 = vadd.f32 %v8527_v16, %v6492_v14 }
 0x850   :  { %6514 = vmatmul.mubr.msk.bf16.vlgmr.msra.gmra.mrb[100].mxu0 %vm101_vm1, %v3517_v21  ;;  %7062 = vpow2.f32 %v5730_v34  ;;  %v3354_v37 = vadd.f32 %v8527_v16, %v3353_v20 }
 0x851   :  { %6526 = vmatpush3.bf16.msra.mxu0 %v8675_v6  ;;  %7064 = vpow2.f32 %v5733_v55 }
 0x852   :  { %6527 = vmatprep.subr.bf16.mxu0 %v8695_v62  ;;  %7066 = vpow2.f32 %v5731_v27 }
 0x855   :  { %6528 = vmatpush3.bf16.msra.mxu0 %v8695_v62  ;;  %v7053_v15 = vpop.eup %7052 }
 0x856   :  { %6541 = vmatprep.subr.bf16.mxu0 %v8703_v45  ;;  %v3383_v42 = vadd.f32 1.0, %v7053_v15  ;;  %v7055_v22 = vpop.eup %7054 }
 0x857   :  { %v3381_v36 = vadd.f32 1.0, %v7055_v22  ;;  %v7057_v31 = vpop.eup %7056 }
 0x858   :  { %7068 = vrcp.f32 %v3383_v42  ;;  %v3384_v21 = vadd.f32 1.0, %v7057_v31  ;;  %v7059_v54 = vpop.eup %7058 }
 0x859   :  { %7070 = vrcp.f32 %v3381_v36  ;;  %v7061_v47 = vpop.eup %7060  ;;  %v3382_v40 = vadd.f32 1.0, %v7059_v54 }
 0x85a   :  { %7072 = vrcp.f32 %v3384_v21  ;;  %v7063_v35 = vpop.eup %7062  ;;  %v3411_v60 = vadd.f32 1.0, %v7061_v47 }
 0x85b   :  { %7074 = vrcp.f32 %v3382_v40  ;;  %v7065_v4 = vpop.eup %7064  ;;  %v3409_v29 = vadd.f32 1.0, %v7063_v35 }
 0x85c   :  { %v7067_v25 = vpop.eup %7066  ;;  %v3412_v3 = vadd.f32 1.0, %v7065_v4  ;;  %7076 = vrcp.f32 %v3411_v60 }
 0x85d   :  { %v3410_v13 = vadd.f32 1.0, %v7067_v25  ;;  %7078 = vrcp.f32 %v3409_v29  ;;  %v3464_v25 = vpop.permute.xlu0 %3463  ;;  %v8773_v29 = vld [vmem:[%s9494_s7 + $0x1] ss:$0 sm:$0xff] }
 0x85e   :  { %7080 = vrcp.f32 %v3412_v3 }
 0x862   :  { %v7069_v23 = vpop.eup %7068 }
 0x863   :  { %v3423_v26 = vmul.f32 %v7069_v23, %v3359_v52  ;;  %v7071_v59 = vpop.eup %7070  ;;  %v8779_v52 = vld [vmem:[%s9495_s8] ss:$0 sm:$0xff] }
 0x864   :  { %v3421_v53 = vmul.f32 %v7071_v59, %v3351_v58  ;;  %v7073_v8 = vpop.eup %7072  ;;  %v8785_v23 = vld [vmem:[%s9496_s10] ss:$0 sm:$0xff] }
 0x865   :  { %v3427_v44 = vadd.f32 %v5718_v28, %v3423_v26  ;;  %v3424_v24 = vmul.f32 %v7073_v8, %v3362_v33  ;;  %v7075_v63 = vpop.eup %7074  ;;  %v8791_v28 = vld [vmem:[%s9495_s8 + $0x1] ss:$0 sm:$0xff] }
 0x866   :  { %v3425_v39 = vadd.f32 %v5716_v18, %v3421_v53  ;;  %v3422_v17 = vmul.f32 %v7075_v63, %v3354_v37  ;;  %v7077_v41 = vpop.eup %7076  ;;  %v8796_v26 = vld [vmem:[%s9496_s10 + $0x1] ss:$0 sm:$0xff] }
 0x867   :  { %7082 = vtanh.f32 %v3427_v44  ;;  %v3428_v7 = vadd.f32 %v5719_v50, %v3424_v24  ;;  %v7079_v48 = vpop.eup %7078  ;;  %v3435_v43 = vsub.f32 1.0, %v7077_v41  ;;  %v3443_v20 = vmul.f32 %v7077_v41, %v8547_v56 }
 0x868   :  { %7084 = vrcp.f32 %v3410_v13  ;;  %v3426_v32 = vadd.f32 %v5717_v61, %v3422_v17  ;;  %v7081_v1 = vpop.eup %7080  ;;  %v3433_v46 = vsub.f32 1.0, %v7079_v48  ;;  %v3441_v15 = vmul.f32 %v7079_v48, %v8549_v5 }
 0x869   :  { %7086 = vtanh.f32 %v3425_v39  ;;  %v3436_v55 = vsub.f32 1.0, %v7081_v1  ;;  %v3444_v54 = vmul.f32 %v7081_v1, %v8553_v51  ;;  %v8746_v51 = vld [vmem:[%s9491_s17 + $0x28] sm:$0xff]  }
 0x86a   :  { %7088 = vtanh.f32 %v3428_v7 }
 0x86b   :  { %7090 = vtanh.f32 %v3426_v32 }
 0x871   :  { %v7083_v10 = vpop.eup %7082 }
 0x872   :  { %v7085_v14 = vpop.eup %7084  ;;  %v3439_v16 = vmul.f32 %v7083_v10, %v3435_v43 }
 0x873   :  { %v7087_v34 = vpop.eup %7086  ;;  %v3434_v36 = vsub.f32 1.0, %v7085_v14  ;;  %v3442_v35 = vmul.f32 %v7085_v14, %v8555_v57  ;;  %v8768_v57 = vld [vmem:[%s9494_s7] ss:$0 sm:$0xff]  ;;  %v8804_v14 = vld [vmem:[%s9494_s7 + $0x2] ss:$0 sm:$0xff] }
 0x874   :  { %v3437_v27 = vmul.f32 %v7087_v34, %v3433_v46  ;;  %v8725_v42 = vadd.f32 %v3443_v20, %v3439_v16  ;;  %v7089_v22 = vpop.eup %7088  ;;  %9537 = vst [vmem:[#allocation4_spill] sm:$0xff] %v8768_v57  ;;  %v8809_v46 = vld [vmem:[%s9496_s10 + $0x2] ss:$0 sm:$0xff]  ;;  %v3507_v16 = vmul.f32 %v8804_v14, %v3464_v25 }
 0x875   :  { %v3440_v21 = vmul.f32 %v7089_v22, %v3436_v55  ;;  %v7091_v47 = vpop.eup %7090  ;;  %v8815_v34 = vld [vmem:[%s9495_s8 + $0x2] ss:$0 sm:$0xff] }
 0x876   :  { %v8727_v31 = vadd.f32 %v3441_v15, %v3437_v27  ;;  %v3438_v40 = vmul.f32 %v7091_v47, %v3434_v36  ;;  %v3516_v15 = vadd.f32 %v8815_v34, %v3507_v16 }
 0x877   :  { %v8731_v4 = vadd.f32 %v3444_v54, %v3440_v21  ;;  %v8819_v21 = vpop.permute.xlu1 %3850 }
 0x878   :  { %v8733_v56 = vadd.f32 %v3442_v35, %v3438_v40 }
 0x879   :  { %v8741_v60 = vpack.c.bf16 %v8731_v4, %v8725_v42 }
 0x87a   :  { %v8737_v5 = vpack.c.bf16 %v8733_v56, %v8727_v31 }
 0x87b   :  { %v8821_v54 = vpop.permute.xlu1 %3855 }
 0x87c   :  { %6529 = vmatprep.mubr.msk.bf16.mxu0 %vm101_vm1, %v8737_v5 }
 0x87d   :  { %6530 = vmatmul.mubr.msk.bf16.vlgmr.msra.gmra.mrb[104].mxu0 %vm101_vm1, %v8741_v60 }
 0x87e   :  { %6542 = vmatpush3.bf16.msra.mxu0 %v8703_v45  ;;  %6545 = vmatprep.mubr.msk.bf16.mxu0 %vm101_vm1, %v8737_v5 }
 0x87f   :  { %6543 = vmatprep.subr.bf16.mxu0 %v8746_v51 }
 0x882   :  { %6544 = vmatpush3.bf16.msra.mxu0 %v8746_v51 }
 0x883   :  { %6557 = vmatprep.subr.bf16.mxu0 %v9514_v0 }
 0x885   :  { %6546 = vmatmul.mubr.msk.bf16.vlgmr.msra.gmra.mrb[108].mxu0 %vm101_vm1, %v8741_v60 }
 0x886   :  { %6558 = vmatpush3.bf16.msra.mxu0 %v8583_v30  ;;  %6561 = vmatprep.mubr.msk.bf16.mxu0 %vm7300_vm0, %v9514_v0  ;;  %v3472_v30 = vmul.f32 %v8768_v57, %v3464_v25 }
 0x887   :  { %6559 = vmatprep.subr.bf16.mxu0 %v9514_v0 }
 0x888   :  { %v3480_v3 = vadd.f32 %v8779_v52, %v3472_v30 }
 0x88a   :  { %6560 = vmatpush3.bf16.msra.mxu0 %v8597_v49  ;;  %v3489_v49 = vmul.f32 %v8773_v29, %v3464_v25  ;;  %v8823_v25 = vpop.permute.xlu1 %3860 }
 0x88c   :  { %v3498_v53 = vadd.f32 %v8791_v28, %v3489_v49 }
 0x91b   :  { %v3578_v58 = vpop.f32.mrb[96].mxu0  ;;  %v3643_v59 = vpop.f32.mrb[96].mxu1 }
 0x91c   :  { %v3579_v13 = vadd.f32 %v8785_v23, %v3578_v58  ;;  %v6499_v18 = vpop.f32.mrb[97].mxu0  ;;  %v6507_v44 = vpop.f32.mrb[97].mxu1  ;;  %v3644_v33 = vadd.f32 %v8796_v26, %v3643_v59  ;;  %v8836_v59 = vld [vmem:[%s9498_s15] ss:$0 sm:$0xff] }
 0x91d   :  { %v3581_v8 = vpop.f32.mrb[98].mxu0  ;;  %v3646_v50 = vpop.f32.mrb[98].mxu1  ;;  %v3876_v44 = vmul.f32 %v8836_v59, %v8823_v25 }
 0x91e   :  { %v3714_v39 = vadd.f32 %v3579_v13, %v3480_v3  ;;  %v6500_v24 = vpop.f32.mrb[99].mxu0  ;;  %v6508_v37 = vpop.f32.mrb[99].mxu1  ;;  %v3721_v61 = vadd.f32 %v3644_v33, %v3498_v53  ;;  %v8829_v3 = vld [vmem:[%s9497_s11] ss:$0 sm:$0xff]  ;;  %v3874_v33 = vmul.f32 %v8836_v59, %v8819_v21 }
 0x91f   :  { %v8844_v18 = vpop.permute.xlu1 %3865  ;;  %v8856_v8 = vld [vmem:[%s9499_s16] ss:$0 sm:$0xff] }
 0x920   :  { %v5766_v63 = vmul.f32 -1.442695, %v3714_v39  ;;  %v5767_v32 = vmul.f32 -1.442695, %v3721_v61  ;;  %v3877_v50 = vmul.f32 %v8836_v59, %v8844_v18  ;;  %v3875_v39 = vmul.f32 %v8836_v59, %v8821_v54  ;;  %v8865_v24 = vld [vmem:[%s9500_s18] ss:$0 sm:$0xff] }
 0x921   :  { %v3887_v37 = vadd.f32 %v8856_v8, %v3876_v44  ;;  %v3885_v61 = vadd.f32 %v8856_v8, %v3874_v33  ;;  %v8878_v44 = vld [vmem:[%s9501_s4] sm:$0xff] }
 0x922   :  { %7092 = vpow2.f32 %v5766_v63  ;;  %6519 = vmatprep.mubr.msk.f32.mxu1 %vm3749_vm2, %v8878_v44 }
 0x923   :  { %v3708_v7 = vpop.f32.mrb[100].mxu0  ;;  %7094 = vpow2.f32 %v5767_v32  ;;  %v3888_v32 = vadd.f32 %v8856_v8, %v3877_v50 }
 0x924   :  { %v6515_v17 = vpop.f32.mrb[101].mxu0  ;;  %v3709_v55 = vadd.f32 %v8809_v46, %v3708_v7 }
 0x925   :  { %v3711_v41 = vpop.f32.mrb[102].mxu0 }
 0x926   :  { %v6516_v48 = vpop.f32.mrb[103].mxu0 }
 0x92c   :  { %v7093_v1 = vpop.eup %7092 }
 0x92d   :  { %v3718_v43 = vadd.f32 1.0, %v7093_v1  ;;  %v7095_v10 = vpop.eup %7094  ;;  %v3886_v1 = vadd.f32 %v8856_v8, %v3875_v39 }
 0x92e   :  { %v3725_v20 = vadd.f32 1.0, %v7095_v10 }
 0x92f   :  { %7096 = vrcp.f32 %v3718_v43 }
 0x930   :  { %7098 = vrcp.f32 %v3725_v20 }
 0x939   :  { %v7097_v27 = vpop.eup %7096 }
 0x93a   :  { %v3728_v22 = vmul.f32 %v7097_v27, %v3709_v55  ;;  %v7099_v47 = vpop.eup %7098 }
 0x93b   :  { %v3731_v40 = vsub.f32 1.0, %v7099_v47  ;;  %v3733_v30 = vmul.f32 %v7099_v47, %v8633_v38 }
 0x93c   :  { %v3729_v36 = vadd.f32 %v3728_v22, %v3516_v15 }
 0x93e   :  { %7100 = vtanh.f32 %v3729_v36 }
 0x948   :  { %v7101_v35 = vpop.eup %7100 }
 0x949   :  { %v3732_v49 = vmul.f32 %v7101_v35, %v3731_v40 }
 0x94b   :  { %v8831_v58 = vadd.f32 %v3733_v30, %v3732_v49 }
 0x94d   :  { %v8840_v13 = vpack.c.bf16 %v8831_v58, %v8831_v58  ;;  %v3742_v38 = vmul.f32 %v8829_v3, %v8831_v58 }
 0x94f   :  { %6562 = vmatmul.mubr.msk.bf16.vlgmr.msra.gmra.mrb[112].mxu0 %vm101_vm1, %v8840_v13  ;;  %v3743_v53 = vsel %vm101_vm1, %v3742_v38, 0.0 }
 0x950   :  { %3744 = vadd.xlane.f32.xlu0 %v3743_v53  ;;  %v6531_v63 = vpop.f32.mrb[104].mxu0  ;;  %6575 = vmatprep.mubr.msk.f32.mxu0 %vm3749_vm2, %v8878_v44 }
 0x951   :  { %v4011_v7 = vadd.f32 %v6531_v63, %v8865_v24  ;;  %v4002_v17 = vpop.f32.mrb[105].mxu0 }
 0x952   :  { %v4003_v41 = vadd.f32 %v8865_v24, %v4002_v17  ;;  %v6532_v48 = vpop.f32.mrb[106].mxu0  ;;  %v8887_v17 = vld [vmem:[%s9500_s18 + $0x2] ss:$0 sm:$0xff] }
 0x953   :  { %v4167_v43 = vadd.f32 %v4011_v7, %v3887_v37  ;;  %v4014_v10 = vadd.f32 %v6532_v48, %v8865_v24  ;;  %v4005_v16 = vpop.f32.mrb[107].mxu0 }
 0x954   :  { %v4165_v20 = vadd.f32 %v4003_v41, %v3885_v61  ;;  %v4006_v55 = vadd.f32 %v8865_v24, %v4005_v16 }
 0x955   :  { %v5810_v27 = vmul.f32 -1.442695, %v4167_v43  ;;  %v4168_v15 = vadd.f32 %v4014_v10, %v3888_v32 }
 0x956   :  { %v5808_v22 = vmul.f32 -1.442695, %v4165_v20  ;;  %v4166_v36 = vadd.f32 %v4006_v55, %v3886_v1 }
 0x957   :  { %7102 = vpow2.f32 %v5810_v27  ;;  %v5811_v47 = vmul.f32 -1.442695, %v4168_v15 }
 0x958   :  { %7104 = vpow2.f32 %v5808_v22  ;;  %v5809_v40 = vmul.f32 -1.442695, %v4166_v36  ;;  %v6547_v35 = vpop.f32.mrb[108].mxu0  ;;  %v8904_v36 = vstv %s9502_s12 }
 0x959   :  { %7106 = vpow2.f32 %v5811_v47  ;;  %v4150_v30 = vpop.f32.mrb[109].mxu0  ;;  %v4159_v32 = vadd.f32 %v6547_v35, %v8887_v17 }
 0x95a   :  { %7108 = vpow2.f32 %v5809_v40  ;;  %v6548_v49 = vpop.f32.mrb[110].mxu0  ;;  %v4151_v48 = vadd.f32 %v8887_v17, %v4150_v30  ;;  %v8914_v30 = vld [vmem:[%s9491_s17 + $0x10] sm:$0xff]  }
 0x95b   :  { %v4153_v38 = vpop.f32.mrb[111].mxu0  ;;  %v4162_v10 = vadd.f32 %v6548_v49, %v8887_v17  ;;  %v8919_v49 = vld [vmem:[%s9501_s4 + $0x8] sm:$0xff] }
 0x95c   :  { %v4154_v55 = vadd.f32 %v8887_v17, %v4153_v38  ;;  %v8924_v38 = vld [vmem:[%s9501_s4 + $0x10] sm:$0xff] }
 0x961   :  { %v7103_v53 = vpop.eup %7102 }
 0x962   :  { %v7105_v33 = vpop.eup %7104  ;;  %v4183_v50 = vadd.f32 1.0, %v7103_v53  ;;  %v8940_v53 = vld [vmem:[%s9501_s4 + $0x18] sm:$0xff] }
 0x963   :  { %v7107_v39 = vpop.eup %7106  ;;  %v4181_v37 = vadd.f32 1.0, %v7105_v33 }
 0x964   :  { %v7109_v63 = vpop.eup %7108  ;;  %7110 = vrcp.f32 %v4183_v50  ;;  %v4184_v61 = vadd.f32 1.0, %v7107_v39 }
 0x965   :  { %7112 = vrcp.f32 %v4181_v37  ;;  %v4182_v7 = vadd.f32 1.0, %v7109_v63  ;;  %v8989_v37 = vld [vmem:[%s9499_s16 + $0x1] ss:$0 sm:$0xff] }
 0x966   :  { %7114 = vrcp.f32 %v4184_v61  ;;  %9539 = vst [vmem:[#allocation6_spill] sm:$0xff] %v8989_v37 }
 0x967   :  { %7116 = vrcp.f32 %v4182_v7 }
 0x96e   :  { %v7111_v41 = vpop.eup %7110 }
 0x96f   :  { %v7113_v1 = vpop.eup %7112  ;;  %v8891_v43 = vmul.f32 %v7111_v41, %v4159_v32  ;;  %v9000_v32 = vld [vmem:[%s9500_s18 + $0x1] ss:$0 sm:$0xff] }
 0x970   :  { %v7115_v16 = vpop.eup %7114  ;;  %v8894_v20 = vmul.f32 %v7113_v1, %v4151_v48  ;;  %9540 = vst [vmem:[#allocation7_spill] sm:$0xff] %v9000_v32 }
 0x971   :  { %v7117_v27 = vpop.eup %7116  ;;  %v8897_v15 = vmul.f32 %v7115_v16, %v4162_v10  ;;  %v9007_v10 = vld [vmem:[%s9498_s15 + $0x2] ss:$0 sm:$0xff] }
 0x972   :  { %v8899_v22 = vmul.f32 %v7117_v27, %v4154_v55 }
 0x9dd   :  { %v3745_v47 = vpop.xlane.xlu0 %3744 }
 0x9de   :  { %v8907_v40 = vadd.f32 %v8904_v36, %v3745_v47 }
 0x9e0   :  { %v3748_v35 = vsub.f32 %v8907_v40, %v8605_v19  ;;  %v8929_v19 = vld [vmem:[%s9491_s17 + $0x18] sm:$0xff]  }
 0x9e2   :  { %6517 = vmatprep.subr.mxu1 %v3748_v35 }
 0x9e3   :  { %6518 = vmatpush3.msra.mxu1 %v3748_v35 }
 0x9e4   :  { %6520 = vmatmul.mubr.msk.f32.vlgmr.msra.gmra.mrb[100].mxu1 %vm3749_vm2, %v8919_v49  ;;  %6533 = vmatprep.subr.bf16.mxu1 %v8914_v30 }
 0x9e5   :  { %6534 = vmatpush3.bf16.msra.mxu1 %v8914_v30  ;;  %6522 = vmatprep.mubr.msk.f32.mxu1 %vm3749_vm2, %v8924_v38 }
 0x9e6   :  { %6535 = vmatprep.subr.bf16.mxu1 %v8929_v19 }
 0x9e8   :  { %6523 = vmatmul.mubr.msk.f32.gmra.mrb[102].mxu1 %vm3749_vm2, %v8940_v53 }
 0x9e9   :  { %6536 = vmatpush3.bf16.msra.mxu1 %v8929_v19  ;;  %6537 = vmatprep.mubr.msk.bf16.mxu1 %vm101_vm1, %v8737_v5 }
 0x9ea   :  { %6549 = vmatprep.subr.bf16.mxu1 %v9514_v0 }
 0x9ec   :  { %6538 = vmatmul.mubr.msk.bf16.vlgmr.msra.gmra.mrb[104].mxu1 %vm101_vm1, %v8741_v60 }
 0x9ed   :  { %6550 = vmatpush3.bf16.msra.mxu1 %v8578_v9  ;;  %6553 = vmatprep.mubr.msk.bf16.mxu1 %vm7300_vm0, %v9514_v0 }
 0x9ee   :  { %6551 = vmatprep.subr.bf16.mxu1 %v9514_v0 }
 0x9f1   :  { %6552 = vmatpush3.bf16.msra.mxu1 %v8592_v12 }
 0x9f2   :  { %6565 = vmatprep.subr.bf16.mxu1 %v9514_v0 }
 0x9f4   :  { %6554 = vmatmul.mubr.msk.bf16.vlgmr.msra.gmra.mrb[108].mxu1 %vm101_vm1, %v8840_v13 }
 0x9f5   :  { %6566 = vmatpush3.bf16.msra.mxu1 %v8638_v2  ;;  %6569 = vmatprep.mubr.msk.bf16.mxu1 %vm7300_vm0, %v9514_v0 }
 0x9f6   :  { %6567 = vmatprep.subr.bf16.mxu1 %v9514_v0 }
 0x9f9   :  { %6568 = vmatpush3.bf16.msra.mxu1 %v8667_v11  ;;  %v8974_v11 = vld [vmem:[%s9498_s15 + $0x1] ss:$0 sm:$0xff] }
 0x9fa   :  { %6581 = vmatprep.subr.bf16.mxu1 %v8675_v6  ;;  %9538 = vst [vmem:[#allocation5_spill] sm:$0xff] %v8974_v11  ;;  %v3899_v33 = vmul.f32 %v8974_v11, %v8823_v25  ;;  %v3897_v50 = vmul.f32 %v8974_v11, %v8819_v21  ;;  %v3900_v63 = vmul.f32 %v8974_v11, %v8844_v18 }
 0x9fb   :  { %v3898_v7 = vmul.f32 %v8974_v11, %v8821_v54 }
 0x9fc   :  { %6570 = vmatmul.mubr.msk.bf16.vlgmr.msra.gmra.mrb[112].mxu1 %vm101_vm1, %v8840_v13  ;;  %v3911_v41 = vadd.f32 %v8989_v37, %v3899_v33  ;;  %v3909_v1 = vadd.f32 %v8989_v37, %v3897_v50  ;;  %v3912_v27 = vadd.f32 %v8989_v37, %v3900_v63  ;;  %v3923_v50 = vmul.f32 %v9007_v10, %v8823_v25 }
 0x9fd   :  { %6582 = vmatpush3.bf16.msra.mxu1 %v8675_v6  ;;  %v4283_v63 = vmul.f32 %v8773_v29, %v8907_v40 }
 0x9fe   :  { %6583 = vmatprep.subr.bf16.mxu1 %v8695_v62 }
 0xa01   :  { %6584 = vmatpush3.bf16.msra.mxu1 %v8695_v62 }
 0xa02   :  { %6597 = vmatprep.subr.bf16.mxu1 %v8703_v45 }
 0xa22   :  { %v4365_v9 = vpop.f32.mrb[112].mxu0 }
 0xa23   :  { %v6563_v12 = vpop.f32.mrb[113].mxu0 }
 0xa24   :  { %v4368_v2 = vpop.f32.mrb[114].mxu0  ;;  %v3910_v12 = vadd.f32 %v8989_v37, %v3898_v7 }
 0xa25   :  { %v6564_v5 = vpop.f32.mrb[115].mxu0 }
 0xab7   :  { %v8976_v60 = vpop.f32.mrb[100].mxu1 }
 0xab8   :  { %v8978_v13 = vpop.f32.mrb[101].mxu1 }
 0xabb   :  { %v8984_v39 = vpop.f32.mrb[102].mxu1 }
 0xabc   :  { %v8993_v61 = vpop.f32.mrb[103].mxu1 }
 0xabf   :  { %v6539_v48 = vpop.f32.mrb[104].mxu1 }
 0xac0   :  { %v4085_v16 = vadd.f32 %v6539_v48, %v9000_v32  ;;  %v4076_v55 = vpop.f32.mrb[105].mxu1  ;;  %v9020_v48 = vld [vmem:[%s9499_s16 + $0x2] ss:$0 sm:$0xff] }
 0xac1   :  { %v4077_v47 = vadd.f32 %v9000_v32, %v4076_v55  ;;  %v6540_v35 = vpop.f32.mrb[106].mxu1 }
 0xac2   :  { %v4195_v2 = vadd.f32 %v4085_v16, %v3911_v41  ;;  %v4088_v5 = vadd.f32 %v6540_v35, %v9000_v32  ;;  %v4079_v33 = vpop.f32.mrb[107].mxu1  ;;  %v4281_v41 = vmul.f32 %v8768_v57, %v8907_v40  ;;  %v3921_v16 = vmul.f32 %v9007_v10, %v8819_v21 }
 0xac3   :  { %v4193_v0 = vadd.f32 %v4077_v47, %v3909_v1  ;;  %v4080_v11 = vadd.f32 %v9000_v32, %v4079_v33  ;;  %v4366_v47 = vadd.f32 %v8796_v26, %v4365_v9  ;;  %v3935_v33 = vadd.f32 %v9020_v48, %v3923_v50 }
 0xac4   :  { %v5814_v55 = vmul.f32 -1.442695, %v4195_v2  ;;  %v4196_v7 = vadd.f32 %v4088_v5, %v3912_v27  ;;  %v4284_v2 = vadd.f32 %v8791_v28, %v4283_v63  ;;  %v4282_v27 = vadd.f32 %v8779_v52, %v4281_v41 }
 0xac5   :  { %v5812_v25 = vmul.f32 -1.442695, %v4193_v0  ;;  %v4194_v1 = vadd.f32 %v4080_v11, %v3910_v12  ;;  %v3933_v0 = vadd.f32 %v9020_v48, %v3921_v16  ;;  %v3924_v50 = vmul.f32 %v9007_v10, %v8844_v18 }
 0xac6   :  { %7118 = vpow2.f32 %v5814_v55  ;;  %v5815_v35 = vmul.f32 -1.442695, %v4196_v7  ;;  %v4418_v9 = vadd.f32 %v4366_v47, %v4284_v2  ;;  %v3922_v55 = vmul.f32 %v9007_v10, %v8821_v54 }
 0xac7   :  { %7120 = vpow2.f32 %v5812_v25  ;;  %v5813_v32 = vmul.f32 -1.442695, %v4194_v1  ;;  %v4325_v37 = vpop.f32.mrb[108].mxu1  ;;  %v4227_v63 = vadd.f32 %v8891_v43, %v3935_v33  ;;  %v4225_v41 = vadd.f32 %v8894_v20, %v3933_v0 }
 0xac8   :  { %7122 = vpow2.f32 %v5815_v35  ;;  %v4326_v5 = vadd.f32 %v8785_v23, %v4325_v37  ;;  %v6555_v57 = vpop.f32.mrb[109].mxu1  ;;  %v5821_v37 = vmul.f32 -1.442695, %v4418_v9  ;;  %v3934_v25 = vadd.f32 %v9020_v48, %v3922_v55 }
 0xac9   :  { %7124 = vpow2.f32 %v5813_v32  ;;  %v4328_v21 = vpop.f32.mrb[110].mxu1  ;;  %v3936_v57 = vadd.f32 %v9020_v48, %v3924_v50 }
 0xaca   :  { %v4411_v11 = vadd.f32 %v4326_v5, %v4282_v27  ;;  %v6556_v12 = vpop.f32.mrb[111].mxu1  ;;  %v4226_v5 = vadd.f32 %v8899_v22, %v3934_v25 }
 0xacb   :  { %v4228_v20 = vadd.f32 %v8897_v15, %v3936_v57 }
 0xacc   :  { %v5820_v7 = vmul.f32 -1.442695, %v4411_v11 }
 0xace   :  { %7126 = vpow2.f32 %v5820_v7 }
 0xacf   :  { %v4405_v32 = vpop.f32.mrb[112].mxu1  ;;  %7128 = vtanh.f32 %v4227_v63 }
 0xad0   :  { %v7119_v16 = vpop.eup %7118  ;;  %v6571_v1 = vpop.f32.mrb[113].mxu1  ;;  %7130 = vtanh.f32 %v4225_v41 }
 0xad1   :  { %v7121_v47 = vpop.eup %7120  ;;  %v4211_v18 = vadd.f32 1.0, %v7119_v16  ;;  %v4408_v35 = vpop.f32.mrb[114].mxu1  ;;  %7132 = vpow2.f32 %v5821_v37  ;;  %v4285_v1 = vmul.f32 %v8804_v14, %v8907_v40 }
 0xad2   :  { %v7123_v54 = vpop.eup %7122  ;;  %v4209_v43 = vadd.f32 1.0, %v7121_v47  ;;  %v6572_v33 = vpop.f32.mrb[115].mxu1 }
 0xad3   :  { %v7125_v2 = vpop.eup %7124  ;;  %7134 = vrcp.f32 %v4211_v18  ;;  %v4212_v27 = vadd.f32 1.0, %v7123_v54 }
 0xad4   :  { %7136 = vrcp.f32 %v4209_v43  ;;  %v4210_v0 = vadd.f32 1.0, %v7125_v2  ;;  %v9052_v2 = vld [vmem:[%s9503_s19] ss:$0 sm:$0xff] }
 0xad5   :  { %7138 = vrcp.f32 %v4212_v27 }
 0xad6   :  { %7140 = vrcp.f32 %v4210_v0 }
 0xad7   :  { %7142 = vtanh.f32 %v4228_v20 }
 0xad8   :  { %v7127_v21 = vpop.eup %7126  ;;  %7144 = vtanh.f32 %v4226_v5 }
 0xad9   :  { %v4415_v9 = vadd.f32 1.0, %v7127_v21  ;;  %v7129_v11 = vpop.eup %7128 }
 0xada   :  { %v7131_v12 = vpop.eup %7130 }
 0xadb   :  { %7146 = vrcp.f32 %v4415_v9  ;;  %v7133_v50 = vpop.eup %7132 }
 0xadc   :  { %v4422_v43 = vadd.f32 1.0, %v7133_v50 }
 0xadd   :  { %v7135_v55 = vpop.eup %7134 }
 0xade   :  { %v7137_v63 = vpop.eup %7136  ;;  %v4235_v7 = vsub.f32 1.0, %v7135_v55  ;;  %v4243_v22 = vmul.f32 %v7135_v55, %v8725_v42  ;;  %7148 = vrcp.f32 %v4422_v43 }
 0xadf   :  { %v7139_v15 = vpop.eup %7138  ;;  %v4233_v41 = vsub.f32 1.0, %v7137_v63  ;;  %v4241_v18 = vmul.f32 %v7137_v63, %v8727_v31  ;;  %v4406_v31 = vadd.f32 %v8809_v46, %v4405_v32 }
 0xae0   :  { %v7141_v37 = vpop.eup %7140  ;;  %v4236_v57 = vsub.f32 1.0, %v7139_v15  ;;  %v4239_v16 = vmul.f32 %v7129_v11, %v4235_v7  ;;  %v4244_v33 = vmul.f32 %v7139_v15, %v8731_v4 }
 0xae1   :  { %v7143_v25 = vpop.eup %7142  ;;  %v4237_v47 = vmul.f32 %v7131_v12, %v4233_v41  ;;  %v4234_v35 = vsub.f32 1.0, %v7141_v37  ;;  %v4242_v0 = vmul.f32 %v7141_v37, %v8733_v56  ;;  %v4286_v12 = vadd.f32 %v8815_v34, %v4285_v1 }
 0xae2   :  { %v7145_v54 = vpop.eup %7144  ;;  %v4240_v42 = vmul.f32 %v7143_v25, %v4236_v57  ;;  %v9054_v20 = vadd.f32 %v4243_v22, %v4239_v16  ;;  %v9541_v22 = vmov 0.0   ;;  %v7278_v16 = vld [vmem:[%s9536_s25 + $0x10] sm:$0xff]  }
 0xae3   :  { %v9056_v27 = vadd.f32 %v4241_v18, %v4237_v47  ;;  %v4238_v5 = vmul.f32 %v7145_v54, %v4234_v35  ;;  %v7279_v18 = vld [vmem:[%s9536_s25 + $0x18] sm:$0xff]  }
 0xae4   :  { %v9060_v21 = vadd.f32 %v4244_v33, %v4240_v42  ;;  %v4258_v7 = vmul.f32 %v9052_v2, %v9054_v20 }
 0xae5   :  { %v7147_v9 = vpop.eup %7146  ;;  %v4256_v4 = vmul.f32 %v9052_v2, %v9056_v27  ;;  %v9064_v11 = vadd.f32 %v4242_v0, %v4238_v5 }
 0xae6   :  { %v4425_v50 = vmul.f32 %v7147_v9, %v4406_v31  ;;  %v9076_v32 = vpack.c.bf16 %v9060_v21, %v9054_v20  ;;  %v4266_v15 = vsel %vm101_vm1, %v4258_v7, 0.0  ;;  %v4259_v41 = vmul.f32 %v9052_v2, %v9060_v21 }
 0xae7   :  { %v4260_v55 = vsel %vm101_vm1, %v4256_v4, 0.0  ;;  %v9070_v63 = vpack.c.bf16 %v9064_v11, %v9056_v27  ;;  %v4257_v56 = vmul.f32 %v9052_v2, %v9064_v11 }
 0xae8   :  { %v4426_v46 = vadd.f32 %v4425_v50, %v4286_v12  ;;  %4261 = vadd.xlane.f32.xlu0 %v4260_v55  ;;  %v7149_v37 = vpop.eup %7148 }
 0xae9   :  { %6585 = vmatprep.mubr.msk.bf16.mxu1 %vm101_vm1, %v9070_v63  ;;  %v4263_v34 = vsel %vm101_vm1, %v4257_v56, 0.0  ;;  %v4428_v57 = vsub.f32 1.0, %v7149_v37  ;;  %v4430_v1 = vmul.f32 %v7149_v37, %v8831_v58  ;;  %v9120_v58 = vstv %s9504_s20 }
 0xaea   :  { %7150 = vtanh.f32 %v4426_v46  ;;  %6586 = vmatmul.mubr.msk.bf16.vlgmr.msra.gmra.mrb[116].mxu1 %vm101_vm1, %v9076_v32 }
 0xaeb   :  { %6598 = vmatpush3.bf16.msra.mxu1 %v8703_v45  ;;  %6601 = vmatprep.mubr.msk.bf16.mxu1 %vm101_vm1, %v9070_v63 }
 0xaec   :  { %4264 = vadd.xlane.f32.xlu0 %v4263_v34  ;;  %6599 = vmatprep.subr.bf16.mxu1 %v8746_v51  ;;  %v7284_v34 = vld [vmem:[%s9491_s17] sm:$0xff]  }
 0xaef   :  { %6600 = vmatpush3.bf16.msra.mxu1 %v8746_v51  ;;  %v4269_v51 = vsel %vm101_vm1, %v4259_v41, 0.0 }
 0xaf0   :  { %4267 = vadd.xlane.f32.xlu0 %v4266_v15  ;;  %6613 = vmatprep.subr.bf16.mxu1 %v9541_v22 }
 0xaf2   :  { %6602 = vmatmul.mubr.msk.bf16.vlgmr.msra.gmra.mrb[120].mxu1 %vm101_vm1, %v9076_v32 }
 0xaf3   :  { %6614 = vmatpush3.bf16.msra.mxu1 %v7278_v16  ;;  %6617 = vmatprep.mubr.msk.bf16.mxu1 %vm7300_vm0, %v9541_v22 }
 0xaf4   :  { %v7151_v25 = vpop.eup %7150  ;;  %4270 = vadd.xlane.f32.xlu0 %v4269_v51  ;;  %6615 = vmatprep.subr.bf16.mxu1 %v9541_v22 }
 0xaf5   :  { %v4429_v47 = vmul.f32 %v7151_v25, %v4428_v57 }
 0xaf7   :  { %6616 = vmatpush3.bf16.msra.mxu1 %v7279_v18  ;;  %v9107_v35 = vadd.f32 %v4430_v1, %v4429_v47 }
 0xaf9   :  { %v4836_v54 = vpack.c.bf16 %v9107_v35, %v9107_v35  ;;  %v4432_v43 = vmul.f32 %v8829_v3, %v9107_v35 }
 0xafb   :  { %6618 = vmatmul.mubr.msk.bf16.vlgmr.msra.gmra.mrb[124].mxu1 %vm101_vm1, %v4836_v54  ;;  %v4433_v33 = vsel %vm101_vm1, %v4432_v43, 0.0 }
 0xafc   :  { %4434 = vadd.xlane.f32.xlu1 %v4433_v33  ;;  %6631 = vmatprep.mubr.msk.f32.mxu1 %vm3749_vm2, %v8878_v44 }
 0xb75   :  { %v4262_v42 = vpop.xlane.xlu0 %4261 }
 0xb76   :  { %v4273_v5 = vadd.f32 %v9120_v58, %v4262_v42 }
 0xb78   :  { %v9124_v0 = vadd.f32 %v4273_v5, %v8978_v13 }
 0xb79   :  { %v4265_v3 = vpop.xlane.xlu0 %4264 }
 0xb7a   :  { %v4274_v31 = vadd.f32 %v9120_v58, %v4265_v3  ;;  %4525 = vperm.xlu0 %6666, %v9124_v0  }
 0xb7c   :  { %v9129_v9 = vadd.f32 %v8976_v60, %v4274_v31 }
 0xb7d   :  { %v4268_v44 = vpop.xlane.xlu0 %4267 }
 0xb7e   :  { %v4275_v4 = vadd.f32 %v9120_v58, %v4268_v44  ;;  %4530 = vperm.xlu1 %6667, %v9129_v9  }
 0xb80   :  { %v9134_v12 = vadd.f32 %v4275_v4, %v8993_v61  ;;  %v7281_v61 = vld [vmem:[%s9536_s25 + $0x8] sm:$0xff]  }
 0xb81   :  { %v4271_v50 = vpop.xlane.xlu0 %4270 }
 0xb82   :  { %v4276_v13 = vadd.f32 %v9120_v58, %v4271_v50  ;;  %4535 = vperm.xlu1 %6667, %v9134_v12  }
 0xb84   :  { %v9139_v55 = vadd.f32 %v8984_v39, %v4276_v13  ;;  %v7280_v39 = vld [vmem:[%s9536_s25] sm:$0xff]  }
 0xb86   :  { %4540 = vperm.xlu0 %6666, %v9139_v55  }
 0xb89   :  { %v4435_v60 = vpop.xlane.xlu1 %4434 }
 0xb8a   :  { %v9143_v56 = vadd.f32 %v4435_v60, %v8904_v36 }
 0xb8c   :  { %v4437_v46 = vsub.f32 %v9143_v56, %v8907_v40 }
 0xb8e   :  { %6573 = vmatprep.subr.mxu0 %v4437_v46 }
 0xb8f   :  { %6574 = vmatpush3.msra.mxu0 %v4437_v46 }
 0xb90   :  { %6576 = vmatmul.mubr.msk.f32.vlgmr.msra.gmra.mrb[116].mxu0 %vm3749_vm2, %v8919_v49  ;;  %6589 = vmatprep.subr.bf16.mxu0 %v8914_v30 }
 0xb91   :  { %6590 = vmatpush3.bf16.msra.mxu0 %v8914_v30  ;;  %6578 = vmatprep.mubr.msk.f32.mxu0 %vm3749_vm2, %v8924_v38 }
 0xb92   :  { %6591 = vmatprep.subr.bf16.mxu0 %v8929_v19 }
 0xb94   :  { %6579 = vmatmul.mubr.msk.f32.gmra.mrb[118].mxu0 %vm3749_vm2, %v8940_v53 }
 0xb95   :  { %6592 = vmatpush3.bf16.msra.mxu0 %v8929_v19  ;;  %6593 = vmatprep.mubr.msk.bf16.mxu0 %vm101_vm1, %v9070_v63  ;;  %v7282_v63 = vld [vmem:[%s9536_s25 + $0x20] sm:$0xff]  }
 0xb96   :  { %6605 = vmatprep.subr.bf16.mxu0 %v9541_v22 }
 0xb98   :  { %6594 = vmatmul.mubr.msk.bf16.vlgmr.msra.gmra.mrb[120].mxu0 %vm101_vm1, %v9076_v32  ;;  %v7283_v32 = vld [vmem:[%s9536_s25 + $0x28] sm:$0xff]  }
 0xb99   :  { %6606 = vmatpush3.bf16.msra.mxu0 %v7280_v39  ;;  %6609 = vmatprep.mubr.msk.bf16.mxu0 %vm7300_vm0, %v9541_v22 }
 0xb9a   :  { %6607 = vmatprep.subr.bf16.mxu0 %v9541_v22 }
 0xb9d   :  { %6608 = vmatpush3.bf16.msra.mxu0 %v7281_v61 }
 0xb9e   :  { %6621 = vmatprep.subr.bf16.mxu0 %v9541_v22 }
 0xba0   :  { %6610 = vmatmul.mubr.msk.bf16.vlgmr.msra.gmra.mrb[124].mxu0 %vm101_vm1, %v4836_v54 }
 0xba1   :  { %6622 = vmatpush3.bf16.msra.mxu0 %v7282_v63  ;;  %6625 = vmatprep.mubr.msk.bf16.mxu0 %vm7300_vm0, %v9541_v22 }
 0xba2   :  { %6623 = vmatprep.subr.bf16.mxu0 %v9541_v22 }
 0xba5   :  { %6624 = vmatpush3.bf16.msra.mxu0 %v7283_v32 }
 0xba6   :  { %6637 = vmatprep.subr.bf16.mxu0 %v8675_v6 }
 0xba8   :  { %6626 = vmatmul.mubr.msk.bf16.vlgmr.msra.gmra.mrb[128].mxu0 %vm101_vm1, %v4836_v54 }
 0xba9   :  { %6638 = vmatpush3.bf16.msra.mxu0 %v7284_v34 }
 0xbaa   :  { %6639 = vmatprep.subr.bf16.mxu0 %v8695_v62 }
 0xbad   :  { %6640 = vmatpush3.bf16.msra.mxu0 %v8695_v62 }
 0xbae   :  { %6653 = vmatprep.subr.bf16.mxu0 %v8703_v45 }
 0xbbd   :  { %v6587_v7 = vpop.f32.mrb[116].mxu1 }
 0xbbe   :  { %v4609_v15 = vpop.f32.mrb[117].mxu1  ;;  %v4618_v13 = vadd.f32 %v6587_v7, %v8865_v24 }
 0xbbf   :  { %v6588_v41 = vpop.f32.mrb[118].mxu1  ;;  %v4610_v45 = vadd.f32 %v8865_v24, %v4609_v15 }
 0xbc0   :  { %v4612_v37 = vpop.f32.mrb[119].mxu1  ;;  %v4621_v32 = vadd.f32 %v6588_v41, %v8865_v24 }
 0xbc1   :  { %v4613_v5 = vadd.f32 %v8865_v24, %v4612_v37 }
 0xbc5   :  { %v6603_v22 = vpop.f32.mrb[120].mxu1 }
 0xbc6   :  { %v4707_v57 = vpop.f32.mrb[121].mxu1 }
 0xbc7   :  { %v6604_v6 = vpop.f32.mrb[122].mxu1 }
 0xbc8   :  { %v4710_v16 = vpop.f32.mrb[123].mxu1 }
 0xbce   :  { %v9190_v51 = vpop.f32.mrb[124].mxu1 }
 0xbcf   :  { %v6619_v25 = vpop.f32.mrb[125].mxu1 }
 0xbd0   :  { %v4917_v1 = vpop.f32.mrb[126].mxu1 }
 0xbd1   :  { %v6620_v47 = vpop.f32.mrb[127].mxu1 }
 0xbf9   :  { %v9192_v18 = vpop.permute.xlu0 %4525 }
 0xbfa   :  { %v4543_v62 = vmul.f32 %v8836_v59, %v9192_v18 }
 0xbfc   :  { %v4547_v54 = vadd.f32 %v8856_v8, %v4543_v62 }
 0xbfd   :  { %v9198_v43 = vpop.permute.xlu1 %4530 }
 0xbfe   :  { %v4722_v33 = vadd.f32 %v4610_v45, %v4547_v54  ;;  %v4544_v42 = vmul.f32 %v8836_v59, %v9198_v43 }
 0xc00   :  { %v5832_v3 = vmul.f32 -1.442695, %v4722_v33  ;;  %v4548_v31 = vadd.f32 %v8856_v8, %v4544_v42 }
 0xc01   :  { %v9204_v44 = vpop.permute.xlu1 %4535 }
 0xc02   :  { %7152 = vpow2.f32 %v5832_v3  ;;  %v4723_v4 = vadd.f32 %v4613_v5, %v4548_v31  ;;  %v4545_v50 = vmul.f32 %v8836_v59, %v9204_v44  ;;  %v4716_v31 = vadd.f32 %v6603_v22, %v8887_v17 }
 0xc04   :  { %v5833_v60 = vmul.f32 -1.442695, %v4723_v4  ;;  %v4549_v46 = vadd.f32 %v8856_v8, %v4545_v50 }
 0xc05   :  { %v9210_v39 = vpop.permute.xlu0 %4540 }
 0xc06   :  { %7154 = vpow2.f32 %v5833_v60  ;;  %v4724_v61 = vadd.f32 %v4618_v13, %v4549_v46  ;;  %v4546_v63 = vmul.f32 %v8836_v59, %v9210_v39  ;;  %v4708_v59 = vadd.f32 %v8887_v17, %v4707_v57 }
 0xc07   :  { %v4719_v13 = vadd.f32 %v6604_v6, %v8887_v17 }
 0xc08   :  { %v5834_v34 = vmul.f32 -1.442695, %v4724_v61  ;;  %v4550_v15 = vadd.f32 %v8856_v8, %v4546_v63  ;;  %v4711_v8 = vadd.f32 %v8887_v17, %v4710_v16  ;;  %v9542_v16 = vld [vmem:[#allocation5_spill] sm:$0xff] }
 0xc09   :  { %v4551_v22 = vmul.f32 %v9542_v16, %v9192_v18  ;;  %v4554_v17 = vmul.f32 %v9542_v16, %v9210_v39  ;;  %v4552_v6 = vmul.f32 %v9542_v16, %v9198_v43 }
 0xc0a   :  { %7156 = vpow2.f32 %v5834_v34  ;;  %v4725_v37 = vadd.f32 %v4621_v32, %v4550_v15  ;;  %v4553_v32 = vmul.f32 %v9542_v16, %v9204_v44  ;;  %v4915_v16 = vadd.f32 %v8796_v26, %v9190_v51 }
 0xc0b   :  { %v4561_v26 = vmul.f32 %v9007_v10, %v9204_v44  ;;  %v4560_v44 = vmul.f32 %v9007_v10, %v9198_v43 }
 0xc0c   :  { %v7153_v25 = vpop.eup %7152  ;;  %v5835_v1 = vmul.f32 -1.442695, %v4725_v37  ;;  %v9543_v37 = vld [vmem:[#allocation6_spill] sm:$0xff] }
 0xc0d   :  { %v4738_v7 = vadd.f32 1.0, %v7153_v25  ;;  %v4557_v25 = vadd.f32 %v9543_v37, %v4553_v32 }
 0xc0e   :  { %7158 = vpow2.f32 %v5835_v1  ;;  %v9544_v1 = vld [vmem:[#allocation7_spill] sm:$0xff] }
 0xc0f   :  { %7160 = vrcp.f32 %v4738_v7 }
 0xc10   :  { %v7155_v47 = vpop.eup %7154 }
 0xc11   :  { %v4739_v62 = vadd.f32 1.0, %v7155_v47 }
 0xc13   :  { %7162 = vrcp.f32 %v4739_v62  ;;  %v4555_v62 = vadd.f32 %v9543_v37, %v4551_v22 }
 0xc14   :  { %v7157_v45 = vpop.eup %7156 }
 0xc15   :  { %v4740_v54 = vadd.f32 1.0, %v7157_v45 }
 0xc17   :  { %7164 = vrcp.f32 %v4740_v54 }
 0xc18   :  { %v7159_v33 = vpop.eup %7158 }
 0xc19   :  { %v7161_v24 = vpop.eup %7160  ;;  %v4741_v41 = vadd.f32 1.0, %v7159_v33  ;;  %v4832_v33 = vmul.f32 %v8773_v29, %v9143_v56 }
 0xc1a   :  { %v4778_v42 = vmul.f32 %v7161_v24, %v4708_v59  ;;  %v4558_v24 = vadd.f32 %v9543_v37, %v4554_v17 }
 0xc1b   :  { %7166 = vrcp.f32 %v4741_v41  ;;  %v4833_v17 = vadd.f32 %v8791_v28, %v4832_v33 }
 0xc1d   :  { %v7163_v5 = vpop.eup %7162 }
 0xc1e   :  { %v9218_v3 = vmul.f32 %v7163_v5, %v4711_v8 }
 0xc21   :  { %v7165_v4 = vpop.eup %7164 }
 0xc22   :  { %v4780_v50 = vmul.f32 %v7165_v4, %v4716_v31  ;;  %v4556_v31 = vadd.f32 %v9543_v37, %v4552_v6 }
 0xc25   :  { %v7167_v60 = vpop.eup %7166 }
 0xc26   :  { %v9222_v46 = vmul.f32 %v7167_v60, %v4719_v13  ;;  %v9545_v13 = vld [vmem:[#allocation4_spill] sm:$0xff] }
 0xc27   :  { %v4830_v60 = vmul.f32 %v9545_v13, %v9143_v56 }
 0xc29   :  { %v4831_v37 = vadd.f32 %v8779_v52, %v4830_v60 }
 0xc63   :  { %v9224_v61 = vpop.f32.mrb[116].mxu0 }
 0xc64   :  { %v9226_v57 = vpop.f32.mrb[117].mxu0 }
 0xc67   :  { %v9228_v63 = vpop.f32.mrb[118].mxu0 }
 0xc68   :  { %v9232_v34 = vpop.f32.mrb[119].mxu0 }
 0xc6b   :  { %v6595_v15 = vpop.f32.mrb[120].mxu0 }
 0xc6c   :  { %v4667_v7 = vadd.f32 %v6595_v15, %v9544_v1  ;;  %v4658_v47 = vpop.f32.mrb[121].mxu0 }
 0xc6d   :  { %v4659_v45 = vadd.f32 %v9544_v1, %v4658_v47  ;;  %v6596_v54 = vpop.f32.mrb[122].mxu0  ;;  %v4967_v47 = vadd.f32 %v4915_v16, %v4833_v17 }
 0xc6e   :  { %v4752_v59 = vadd.f32 %v4667_v7, %v4557_v25  ;;  %v4670_v41 = vadd.f32 %v6596_v54, %v9544_v1  ;;  %v4661_v8 = vpop.f32.mrb[123].mxu0  ;;  %v4559_v7 = vmul.f32 %v9007_v10, %v9192_v18 }
 0xc6f   :  { %v4750_v5 = vadd.f32 %v4659_v45, %v4555_v62  ;;  %v4662_v4 = vadd.f32 %v9544_v1, %v4661_v8  ;;  %v5844_v18 = vmul.f32 -1.442695, %v4967_v47 }
 0xc70   :  { %v5838_v32 = vmul.f32 -1.442695, %v4752_v59  ;;  %v4753_v22 = vadd.f32 %v4670_v41, %v4558_v24  ;;  %v4563_v33 = vadd.f32 %v9020_v48, %v4559_v7  ;;  %v4565_v59 = vadd.f32 %v9020_v48, %v4561_v26 }
 0xc71   :  { %v5836_v29 = vmul.f32 -1.442695, %v4750_v5  ;;  %v4751_v15 = vadd.f32 %v4662_v4, %v4556_v31  ;;  %v4562_v41 = vmul.f32 %v9007_v10, %v9210_v39 }
 0xc72   :  { %7168 = vpow2.f32 %v5838_v32  ;;  %v5839_v25 = vmul.f32 -1.442695, %v4753_v22  ;;  %v4782_v52 = vadd.f32 %v4778_v42, %v4563_v33  ;;  %v4784_v8 = vadd.f32 %v4780_v50, %v4565_v59 }
 0xc73   :  { %7170 = vpow2.f32 %v5836_v29  ;;  %v5837_v6 = vmul.f32 -1.442695, %v4751_v15  ;;  %v4874_v1 = vpop.f32.mrb[124].mxu0  ;;  %v4566_v13 = vadd.f32 %v9020_v48, %v4562_v41  ;;  %v4564_v42 = vadd.f32 %v9020_v48, %v4560_v44 }
 0xc74   :  { %7172 = vpow2.f32 %v5839_v25  ;;  %v4875_v51 = vadd.f32 %v8785_v23, %v4874_v1  ;;  %v6611_v62 = vpop.f32.mrb[125].mxu0 }
 0xc75   :  { %7174 = vpow2.f32 %v5837_v6  ;;  %v4877_v28 = vpop.f32.mrb[126].mxu0  ;;  %v4785_v10 = vadd.f32 %v9222_v46, %v4566_v13  ;;  %v4783_v50 = vadd.f32 %v9218_v3, %v4564_v42 }
 0xc76   :  { %v4960_v45 = vadd.f32 %v4875_v51, %v4831_v37  ;;  %v6612_v54 = vpop.f32.mrb[127].mxu0 }
 0xc77   :  { %v4834_v54 = vmul.f32 %v8804_v14, %v9143_v56  ;;  %v7285_v14 = vld [vmem:[%s9496_s10 + $0x2] ss:$0 sm:$0xff] }
 0xc78   :  { %v5843_v24 = vmul.f32 -1.442695, %v4960_v45 }
 0xc7a   :  { %7176 = vpow2.f32 %v5843_v24 }
 0xc7b   :  { %v4954_v23 = vpop.f32.mrb[128].mxu0  ;;  %7178 = vpow2.f32 %v5844_v18 }
 0xc7c   :  { %v7169_v5 = vpop.eup %7168  ;;  %v6627_v31 = vpop.f32.mrb[129].mxu0  ;;  %7180 = vtanh.f32 %v4782_v52 }
 0xc7d   :  { %v7171_v4 = vpop.eup %7170  ;;  %v4768_v60 = vadd.f32 1.0, %v7169_v5  ;;  %v4957_v16 = vpop.f32.mrb[130].mxu0  ;;  %7182 = vtanh.f32 %v4784_v8 }
 0xc7e   :  { %v7173_v32 = vpop.eup %7172  ;;  %v4766_v39 = vadd.f32 1.0, %v7171_v4  ;;  %v6628_v22 = vpop.f32.mrb[131].mxu0  ;;  %v4955_v4 = vadd.f32 %v7285_v14, %v4954_v23  ;;  %v7286_v16 = vld [vmem:[%s9495_s8 + $0x2] ss:$0 sm:$0xff] }
 0xc7f   :  { %v7175_v29 = vpop.eup %7174  ;;  %7184 = vrcp.f32 %v4768_v60  ;;  %v4769_v43 = vadd.f32 1.0, %v7173_v32  ;;  %v4835_v32 = vadd.f32 %v7286_v16, %v4834_v54 }
 0xc80   :  { %7186 = vrcp.f32 %v4766_v39  ;;  %v4767_v15 = vadd.f32 1.0, %v7175_v29 }
 0xc81   :  { %7188 = vrcp.f32 %v4769_v43 }
 0xc82   :  { %7190 = vrcp.f32 %v4767_v15  ;;  %v7288_v15 = vld [vmem:[%s9491_s17 + $0x28] sm:$0xff]  }
 0xc83   :  { %7192 = vtanh.f32 %v4785_v10  ;;  %v7287_v10 = vld [vmem:[%s9491_s17 + $0x20] sm:$0xff]  }
 0xc84   :  { %v7177_v17 = vpop.eup %7176  ;;  %7194 = vtanh.f32 %v4783_v50 }
 0xc85   :  { %v4964_v25 = vadd.f32 1.0, %v7177_v17  ;;  %v7179_v7 = vpop.eup %7178 }
 0xc86   :  { %v7181_v48 = vpop.eup %7180  ;;  %v4971_v52 = vadd.f32 1.0, %v7179_v7 }
 0xc87   :  { %7196 = vrcp.f32 %v4964_v25  ;;  %v7183_v6 = vpop.eup %7182 }
 0xc88   :  { %7198 = vrcp.f32 %v4971_v52 }
 0xc89   :  { %v7185_v37 = vpop.eup %7184 }
 0xc8a   :  { %v7187_v1 = vpop.eup %7186  ;;  %v4792_v47 = vsub.f32 1.0, %v7185_v37  ;;  %v4800_v3 = vmul.f32 %v7185_v37, %v9054_v20 }
 0xc8b   :  { %v7189_v46 = vpop.eup %7188  ;;  %v4790_v26 = vsub.f32 1.0, %v7187_v1  ;;  %v4798_v18 = vmul.f32 %v7187_v1, %v9056_v27 }
 0xc8c   :  { %v7191_v51 = vpop.eup %7190  ;;  %v4793_v62 = vsub.f32 1.0, %v7189_v46  ;;  %v4796_v28 = vmul.f32 %v7183_v6, %v4792_v47  ;;  %v4801_v41 = vmul.f32 %v7189_v46, %v9060_v21  ;;  %v7289_v47 = vld [vmem:[%s9497_s11] ss:$0 sm:$0xff] }
 0xc8d   :  { %v7193_v45 = vpop.eup %7192  ;;  %v4794_v33 = vmul.f32 %v7181_v48, %v4790_v26  ;;  %v4791_v59 = vsub.f32 1.0, %v7191_v51  ;;  %v4799_v31 = vmul.f32 %v7191_v51, %v9064_v11 }
 0xc8e   :  { %v7195_v24 = vpop.eup %7194  ;;  %v4797_v44 = vmul.f32 %v7193_v45, %v4793_v62  ;;  %v9276_v8 = vadd.f32 %v4800_v3, %v4796_v28 }
 0xc8f   :  { %v9278_v5 = vadd.f32 %v4798_v18, %v4794_v33  ;;  %v4795_v20 = vmul.f32 %v7195_v24, %v4791_v59 }
 0xc90   :  { %v9284_v13 = vadd.f32 %v4801_v41, %v4797_v44  ;;  %v4808_v51 = vmul.f32 %v9052_v2, %v9276_v8 }
 0xc91   :  { %v7197_v27 = vpop.eup %7196  ;;  %v4806_v60 = vmul.f32 %v9052_v2, %v9278_v5  ;;  %v9288_v21 = vadd.f32 %v4799_v31, %v4795_v20 }
 0xc92   :  { %v4974_v11 = vmul.f32 %v7197_v27, %v4955_v4  ;;  %v9302_v29 = vpack.c.bf16 %v9284_v13, %v9276_v8  ;;  %v4809_v50 = vmul.f32 %v9052_v2, %v9284_v13  ;;  %v7199_v25 = vpop.eup %7198  ;;  %v4816_v3 = vsel %vm101_vm1, %v4808_v51, 0.0 }
 0xc93   :  { %v4810_v42 = vsel %vm101_vm1, %v4806_v60, 0.0  ;;  %v9296_v23 = vpack.c.bf16 %v9288_v21, %v9278_v5  ;;  %v4807_v39 = vmul.f32 %v9052_v2, %v9288_v21  ;;  %v4977_v7 = vsub.f32 1.0, %v7199_v25  ;;  %v7291_v60 = vld [vmem:[%s9500_s18] ss:$0 sm:$0xff] }
 0xc94   :  { %v4975_v22 = vadd.f32 %v4974_v11, %v4835_v32  ;;  %4811 = vadd.xlane.f32.xlu0 %v4810_v42  ;;  %v4819_v17 = vsel %vm101_vm1, %v4809_v50, 0.0  ;;  %v4979_v37 = vmul.f32 %v7199_v25, %v9107_v35  ;;  %v7292_v32 = vld [vmem:[%s9499_s16] ss:$0 sm:$0xff] }
 0xc95   :  { %6641 = vmatprep.mubr.msk.bf16.mxu0 %vm101_vm1, %v9296_v23  ;;  %v4813_v43 = vsel %vm101_vm1, %v4807_v39, 0.0 }
 0xc96   :  { %7200 = vtanh.f32 %v4975_v22  ;;  %6642 = vmatmul.mubr.msk.bf16.vlgmr.msra.gmra.mrb[132].mxu0 %vm101_vm1, %v9302_v29 }
 0xc97   :  { %6654 = vmatpush3.bf16.msra.mxu0 %v7287_v10  ;;  %6657 = vmatprep.mubr.msk.bf16.mxu0 %vm101_vm1, %v9296_v23 }
 0xc98   :  { %4814 = vadd.xlane.f32.xlu0 %v4813_v43  ;;  %6655 = vmatprep.subr.bf16.mxu0 %v7288_v15 }
 0xc9b   :  { %6656 = vmatpush3.bf16.msra.mxu0 %v7288_v15 }
 0xc9c   :  { %4820 = vadd.xlane.f32.xlu0 %v4819_v17 }
 0xc9e   :  { %6658 = vmatmul.mubr.msk.bf16.vlgmr.msra.gmra.mrb[136].mxu0 %vm101_vm1, %v9302_v29 }
 0xca0   :  { %v7201_v48 = vpop.eup %7200 }
 0xca1   :  { %v4978_v6 = vmul.f32 %v7201_v48, %v4977_v7 }
 0xca3   :  { %v4980_v1 = vadd.f32 %v4979_v37, %v4978_v6 }
 0xca5   :  { %v4981_v46 = vmul.f32 %v7289_v47, %v4980_v1 }
 0xca7   :  { %v4982_v26 = vsel %vm101_vm1, %v4981_v46, 0.0 }
 0xca8   :  { %4983 = vadd.xlane.f32.xlu1 %v4982_v26 }
 0xcac   :  { %4817 = vadd.xlane.f32.xlu1 %v4816_v3  ;;  %v7293_v3 = vld [vmem:[%s9500_s18 + $0x2] ss:$0 sm:$0xff] }
 0xd21   :  { %v4812_v62 = vpop.xlane.xlu0 %4811 }
 0xd22   :  { %v4822_v28 = vadd.f32 %v4812_v62, %v9120_v58 }
 0xd24   :  { %v9332_v35 = vadd.f32 %v4822_v28, %v9226_v57  ;;  %v5380_v57 = vsel %vm5379_vm3, %v8907_v40, %v9143_v56 }
 0xd25   :  { %v4815_v45 = vpop.xlane.xlu0 %4814 }
 0xd26   :  { %v4823_v54 = vadd.f32 %v4815_v45, %v9120_v58  ;;  %5074 = vperm.xlu1 %6667, %v9332_v35  }
 0xd28   :  { %v9337_v33 = vadd.f32 %v9224_v61, %v4823_v54 }
 0xd29   :  { %v4821_v41 = vpop.xlane.xlu0 %4820 }
 0xd2a   :  { %5079 = vperm.xlu0 %6666, %v9337_v33  }
 0xd35   :  { %v4984_v18 = vpop.xlane.xlu1 %4983 }
 0xd36   :  { %v4985_v59 = vadd.f32 %v4984_v18, %v8904_v36  ;;  %v4825_v36 = vadd.f32 %v4821_v41, %v9120_v58 }
 0xd38   :  { %v4986_v24 = vsub.f32 %v4985_v59, %v9143_v56  ;;  %v5382_v52 = vsel %vm5381_vm4, %v5380_v57, %v4985_v59  ;;  %v9364_v56 = vadd.f32 %v9228_v63, %v4825_v36 }
 0xd39   :  { %v5384_v61 = vsel %vm5383_vm5, %v5382_v52, 0.0  ;;  %v4818_v44 = vpop.xlane.xlu1 %4817 }
 0xd3a   :  { %5385 = vst [vmem:[%s9505_s22] sm:$0xff] %v5384_v61  ;;  %v4824_v20 = vadd.f32 %v4818_v44, %v9120_v58  ;;  %6629 = vmatprep.subr.mxu1 %v4986_v24 }
 0xd3b   :  { %6630 = vmatpush3.msra.mxu1 %v4986_v24 }
 0xd3c   :  { %v9353_v40 = vadd.f32 %v4824_v20, %v9232_v34  ;;  %6632 = vmatmul.mubr.msk.f32.vlgmr.msra.gmra.mrb[128].mxu1 %vm3749_vm2, %v8919_v49  ;;  %6645 = vmatprep.subr.bf16.mxu1 %v8914_v30 }
 0xd3d   :  { %6646 = vmatpush3.bf16.msra.mxu1 %v8914_v30  ;;  %6634 = vmatprep.mubr.msk.f32.mxu1 %vm3749_vm2, %v8924_v38 }
 0xd3e   :  { %5084 = vperm.xlu1 %6667, %v9353_v40   ;;  %6647 = vmatprep.subr.bf16.mxu1 %v8929_v19 }
 0xd40   :  { %6635 = vmatmul.mubr.msk.f32.gmra.mrb[130].mxu1 %vm3749_vm2, %v8940_v53 }
 0xd41   :  { %6648 = vmatpush3.bf16.msra.mxu1 %v8929_v19  ;;  %6649 = vmatprep.mubr.msk.bf16.mxu1 %vm101_vm1, %v9296_v23  ;;  %v7290_v19 = vld [vmem:[%s9498_s15] ss:$0 sm:$0xff] }
 0xd42   :  { %5089 = vperm.xlu1 %6667, %v9364_v56  }
 0xd44   :  { %6650 = vmatmul.mubr.msk.bf16.vlgmr.msra.gmra.mrb[132].mxu1 %vm101_vm1, %v9302_v29 }
 0xd69   :  { %v6643_v30 = vpop.f32.mrb[132].mxu0 }
 0xd6a   :  { %v5158_v49 = vpop.f32.mrb[133].mxu0  ;;  %v5167_v37 = vadd.f32 %v7291_v60, %v6643_v30 }
 0xd6b   :  { %v6644_v38 = vpop.f32.mrb[134].mxu0  ;;  %v5159_v16 = vadd.f32 %v7291_v60, %v5158_v49 }
 0xd6c   :  { %v5161_v34 = vpop.f32.mrb[135].mxu0  ;;  %v5170_v51 = vadd.f32 %v7291_v60, %v6644_v38 }
 0xd6d   :  { %v5162_v22 = vadd.f32 %v7291_v60, %v5161_v34 }
 0xd71   :  { %v6659_v31 = vpop.f32.mrb[136].mxu0 }
 0xd72   :  { %v5256_v63 = vpop.f32.mrb[137].mxu0  ;;  %v5265_v30 = vadd.f32 %v7293_v3, %v6659_v31 }
 0xd73   :  { %v6660_v14 = vpop.f32.mrb[138].mxu0  ;;  %v5257_v62 = vadd.f32 %v7293_v3, %v5256_v63 }
 0xd74   :  { %v5259_v4 = vpop.f32.mrb[139].mxu0  ;;  %v5268_v34 = vadd.f32 %v7293_v3, %v6660_v14 }
 0xd75   :  { %v5260_v57 = vadd.f32 %v7293_v3, %v5259_v4 }
 0xda5   :  { %v9374_v27 = vpop.permute.xlu1 %5074 }
 0xda6   :  { %v5092_v53 = vmul.f32 %v7290_v19, %v9374_v27 }
 0xda8   :  { %v5096_v11 = vadd.f32 %v7292_v32, %v5092_v53 }
 0xda9   :  { %v9386_v42 = vpop.permute.xlu0 %5079 }
 0xdaa   :  { %v5271_v23 = vadd.f32 %v5159_v16, %v5096_v11  ;;  %v5093_v39 = vmul.f32 %v7290_v19, %v9386_v42  ;;  %v7294_v16 = vld [vmem:[%s9498_s15 + $0x1] ss:$0 sm:$0xff] }
 0xdab   :  { %v5100_v31 = vmul.f32 %v7294_v16, %v9374_v27 }
 0xdac   :  { %v5855_v29 = vmul.f32 -1.442695, %v5271_v23  ;;  %v5097_v10 = vadd.f32 %v7292_v32, %v5093_v39  ;;  %v5101_v23 = vmul.f32 %v7294_v16, %v9386_v42 }
 0xdae   :  { %7202 = vpow2.f32 %v5855_v29  ;;  %v5272_v43 = vadd.f32 %v5162_v22, %v5097_v10  ;;  %v7295_v22 = vld [vmem:[%s9499_s16 + $0x1] ss:$0 sm:$0xff] }
 0xdaf   :  { %v7296_v10 = vld [vmem:[%s9500_s18 + $0x1] ss:$0 sm:$0xff] }
 0xdb0   :  { %v5856_v50 = vmul.f32 -1.442695, %v5272_v43 }
 0xdb2   :  { %7204 = vpow2.f32 %v5856_v50 }
 0xdb8   :  { %v7203_v15 = vpop.eup %7202 }
 0xdb9   :  { %v5287_v17 = vadd.f32 1.0, %v7203_v15  ;;  %v5104_v15 = vadd.f32 %v7295_v22, %v5100_v31 }
 0xdbb   :  { %7206 = vrcp.f32 %v5287_v17 }
 0xdbc   :  { %v7205_v25 = vpop.eup %7204 }
 0xdbd   :  { %v5288_v7 = vadd.f32 1.0, %v7205_v25  ;;  %v9389_v48 = vpop.permute.xlu1 %5084 }
 0xdbe   :  { %v5094_v6 = vmul.f32 %v7290_v19, %v9389_v48 }
 0xdbf   :  { %7208 = vrcp.f32 %v5288_v7 }
 0xdc0   :  { %v5098_v1 = vadd.f32 %v7292_v32, %v5094_v6 }
 0xdc1   :  { %v9392_v47 = vpop.permute.xlu1 %5089 }
 0xdc2   :  { %v5273_v46 = vadd.f32 %v5167_v37, %v5098_v1  ;;  %v5095_v26 = vmul.f32 %v7290_v19, %v9392_v47  ;;  %v5103_v14 = vmul.f32 %v7294_v16, %v9392_v47 }
 0xdc4   :  { %v5857_v28 = vmul.f32 -1.442695, %v5273_v46  ;;  %v5099_v45 = vadd.f32 %v7292_v32, %v5095_v26  ;;  %v5102_v32 = vmul.f32 %v7294_v16, %v9389_v48  ;;  %v5107_v6 = vadd.f32 %v7295_v22, %v5103_v14 }
 0xdc5   :  { %v7207_v54 = vpop.eup %7206  ;;  %v5105_v26 = vadd.f32 %v7295_v22, %v5101_v23 }
 0xdc6   :  { %v5327_v18 = vmul.f32 %v7207_v54, %v5257_v62  ;;  %7210 = vpow2.f32 %v5857_v28  ;;  %v5274_v59 = vadd.f32 %v5170_v51, %v5099_v45  ;;  %v5106_v29 = vadd.f32 %v7295_v22, %v5102_v32 }
 0xdc8   :  { %v5858_v24 = vmul.f32 -1.442695, %v5274_v59  ;;  %v7297_v59 = vld [vmem:[%s9498_s15 + $0x2] ss:$0 sm:$0xff]  ;;  %s7302_s15 = smov 1  }
 0xdc9   :  { %v7209_v52 = vpop.eup %7208 }
 0xdca   :  { %v9398_v41 = vmul.f32 %v7209_v52, %v5260_v57  ;;  %7212 = vpow2.f32 %v5858_v24  ;;  %v5108_v57 = vmul.f32 %v7297_v59, %v9374_v27  ;;  %v5110_v52 = vmul.f32 %v7297_v59, %v9389_v48 }
 0xdd0   :  { %v7211_v61 = vpop.eup %7210 }
 0xdd1   :  { %v5289_v44 = vadd.f32 1.0, %v7211_v61  ;;  %v7298_v61 = vld [vmem:[%s9499_s16 + $0x2] ss:$0 sm:$0xff]  ;;  %s7303_s16 = smov 2  }
 0xdd3   :  { %7214 = vrcp.f32 %v5289_v44  ;;  %v5112_v44 = vadd.f32 %v7298_v61, %v5108_v57 }
 0xdd4   :  { %v7213_v20 = vpop.eup %7212 }
 0xdd5   :  { %v5290_v36 = vadd.f32 1.0, %v7213_v20  ;;  %v5114_v20 = vadd.f32 %v7298_v61, %v5110_v52 }
 0xdd7   :  { %7216 = vrcp.f32 %v5290_v36  ;;  %v5331_v36 = vadd.f32 %v5327_v18, %v5112_v44 }
 0xddd   :  { %v7215_v49 = vpop.eup %7214 }
 0xdde   :  { %v5329_v38 = vmul.f32 %v7215_v49, %v5265_v30  ;;  %v5111_v30 = vmul.f32 %v7297_v59, %v9392_v47  ;;  %v5109_v49 = vmul.f32 %v7297_v59, %v9386_v42 }
 0xde0   :  { %v5115_v16 = vadd.f32 %v7298_v61, %v5111_v30  ;;  %v5113_v31 = vadd.f32 %v7298_v61, %v5109_v49 }
 0xde1   :  { %v7217_v63 = vpop.eup %7216 }
 0xde2   :  { %v5330_v19 = vmul.f32 %v7217_v63, %v5268_v34  ;;  %v5333_v34 = vadd.f32 %v5329_v38, %v5114_v20  ;;  %v5332_v18 = vadd.f32 %v9398_v41, %v5113_v31 }
 0xe0f   :  { %v9400_v53 = vpop.f32.mrb[128].mxu1 }
 0xe10   :  { %v9402_v4 = vpop.f32.mrb[129].mxu1 }
 0xe13   :  { %v9404_v60 = vpop.f32.mrb[130].mxu1 }
 0xe14   :  { %v9410_v11 = vpop.f32.mrb[131].mxu1 }
 0xe17   :  { %v6651_v39 = vpop.f32.mrb[132].mxu1 }
 0xe18   :  { %v5216_v43 = vadd.f32 %v7296_v10, %v6651_v39  ;;  %v5207_v50 = vpop.f32.mrb[133].mxu1  ;;  %v5334_v39 = vadd.f32 %v5330_v19, %v5115_v16 }
 0xe19   :  { %v5208_v17 = vadd.f32 %v7296_v10, %v5207_v50  ;;  %v6652_v25 = vpop.f32.mrb[134].mxu1 }
 0xe1a   :  { %v5301_v7 = vadd.f32 %v5216_v43, %v5106_v29  ;;  %v5219_v37 = vadd.f32 %v7296_v10, %v6652_v25  ;;  %v5210_v1 = vpop.f32.mrb[135].mxu1 }
 0xe1b   :  { %v5299_v46 = vadd.f32 %v5208_v17, %v5104_v15  ;;  %v5211_v51 = vadd.f32 %v7296_v10, %v5210_v1 }
 0xe1c   :  { %v5861_v3 = vmul.f32 -1.442695, %v5301_v7  ;;  %v5302_v62 = vadd.f32 %v5219_v37, %v5107_v6 }
 0xe1d   :  { %v5859_v28 = vmul.f32 -1.442695, %v5299_v46  ;;  %v5300_v45 = vadd.f32 %v5211_v51, %v5105_v26 }
 0xe1e   :  { %7218 = vpow2.f32 %v5861_v3  ;;  %v5862_v54 = vmul.f32 -1.442695, %v5302_v62 }
 0xe1f   :  { %7220 = vpow2.f32 %v5859_v28  ;;  %v5860_v24 = vmul.f32 -1.442695, %v5300_v45 }
 0xe20   :  { %7222 = vpow2.f32 %v5862_v54 }
 0xe21   :  { %7224 = vpow2.f32 %v5860_v24 }
 0xe22   :  { %7226 = vtanh.f32 %v5331_v36 }
 0xe23   :  { %7228 = vtanh.f32 %v5333_v34 }
 0xe28   :  { %v7219_v63 = vpop.eup %7218 }
 0xe29   :  { %v7221_v27 = vpop.eup %7220  ;;  %v5317_v32 = vadd.f32 1.0, %v7219_v63 }
 0xe2a   :  { %v7223_v48 = vpop.eup %7222  ;;  %v5315_v14 = vadd.f32 1.0, %v7221_v27 }
 0xe2b   :  { %v7225_v23 = vpop.eup %7224  ;;  %7230 = vrcp.f32 %v5317_v32  ;;  %v5318_v22 = vadd.f32 1.0, %v7223_v48 }
 0xe2c   :  { %7232 = vrcp.f32 %v5315_v14  ;;  %v5316_v47 = vadd.f32 1.0, %v7225_v23  ;;  %v7227_v42 = vpop.eup %7226 }
 0xe2d   :  { %7234 = vrcp.f32 %v5318_v22  ;;  %v7229_v38 = vpop.eup %7228 }
 0xe2e   :  { %7236 = vrcp.f32 %v5316_v47 }
 0xe2f   :  { %7238 = vtanh.f32 %v5334_v39 }
 0xe30   :  { %7240 = vtanh.f32 %v5332_v18 }
 0xe35   :  { %v7231_v29 = vpop.eup %7230 }
 0xe36   :  { %v7233_v10 = vpop.eup %7232  ;;  %v5341_v43 = vsub.f32 1.0, %v7231_v29  ;;  %v5349_v19 = vmul.f32 %v7231_v29, %v9276_v8 }
 0xe37   :  { %v7235_v50 = vpop.eup %7234  ;;  %v5339_v15 = vsub.f32 1.0, %v7233_v10  ;;  %v5347_v37 = vmul.f32 %v7233_v10, %v9278_v5 }
 0xe38   :  { %v7237_v17 = vpop.eup %7236  ;;  %v5345_v25 = vmul.f32 %v7229_v38, %v5341_v43  ;;  %v5342_v7 = vsub.f32 1.0, %v7235_v50  ;;  %v5350_v3 = vmul.f32 %v7235_v50, %v9284_v13 }
 0xe39   :  { %v7239_v6 = vpop.eup %7238  ;;  %v5343_v41 = vmul.f32 %v7227_v42, %v5339_v15  ;;  %v5340_v1 = vsub.f32 1.0, %v7237_v17  ;;  %v5348_v45 = vmul.f32 %v7237_v17, %v9288_v21 }
 0xe3a   :  { %v7241_v46 = vpop.eup %7240  ;;  %v5353_v26 = vadd.f32 %v5349_v19, %v5345_v25  ;;  %v5346_v51 = vmul.f32 %v7239_v6, %v5342_v7 }
 0xe3b   :  { %v5351_v62 = vadd.f32 %v5347_v37, %v5343_v41  ;;  %v5344_v28 = vmul.f32 %v7241_v46, %v5340_v1 }
 0xe3c   :  { %v5354_v54 = vadd.f32 %v5350_v3, %v5346_v51  ;;  %v5357_v5 = vmul.f32 %v9052_v2, %v5353_v26 }
 0xe3d   :  { %v5355_v59 = vmul.f32 %v9052_v2, %v5351_v62  ;;  %v5352_v57 = vadd.f32 %v5348_v45, %v5344_v28 }
 0xe3e   :  { %v5365_v13 = vsel %vm101_vm1, %v5357_v5, 0.0  ;;  %v5358_v61 = vmul.f32 %v9052_v2, %v5354_v54 }
 0xe3f   :  { %v5359_v8 = vsel %vm101_vm1, %v5355_v59, 0.0  ;;  %v5356_v24 = vmul.f32 %v9052_v2, %v5352_v57 }
 0xe40   :  { %5360 = vadd.xlane.f32.xlu0 %v5359_v8  ;;  %v5368_v21 = vsel %vm101_vm1, %v5358_v61, 0.0 }
 0xe41   :  { %v5362_v52 = vsel %vm101_vm1, %v5356_v24, 0.0 }
 0xe42   :  { %5363 = vadd.xlane.f32.xlu1 %v5362_v52 }
 0xe44   :  { %5366 = vadd.xlane.f32.xlu0 %v5365_v13 }
 0xe48   :  { %5369 = vadd.xlane.f32.xlu0 %v5368_v21 }
 0xe53   :  { %5386 = vrot.lane.b32.xlu1 %v9332_v35, %s7302_s15 }
 0xe57   :  { %5390 = vrot.lane.b32.xlu1 %v9353_v40, %s7302_s15 }
 0xe5b   :  { %5392 = vrot.lane.b32.xlu1 %v9364_v56, %s7302_s15 }
 0xe5e   :  { %5388 = vrot.lane.b32.xlu0 %v9337_v33, %s7302_s15 }
 0xecd   :  { %v5361_v44 = vpop.xlane.xlu0 %5360 }
 0xece   :  { %v5371_v20 = vadd.f32 %v5361_v44, %v9120_v58 }
 0xecf   :  { %v5364_v36 = vpop.xlane.xlu1 %5363 }
 0xed0   :  { %v5375_v30 = vadd.f32 %v5371_v20, %v9402_v4  ;;  %v5372_v2 = vadd.f32 %v5364_v36, %v9120_v58 }
 0xed1   :  { %v5367_v49 = vpop.xlane.xlu0 %5366 }
 0xed2   :  { %v5376_v34 = vadd.f32 %v9400_v53, %v5372_v2  ;;  %v5373_v63 = vadd.f32 %v5367_v49, %v9120_v58  ;;  %5402 = vrot.lane.b32.xlu0 %v5375_v30, %s7303_s16 }
 0xed3   :  { %v5387_v4 = vpop.permute.xlu1 %5386 }
 0xed4   :  { %v5377_v35 = vadd.f32 %v5373_v63, %v9410_v11  ;;  %5404 = vrot.lane.b32.xlu1 %v5376_v34, %s7303_s16  ;;  %v5414_v53 = vsel %vm5379_vm3, %v9124_v0, %v5387_v4 }
 0xed5   :  { %v5370_v40 = vpop.xlane.xlu0 %5369 }
 0xed6   :  { %v5374_v33 = vadd.f32 %v5370_v40, %v9120_v58  ;;  %5406 = vrot.lane.b32.xlu0 %v5377_v35, %s7303_s16 }
 0xed7   :  { %v5391_v27 = vpop.permute.xlu1 %5390 }
 0xed8   :  { %v5378_v56 = vadd.f32 %v9404_v60, %v5374_v33  ;;  %v5416_v23 = vsel %vm5379_vm3, %v9134_v12, %v5391_v27 }
 0xed9   :  { %v5389_v16 = vpop.permute.xlu0 %5388 }
 0xeda   :  { %5408 = vrot.lane.b32.xlu1 %v5378_v56, %s7303_s16  ;;  %v5415_v11 = vsel %vm5379_vm3, %v9129_v9, %v5389_v16 }
 0xedb   :  { %v5393_v32 = vpop.permute.xlu1 %5392 }
 0xedc   :  { %v5417_v18 = vsel %vm5379_vm3, %v9139_v55, %v5393_v32 }
 0xf44   :  { %v5403_v48 = vpop.permute.xlu0 %5402 }
 0xf45   :  { %v5418_v31 = vsel %vm5381_vm4, %v5414_v53, %v5403_v48 }
 0xf46   :  { %v5422_v14 = vsel %vm5383_vm5, %v5418_v31, 0.0  ;;  %v5405_v58 = vpop.permute.xlu1 %5404 }
 0xf47   :  { %5426 = vst [vmem:[%s9506_s21] sm:$0xff] %v5422_v14  ;;  %v5419_v60 = vsel %vm5381_vm4, %v5415_v11, %v5405_v58 }
 0xf48   :  { %v5423_v0 = vsel %vm5383_vm5, %v5419_v60, 0.0  ;;  %v5407_v39 = vpop.permute.xlu0 %5406 }
 0xf49   :  { %5427 = vst [vmem:[%s9506_s21 + $0x8] sm:$0xff] %v5423_v0  ;;  %v5420_v9 = vsel %vm5381_vm4, %v5416_v23, %v5407_v39 }
 0xf4a   :  { %v5424_v22 = vsel %vm5383_vm5, %v5420_v9, 0.0 }
 0xf4b   :  { %5428 = vst [vmem:[%s9506_s21 + $0x10] sm:$0xff] %v5424_v22 }
 0xf4c   :  { %v5409_v47 = vpop.permute.xlu1 %5408 }
 0xf4d   :  { %v5421_v12 = vsel %vm5381_vm4, %v5417_v18, %v5409_v47 }
 0xf4e   :  { %v5425_v42 = vsel %vm5383_vm5, %v5421_v12, 0.0 }
 0xf4f   :  { %5429 = vst [vmem:[%s9506_s21 + $0x18] sm:$0xff] %v5425_v42 }

</bundles_post_ra>
